<compile_context>
chip_gen: v7x
topology: tpu7x:2x2x1
jax: 0.10.0
libtpu: 0.0.40
codegen_flags: <defaults>
</compile_context>

<pallas_src>
import jax
import jax.numpy as jnp
from jax.experimental import pallas as pl
from jax.experimental.pallas import tpu as pltpu

BN_EPS = 1e-5
_VMEM_LIMIT = 32 * 1024 * 1024  # v7x-safe (64 MiB/TC)


def _round_up(x, m):
    return ((x + m - 1) // m) * m


def _row_tiling(M, tm):
    """Balanced row tiling: minimal zero-padding, TM a multiple of 8."""
    g = (M + tm - 1) // tm
    TM = _round_up((M + g - 1) // g, 8)
    return TM, TM * g, g


# ---------------------------------------------------------------------------
# Pallas kernels (all arithmetic of the forward pass lives here)
# ---------------------------------------------------------------------------
def _conv_bn_kernel(x_ref, w_ref, b_ref, s_ref, t_ref, o_ref):
    """o = s * relu(x @ w + b) + t  (conv-as-matmul + ReLU + BatchNorm affine)."""
    y = jnp.dot(x_ref[...], w_ref[...], preferred_element_type=jnp.float32) + b_ref[...]
    y = jnp.maximum(y, 0.0)
    o_ref[...] = y * s_ref[...] + t_ref[...]


def _conv_pool_bn_kernel(x0_ref, x1_ref, x2_ref, x3_ref, w_ref, b_ref, s_ref, t_ref, o_ref):
    """o = s * max_{4 corners}(relu(x_c @ w + b)) + t  (conv + ReLU + 2x2 maxpool + BN)."""
    w = w_ref[...]
    b = b_ref[...]

    def corner(xr):
        return jnp.maximum(
            jnp.dot(xr[...], w, preferred_element_type=jnp.float32) + b, 0.0)

    y = jnp.maximum(jnp.maximum(corner(x0_ref), corner(x1_ref)),
                    jnp.maximum(corner(x2_ref), corner(x3_ref)))
    o_ref[...] = y * s_ref[...] + t_ref[...]


def _head_kernel(x_ref, w1_ref, b1_ref, s5_ref, t5_ref, w2_ref, b2_ref, o_ref):
    """fc1 + ReLU + BatchNorm1d(300) + (Dropout==identity) + fc2 + log_softmax."""
    h = jnp.dot(x_ref[...], w1_ref[...], preferred_element_type=jnp.float32) + b1_ref[...]
    h = jnp.maximum(h, 0.0)
    h = h * s5_ref[...] + t5_ref[...]
    y = jnp.dot(h, w2_ref[...], preferred_element_type=jnp.float32) + b2_ref[...]
    m = jnp.max(y, axis=1, keepdims=True)
    s = y - m
    lse = jnp.log(jnp.sum(jnp.exp(s), axis=1, keepdims=True))
    o_ref[...] = s - lse


# ---------------------------------------------------------------------------
# pallas_call wrappers
# ---------------------------------------------------------------------------
def _conv_bn(patches, c, *, tm=256):
    """(M, K) patches -> (M, Cout): conv + ReLU + BN, rows tiled over a parallel grid."""
    M, K = patches.shape
    Cout = c["w"].shape[1]
    TM, Mp, g = _row_tiling(M, tm)
    if Mp != M:
        patches = jnp.pad(patches, ((0, Mp - M), (0, 0)))
    out = pl.pallas_call(
        _conv_bn_kernel,
        out_shape=jax.ShapeDtypeStruct((Mp, Cout), jnp.float32),
        grid=(g,),
        in_specs=[
            pl.BlockSpec((TM, K), lambda i: (i, 0)),
            pl.BlockSpec((K, Cout), lambda i: (0, 0)),
            pl.BlockSpec((1, Cout), lambda i: (0, 0)),
            pl.BlockSpec((1, Cout), lambda i: (0, 0)),
            pl.BlockSpec((1, Cout), lambda i: (0, 0)),
        ],
        out_specs=pl.BlockSpec((TM, Cout), lambda i: (i, 0)),
        compiler_params=pltpu.CompilerParams(
            dimension_semantics=("parallel",),
            vmem_limit_bytes=_VMEM_LIMIT),
    )(patches, c["w"], c["b"], c["s"], c["t"])
    return out[:M]


def _conv_pool_bn(corners, c, *, tm=256):
    """Four (M, K) corner-patch matrices -> (M, Cout): conv + ReLU + 2x2 maxpool + BN."""
    M, K = corners[0].shape
    Cout = c["w"].shape[1]
    TM, Mp, g = _row_tiling(M, tm)
    if Mp != M:
        corners = [jnp.pad(x, ((0, Mp - M), (0, 0))) for x in corners]
    out = pl.pallas_call(
        _conv_pool_bn_kernel,
        out_shape=jax.ShapeDtypeStruct((Mp, Cout), jnp.float32),
        grid=(g,),
        in_specs=[pl.BlockSpec((TM, K), lambda i: (i, 0))] * 4 + [
            pl.BlockSpec((K, Cout), lambda i: (0, 0)),
            pl.BlockSpec((1, Cout), lambda i: (0, 0)),
            pl.BlockSpec((1, Cout), lambda i: (0, 0)),
            pl.BlockSpec((1, Cout), lambda i: (0, 0)),
        ],
        out_specs=pl.BlockSpec((TM, Cout), lambda i: (i, 0)),
        compiler_params=pltpu.CompilerParams(
            dimension_semantics=("parallel",),
            vmem_limit_bytes=_VMEM_LIMIT),
    )(*corners, c["w"], c["b"], c["s"], c["t"])
    return out[:M]


def _head(x2d, h):
    N = x2d.shape[0]
    return pl.pallas_call(
        _head_kernel,
        out_shape=jax.ShapeDtypeStruct((N, h["w2"].shape[1]), jnp.float32),
        in_specs=[pl.BlockSpec(memory_space=pltpu.VMEM)] * 7,
        out_specs=pl.BlockSpec(memory_space=pltpu.VMEM),
        compiler_params=pltpu.CompilerParams(vmem_limit_bytes=_VMEM_LIMIT),
    )(x2d, h["w1"], h["b1"], h["s5"], h["t5"], h["w2"], h["b2"])


# ---------------------------------------------------------------------------
# JAX glue: im2col + pooling-corner regrouping + one-time parameter preprocessing
# ---------------------------------------------------------------------------
def _extract_patches(x_nhwc, k):
    # column order: (kh*k + kw)*C + c  -- matches _conv_w_mat below.
    N, H, W, C = x_nhwc.shape
    Ho, Wo = H - k + 1, W - k + 1
    cols = [x_nhwc[:, kh:kh + Ho, kw:kw + Wo, :] for kh in range(k) for kw in range(k)]
    return jnp.concatenate(cols, axis=-1)                     # (N, Ho, Wo, k*k*C)


def _pool_corners(patches4d):
    # Regroup conv-output positions into the 4 corners of each 2x2 pooling window.
    N, Ho, Wo, K = patches4d.shape
    Hp, Wp = Ho // 2, Wo // 2
    corners = [patches4d[:, dh::2, dw::2, :].reshape(N * Hp * Wp, K)
               for dh in (0, 1) for dw in (0, 1)]
    return corners, (N, Hp, Wp)


def _bn_affine(bn):
    s = bn["gamma"] / jnp.sqrt(bn["var"] + BN_EPS)
    return s, bn["beta"] - bn["mean"] * s


def _conv_w_mat(w):  # (O, Cin, K, K) -> (K*K*Cin, O), row index = (kh*K+kw)*Cin + cin
    return jnp.transpose(w, (2, 3, 1, 0)).reshape(-1, w.shape[0]).astype(jnp.float32)


def prepare_params(p):
    """One-time weight / BatchNorm preprocessing (hoisted out of the forward path)."""
    def row(v):
        return v.reshape(1, -1).astype(jnp.float32)

    s1, t1 = _bn_affine(p["bn1"])
    s2, t2 = _bn_affine(p["bn2"])
    s3, t3 = _bn_affine(p["bn3"])
    s4, t4 = _bn_affine(p["bn4"])
    s5, t5 = _bn_affine(p["bn5"])

    prep = {
        # conv1 + relu + pool fused; bn1 applied as the output affine (after the max).
        "c1": dict(w=_conv_w_mat(p["conv1_w"]), b=row(p["conv1_b"]), s=row(s1), t=row(t1)),
        # conv2 + relu; bn2 as output affine.
        "c2": dict(w=_conv_w_mat(p["conv2_w"]), b=row(p["conv2_b"]), s=row(s2), t=row(t2)),
        # conv3 + relu + pool fused; bn3 as output affine.
        "c3": dict(w=_conv_w_mat(p["conv3_w"]), b=row(p["conv3_b"]), s=row(s3), t=row(t3)),
        # conv4 + relu; bn4 as output affine.
        "c4": dict(w=_conv_w_mat(p["conv4_w"]), b=row(p["conv4_b"]), s=row(s4), t=row(t4)),
    }
    # fc1: permute columns so the NHWC-flattened activation matches PyTorch's NCHW .view order.
    n_hid, n_flat = p["fc1_w"].shape            # (300, 2304) = (300, 256*3*3)
    w_fc1 = jnp.transpose(p["fc1_w"].reshape(n_hid, 256, 3, 3),
                          (2, 3, 1, 0)).reshape(n_flat, n_hid)
    prep["head"] = dict(w1=w_fc1.astype(jnp.float32), b1=row(p["fc1_b"]),
                        s5=row(s5), t5=row(t5),
                        w2=p["fc2_w"].T.astype(jnp.float32), b2=row(p["fc2_b"]))
    return prep


def ref_cnn_forward(x_nchw, prep):
    x = jnp.transpose(x_nchw.astype(jnp.float32), (0, 2, 3, 1))   # NHWC: channels on lanes

    # conv1 + ReLU + maxpool2x2 + bn1 (one fused kernel)
    corners, (N, Hp, Wp) = _pool_corners(_extract_patches(x, 5))
    x = _conv_pool_bn(corners, prep["c1"]).reshape(N, Hp, Wp, -1)

    # conv2 + ReLU + bn2
    p2 = _extract_patches(x, 3)
    N, Ho, Wo = p2.shape[:3]
    x = _conv_bn(p2.reshape(N * Ho * Wo, -1), prep["c2"]).reshape(N, Ho, Wo, -1)

    # conv3 + ReLU + maxpool2x2 + bn3 (one fused kernel)
    corners, (N, Hp, Wp) = _pool_corners(_extract_patches(x, 3))
    x = _conv_pool_bn(corners, prep["c3"]).reshape(N, Hp, Wp, -1)

    # conv4 + ReLU + bn4
    p4 = _extract_patches(x, 3)
    N, Ho, Wo = p4.shape[:3]
    x = _conv_bn(p4.reshape(N * Ho * Wo, -1), prep["c4"]).reshape(N, Ho, Wo, -1)

    x2d = x.reshape(x.shape[0], -1)                               # (N, 3*3*256), NHWC order
    return _head(x2d, prep["head"])                               # fc1+relu+bn5+fc2+log_softmax


# ---------------------------------------------------------------------------
# Pure-JAX reference (mirrors the PyTorch module exactly, inference mode)
# ---------------------------------------------------------------------------
def _reference(x_nchw, p):
    def conv(x, w, b):
        y = jax.lax.conv_general_dilated(x, w, (1, 1), "VALID",
                                         dimension_numbers=("NCHW", "OIHW", "NCHW"))
        return y + b[None, :, None, None]

    def bn2d(x, bn):
        s = bn["gamma"] / jnp.sqrt(bn["var"] + BN_EPS)
        t = bn["beta"] - bn["mean"] * s
        return x * s[None, :, None, None] + t[None, :, None, None]

    def pool(x):
        n, c, h, w = x.shape
        return x.reshape(n, c, h // 2, 2, w // 2, 2).max(axis=(3, 5))

    x = jax.nn.relu(conv(x_nchw, p["conv1_w"], p["conv1_b"]))
    x = bn2d(pool(x), p["bn1"])
    x = bn2d(jax.nn.relu(conv(x, p["conv2_w"], p["conv2_b"])), p["bn2"])
    x = jax.nn.relu(conv(x, p["conv3_w"], p["conv3_b"]))
    x = bn2d(pool(x), p["bn3"])
    x = bn2d(jax.nn.relu(conv(x, p["conv4_w"], p["conv4_b"])), p["bn4"])
    x = x.reshape(x.shape[0], -1)
    h = jax.nn.relu(x @ p["fc1_w"].T + p["fc1_b"])
    s5 = p["bn5"]["gamma"] / jnp.sqrt(p["bn5"]["var"] + BN_EPS)
    h = h * s5 + (p["bn5"]["beta"] - p["bn5"]["mean"] * s5)
    y = h @ p["fc2_w"].T + p["fc2_b"]
    return jax.nn.log_softmax(y, axis=1)


if __name__ == "__main__":
    key = jax.random.PRNGKey(0)
    keys = iter(jax.random.split(key, 24))

    def bn_params(k, c):
        ks = jax.random.split(k, 4)
        return dict(gamma=jax.random.uniform(ks[0], (c,), jnp.float32, 0.5, 1.5),
                    beta=0.1 * jax.random.normal(ks[1], (c,), jnp.float32),
                    mean=0.1 * jax.random.normal(ks[2], (c,), jnp.float32),
                    var=jax.random.uniform(ks[3], (c,), jnp.float32, 0.5, 1.5))

    # fc1 = Linear(3*3*256, 300) forces the 32x32 input spatial size (CIFAR-like).
    N = 2
    x = jax.random.normal(next(keys), (N, 3, 32, 32), dtype=jnp.float32)

    params = dict(
        conv1_w=0.10 * jax.random.normal(next(keys), (96, 3, 5, 5), jnp.float32),
        conv1_b=0.05 * jax.random.normal(next(keys), (96,), jnp.float32),
        conv2_w=0.03 * jax.random.normal(next(keys), (128, 96, 3, 3), jnp.float32),
        conv2_b=0.05 * jax.random.normal(next(keys), (128,), jnp.float32),
        conv3_w=0.03 * jax.random.normal(next(keys), (192, 128, 3, 3), jnp.float32),
        conv3_b=0.05 * jax.random.normal(next(keys), (192,), jnp.float32),
        conv4_w=0.02 * jax.random.normal(next(keys), (256, 192, 3, 3), jnp.float32),
        conv4_b=0.05 * jax.random.normal(next(keys), (256,), jnp.float32),
        fc1_w=0.02 * jax.random.normal(next(keys), (300, 3 * 3 * 256), jnp.float32),
        fc1_b=0.05 * jax.random.normal(next(keys), (300,), jnp.float32),
        fc2_w=0.05 * jax.random.normal(next(keys), (10, 300), jnp.float32),
        fc2_b=0.05 * jax.random.normal(next(keys), (10,), jnp.float32),
        bn1=bn_params(next(keys), 96),
        bn2=bn_params(next(keys), 128),
        bn3=bn_params(next(keys), 192),
        bn4=bn_params(next(keys), 256),
        bn5=bn_params(next(keys), 300),
    )

    prep = prepare_params(params)                 # hoisted one-time preprocessing
    fwd = jax.jit(ref_cnn_forward)
    out = fwd(x, prep)
    jax.block_until_ready(out)

    ref = _reference(x, params)
    assert out.shape == (N, 10)
    assert bool(jnp.allclose(out, ref, atol=2e-3, rtol=2e-3)), \
        float(jnp.max(jnp.abs(out - ref)))

    print("KERNEL_OK")
</pallas_src>

<mosaic_0001>
module attributes {stable_mosaic.version = 11 : i64} {
  func.func @_conv_pool_bn_kernel(%arg0: i32, %arg1: memref<200x75xf32, #tpu.memory_space<vmem>>, %arg2: memref<200x75xf32, #tpu.memory_space<vmem>>, %arg3: memref<200x75xf32, #tpu.memory_space<vmem>>, %arg4: memref<200x75xf32, #tpu.memory_space<vmem>>, %arg5: memref<75x96xf32, #tpu.memory_space<vmem>>, %arg6: memref<1x96xf32, #tpu.memory_space<vmem>>, %arg7: memref<1x96xf32, #tpu.memory_space<vmem>>, %arg8: memref<1x96xf32, #tpu.memory_space<vmem>>, %arg9: memref<200x96xf32, #tpu.memory_space<vmem>>) attributes {dimension_semantics = [#tpu.dimension_semantics<parallel>], iteration_bounds = array<i64: 2>, scalar_prefetch = 0 : i64, scratch_operands = 0 : i64, tpu.core_type = #tpu.core_type<tc>, window_params = [{transform_indices = @transform_0, window_bounds = array<i64: 200, 75>}, {transform_indices = @transform_1, window_bounds = array<i64: 200, 75>}, {transform_indices = @transform_2, window_bounds = array<i64: 200, 75>}, {transform_indices = @transform_3, window_bounds = array<i64: 200, 75>}, {pipeline_mode = #tpu.pipeline_mode<synchronous>, transform_indices = @transform_4, window_bounds = array<i64: 75, 96>}, {pipeline_mode = #tpu.pipeline_mode<synchronous>, transform_indices = @transform_5, window_bounds = array<i64: 1, 96>}, {pipeline_mode = #tpu.pipeline_mode<synchronous>, transform_indices = @transform_6, window_bounds = array<i64: 1, 96>}, {pipeline_mode = #tpu.pipeline_mode<synchronous>, transform_indices = @transform_7, window_bounds = array<i64: 1, 96>}, {transform_indices = @transform_8, window_bounds = array<i64: 200, 96>}]} {
    %c0 = arith.constant 0 : index
    %c0_0 = arith.constant 0 : index
    %0 = vector.load %arg5[%c0, %c0_0] : memref<75x96xf32, #tpu.memory_space<vmem>>, vector<75x96xf32>
    %c0_1 = arith.constant 0 : index
    %c0_2 = arith.constant 0 : index
    %1 = vector.load %arg6[%c0_1, %c0_2] : memref<1x96xf32, #tpu.memory_space<vmem>>, vector<1x96xf32>
    %c0_3 = arith.constant 0 : index
    %c0_4 = arith.constant 0 : index
    %2 = vector.load %arg1[%c0_3, %c0_4] : memref<200x75xf32, #tpu.memory_space<vmem>>, vector<200x75xf32>
    %cst = arith.constant dense<0.000000e+00> : vector<200x96xf32>
    %3 = tpu.matmul %2, %0, %cst {dimension_numbers = #tpu.dot_dimension_numbers<[1], [0], [0], [1], [0, 0, 1, 1], [], []>} : vector<200x75xf32>, vector<75x96xf32>, vector<200x96xf32> -> vector<200x96xf32>
    %4 = vector.broadcast %1 : vector<1x96xf32> to vector<200x96xf32>
    %5 = arith.addf %3, %4 : vector<200x96xf32>
    %cst_5 = arith.constant 0.000000e+00 : f32
    %6 = vector.broadcast %cst_5 : f32 to vector<200x96xf32>
    %7 = arith.maximumf %5, %6 : vector<200x96xf32>
    %c0_6 = arith.constant 0 : index
    %c0_7 = arith.constant 0 : index
    %8 = vector.load %arg2[%c0_6, %c0_7] : memref<200x75xf32, #tpu.memory_space<vmem>>, vector<200x75xf32>
    %cst_8 = arith.constant dense<0.000000e+00> : vector<200x96xf32>
    %9 = tpu.matmul %8, %0, %cst_8 {dimension_numbers = #tpu.dot_dimension_numbers<[1], [0], [0], [1], [0, 0, 1, 1], [], []>} : vector<200x75xf32>, vector<75x96xf32>, vector<200x96xf32> -> vector<200x96xf32>
    %10 = vector.broadcast %1 : vector<1x96xf32> to vector<200x96xf32>
    %11 = arith.addf %9, %10 : vector<200x96xf32>
    %cst_9 = arith.constant 0.000000e+00 : f32
    %12 = vector.broadcast %cst_9 : f32 to vector<200x96xf32>
    %13 = arith.maximumf %11, %12 : vector<200x96xf32>
    %14 = arith.maximumf %7, %13 : vector<200x96xf32>
    %c0_10 = arith.constant 0 : index
    %c0_11 = arith.constant 0 : index
    %15 = vector.load %arg3[%c0_10, %c0_11] : memref<200x75xf32, #tpu.memory_space<vmem>>, vector<200x75xf32>
    %cst_12 = arith.constant dense<0.000000e+00> : vector<200x96xf32>
    %16 = tpu.matmul %15, %0, %cst_12 {dimension_numbers = #tpu.dot_dimension_numbers<[1], [0], [0], [1], [0, 0, 1, 1], [], []>} : vector<200x75xf32>, vector<75x96xf32>, vector<200x96xf32> -> vector<200x96xf32>
    %17 = vector.broadcast %1 : vector<1x96xf32> to vector<200x96xf32>
    %18 = arith.addf %16, %17 : vector<200x96xf32>
    %cst_13 = arith.constant 0.000000e+00 : f32
    %19 = vector.broadcast %cst_13 : f32 to vector<200x96xf32>
    %20 = arith.maximumf %18, %19 : vector<200x96xf32>
    %c0_14 = arith.constant 0 : index
    %c0_15 = arith.constant 0 : index
    %21 = vector.load %arg4[%c0_14, %c0_15] : memref<200x75xf32, #tpu.memory_space<vmem>>, vector<200x75xf32>
    %cst_16 = arith.constant dense<0.000000e+00> : vector<200x96xf32>
    %22 = tpu.matmul %21, %0, %cst_16 {dimension_numbers = #tpu.dot_dimension_numbers<[1], [0], [0], [1], [0, 0, 1, 1], [], []>} : vector<200x75xf32>, vector<75x96xf32>, vector<200x96xf32> -> vector<200x96xf32>
    %23 = vector.broadcast %1 : vector<1x96xf32> to vector<200x96xf32>
    %24 = arith.addf %22, %23 : vector<200x96xf32>
    %cst_17 = arith.constant 0.000000e+00 : f32
    %25 = vector.broadcast %cst_17 : f32 to vector<200x96xf32>
    %26 = arith.maximumf %24, %25 : vector<200x96xf32>
    %27 = arith.maximumf %20, %26 : vector<200x96xf32>
    %28 = arith.maximumf %14, %27 : vector<200x96xf32>
    %c0_18 = arith.constant 0 : index
    %c0_19 = arith.constant 0 : index
    %29 = vector.load %arg7[%c0_18, %c0_19] : memref<1x96xf32, #tpu.memory_space<vmem>>, vector<1x96xf32>
    %30 = vector.broadcast %29 : vector<1x96xf32> to vector<200x96xf32>
    %31 = arith.mulf %28, %30 : vector<200x96xf32>
    %c0_20 = arith.constant 0 : index
    %c0_21 = arith.constant 0 : index
    %32 = vector.load %arg8[%c0_20, %c0_21] : memref<1x96xf32, #tpu.memory_space<vmem>>, vector<1x96xf32>
    %33 = vector.broadcast %32 : vector<1x96xf32> to vector<200x96xf32>
    %34 = arith.addf %31, %33 : vector<200x96xf32>
    %c0_22 = arith.constant 0 : index
    %c0_23 = arith.constant 0 : index
    %35 = vector.load %arg9[%c0_22, %c0_23] : memref<200x96xf32, #tpu.memory_space<vmem>>, vector<200x96xf32>
    tpu.vector_store %arg9[%c0_22, %c0_23], %34 {strides = array<i32>} : memref<200x96xf32, #tpu.memory_space<vmem>>, vector<200x96xf32>,
    return
  }
  func.func @transform_0(%arg0: i32) -> (i32, i32) {
    %c0_i32 = arith.constant 0 : i32
    %c0_i32_0 = arith.constant 0 : i32
    return %arg0, %c0_i32 : i32, i32
  }
  func.func @transform_1(%arg0: i32) -> (i32, i32) {
    %c0_i32 = arith.constant 0 : i32
    %c0_i32_0 = arith.constant 0 : i32
    return %arg0, %c0_i32 : i32, i32
  }
  func.func @transform_2(%arg0: i32) -> (i32, i32) {
    %c0_i32 = arith.constant 0 : i32
    %c0_i32_0 = arith.constant 0 : i32
    return %arg0, %c0_i32 : i32, i32
  }
  func.func @transform_3(%arg0: i32) -> (i32, i32) {
    %c0_i32 = arith.constant 0 : i32
    %c0_i32_0 = arith.constant 0 : i32
    return %arg0, %c0_i32 : i32, i32
  }
  func.func @transform_4(%arg0: i32) -> (i32, i32) {
    %c0_i32 = arith.constant 0 : i32
    %c0_i32_0 = arith.constant 0 : i32
    %c0_i32_1 = arith.constant 0 : i32
    return %c0_i32, %c0_i32_0 : i32, i32
  }
  func.func @transform_5(%arg0: i32) -> (i32, i32) {
    %c0_i32 = arith.constant 0 : i32
    %c0_i32_0 = arith.constant 0 : i32
    %c0_i32_1 = arith.constant 0 : i32
    return %c0_i32, %c0_i32_0 : i32, i32
  }
  func.func @transform_6(%arg0: i32) -> (i32, i32) {
    %c0_i32 = arith.constant 0 : i32
    %c0_i32_0 = arith.constant 0 : i32
    %c0_i32_1 = arith.constant 0 : i32
    return %c0_i32, %c0_i32_0 : i32, i32
  }
  func.func @transform_7(%arg0: i32) -> (i32, i32) {
    %c0_i32 = arith.constant 0 : i32
    %c0_i32_0 = arith.constant 0 : i32
    %c0_i32_1 = arith.constant 0 : i32
    return %c0_i32, %c0_i32_0 : i32, i32
  }
  func.func @transform_8(%arg0: i32) -> (i32, i32) {
    %c0_i32 = arith.constant 0 : i32
    %c0_i32_0 = arith.constant 0 : i32
    return %arg0, %c0_i32 : i32, i32
  }
}

module attributes {stable_mosaic.version = 11 : i64} {
  func.func @_conv_bn_kernel(%arg0: i32, %arg1: memref<144x864xf32, #tpu.memory_space<vmem>>, %arg2: memref<864x128xf32, #tpu.memory_space<vmem>>, %arg3: memref<1x128xf32, #tpu.memory_space<vmem>>, %arg4: memref<1x128xf32, #tpu.memory_space<vmem>>, %arg5: memref<1x128xf32, #tpu.memory_space<vmem>>, %arg6: memref<144x128xf32, #tpu.memory_space<vmem>>) attributes {dimension_semantics = [#tpu.dimension_semantics<parallel>], iteration_bounds = array<i64: 2>, scalar_prefetch = 0 : i64, scratch_operands = 0 : i64, tpu.core_type = #tpu.core_type<tc>, window_params = [{transform_indices = @transform_0, window_bounds = array<i64: 144, 864>}, {pipeline_mode = #tpu.pipeline_mode<synchronous>, transform_indices = @transform_1, window_bounds = array<i64: 864, 128>}, {pipeline_mode = #tpu.pipeline_mode<synchronous>, transform_indices = @transform_2, window_bounds = array<i64: 1, 128>}, {pipeline_mode = #tpu.pipeline_mode<synchronous>, transform_indices = @transform_3, window_bounds = array<i64: 1, 128>}, {pipeline_mode = #tpu.pipeline_mode<synchronous>, transform_indices = @transform_4, window_bounds = array<i64: 1, 128>}, {transform_indices = @transform_5, window_bounds = array<i64: 144, 128>}]} {
    %c0 = arith.constant 0 : index
    %c0_0 = arith.constant 0 : index
    %0 = vector.load %arg1[%c0, %c0_0] : memref<144x864xf32, #tpu.memory_space<vmem>>, vector<144x864xf32>
    %c0_1 = arith.constant 0 : index
    %c0_2 = arith.constant 0 : index
    %1 = vector.load %arg2[%c0_1, %c0_2] : memref<864x128xf32, #tpu.memory_space<vmem>>, vector<864x128xf32>
    %cst = arith.constant dense<0.000000e+00> : vector<144x128xf32>
    %2 = tpu.matmul %0, %1, %cst {dimension_numbers = #tpu.dot_dimension_numbers<[1], [0], [0], [1], [0, 0, 1, 1], [], []>} : vector<144x864xf32>, vector<864x128xf32>, vector<144x128xf32> -> vector<144x128xf32>
    %c0_3 = arith.constant 0 : index
    %c0_4 = arith.constant 0 : index
    %3 = vector.load %arg3[%c0_3, %c0_4] : memref<1x128xf32, #tpu.memory_space<vmem>>, vector<1x128xf32>
    %4 = vector.broadcast %3 : vector<1x128xf32> to vector<144x128xf32>
    %5 = arith.addf %2, %4 : vector<144x128xf32>
    %cst_5 = arith.constant 0.000000e+00 : f32
    %6 = vector.broadcast %cst_5 : f32 to vector<144x128xf32>
    %7 = arith.maximumf %5, %6 : vector<144x128xf32>
    %c0_6 = arith.constant 0 : index
    %c0_7 = arith.constant 0 : index
    %8 = vector.load %arg4[%c0_6, %c0_7] : memref<1x128xf32, #tpu.memory_space<vmem>>, vector<1x128xf32>
    %9 = vector.broadcast %8 : vector<1x128xf32> to vector<144x128xf32>
    %10 = arith.mulf %7, %9 : vector<144x128xf32>
    %c0_8 = arith.constant 0 : index
    %c0_9 = arith.constant 0 : index
    %11 = vector.load %arg5[%c0_8, %c0_9] : memref<1x128xf32, #tpu.memory_space<vmem>>, vector<1x128xf32>
    %12 = vector.broadcast %11 : vector<1x128xf32> to vector<144x128xf32>
    %13 = arith.addf %10, %12 : vector<144x128xf32>
    %c0_10 = arith.constant 0 : index
    %c0_11 = arith.constant 0 : index
    %14 = vector.load %arg6[%c0_10, %c0_11] : memref<144x128xf32, #tpu.memory_space<vmem>>, vector<144x128xf32>
    tpu.vector_store %arg6[%c0_10, %c0_11], %13 {strides = array<i32>} : memref<144x128xf32, #tpu.memory_space<vmem>>, vector<144x128xf32>,
    return
  }
  func.func @transform_0(%arg0: i32) -> (i32, i32) {
    %c0_i32 = arith.constant 0 : i32
    %c0_i32_0 = arith.constant 0 : i32
    return %arg0, %c0_i32 : i32, i32
  }
  func.func @transform_1(%arg0: i32) -> (i32, i32) {
    %c0_i32 = arith.constant 0 : i32
    %c0_i32_0 = arith.constant 0 : i32
    %c0_i32_1 = arith.constant 0 : i32
    return %c0_i32, %c0_i32_0 : i32, i32
  }
  func.func @transform_2(%arg0: i32) -> (i32, i32) {
    %c0_i32 = arith.constant 0 : i32
    %c0_i32_0 = arith.constant 0 : i32
    %c0_i32_1 = arith.constant 0 : i32
    return %c0_i32, %c0_i32_0 : i32, i32
  }
  func.func @transform_3(%arg0: i32) -> (i32, i32) {
    %c0_i32 = arith.constant 0 : i32
    %c0_i32_0 = arith.constant 0 : i32
    %c0_i32_1 = arith.constant 0 : i32
    return %c0_i32, %c0_i32_0 : i32, i32
  }
  func.func @transform_4(%arg0: i32) -> (i32, i32) {
    %c0_i32 = arith.constant 0 : i32
    %c0_i32_0 = arith.constant 0 : i32
    %c0_i32_1 = arith.constant 0 : i32
    return %c0_i32, %c0_i32_0 : i32, i32
  }
  func.func @transform_5(%arg0: i32) -> (i32, i32) {
    %c0_i32 = arith.constant 0 : i32
    %c0_i32_0 = arith.constant 0 : i32
    return %arg0, %c0_i32 : i32, i32
  }
}

module attributes {stable_mosaic.version = 11 : i64} {
  func.func @_conv_pool_bn_kernel(%arg0: i32, %arg1: memref<56x1152xf32, #tpu.memory_space<vmem>>, %arg2: memref<56x1152xf32, #tpu.memory_space<vmem>>, %arg3: memref<56x1152xf32, #tpu.memory_space<vmem>>, %arg4: memref<56x1152xf32, #tpu.memory_space<vmem>>, %arg5: memref<1152x192xf32, #tpu.memory_space<vmem>>, %arg6: memref<1x192xf32, #tpu.memory_space<vmem>>, %arg7: memref<1x192xf32, #tpu.memory_space<vmem>>, %arg8: memref<1x192xf32, #tpu.memory_space<vmem>>, %arg9: memref<56x192xf32, #tpu.memory_space<vmem>>) attributes {dimension_semantics = [#tpu.dimension_semantics<parallel>], iteration_bounds = array<i64: 1>, scalar_prefetch = 0 : i64, scratch_operands = 0 : i64, tpu.core_type = #tpu.core_type<tc>, window_params = [{transform_indices = @transform_0, window_bounds = array<i64: 56, 1152>}, {transform_indices = @transform_1, window_bounds = array<i64: 56, 1152>}, {transform_indices = @transform_2, window_bounds = array<i64: 56, 1152>}, {transform_indices = @transform_3, window_bounds = array<i64: 56, 1152>}, {pipeline_mode = #tpu.pipeline_mode<synchronous>, transform_indices = @transform_4, window_bounds = array<i64: 1152, 192>}, {pipeline_mode = #tpu.pipeline_mode<synchronous>, transform_indices = @transform_5, window_bounds = array<i64: 1, 192>}, {pipeline_mode = #tpu.pipeline_mode<synchronous>, transform_indices = @transform_6, window_bounds = array<i64: 1, 192>}, {pipeline_mode = #tpu.pipeline_mode<synchronous>, transform_indices = @transform_7, window_bounds = array<i64: 1, 192>}, {transform_indices = @transform_8, window_bounds = array<i64: 56, 192>}]} {
    %c0 = arith.constant 0 : index
    %c0_0 = arith.constant 0 : index
    %0 = vector.load %arg5[%c0, %c0_0] : memref<1152x192xf32, #tpu.memory_space<vmem>>, vector<1152x192xf32>
    %c0_1 = arith.constant 0 : index
    %c0_2 = arith.constant 0 : index
    %1 = vector.load %arg6[%c0_1, %c0_2] : memref<1x192xf32, #tpu.memory_space<vmem>>, vector<1x192xf32>
    %c0_3 = arith.constant 0 : index
    %c0_4 = arith.constant 0 : index
    %2 = vector.load %arg1[%c0_3, %c0_4] : memref<56x1152xf32, #tpu.memory_space<vmem>>, vector<56x1152xf32>
    %cst = arith.constant dense<0.000000e+00> : vector<56x192xf32>
    %3 = tpu.matmul %2, %0, %cst {dimension_numbers = #tpu.dot_dimension_numbers<[1], [0], [0], [1], [0, 0, 1, 1], [], []>} : vector<56x1152xf32>, vector<1152x192xf32>, vector<56x192xf32> -> vector<56x192xf32>
    %4 = vector.broadcast %1 : vector<1x192xf32> to vector<56x192xf32>
    %5 = arith.addf %3, %4 : vector<56x192xf32>
    %cst_5 = arith.constant 0.000000e+00 : f32
    %6 = vector.broadcast %cst_5 : f32 to vector<56x192xf32>
    %7 = arith.maximumf %5, %6 : vector<56x192xf32>
    %c0_6 = arith.constant 0 : index
    %c0_7 = arith.constant 0 : index
    %8 = vector.load %arg2[%c0_6, %c0_7] : memref<56x1152xf32, #tpu.memory_space<vmem>>, vector<56x1152xf32>
    %cst_8 = arith.constant dense<0.000000e+00> : vector<56x192xf32>
    %9 = tpu.matmul %8, %0, %cst_8 {dimension_numbers = #tpu.dot_dimension_numbers<[1], [0], [0], [1], [0, 0, 1, 1], [], []>} : vector<56x1152xf32>, vector<1152x192xf32>, vector<56x192xf32> -> vector<56x192xf32>
    %10 = vector.broadcast %1 : vector<1x192xf32> to vector<56x192xf32>
    %11 = arith.addf %9, %10 : vector<56x192xf32>
    %cst_9 = arith.constant 0.000000e+00 : f32
    %12 = vector.broadcast %cst_9 : f32 to vector<56x192xf32>
    %13 = arith.maximumf %11, %12 : vector<56x192xf32>
    %14 = arith.maximumf %7, %13 : vector<56x192xf32>
    %c0_10 = arith.constant 0 : index
    %c0_11 = arith.constant 0 : index
    %15 = vector.load %arg3[%c0_10, %c0_11] : memref<56x1152xf32, #tpu.memory_space<vmem>>, vector<56x1152xf32>
    %cst_12 = arith.constant dense<0.000000e+00> : vector<56x192xf32>
    %16 = tpu.matmul %15, %0, %cst_12 {dimension_numbers = #tpu.dot_dimension_numbers<[1], [0], [0], [1], [0, 0, 1, 1], [], []>} : vector<56x1152xf32>, vector<1152x192xf32>, vector<56x192xf32> -> vector<56x192xf32>
    %17 = vector.broadcast %1 : vector<1x192xf32> to vector<56x192xf32>
    %18 = arith.addf %16, %17 : vector<56x192xf32>
    %cst_13 = arith.constant 0.000000e+00 : f32
    %19 = vector.broadcast %cst_13 : f32 to vector<56x192xf32>
    %20 = arith.maximumf %18, %19 : vector<56x192xf32>
    %c0_14 = arith.constant 0 : index
    %c0_15 = arith.constant 0 : index
    %21 = vector.load %arg4[%c0_14, %c0_15] : memref<56x1152xf32, #tpu.memory_space<vmem>>, vector<56x1152xf32>
    %cst_16 = arith.constant dense<0.000000e+00> : vector<56x192xf32>
    %22 = tpu.matmul %21, %0, %cst_16 {dimension_numbers = #tpu.dot_dimension_numbers<[1], [0], [0], [1], [0, 0, 1, 1], [], []>} : vector<56x1152xf32>, vector<1152x192xf32>, vector<56x192xf32> -> vector<56x192xf32>
    %23 = vector.broadcast %1 : vector<1x192xf32> to vector<56x192xf32>
    %24 = arith.addf %22, %23 : vector<56x192xf32>
    %cst_17 = arith.constant 0.000000e+00 : f32
    %25 = vector.broadcast %cst_17 : f32 to vector<56x192xf32>
    %26 = arith.maximumf %24, %25 : vector<56x192xf32>
    %27 = arith.maximumf %20, %26 : vector<56x192xf32>
    %28 = arith.maximumf %14, %27 : vector<56x192xf32>
    %c0_18 = arith.constant 0 : index
    %c0_19 = arith.constant 0 : index
    %29 = vector.load %arg7[%c0_18, %c0_19] : memref<1x192xf32, #tpu.memory_space<vmem>>, vector<1x192xf32>
    %30 = vector.broadcast %29 : vector<1x192xf32> to vector<56x192xf32>
    %31 = arith.mulf %28, %30 : vector<56x192xf32>
    %c0_20 = arith.constant 0 : index
    %c0_21 = arith.constant 0 : index
    %32 = vector.load %arg8[%c0_20, %c0_21] : memref<1x192xf32, #tpu.memory_space<vmem>>, vector<1x192xf32>
    %33 = vector.broadcast %32 : vector<1x192xf32> to vector<56x192xf32>
    %34 = arith.addf %31, %33 : vector<56x192xf32>
    %c0_22 = arith.constant 0 : index
    %c0_23 = arith.constant 0 : index
    %35 = vector.load %arg9[%c0_22, %c0_23] : memref<56x192xf32, #tpu.memory_space<vmem>>, vector<56x192xf32>
    tpu.vector_store %arg9[%c0_22, %c0_23], %34 {strides = array<i32>} : memref<56x192xf32, #tpu.memory_space<vmem>>, vector<56x192xf32>,
    return
  }
  func.func @transform_0(%arg0: i32) -> (i32, i32) {
    %c0_i32 = arith.constant 0 : i32
    %c0_i32_0 = arith.constant 0 : i32
    return %arg0, %c0_i32 : i32, i32
  }
  func.func @transform_1(%arg0: i32) -> (i32, i32) {
    %c0_i32 = arith.constant 0 : i32
    %c0_i32_0 = arith.constant 0 : i32
    return %arg0, %c0_i32 : i32, i32
  }
  func.func @transform_2(%arg0: i32) -> (i32, i32) {
    %c0_i32 = arith.constant 0 : i32
    %c0_i32_0 = arith.constant 0 : i32
    return %arg0, %c0_i32 : i32, i32
  }
  func.func @transform_3(%arg0: i32) -> (i32, i32) {
    %c0_i32 = arith.constant 0 : i32
    %c0_i32_0 = arith.constant 0 : i32
    return %arg0, %c0_i32 : i32, i32
  }
  func.func @transform_4(%arg0: i32) -> (i32, i32) {
    %c0_i32 = arith.constant 0 : i32
    %c0_i32_0 = arith.constant 0 : i32
    %c0_i32_1 = arith.constant 0 : i32
    return %c0_i32, %c0_i32_0 : i32, i32
  }
  func.func @transform_5(%arg0: i32) -> (i32, i32) {
    %c0_i32 = arith.constant 0 : i32
    %c0_i32_0 = arith.constant 0 : i32
    %c0_i32_1 = arith.constant 0 : i32
    return %c0_i32, %c0_i32_0 : i32, i32
  }
  func.func @transform_6(%arg0: i32) -> (i32, i32) {
    %c0_i32 = arith.constant 0 : i32
    %c0_i32_0 = arith.constant 0 : i32
    %c0_i32_1 = arith.constant 0 : i32
    return %c0_i32, %c0_i32_0 : i32, i32
  }
  func.func @transform_7(%arg0: i32) -> (i32, i32) {
    %c0_i32 = arith.constant 0 : i32
    %c0_i32_0 = arith.constant 0 : i32
    %c0_i32_1 = arith.constant 0 : i32
    return %c0_i32, %c0_i32_0 : i32, i32
  }
  func.func @transform_8(%arg0: i32) -> (i32, i32) {
    %c0_i32 = arith.constant 0 : i32
    %c0_i32_0 = arith.constant 0 : i32
    return %arg0, %c0_i32 : i32, i32
  }
}

module attributes {stable_mosaic.version = 11 : i64} {
  func.func @_conv_bn_kernel(%arg0: i32, %arg1: memref<24x1728xf32, #tpu.memory_space<vmem>>, %arg2: memref<1728x256xf32, #tpu.memory_space<vmem>>, %arg3: memref<1x256xf32, #tpu.memory_space<vmem>>, %arg4: memref<1x256xf32, #tpu.memory_space<vmem>>, %arg5: memref<1x256xf32, #tpu.memory_space<vmem>>, %arg6: memref<24x256xf32, #tpu.memory_space<vmem>>) attributes {dimension_semantics = [#tpu.dimension_semantics<parallel>], iteration_bounds = array<i64: 1>, scalar_prefetch = 0 : i64, scratch_operands = 0 : i64, tpu.core_type = #tpu.core_type<tc>, window_params = [{transform_indices = @transform_0, window_bounds = array<i64: 24, 1728>}, {pipeline_mode = #tpu.pipeline_mode<synchronous>, transform_indices = @transform_1, window_bounds = array<i64: 1728, 256>}, {pipeline_mode = #tpu.pipeline_mode<synchronous>, transform_indices = @transform_2, window_bounds = array<i64: 1, 256>}, {pipeline_mode = #tpu.pipeline_mode<synchronous>, transform_indices = @transform_3, window_bounds = array<i64: 1, 256>}, {pipeline_mode = #tpu.pipeline_mode<synchronous>, transform_indices = @transform_4, window_bounds = array<i64: 1, 256>}, {transform_indices = @transform_5, window_bounds = array<i64: 24, 256>}]} {
    %c0 = arith.constant 0 : index
    %c0_0 = arith.constant 0 : index
    %0 = vector.load %arg1[%c0, %c0_0] : memref<24x1728xf32, #tpu.memory_space<vmem>>, vector<24x1728xf32>
    %c0_1 = arith.constant 0 : index
    %c0_2 = arith.constant 0 : index
    %1 = vector.load %arg2[%c0_1, %c0_2] : memref<1728x256xf32, #tpu.memory_space<vmem>>, vector<1728x256xf32>
    %cst = arith.constant dense<0.000000e+00> : vector<24x256xf32>
    %2 = tpu.matmul %0, %1, %cst {dimension_numbers = #tpu.dot_dimension_numbers<[1], [0], [0], [1], [0, 0, 1, 1], [], []>} : vector<24x1728xf32>, vector<1728x256xf32>, vector<24x256xf32> -> vector<24x256xf32>
    %c0_3 = arith.constant 0 : index
    %c0_4 = arith.constant 0 : index
    %3 = vector.load %arg3[%c0_3, %c0_4] : memref<1x256xf32, #tpu.memory_space<vmem>>, vector<1x256xf32>
    %4 = vector.broadcast %3 : vector<1x256xf32> to vector<24x256xf32>
    %5 = arith.addf %2, %4 : vector<24x256xf32>
    %cst_5 = arith.constant 0.000000e+00 : f32
    %6 = vector.broadcast %cst_5 : f32 to vector<24x256xf32>
    %7 = arith.maximumf %5, %6 : vector<24x256xf32>
    %c0_6 = arith.constant 0 : index
    %c0_7 = arith.constant 0 : index
    %8 = vector.load %arg4[%c0_6, %c0_7] : memref<1x256xf32, #tpu.memory_space<vmem>>, vector<1x256xf32>
    %9 = vector.broadcast %8 : vector<1x256xf32> to vector<24x256xf32>
    %10 = arith.mulf %7, %9 : vector<24x256xf32>
    %c0_8 = arith.constant 0 : index
    %c0_9 = arith.constant 0 : index
    %11 = vector.load %arg5[%c0_8, %c0_9] : memref<1x256xf32, #tpu.memory_space<vmem>>, vector<1x256xf32>
    %12 = vector.broadcast %11 : vector<1x256xf32> to vector<24x256xf32>
    %13 = arith.addf %10, %12 : vector<24x256xf32>
    %c0_10 = arith.constant 0 : index
    %c0_11 = arith.constant 0 : index
    %14 = vector.load %arg6[%c0_10, %c0_11] : memref<24x256xf32, #tpu.memory_space<vmem>>, vector<24x256xf32>
    tpu.vector_store %arg6[%c0_10, %c0_11], %13 {strides = array<i32>} : memref<24x256xf32, #tpu.memory_space<vmem>>, vector<24x256xf32>,
    return
  }
  func.func @transform_0(%arg0: i32) -> (i32, i32) {
    %c0_i32 = arith.constant 0 : i32
    %c0_i32_0 = arith.constant 0 : i32
    return %arg0, %c0_i32 : i32, i32
  }
  func.func @transform_1(%arg0: i32) -> (i32, i32) {
    %c0_i32 = arith.constant 0 : i32
    %c0_i32_0 = arith.constant 0 : i32
    %c0_i32_1 = arith.constant 0 : i32
    return %c0_i32, %c0_i32_0 : i32, i32
  }
  func.func @transform_2(%arg0: i32) -> (i32, i32) {
    %c0_i32 = arith.constant 0 : i32
    %c0_i32_0 = arith.constant 0 : i32
    %c0_i32_1 = arith.constant 0 : i32
    return %c0_i32, %c0_i32_0 : i32, i32
  }
  func.func @transform_3(%arg0: i32) -> (i32, i32) {
    %c0_i32 = arith.constant 0 : i32
    %c0_i32_0 = arith.constant 0 : i32
    %c0_i32_1 = arith.constant 0 : i32
    return %c0_i32, %c0_i32_0 : i32, i32
  }
  func.func @transform_4(%arg0: i32) -> (i32, i32) {
    %c0_i32 = arith.constant 0 : i32
    %c0_i32_0 = arith.constant 0 : i32
    %c0_i32_1 = arith.constant 0 : i32
    return %c0_i32, %c0_i32_0 : i32, i32
  }
  func.func @transform_5(%arg0: i32) -> (i32, i32) {
    %c0_i32 = arith.constant 0 : i32
    %c0_i32_0 = arith.constant 0 : i32
    return %arg0, %c0_i32 : i32, i32
  }
}

module attributes {stable_mosaic.version = 11 : i64} {
  func.func @_head_kernel(%arg0: memref<2x2304xf32, #tpu.memory_space<vmem>>, %arg1: memref<2304x300xf32, #tpu.memory_space<vmem>>, %arg2: memref<1x300xf32, #tpu.memory_space<vmem>>, %arg3: memref<1x300xf32, #tpu.memory_space<vmem>>, %arg4: memref<1x300xf32, #tpu.memory_space<vmem>>, %arg5: memref<300x10xf32, #tpu.memory_space<vmem>>, %arg6: memref<1x10xf32, #tpu.memory_space<vmem>>, %arg7: memref<2x10xf32, #tpu.memory_space<vmem>>) attributes {dimension_semantics = [], scalar_prefetch = 0 : i64, scratch_operands = 0 : i64, tpu.core_type = #tpu.core_type<tc>} {
    %c0 = arith.constant 0 : index
    %c0_0 = arith.constant 0 : index
    %0 = vector.load %arg0[%c0, %c0_0] : memref<2x2304xf32, #tpu.memory_space<vmem>>, vector<2x2304xf32>
    %c0_1 = arith.constant 0 : index
    %c0_2 = arith.constant 0 : index
    %1 = vector.load %arg1[%c0_1, %c0_2] : memref<2304x300xf32, #tpu.memory_space<vmem>>, vector<2304x300xf32>
    %cst = arith.constant dense<0.000000e+00> : vector<2x300xf32>
    %2 = tpu.matmul %0, %1, %cst {dimension_numbers = #tpu.dot_dimension_numbers<[1], [0], [0], [1], [0, 0, 1, 1], [], []>} : vector<2x2304xf32>, vector<2304x300xf32>, vector<2x300xf32> -> vector<2x300xf32>
    %c0_3 = arith.constant 0 : index
    %c0_4 = arith.constant 0 : index
    %3 = vector.load %arg2[%c0_3, %c0_4] : memref<1x300xf32, #tpu.memory_space<vmem>>, vector<1x300xf32>
    %4 = vector.broadcast %3 : vector<1x300xf32> to vector<2x300xf32>
    %5 = arith.addf %2, %4 : vector<2x300xf32>
    %cst_5 = arith.constant 0.000000e+00 : f32
    %6 = vector.broadcast %cst_5 : f32 to vector<2x300xf32>
    %7 = arith.maximumf %5, %6 : vector<2x300xf32>
    %c0_6 = arith.constant 0 : index
    %c0_7 = arith.constant 0 : index
    %8 = vector.load %arg3[%c0_6, %c0_7] : memref<1x300xf32, #tpu.memory_space<vmem>>, vector<1x300xf32>
    %9 = vector.broadcast %8 : vector<1x300xf32> to vector<2x300xf32>
    %10 = arith.mulf %7, %9 : vector<2x300xf32>
    %c0_8 = arith.constant 0 : index
    %c0_9 = arith.constant 0 : index
    %11 = vector.load %arg4[%c0_8, %c0_9] : memref<1x300xf32, #tpu.memory_space<vmem>>, vector<1x300xf32>
    %12 = vector.broadcast %11 : vector<1x300xf32> to vector<2x300xf32>
    %13 = arith.addf %10, %12 : vector<2x300xf32>
    %c0_10 = arith.constant 0 : index
    %c0_11 = arith.constant 0 : index
    %14 = vector.load %arg5[%c0_10, %c0_11] : memref<300x10xf32, #tpu.memory_space<vmem>>, vector<300x10xf32>
    %cst_12 = arith.constant dense<0.000000e+00> : vector<2x10xf32>
    %15 = tpu.matmul %13, %14, %cst_12 {dimension_numbers = #tpu.dot_dimension_numbers<[1], [0], [0], [1], [0, 0, 1, 1], [], []>} : vector<2x300xf32>, vector<300x10xf32>, vector<2x10xf32> -> vector<2x10xf32>
    %c0_13 = arith.constant 0 : index
    %c0_14 = arith.constant 0 : index
    %16 = vector.load %arg6[%c0_13, %c0_14] : memref<1x10xf32, #tpu.memory_space<vmem>>, vector<1x10xf32>
    %17 = vector.broadcast %16 : vector<1x10xf32> to vector<2x10xf32>
    %18 = arith.addf %15, %17 : vector<2x10xf32>
    %cst_15 = arith.constant dense<0xFF800000> : vector<2xf32>
    %19 = vector.multi_reduction <maximumf>, %18, %cst_15 [1] : vector<2x10xf32> to vector<2xf32>
    %20 = vector.shape_cast %19 : vector<2xf32> to vector<2x1xf32>
    %21 = vector.broadcast %20 : vector<2x1xf32> to vector<2x10xf32>
    %22 = arith.subf %18, %21 : vector<2x10xf32>
    %23 = math.exp %22 : vector<2x10xf32>
    %cst_16 = arith.constant dense<0.000000e+00> : vector<2xf32>
    %24 = vector.multi_reduction <add>, %23, %cst_16 [1] : vector<2x10xf32> to vector<2xf32>
    %25 = vector.shape_cast %24 : vector<2xf32> to vector<2x1xf32>
    %26 = math.log %25 : vector<2x1xf32>
    %27 = vector.broadcast %26 : vector<2x1xf32> to vector<2x10xf32>
    %28 = arith.subf %22, %27 : vector<2x10xf32>
    %c0_17 = arith.constant 0 : index
    %c0_18 = arith.constant 0 : index
    %29 = vector.load %arg7[%c0_17, %c0_18] : memref<2x10xf32, #tpu.memory_space<vmem>>, vector<2x10xf32>
    tpu.vector_store %arg7[%c0_17, %c0_18], %28 {strides = array<i32>} : memref<2x10xf32, #tpu.memory_space<vmem>>, vector<2x10xf32>,
    return
  }
}

</mosaic_0001>

<bundles_post_ra>
// kernel: ref_cnn_forward.5
= control target key start
LH: loop header
LB: loop body
LE: loop exit
PB: predicated region body
PF: predicated region fallthrough
CT: control target
= control target key end

     0   :  { %s2687_s27 = smov 0   ;;  %s3479_s0 = inlined_call_operand.vmem [shape: f32[400,75], index: 0, kind: input, shape index: {}]   ;;  %s3480_s1 = inlined_call_operand.vmem [shape: f32[400,75], index: 1, kind: input, shape index: {}]   ;;  %s3481_s2 = inlined_call_operand.vmem [shape: f32[400,75], index: 2, kind: input, shape index: {}]   ;;  %s3482_s3 = inlined_call_operand.vmem [shape: f32[400,75], index: 3, kind: input, shape index: {}]   ;;  %s3483_s4 = inlined_call_operand.vmem [shape: f32[75,96], index: 4, kind: input, shape index: {}]   ;;  %s3484_s5 = inlined_call_operand.vmem [shape: f32[1,96], index: 5, kind: input, shape index: {}]   ;;  %s3485_s6 = inlined_call_operand.vmem [shape: f32[1,96], index: 6, kind: input, shape index: {}]   ;;  %s3486_s7 = inlined_call_operand.vmem [shape: f32[1,96], index: 7, kind: input, shape index: {}]   ;;  %s3487_s8 = inlined_call_operand.vmem [shape: f32[400,96], index: 8, kind: output, shape index: {}]  }
   0x1 LB: > { %s1914_s28 = sadd.s32 4294967295, %s2636_s27   ;;  %p1918_p0 = scmp.ge.s32.totalorder %s2636_s27, 1  ;;  %s2636_s27 = sphi %s2687_s27, %s18_s27  }
   0x2   : > { %p296_p1 = scmp.lt.s32.totalorder %s2636_s27, 3 }
   0x4   : > { %p297_p2 = pnand %p1918_p0, %p296_p1 }
   0x5   : > { %v375_v0 = vld [vmem:[%s3483_s4] sm:$0xff] (!%p297_p2)  ;;  %v376_v1 = vld [vmem:[%s3483_s4 + $0x8] sm:$0xff] (!%p297_p2)  ;;  %v377_v2 = vld [vmem:[%s3483_s4 + $0x10] sm:$0xff] (!%p297_p2)  ;;  %v2638_v3 = vmov (!%p297_p2), 0.0|0.0   ;;  %s345_s15 = smul.u32 (!%p297_p2), 25, %s1914_s28  ;;  %vm2639_vm0 = vmmov (!%p297_p2), 0  }
   0x6   : > { %300 = sbr.rel (%p297_p2) target bundleno = 448 (0x1c0), region = 52  ;;  %2553 = vmatprep.subr.bf16.mxu0 (!%p297_p2), %v2638_v3  ;;  %2569 = vmatprep.subr.bf16.mxu1 (!%p297_p2), %v2638_v3  ;;  %v2554_v4 = vpack.c.bf16 (!%p297_p2), %v376_v1, %v375_v0  ;;  %v378_v5 = vld [vmem:[%s3483_s4 + $0x18] sm:$0xff] (!%p297_p2)  ;;  %v2640_v6 = vmov (!%p297_p2), 0.0   ;;  %v379_v8 = vld [vmem:[%s3483_s4 + $0x20] sm:$0xff] (!%p297_p2)  ;;  %v380_v9 = vld [vmem:[%s3483_s4 + $0x28] sm:$0xff] (!%p297_p2)  ;;  %vm493_vm1 = vcmask (!%p297_p2), 1042432  }
   0x7   : > { %2193 = vmatprep.mubr.msk.f32.mxu0 (!%p297_p2), %vm2639_vm0, %v2640_v6  ;;  %2288 = vmatprep.mubr.msk.f32.mxu1 (!%p297_p2), %vm2639_vm0, %v2640_v6  ;;  %v2557_v7 = vpack.c.bf16 (!%p297_p2), %v378_v5, %v377_v2  ;;  %p346_p3 = scmp.lt.s32.totalorder (!%p297_p2), %s345_s15, 49  ;;  %v2560_v10 = vpack.c.bf16 (!%p297_p2), %v380_v9, %v379_v8  ;;  %v381_v11 = vld [vmem:[%s3483_s4 + $0x30] sm:$0xff] (!%p297_p2)  ;;  %v382_v12 = vld [vmem:[%s3483_s4 + $0x38] sm:$0xff] (!%p297_p2)  ;;  %v383_v14 = vld [vmem:[%s3483_s4 + $0x40] sm:$0xff] (!%p297_p2)  ;;  %vm2641_vm2 = vmmov (!%p297_p2), 1   ;;  %vm417_vm4 = vcmask (!%p297_p2), 613376  }
   0x8   : > { %2555 = vmatpush3.bf16.msra.mxu0 (!%p297_p2), %v2554_v4  ;;  %2571 = vmatpush3.bf16.msra.mxu1 (!%p297_p2), %v2554_v4  ;;  %v2563_v13 = vpack.c.bf16 (!%p297_p2), %v382_v12, %v381_v11  ;;  %v384_v15 = vld [vmem:[%s3483_s4 + $0x48] sm:$0x7] (!%p297_p2)  ;;  %vm2741_vm3 = vmpackc.low (!%p297_p2), %vm493_vm1, %vm2641_vm2  ;;  %vm1796_vm5 = vcmask (!%p297_p2), 785408  }
   0x9   : > { %2556 = vmatprep.subr.bf16.mxu0 (!%p297_p2), %v2638_v3  ;;  %2572 = vmatprep.subr.bf16.mxu1 (!%p297_p2), %v2638_v3  ;;  %v2566_v16 = vpack.c.bf16 (!%p297_p2), %v384_v15, %v383_v14 }
   0xc   : > { %2558 = vmatpush3.bf16.msra.mxu0 (!%p297_p2), %v2557_v7  ;;  %2574 = vmatpush3.bf16.msra.mxu1 (!%p297_p2), %v2557_v7 }
   0xd   : > { %2559 = vmatprep.subr.bf16.mxu0 %v2638_v3  ;;  %2575 = vmatprep.subr.bf16.mxu1 %v2638_v3  ;;  %s3491_s15 = smov (!%p346_p3, %s345_s15), 49 }
   0xe   : > { %s2737_s29 = sshll.u32 %s3491_s15, 3 }
   0xf   : > { %s2749_s10 = scalar_lea.vmem %s3479_s0, %s2737_s29  ;;  %s2755_s13 = scalar_lea.vmem %s3480_s1, %s2737_s29 }
  0x10   : > { %2561 = vmatpush3.bf16.msra.mxu0 %v2560_v10  ;;  %2577 = vmatpush3.bf16.msra.mxu1 %v2560_v10  ;;  %v386_v18 = vld [vmem:[%s2749_s10] sm:$0xff]  ;;  %v387_v20 = vld [vmem:[%s2749_s10 + $0x8] sm:$0xff]  ;;  %v388_v22 = vld [vmem:[%s2749_s10 + $0x10] sm:$0xff]  ;;  %s2973_s16 = scalar_lea.vmem %s3481_s2, %s2737_s29  ;;  %s2979_s19 = scalar_lea.vmem %s3482_s3, %s2737_s29 }
  0x11   : > { %2562 = vmatprep.subr.bf16.mxu0 %v2638_v3  ;;  %2578 = vmatprep.subr.bf16.mxu1 %v2638_v3  ;;  %v712_v19 = vld [vmem:[%s2755_s13] sm:$0xff]  ;;  %v713_v21 = vld [vmem:[%s2755_s13 + $0x8] sm:$0xff]  ;;  %v714_v23 = vld [vmem:[%s2755_s13 + $0x10] sm:$0xff]  ;;  %s3310_s30 = scalar_lea.vmem %s3487_s8, %s2737_s29 }
  0x12   : > { %v389_v24 = vld [vmem:[%s2749_s10 + $0x18] sm:$0xff]  ;;  %v390_v26 = vld [vmem:[%s2749_s10 + $0x20] sm:$0xff]  ;;  %v391_v28 = vld [vmem:[%s2749_s10 + $0x28] sm:$0xff] }
  0x13   : > { %v715_v25 = vld [vmem:[%s2755_s13 + $0x18] sm:$0xff]  ;;  %v716_v27 = vld [vmem:[%s2755_s13 + $0x20] sm:$0xff]  ;;  %v717_v29 = vld [vmem:[%s2755_s13 + $0x28] sm:$0xff] }
  0x14   : > { %2564 = vmatpush3.bf16.msra.mxu0 %v2563_v13  ;;  %2580 = vmatpush3.bf16.msra.mxu1 %v2563_v13  ;;  %v392_v30 = vld [vmem:[%s2749_s10 + $0x30] sm:$0xff]  ;;  %v393_v32 = vld [vmem:[%s2749_s10 + $0x38] sm:$0xff]  ;;  %v394_v34 = vld [vmem:[%s2749_s10 + $0x40] sm:$0xff] }
  0x15   : > { %2565 = vmatprep.subr.bf16.mxu0 %v2638_v3  ;;  %2581 = vmatprep.subr.bf16.mxu1 %v2638_v3  ;;  %v718_v31 = vld [vmem:[%s2755_s13 + $0x30] sm:$0xff]  ;;  %v719_v33 = vld [vmem:[%s2755_s13 + $0x38] sm:$0xff]  ;;  %v720_v35 = vld [vmem:[%s2755_s13 + $0x40] sm:$0xff] }
  0x16   : > { %v395_v36 = vld [vmem:[%s2749_s10 + $0x48] sm:$0xff]  ;;  %v396_v38 = vld [vmem:[%s2749_s10 + $0x50] sm:$0xff]  ;;  %v397_v40 = vld [vmem:[%s2749_s10 + $0x58] sm:$0xff] }
  0x17   : > { %v721_v37 = vld [vmem:[%s2755_s13 + $0x48] sm:$0xff]  ;;  %v722_v39 = vld [vmem:[%s2755_s13 + $0x50] sm:$0xff]  ;;  %v723_v41 = vld [vmem:[%s2755_s13 + $0x58] sm:$0xff] }
  0x18   : > { %2568 = vmatpush3.bf16.msk.msra.mxu0 %vm2741_vm3, %v2566_v16  ;;  %2584 = vmatpush3.bf16.msk.msra.mxu1 %vm2741_vm3, %v2566_v16  ;;  %v398_v42 = vld [vmem:[%s2749_s10 + $0x60] sm:$0xff]  ;;  %v399_v44 = vld [vmem:[%s2749_s10 + $0x68] sm:$0xff]  ;;  %v400_v46 = vld [vmem:[%s2749_s10 + $0x70] sm:$0xff] }
  0x19   : > { %2585 = vmatprep.subr.bf16.mxu0 %v2638_v3  ;;  %2601 = vmatprep.subr.bf16.mxu1 %v2638_v3  ;;  %v724_v43 = vld [vmem:[%s2755_s13 + $0x60] sm:$0xff]  ;;  %v725_v45 = vld [vmem:[%s2755_s13 + $0x68] sm:$0xff]  ;;  %v726_v47 = vld [vmem:[%s2755_s13 + $0x70] sm:$0xff] }
  0x1a   : > { %v401_v48 = vld [vmem:[%s2749_s10 + $0x78] sm:$0xff]  ;;  %v402_v50 = vld [vmem:[%s2749_s10 + $0x80] sm:$0xff]  ;;  %v403_v52 = vld [vmem:[%s2749_s10 + $0x88] sm:$0xff] }
  0x1b   : > { %2194 = vmatmul.mubr.msk.f32.vlgmr.msra.gmra.mrb[0].mxu0 %vm417_vm4, %v386_v18  ;;  %2289 = vmatmul.mubr.msk.f32.vlgmr.msra.gmra.mrb[0].mxu1 %vm417_vm4, %v712_v19  ;;  %v727_v49 = vld [vmem:[%s2755_s13 + $0x78] sm:$0xff]  ;;  %v728_v51 = vld [vmem:[%s2755_s13 + $0x80] sm:$0xff]  ;;  %v729_v53 = vld [vmem:[%s2755_s13 + $0x88] sm:$0xff] }
  0x1c   : > { %2587 = vmatpush3.bf16.msra.mxu0 %v2554_v4  ;;  %2603 = vmatpush3.bf16.msra.mxu1 %v2554_v4  ;;  %v404_v54 = vld [vmem:[%s2749_s10 + $0x90] sm:$0xff]  ;;  %v405_v56 = vld [vmem:[%s2749_s10 + $0x98] sm:$0xff]  ;;  %v406_v58 = vld [vmem:[%s2749_s10 + $0xa0] sm:$0xff] }
  0x1d   : > { %2196 = vmatprep.mubr.msk.f32.mxu0 %vm2639_vm0, %v2640_v6  ;;  %2291 = vmatprep.mubr.msk.f32.mxu1 %vm2639_vm0, %v2640_v6  ;;  %v730_v55 = vld [vmem:[%s2755_s13 + $0x90] sm:$0xff]  ;;  %v731_v57 = vld [vmem:[%s2755_s13 + $0x98] sm:$0xff]  ;;  %v732_v59 = vld [vmem:[%s2755_s13 + $0xa0] sm:$0xff] }
  0x1e   : > { %2588 = vmatprep.subr.bf16.mxu0 %v2638_v3  ;;  %2604 = vmatprep.subr.bf16.mxu1 %v2638_v3  ;;  %v407_v60 = vld [vmem:[%s2749_s10 + $0xa8] sm:$0xff]  ;;  %v408_v62 = vld [vmem:[%s2749_s10 + $0xb0] sm:$0xff]  ;;  %v409_v0 = vld [vmem:[%s2749_s10 + $0xb8] sm:$0xff] }
  0x1f   : > { %2197 = vmatmul.mubr.msk.f32.gmra.mrb[2].mxu0 %vm417_vm4, %v387_v20  ;;  %2292 = vmatmul.mubr.msk.f32.gmra.mrb[2].mxu1 %vm417_vm4, %v713_v21  ;;  %v733_v61 = vld [vmem:[%s2755_s13 + $0xa8] sm:$0xff]  ;;  %v734_v63 = vld [vmem:[%s2755_s13 + $0xb0] sm:$0xff]  ;;  %v735_v1 = vld [vmem:[%s2755_s13 + $0xb8] sm:$0xff] }
  0x20   : > { %2199 = vmatprep.mubr.msk.f32.mxu0 %vm2639_vm0, %v2640_v6  ;;  %2294 = vmatprep.mubr.msk.f32.mxu1 %vm2639_vm0, %v2640_v6  ;;  %v410_v2 = vld [vmem:[%s2749_s10 + $0xc0] sm:$0xff]  ;;  %v1368_v8 = vld [vmem:[%s2979_s19 + $0x8] sm:$0xff]  ;;  %v1054_v9 = vld [vmem:[%s2973_s16 + $0x10] sm:$0xff] }
  0x21   : > { %2590 = vmatpush3.bf16.msra.mxu0 %v2557_v7  ;;  %2606 = vmatpush3.bf16.msra.mxu1 %v2557_v7  ;;  %v1052_v4 = vld [vmem:[%s2973_s16] sm:$0xff]  ;;  %v1053_v7 = vld [vmem:[%s2973_s16 + $0x8] sm:$0xff]  ;;  %v1055_v11 = vld [vmem:[%s2973_s16 + $0x18] sm:$0xff] }
  0x22   : > { %2591 = vmatprep.subr.bf16.mxu0 %v2638_v3  ;;  %2607 = vmatprep.subr.bf16.mxu1 %v2638_v3  ;;  %v1367_v5 = vld [vmem:[%s2979_s19] sm:$0xff]  ;;  %v1370_v12 = vld [vmem:[%s2979_s19 + $0x18] sm:$0xff]  ;;  %v1057_v15 = vld [vmem:[%s2973_s16 + $0x28] sm:$0xff] }
  0x23   : > { %2200 = vmatmul.mubr.msk.f32.gmra.mrb[4].mxu0 %vm417_vm4, %v388_v22  ;;  %2295 = vmatmul.mubr.msk.f32.gmra.mrb[4].mxu1 %vm417_vm4, %v714_v23  ;;  %v1371_v14 = vld [vmem:[%s2979_s19 + $0x20] sm:$0xff]  ;;  %v1058_v17 = vld [vmem:[%s2973_s16 + $0x30] sm:$0xff]  ;;  %v1059_v19 = vld [vmem:[%s2973_s16 + $0x38] sm:$0xff] }
  0x24   : > { %2202 = vmatprep.mubr.msk.f32.mxu0 %vm2639_vm0, %v2640_v6  ;;  %2297 = vmatprep.mubr.msk.f32.mxu1 %vm2639_vm0, %v2640_v6  ;;  %v1373_v18 = vld [vmem:[%s2979_s19 + $0x30] sm:$0xff]  ;;  %v1374_v20 = vld [vmem:[%s2979_s19 + $0x38] sm:$0xff]  ;;  %v1060_v21 = vld [vmem:[%s2973_s16 + $0x40] sm:$0xff] }
  0x25   : > { %2593 = vmatpush3.bf16.msra.mxu0 %v2560_v10  ;;  %2609 = vmatpush3.bf16.msra.mxu1 %v2560_v10  ;;  %v1369_v10 = vld [vmem:[%s2979_s19 + $0x10] sm:$0xff]  ;;  %v1375_v22 = vld [vmem:[%s2979_s19 + $0x40] sm:$0xff]  ;;  %v1061_v23 = vld [vmem:[%s2973_s16 + $0x48] sm:$0xff] }
  0x26   : > { %2594 = vmatprep.subr.bf16.mxu0 %v2638_v3  ;;  %2610 = vmatprep.subr.bf16.mxu1 %v2638_v3 }
  0x27   : > { %2203 = vmatmul.mubr.msk.f32.gmra.mrb[6].mxu0 %vm417_vm4, %v389_v24  ;;  %2298 = vmatmul.mubr.msk.f32.gmra.mrb[6].mxu1 %vm417_vm4, %v715_v25  ;;  %v1376_v24 = vld [vmem:[%s2979_s19 + $0x48] sm:$0xff]  ;;  %v1062_v25 = vld [vmem:[%s2973_s16 + $0x50] sm:$0xff] }
  0x28   : > { %2205 = vmatprep.mubr.msk.f32.mxu0 %vm2639_vm0, %v2640_v6  ;;  %2300 = vmatprep.mubr.msk.f32.mxu1 %vm2639_vm0, %v2640_v6 }
  0x29   : > { %2596 = vmatpush3.bf16.msra.mxu0 %v2563_v13  ;;  %2612 = vmatpush3.bf16.msra.mxu1 %v2563_v13  ;;  %v1056_v13 = vld [vmem:[%s2973_s16 + $0x20] sm:$0xff] }
  0x2a   : > { %2597 = vmatprep.subr.bf16.mxu0 %v2638_v3  ;;  %2613 = vmatprep.subr.bf16.mxu1 %v2638_v3  ;;  %v736_v3 = vld [vmem:[%s2755_s13 + $0xc0] sm:$0xff] }
  0x2b   : > { %2206 = vmatmul.mubr.msk.f32.gmra.mrb[8].mxu0 %vm417_vm4, %v390_v26  ;;  %2301 = vmatmul.mubr.msk.f32.gmra.mrb[8].mxu1 %vm417_vm4, %v716_v27  ;;  %v1377_v26 = vld [vmem:[%s2979_s19 + $0x50] sm:$0xff]  ;;  %v1063_v27 = vld [vmem:[%s2973_s16 + $0x58] sm:$0xff] }
  0x2c   : > { %2208 = vmatprep.mubr.msk.f32.mxu0 %vm2639_vm0, %v2640_v6  ;;  %2303 = vmatprep.mubr.msk.f32.mxu1 %vm2639_vm0, %v2640_v6 }
  0x2d   : > { %2600 = vmatpush3.bf16.msk.msra.mxu0 %vm2741_vm3, %v2566_v16  ;;  %2616 = vmatpush3.bf16.msk.msra.mxu1 %vm2741_vm3, %v2566_v16  ;;  %v1372_v16 = vld [vmem:[%s2979_s19 + $0x28] sm:$0xff] }
  0x2f   : > { %2209 = vmatmul.mubr.msk.f32.gmra.mrb[10].mxu0 %vm417_vm4, %v391_v28  ;;  %2304 = vmatmul.mubr.msk.f32.gmra.mrb[10].mxu1 %vm417_vm4, %v717_v29  ;;  %v1378_v28 = vld [vmem:[%s2979_s19 + $0x58] sm:$0xff]  ;;  %v1064_v29 = vld [vmem:[%s2973_s16 + $0x60] sm:$0xff] }
  0x30   : > { %2211 = vmatprep.mubr.msk.f32.mxu0 %vm2639_vm0, %v2640_v6  ;;  %2306 = vmatprep.mubr.msk.f32.mxu1 %vm2639_vm0, %v2640_v6 }
  0x33   : > { %2212 = vmatmul.mubr.msk.f32.gmra.mrb[12].mxu0 %vm417_vm4, %v392_v30  ;;  %2307 = vmatmul.mubr.msk.f32.gmra.mrb[12].mxu1 %vm417_vm4, %v718_v31  ;;  %v1379_v30 = vld [vmem:[%s2979_s19 + $0x60] sm:$0xff]  ;;  %v1065_v31 = vld [vmem:[%s2973_s16 + $0x68] sm:$0xff] }
  0x34   : > { %2214 = vmatprep.mubr.msk.f32.mxu0 %vm2639_vm0, %v2640_v6  ;;  %2309 = vmatprep.mubr.msk.f32.mxu1 %vm2639_vm0, %v2640_v6 }
  0x37   : > { %2215 = vmatmul.mubr.msk.f32.gmra.mrb[14].mxu0 %vm417_vm4, %v393_v32  ;;  %2310 = vmatmul.mubr.msk.f32.gmra.mrb[14].mxu1 %vm417_vm4, %v719_v33  ;;  %v1380_v32 = vld [vmem:[%s2979_s19 + $0x68] sm:$0xff]  ;;  %v1066_v33 = vld [vmem:[%s2973_s16 + $0x70] sm:$0xff] }
  0x38   : > { %2217 = vmatprep.mubr.msk.f32.mxu0 %vm2639_vm0, %v2640_v6  ;;  %2312 = vmatprep.mubr.msk.f32.mxu1 %vm2639_vm0, %v2640_v6 }
  0x3b   : > { %2218 = vmatmul.mubr.msk.f32.gmra.mrb[16].mxu0 %vm417_vm4, %v394_v34  ;;  %2313 = vmatmul.mubr.msk.f32.gmra.mrb[16].mxu1 %vm417_vm4, %v720_v35  ;;  %v1381_v34 = vld [vmem:[%s2979_s19 + $0x70] sm:$0xff]  ;;  %v1067_v35 = vld [vmem:[%s2973_s16 + $0x78] sm:$0xff] }
  0x3c   : > { %2220 = vmatprep.mubr.msk.f32.mxu0 %vm2639_vm0, %v2640_v6  ;;  %2315 = vmatprep.mubr.msk.f32.mxu1 %vm2639_vm0, %v2640_v6 }
  0x3f   : > { %2221 = vmatmul.mubr.msk.f32.gmra.mrb[18].mxu0 %vm417_vm4, %v395_v36  ;;  %2316 = vmatmul.mubr.msk.f32.gmra.mrb[18].mxu1 %vm417_vm4, %v721_v37  ;;  %v1382_v36 = vld [vmem:[%s2979_s19 + $0x78] sm:$0xff]  ;;  %v1068_v37 = vld [vmem:[%s2973_s16 + $0x80] sm:$0xff] }
  0x40   : > { %2223 = vmatprep.mubr.msk.f32.mxu0 %vm2639_vm0, %v2640_v6  ;;  %2318 = vmatprep.mubr.msk.f32.mxu1 %vm2639_vm0, %v2640_v6 }
  0x43   : > { %2224 = vmatmul.mubr.msk.f32.gmra.mrb[20].mxu0 %vm417_vm4, %v396_v38  ;;  %2319 = vmatmul.mubr.msk.f32.gmra.mrb[20].mxu1 %vm417_vm4, %v722_v39  ;;  %v1383_v38 = vld [vmem:[%s2979_s19 + $0x80] sm:$0xff]  ;;  %v1069_v39 = vld [vmem:[%s2973_s16 + $0x88] sm:$0xff] }
  0x44   : > { %2226 = vmatprep.mubr.msk.f32.mxu0 %vm2639_vm0, %v2640_v6  ;;  %2321 = vmatprep.mubr.msk.f32.mxu1 %vm2639_vm0, %v2640_v6 }
  0x47   : > { %2227 = vmatmul.mubr.msk.f32.gmra.mrb[22].mxu0 %vm417_vm4, %v397_v40  ;;  %2322 = vmatmul.mubr.msk.f32.gmra.mrb[22].mxu1 %vm417_vm4, %v723_v41  ;;  %v1384_v40 = vld [vmem:[%s2979_s19 + $0x88] sm:$0xff]  ;;  %v1070_v41 = vld [vmem:[%s2973_s16 + $0x90] sm:$0xff] }
  0x48   : > { %2229 = vmatprep.mubr.msk.f32.mxu0 %vm2639_vm0, %v2640_v6  ;;  %2324 = vmatprep.mubr.msk.f32.mxu1 %vm2639_vm0, %v2640_v6 }
  0x4b   : > { %2230 = vmatmul.mubr.msk.f32.gmra.mrb[24].mxu0 %vm417_vm4, %v398_v42  ;;  %2325 = vmatmul.mubr.msk.f32.gmra.mrb[24].mxu1 %vm417_vm4, %v724_v43  ;;  %v1385_v42 = vld [vmem:[%s2979_s19 + $0x90] sm:$0xff]  ;;  %v1071_v43 = vld [vmem:[%s2973_s16 + $0x98] sm:$0xff] }
  0x4c   : > { %2232 = vmatprep.mubr.msk.f32.mxu0 %vm2639_vm0, %v2640_v6  ;;  %2327 = vmatprep.mubr.msk.f32.mxu1 %vm2639_vm0, %v2640_v6 }
  0x4f   : > { %2233 = vmatmul.mubr.msk.f32.gmra.mrb[26].mxu0 %vm417_vm4, %v399_v44  ;;  %2328 = vmatmul.mubr.msk.f32.gmra.mrb[26].mxu1 %vm417_vm4, %v725_v45  ;;  %v1386_v44 = vld [vmem:[%s2979_s19 + $0x98] sm:$0xff]  ;;  %v1072_v45 = vld [vmem:[%s2973_s16 + $0xa0] sm:$0xff] }
  0x50   : > { %2235 = vmatprep.mubr.msk.f32.mxu0 %vm2639_vm0, %v2640_v6  ;;  %2330 = vmatprep.mubr.msk.f32.mxu1 %vm2639_vm0, %v2640_v6 }
  0x53   : > { %2236 = vmatmul.mubr.msk.f32.gmra.mrb[28].mxu0 %vm417_vm4, %v400_v46  ;;  %2331 = vmatmul.mubr.msk.f32.gmra.mrb[28].mxu1 %vm417_vm4, %v726_v47  ;;  %v1387_v46 = vld [vmem:[%s2979_s19 + $0xa0] sm:$0xff]  ;;  %v1073_v47 = vld [vmem:[%s2973_s16 + $0xa8] sm:$0xff] }
  0x54   : > { %2238 = vmatprep.mubr.msk.f32.mxu0 %vm2639_vm0, %v2640_v6  ;;  %2333 = vmatprep.mubr.msk.f32.mxu1 %vm2639_vm0, %v2640_v6 }
  0x57   : > { %2239 = vmatmul.mubr.msk.f32.gmra.mrb[30].mxu0 %vm417_vm4, %v401_v48  ;;  %2334 = vmatmul.mubr.msk.f32.gmra.mrb[30].mxu1 %vm417_vm4, %v727_v49  ;;  %v1388_v48 = vld [vmem:[%s2979_s19 + $0xa8] sm:$0xff]  ;;  %v1074_v49 = vld [vmem:[%s2973_s16 + $0xb0] sm:$0xff] }
  0x58   : > { %2241 = vmatprep.mubr.msk.f32.mxu0 %vm2639_vm0, %v2640_v6  ;;  %2336 = vmatprep.mubr.msk.f32.mxu1 %vm2639_vm0, %v2640_v6 }
  0x5b   : > { %2242 = vmatmul.mubr.msk.f32.gmra.mrb[32].mxu0 %vm417_vm4, %v402_v50  ;;  %2337 = vmatmul.mubr.msk.f32.gmra.mrb[32].mxu1 %vm417_vm4, %v728_v51  ;;  %v1389_v50 = vld [vmem:[%s2979_s19 + $0xb0] sm:$0xff]  ;;  %v1075_v51 = vld [vmem:[%s2973_s16 + $0xb8] sm:$0xff] }
  0x5c   : > { %2244 = vmatprep.mubr.msk.f32.mxu0 %vm2639_vm0, %v2640_v6  ;;  %2339 = vmatprep.mubr.msk.f32.mxu1 %vm2639_vm0, %v2640_v6 }
  0x5f   : > { %2245 = vmatmul.mubr.msk.f32.gmra.mrb[34].mxu0 %vm417_vm4, %v403_v52  ;;  %2340 = vmatmul.mubr.msk.f32.gmra.mrb[34].mxu1 %vm417_vm4, %v729_v53  ;;  %v1390_v52 = vld [vmem:[%s2979_s19 + $0xb8] sm:$0xff]  ;;  %v1076_v53 = vld [vmem:[%s2973_s16 + $0xc0] sm:$0xff] }
  0x60   : > { %2247 = vmatprep.mubr.msk.f32.mxu0 %vm2639_vm0, %v2640_v6  ;;  %2342 = vmatprep.mubr.msk.f32.mxu1 %vm2639_vm0, %v2640_v6 }
  0x63   : > { %2248 = vmatmul.mubr.msk.f32.gmra.mrb[36].mxu0 %vm417_vm4, %v404_v54  ;;  %2343 = vmatmul.mubr.msk.f32.gmra.mrb[36].mxu1 %vm417_vm4, %v730_v55  ;;  %v1391_v54 = vld [vmem:[%s2979_s19 + $0xc0] sm:$0xff] }
  0x64   : > { %2250 = vmatprep.mubr.msk.f32.mxu0 %vm2639_vm0, %v2640_v6  ;;  %2345 = vmatprep.mubr.msk.f32.mxu1 %vm2639_vm0, %v2640_v6  ;;  %v3186_v55 = vld [vmem:[%s3484_s5] ss:$0 sm:$0xff] }
  0x67   : > { %2251 = vmatmul.mubr.msk.f32.gmra.mrb[38].mxu0 %vm417_vm4, %v405_v56  ;;  %2346 = vmatmul.mubr.msk.f32.gmra.mrb[38].mxu1 %vm417_vm4, %v731_v57 }
  0x68   : > { %2253 = vmatprep.mubr.msk.f32.mxu0 %vm2639_vm0, %v2640_v6  ;;  %2348 = vmatprep.mubr.msk.f32.mxu1 %vm2639_vm0, %v2640_v6 }
  0x6b   : > { %2254 = vmatmul.mubr.msk.f32.gmra.mrb[40].mxu0 %vm417_vm4, %v406_v58  ;;  %2349 = vmatmul.mubr.msk.f32.gmra.mrb[40].mxu1 %vm417_vm4, %v732_v59 }
  0x6c   : > { %2256 = vmatprep.mubr.msk.f32.mxu0 %vm2639_vm0, %v2640_v6  ;;  %2351 = vmatprep.mubr.msk.f32.mxu1 %vm2639_vm0, %v2640_v6 }
  0x6f   : > { %2257 = vmatmul.mubr.msk.f32.gmra.mrb[42].mxu0 %vm417_vm4, %v407_v60  ;;  %2352 = vmatmul.mubr.msk.f32.gmra.mrb[42].mxu1 %vm417_vm4, %v733_v61 }
  0x70   : > { %2259 = vmatprep.mubr.msk.f32.mxu0 %vm2639_vm0, %v2640_v6  ;;  %2354 = vmatprep.mubr.msk.f32.mxu1 %vm2639_vm0, %v2640_v6 }
  0x73   : > { %2260 = vmatmul.mubr.msk.f32.gmra.mrb[44].mxu0 %vm417_vm4, %v408_v62  ;;  %2355 = vmatmul.mubr.msk.f32.gmra.mrb[44].mxu1 %vm417_vm4, %v734_v63 }
  0x74   : > { %2262 = vmatprep.mubr.msk.f32.mxu0 %vm2639_vm0, %v2640_v6  ;;  %2357 = vmatprep.mubr.msk.f32.mxu1 %vm2639_vm0, %v2640_v6 }
  0x77   : > { %2263 = vmatmul.mubr.msk.f32.gmra.mrb[46].mxu0 %vm417_vm4, %v409_v0  ;;  %2358 = vmatmul.mubr.msk.f32.gmra.mrb[46].mxu1 %vm417_vm4, %v735_v1 }
  0x78   : > { %2265 = vmatprep.mubr.msk.f32.mxu0 %vm2639_vm0, %v2640_v6  ;;  %2360 = vmatprep.mubr.msk.f32.mxu1 %vm2639_vm0, %v2640_v6 }
  0x7b   : > { %2266 = vmatmul.mubr.msk.f32.gmra.mrb[48].mxu0 %vm417_vm4, %v410_v2  ;;  %2361 = vmatmul.mubr.msk.f32.gmra.mrb[48].mxu1 %vm417_vm4, %v736_v3 }
  0x7c   : > { %2383 = vmatprep.mubr.msk.f32.mxu0 %vm2639_vm0, %v2640_v6  ;;  %2478 = vmatprep.mubr.msk.f32.mxu1 %vm2639_vm0, %v2640_v6 }
  0x7f   : > { %2384 = vmatmul.mubr.msk.f32.vlgmr.msra.gmra.mrb[50].mxu0 %vm417_vm4, %v1052_v4  ;;  %2479 = vmatmul.mubr.msk.f32.vlgmr.msra.gmra.mrb[50].mxu1 %vm417_vm4, %v1367_v5 }
  0x80   : > { %2386 = vmatprep.mubr.msk.f32.mxu0 %vm2639_vm0, %v2640_v6  ;;  %2481 = vmatprep.mubr.msk.f32.mxu1 %vm2639_vm0, %v2640_v6 }
  0x83   : > { %2387 = vmatmul.mubr.msk.f32.gmra.mrb[52].mxu0 %vm417_vm4, %v1053_v7  ;;  %2482 = vmatmul.mubr.msk.f32.gmra.mrb[52].mxu1 %vm417_vm4, %v1368_v8 }
  0x84   : > { %2389 = vmatprep.mubr.msk.f32.mxu0 %vm2639_vm0, %v2640_v6  ;;  %2484 = vmatprep.mubr.msk.f32.mxu1 %vm2639_vm0, %v2640_v6 }
  0x87   : > { %2390 = vmatmul.mubr.msk.f32.gmra.mrb[54].mxu0 %vm417_vm4, %v1054_v9  ;;  %2485 = vmatmul.mubr.msk.f32.gmra.mrb[54].mxu1 %vm417_vm4, %v1369_v10 }
  0x88   : > { %2392 = vmatprep.mubr.msk.f32.mxu0 %vm2639_vm0, %v2640_v6  ;;  %2487 = vmatprep.mubr.msk.f32.mxu1 %vm2639_vm0, %v2640_v6 }
  0x8b   : > { %2393 = vmatmul.mubr.msk.f32.gmra.mrb[56].mxu0 %vm417_vm4, %v1055_v11  ;;  %2488 = vmatmul.mubr.msk.f32.gmra.mrb[56].mxu1 %vm417_vm4, %v1370_v12 }
  0x8c   : > { %2395 = vmatprep.mubr.msk.f32.mxu0 %vm2639_vm0, %v2640_v6  ;;  %2490 = vmatprep.mubr.msk.f32.mxu1 %vm2639_vm0, %v2640_v6 }
  0x8f   : > { %2396 = vmatmul.mubr.msk.f32.gmra.mrb[58].mxu0 %vm417_vm4, %v1056_v13  ;;  %2491 = vmatmul.mubr.msk.f32.gmra.mrb[58].mxu1 %vm417_vm4, %v1371_v14 }
  0x90   : > { %2398 = vmatprep.mubr.msk.f32.mxu0 %vm2639_vm0, %v2640_v6  ;;  %2493 = vmatprep.mubr.msk.f32.mxu1 %vm2639_vm0, %v2640_v6 }
  0x93   : > { %2399 = vmatmul.mubr.msk.f32.gmra.mrb[60].mxu0 %vm417_vm4, %v1057_v15  ;;  %2494 = vmatmul.mubr.msk.f32.gmra.mrb[60].mxu1 %vm417_vm4, %v1372_v16 }
  0x94   : > { %2401 = vmatprep.mubr.msk.f32.mxu0 %vm2639_vm0, %v2640_v6  ;;  %2496 = vmatprep.mubr.msk.f32.mxu1 %vm2639_vm0, %v2640_v6 }
  0x97   : > { %2402 = vmatmul.mubr.msk.f32.gmra.mrb[62].mxu0 %vm417_vm4, %v1058_v17  ;;  %2497 = vmatmul.mubr.msk.f32.gmra.mrb[62].mxu1 %vm417_vm4, %v1373_v18 }
  0x98   : > { %2404 = vmatprep.mubr.msk.f32.mxu0 %vm2639_vm0, %v2640_v6  ;;  %2499 = vmatprep.mubr.msk.f32.mxu1 %vm2639_vm0, %v2640_v6 }
  0x9b   : > { %2405 = vmatmul.mubr.msk.f32.gmra.mrb[64].mxu0 %vm417_vm4, %v1059_v19  ;;  %2500 = vmatmul.mubr.msk.f32.gmra.mrb[64].mxu1 %vm417_vm4, %v1374_v20 }
  0x9c   : > { %2407 = vmatprep.mubr.msk.f32.mxu0 %vm2639_vm0, %v2640_v6  ;;  %2502 = vmatprep.mubr.msk.f32.mxu1 %vm2639_vm0, %v2640_v6 }
  0x9f   : > { %2408 = vmatmul.mubr.msk.f32.gmra.mrb[66].mxu0 %vm417_vm4, %v1060_v21  ;;  %2503 = vmatmul.mubr.msk.f32.gmra.mrb[66].mxu1 %vm417_vm4, %v1375_v22 }
  0xa0   : > { %2410 = vmatprep.mubr.msk.f32.mxu0 %vm2639_vm0, %v2640_v6  ;;  %2505 = vmatprep.mubr.msk.f32.mxu1 %vm2639_vm0, %v2640_v6 }
  0xa3   : > { %2411 = vmatmul.mubr.msk.f32.gmra.mrb[68].mxu0 %vm417_vm4, %v1061_v23  ;;  %2506 = vmatmul.mubr.msk.f32.gmra.mrb[68].mxu1 %vm417_vm4, %v1376_v24 }
  0xa4   : > { %2413 = vmatprep.mubr.msk.f32.mxu0 %vm2639_vm0, %v2640_v6  ;;  %2508 = vmatprep.mubr.msk.f32.mxu1 %vm2639_vm0, %v2640_v6 }
  0xa7   : > { %2414 = vmatmul.mubr.msk.f32.gmra.mrb[70].mxu0 %vm417_vm4, %v1062_v25  ;;  %2509 = vmatmul.mubr.msk.f32.gmra.mrb[70].mxu1 %vm417_vm4, %v1377_v26 }
  0xa8   : > { %2416 = vmatprep.mubr.msk.f32.mxu0 %vm2639_vm0, %v2640_v6  ;;  %2511 = vmatprep.mubr.msk.f32.mxu1 %vm2639_vm0, %v2640_v6 }
  0xab   : > { %2417 = vmatmul.mubr.msk.f32.gmra.mrb[72].mxu0 %vm417_vm4, %v1063_v27  ;;  %2512 = vmatmul.mubr.msk.f32.gmra.mrb[72].mxu1 %vm417_vm4, %v1378_v28 }
  0xac   : > { %2419 = vmatprep.mubr.msk.f32.mxu0 %vm2639_vm0, %v2640_v6  ;;  %2514 = vmatprep.mubr.msk.f32.mxu1 %vm2639_vm0, %v2640_v6 }
  0xaf   : > { %2420 = vmatmul.mubr.msk.f32.gmra.mrb[74].mxu0 %vm417_vm4, %v1064_v29  ;;  %2515 = vmatmul.mubr.msk.f32.gmra.mrb[74].mxu1 %vm417_vm4, %v1379_v30 }
  0xb0   : > { %2422 = vmatprep.mubr.msk.f32.mxu0 %vm2639_vm0, %v2640_v6  ;;  %2517 = vmatprep.mubr.msk.f32.mxu1 %vm2639_vm0, %v2640_v6 }
  0xb3   : > { %2423 = vmatmul.mubr.msk.f32.gmra.mrb[76].mxu0 %vm417_vm4, %v1065_v31  ;;  %2518 = vmatmul.mubr.msk.f32.gmra.mrb[76].mxu1 %vm417_vm4, %v1380_v32 }
  0xb4   : > { %2425 = vmatprep.mubr.msk.f32.mxu0 %vm2639_vm0, %v2640_v6  ;;  %2520 = vmatprep.mubr.msk.f32.mxu1 %vm2639_vm0, %v2640_v6 }
  0xb7   : > { %2426 = vmatmul.mubr.msk.f32.gmra.mrb[78].mxu0 %vm417_vm4, %v1066_v33  ;;  %2521 = vmatmul.mubr.msk.f32.gmra.mrb[78].mxu1 %vm417_vm4, %v1381_v34 }
  0xb8   : > { %2428 = vmatprep.mubr.msk.f32.mxu0 %vm2639_vm0, %v2640_v6  ;;  %2523 = vmatprep.mubr.msk.f32.mxu1 %vm2639_vm0, %v2640_v6 }
  0xbb   : > { %2429 = vmatmul.mubr.msk.f32.gmra.mrb[80].mxu0 %vm417_vm4, %v1067_v35  ;;  %2524 = vmatmul.mubr.msk.f32.gmra.mrb[80].mxu1 %vm417_vm4, %v1382_v36 }
  0xbc   : > { %2431 = vmatprep.mubr.msk.f32.mxu0 %vm2639_vm0, %v2640_v6  ;;  %2526 = vmatprep.mubr.msk.f32.mxu1 %vm2639_vm0, %v2640_v6 }
  0xbf   : > { %2432 = vmatmul.mubr.msk.f32.gmra.mrb[82].mxu0 %vm417_vm4, %v1068_v37  ;;  %2527 = vmatmul.mubr.msk.f32.gmra.mrb[82].mxu1 %vm417_vm4, %v1383_v38 }
  0xc0   : > { %2434 = vmatprep.mubr.msk.f32.mxu0 %vm2639_vm0, %v2640_v6  ;;  %2529 = vmatprep.mubr.msk.f32.mxu1 %vm2639_vm0, %v2640_v6 }
  0xc3   : > { %2435 = vmatmul.mubr.msk.f32.gmra.mrb[84].mxu0 %vm417_vm4, %v1069_v39  ;;  %2530 = vmatmul.mubr.msk.f32.gmra.mrb[84].mxu1 %vm417_vm4, %v1384_v40 }
  0xc4   : > { %2437 = vmatprep.mubr.msk.f32.mxu0 %vm2639_vm0, %v2640_v6  ;;  %2532 = vmatprep.mubr.msk.f32.mxu1 %vm2639_vm0, %v2640_v6 }
  0xc7   : > { %2438 = vmatmul.mubr.msk.f32.gmra.mrb[86].mxu0 %vm417_vm4, %v1070_v41  ;;  %2533 = vmatmul.mubr.msk.f32.gmra.mrb[86].mxu1 %vm417_vm4, %v1385_v42 }
  0xc8   : > { %2440 = vmatprep.mubr.msk.f32.mxu0 %vm2639_vm0, %v2640_v6  ;;  %2535 = vmatprep.mubr.msk.f32.mxu1 %vm2639_vm0, %v2640_v6 }
  0xcb   : > { %2441 = vmatmul.mubr.msk.f32.gmra.mrb[88].mxu0 %vm417_vm4, %v1071_v43  ;;  %2536 = vmatmul.mubr.msk.f32.gmra.mrb[88].mxu1 %vm417_vm4, %v1386_v44 }
  0xcc   : > { %2443 = vmatprep.mubr.msk.f32.mxu0 %vm2639_vm0, %v2640_v6  ;;  %2538 = vmatprep.mubr.msk.f32.mxu1 %vm2639_vm0, %v2640_v6 }
  0xcf   : > { %2444 = vmatmul.mubr.msk.f32.gmra.mrb[90].mxu0 %vm417_vm4, %v1072_v45  ;;  %2539 = vmatmul.mubr.msk.f32.gmra.mrb[90].mxu1 %vm417_vm4, %v1387_v46 }
  0xd0   : > { %2446 = vmatprep.mubr.msk.f32.mxu0 %vm2639_vm0, %v2640_v6  ;;  %2541 = vmatprep.mubr.msk.f32.mxu1 %vm2639_vm0, %v2640_v6 }
  0xd3   : > { %2447 = vmatmul.mubr.msk.f32.gmra.mrb[92].mxu0 %vm417_vm4, %v1073_v47  ;;  %2542 = vmatmul.mubr.msk.f32.gmra.mrb[92].mxu1 %vm417_vm4, %v1388_v48 }
  0xd4   : > { %2449 = vmatprep.mubr.msk.f32.mxu0 %vm2639_vm0, %v2640_v6  ;;  %2544 = vmatprep.mubr.msk.f32.mxu1 %vm2639_vm0, %v2640_v6 }
  0xd7   : > { %2450 = vmatmul.mubr.msk.f32.gmra.mrb[94].mxu0 %vm417_vm4, %v1074_v49  ;;  %2545 = vmatmul.mubr.msk.f32.gmra.mrb[94].mxu1 %vm417_vm4, %v1389_v50 }
  0xd8   : > { %2452 = vmatprep.mubr.msk.f32.mxu0 %vm2639_vm0, %v2640_v6  ;;  %2547 = vmatprep.mubr.msk.f32.mxu1 %vm2639_vm0, %v2640_v6 }
  0xdb   : > { %2453 = vmatmul.mubr.msk.f32.gmra.mrb[96].mxu0 %vm417_vm4, %v1075_v51  ;;  %2548 = vmatmul.mubr.msk.f32.gmra.mrb[96].mxu1 %vm417_vm4, %v1390_v52 }
  0xdc   : > { %2455 = vmatprep.mubr.msk.f32.mxu0 %vm2639_vm0, %v2640_v6  ;;  %2550 = vmatprep.mubr.msk.f32.mxu1 %vm2639_vm0, %v2640_v6 }
  0xdf   : > { %2456 = vmatmul.mubr.msk.f32.gmra.mrb[98].mxu0 %vm417_vm4, %v1076_v53  ;;  %2551 = vmatmul.mubr.msk.f32.gmra.mrb[98].mxu1 %vm417_vm4, %v1391_v54 }
  0xee   : > { %v563_v56 = vpop.f32.mrb[0].mxu0  ;;  %v878_v57 = vpop.f32.mrb[0].mxu1 }
  0xef   : > { %v564_v58 = vadd.f32 %v3186_v55, %v563_v56  ;;  %v879_v59 = vadd.f32 %v3186_v55, %v878_v57  ;;  %v2195_v60 = vpop.f32.mrb[1].mxu0  ;;  %v2290_v61 = vpop.f32.mrb[1].mxu1 }
  0xf1   : > { %v687_v6 = vmax.f32 %v564_v58, 0.0  ;;  %v1002_v62 = vmax.f32 %v879_v59, 0.0 }
  0xf2   : > { %v568_v63 = vpop.f32.mrb[2].mxu0  ;;  %v883_v0 = vpop.f32.mrb[2].mxu1 }
  0xf3   : > { %v3190_v1 = vmax.f32 %v687_v6, %v1002_v62  ;;  %v569_v2 = vadd.f32 %v3186_v55, %v568_v63  ;;  %v884_v3 = vadd.f32 %v3186_v55, %v883_v0  ;;  %v2198_v4 = vpop.f32.mrb[3].mxu0  ;;  %v2293_v5 = vpop.f32.mrb[3].mxu1 }
  0xf5   : > { %v688_v7 = vmax.f32 %v569_v2, 0.0  ;;  %v1003_v8 = vmax.f32 %v884_v3, 0.0 }
  0xf6   : > { %v573_v9 = vpop.f32.mrb[4].mxu0  ;;  %v888_v10 = vpop.f32.mrb[4].mxu1 }
  0xf7   : > { %v3194_v11 = vmax.f32 %v688_v7, %v1003_v8  ;;  %v574_v12 = vadd.f32 %v3186_v55, %v573_v9  ;;  %v889_v13 = vadd.f32 %v3186_v55, %v888_v10  ;;  %v2201_v14 = vpop.f32.mrb[5].mxu0  ;;  %v2296_v15 = vpop.f32.mrb[5].mxu1 }
  0xf9   : > { %v689_v16 = vmax.f32 %v574_v12, 0.0  ;;  %v1004_v17 = vmax.f32 %v889_v13, 0.0 }
  0xfa   : > { %v578_v18 = vpop.f32.mrb[6].mxu0  ;;  %v893_v19 = vpop.f32.mrb[6].mxu1 }
  0xfb   : > { %v3198_v20 = vmax.f32 %v689_v16, %v1004_v17  ;;  %v579_v21 = vadd.f32 %v3186_v55, %v578_v18  ;;  %v894_v22 = vadd.f32 %v3186_v55, %v893_v19  ;;  %v2204_v23 = vpop.f32.mrb[7].mxu0  ;;  %v2299_v24 = vpop.f32.mrb[7].mxu1 }
  0xfd   : > { %v690_v25 = vmax.f32 %v579_v21, 0.0  ;;  %v1005_v26 = vmax.f32 %v894_v22, 0.0 }
  0xfe   : > { %v583_v27 = vpop.f32.mrb[8].mxu0  ;;  %v898_v28 = vpop.f32.mrb[8].mxu1 }
  0xff   : > { %v3202_v29 = vmax.f32 %v690_v25, %v1005_v26  ;;  %v584_v30 = vadd.f32 %v3186_v55, %v583_v27  ;;  %v899_v31 = vadd.f32 %v3186_v55, %v898_v28  ;;  %v2207_v32 = vpop.f32.mrb[9].mxu0  ;;  %v2302_v33 = vpop.f32.mrb[9].mxu1 }
 0x101   : > { %v691_v34 = vmax.f32 %v584_v30, 0.0  ;;  %v1006_v35 = vmax.f32 %v899_v31, 0.0 }
 0x102   : > { %v588_v36 = vpop.f32.mrb[10].mxu0  ;;  %v903_v37 = vpop.f32.mrb[10].mxu1 }
 0x103   : > { %v3206_v38 = vmax.f32 %v691_v34, %v1006_v35  ;;  %v589_v39 = vadd.f32 %v3186_v55, %v588_v36  ;;  %v904_v40 = vadd.f32 %v3186_v55, %v903_v37  ;;  %v2210_v41 = vpop.f32.mrb[11].mxu0  ;;  %v2305_v42 = vpop.f32.mrb[11].mxu1 }
 0x105   : > { %v692_v43 = vmax.f32 %v589_v39, 0.0  ;;  %v1007_v44 = vmax.f32 %v904_v40, 0.0 }
 0x106   : > { %v593_v45 = vpop.f32.mrb[12].mxu0  ;;  %v908_v46 = vpop.f32.mrb[12].mxu1 }
 0x107   : > { %v3210_v47 = vmax.f32 %v692_v43, %v1007_v44  ;;  %v594_v48 = vadd.f32 %v3186_v55, %v593_v45  ;;  %v909_v49 = vadd.f32 %v3186_v55, %v908_v46  ;;  %v2213_v50 = vpop.f32.mrb[13].mxu0  ;;  %v2308_v51 = vpop.f32.mrb[13].mxu1 }
 0x109   : > { %v693_v52 = vmax.f32 %v594_v48, 0.0  ;;  %v1008_v53 = vmax.f32 %v909_v49, 0.0 }
 0x10a   : > { %v598_v54 = vpop.f32.mrb[14].mxu0  ;;  %v913_v56 = vpop.f32.mrb[14].mxu1 }
 0x10b   : > { %v3214_v57 = vmax.f32 %v693_v52, %v1008_v53  ;;  %v599_v58 = vadd.f32 %v3186_v55, %v598_v54  ;;  %v914_v59 = vadd.f32 %v3186_v55, %v913_v56  ;;  %v2216_v60 = vpop.f32.mrb[15].mxu0  ;;  %v2311_v61 = vpop.f32.mrb[15].mxu1 }
 0x10d   : > { %v694_v6 = vmax.f32 %v599_v58, 0.0  ;;  %v1009_v62 = vmax.f32 %v914_v59, 0.0 }
 0x10e   : > { %v603_v63 = vpop.f32.mrb[16].mxu0  ;;  %v918_v0 = vpop.f32.mrb[16].mxu1 }
 0x10f   : > { %v3218_v2 = vmax.f32 %v694_v6, %v1009_v62  ;;  %v604_v3 = vadd.f32 %v3186_v55, %v603_v63  ;;  %v919_v4 = vadd.f32 %v3186_v55, %v918_v0  ;;  %v2219_v5 = vpop.f32.mrb[17].mxu0  ;;  %v2314_v7 = vpop.f32.mrb[17].mxu1 }
 0x111   : > { %v695_v8 = vmax.f32 %v604_v3, 0.0  ;;  %v1010_v9 = vmax.f32 %v919_v4, 0.0 }
 0x112   : > { %v608_v10 = vpop.f32.mrb[18].mxu0  ;;  %v923_v12 = vpop.f32.mrb[18].mxu1 }
 0x113   : > { %v3222_v13 = vmax.f32 %v695_v8, %v1010_v9  ;;  %v609_v14 = vadd.f32 %v3186_v55, %v608_v10  ;;  %v924_v15 = vadd.f32 %v3186_v55, %v923_v12  ;;  %v2222_v16 = vpop.f32.mrb[19].mxu0  ;;  %v2317_v17 = vpop.f32.mrb[19].mxu1 }
 0x115   : > { %v696_v18 = vmax.f32 %v609_v14, 0.0  ;;  %v1011_v19 = vmax.f32 %v924_v15, 0.0 }
 0x116   : > { %v613_v21 = vpop.f32.mrb[20].mxu0  ;;  %v928_v22 = vpop.f32.mrb[20].mxu1 }
 0x117   : > { %v3226_v23 = vmax.f32 %v696_v18, %v1011_v19  ;;  %v614_v24 = vadd.f32 %v3186_v55, %v613_v21  ;;  %v929_v25 = vadd.f32 %v3186_v55, %v928_v22  ;;  %v2225_v26 = vpop.f32.mrb[21].mxu0  ;;  %v2320_v27 = vpop.f32.mrb[21].mxu1 }
 0x119   : > { %v697_v28 = vmax.f32 %v614_v24, 0.0  ;;  %v1012_v30 = vmax.f32 %v929_v25, 0.0 }
 0x11a   : > { %v618_v31 = vpop.f32.mrb[22].mxu0  ;;  %v933_v32 = vpop.f32.mrb[22].mxu1 }
 0x11b   : > { %v3230_v33 = vmax.f32 %v697_v28, %v1012_v30  ;;  %v619_v34 = vadd.f32 %v3186_v55, %v618_v31  ;;  %v934_v35 = vadd.f32 %v3186_v55, %v933_v32  ;;  %v2228_v36 = vpop.f32.mrb[23].mxu0  ;;  %v2323_v37 = vpop.f32.mrb[23].mxu1 }
 0x11d   : > { %v698_v39 = vmax.f32 %v619_v34, 0.0  ;;  %v1013_v40 = vmax.f32 %v934_v35, 0.0 }
 0x11e   : > { %v623_v41 = vpop.f32.mrb[24].mxu0  ;;  %v938_v42 = vpop.f32.mrb[24].mxu1 }
 0x11f   : > { %v3234_v43 = vmax.f32 %v698_v39, %v1013_v40  ;;  %v624_v44 = vadd.f32 %v3186_v55, %v623_v41  ;;  %v939_v45 = vadd.f32 %v3186_v55, %v938_v42  ;;  %v2231_v46 = vpop.f32.mrb[25].mxu0  ;;  %v2326_v48 = vpop.f32.mrb[25].mxu1 }
 0x121   : > { %v699_v49 = vmax.f32 %v624_v44, 0.0  ;;  %v1014_v50 = vmax.f32 %v939_v45, 0.0 }
 0x122   : > { %v628_v51 = vpop.f32.mrb[26].mxu0  ;;  %v943_v52 = vpop.f32.mrb[26].mxu1 }
 0x123   : > { %v3238_v53 = vmax.f32 %v699_v49, %v1014_v50  ;;  %v629_v54 = vadd.f32 %v3186_v55, %v628_v51  ;;  %v944_v56 = vadd.f32 %v3186_v55, %v943_v52  ;;  %v2234_v58 = vpop.f32.mrb[27].mxu0  ;;  %v2329_v59 = vpop.f32.mrb[27].mxu1 }
 0x125   : > { %v700_v60 = vmax.f32 %v629_v54, 0.0  ;;  %v1015_v61 = vmax.f32 %v944_v56, 0.0 }
 0x126   : > { %v633_v6 = vpop.f32.mrb[28].mxu0  ;;  %v948_v62 = vpop.f32.mrb[28].mxu1 }
 0x127   : > { %v3242_v63 = vmax.f32 %v700_v60, %v1015_v61  ;;  %v634_v0 = vadd.f32 %v3186_v55, %v633_v6  ;;  %v949_v3 = vadd.f32 %v3186_v55, %v948_v62  ;;  %v2237_v4 = vpop.f32.mrb[29].mxu0  ;;  %v2332_v5 = vpop.f32.mrb[29].mxu1 }
 0x129   : > { %v701_v7 = vmax.f32 %v634_v0, 0.0  ;;  %v1016_v8 = vmax.f32 %v949_v3, 0.0 }
 0x12a   : > { %v638_v9 = vpop.f32.mrb[30].mxu0  ;;  %v953_v10 = vpop.f32.mrb[30].mxu1 }
 0x12b   : > { %v3246_v12 = vmax.f32 %v701_v7, %v1016_v8  ;;  %v639_v14 = vadd.f32 %v3186_v55, %v638_v9  ;;  %v954_v15 = vadd.f32 %v3186_v55, %v953_v10  ;;  %v2240_v16 = vpop.f32.mrb[31].mxu0  ;;  %v2335_v17 = vpop.f32.mrb[31].mxu1 }
 0x12d   : > { %v702_v18 = vmax.f32 %v639_v14, 0.0  ;;  %v1017_v19 = vmax.f32 %v954_v15, 0.0 }
 0x12e   : > { %v643_v21 = vpop.f32.mrb[32].mxu0  ;;  %v958_v22 = vpop.f32.mrb[32].mxu1 }
 0x12f   : > { %v3250_v24 = vmax.f32 %v702_v18, %v1017_v19  ;;  %v644_v25 = vadd.f32 %v3186_v55, %v643_v21  ;;  %v959_v26 = vadd.f32 %v3186_v55, %v958_v22  ;;  %v2243_v27 = vpop.f32.mrb[33].mxu0  ;;  %v2338_v28 = vpop.f32.mrb[33].mxu1 }
 0x131   : > { %v703_v30 = vmax.f32 %v644_v25, 0.0  ;;  %v1018_v31 = vmax.f32 %v959_v26, 0.0 }
 0x132   : > { %v648_v32 = vpop.f32.mrb[34].mxu0  ;;  %v963_v34 = vpop.f32.mrb[34].mxu1 }
 0x133   : > { %v3254_v35 = vmax.f32 %v703_v30, %v1018_v31  ;;  %v649_v36 = vadd.f32 %v3186_v55, %v648_v32  ;;  %v964_v37 = vadd.f32 %v3186_v55, %v963_v34  ;;  %v2246_v39 = vpop.f32.mrb[35].mxu0  ;;  %v2341_v40 = vpop.f32.mrb[35].mxu1 }
 0x135   : > { %v704_v41 = vmax.f32 %v649_v36, 0.0  ;;  %v1019_v42 = vmax.f32 %v964_v37, 0.0 }
 0x136   : > { %v653_v44 = vpop.f32.mrb[36].mxu0  ;;  %v968_v45 = vpop.f32.mrb[36].mxu1 }
 0x137   : > { %v3258_v46 = vmax.f32 %v704_v41, %v1019_v42  ;;  %v654_v48 = vadd.f32 %v3186_v55, %v653_v44  ;;  %v969_v49 = vadd.f32 %v3186_v55, %v968_v45  ;;  %v2249_v50 = vpop.f32.mrb[37].mxu0  ;;  %v2344_v51 = vpop.f32.mrb[37].mxu1 }
 0x139   : > { %v705_v52 = vmax.f32 %v654_v48, 0.0  ;;  %v1020_v54 = vmax.f32 %v969_v49, 0.0 }
 0x13a   : > { %v658_v56 = vpop.f32.mrb[38].mxu0  ;;  %v973_v58 = vpop.f32.mrb[38].mxu1 }
 0x13b   : > { %v3262_v59 = vmax.f32 %v705_v52, %v1020_v54  ;;  %v659_v60 = vadd.f32 %v3186_v55, %v658_v56  ;;  %v974_v61 = vadd.f32 %v3186_v55, %v973_v58  ;;  %v2252_v6 = vpop.f32.mrb[39].mxu0  ;;  %v2347_v62 = vpop.f32.mrb[39].mxu1 }
 0x13d   : > { %v706_v0 = vmax.f32 %v659_v60, 0.0  ;;  %v1021_v3 = vmax.f32 %v974_v61, 0.0 }
 0x13e   : > { %v663_v4 = vpop.f32.mrb[40].mxu0  ;;  %v978_v5 = vpop.f32.mrb[40].mxu1 }
 0x13f   : > { %v3266_v7 = vmax.f32 %v706_v0, %v1021_v3  ;;  %v664_v8 = vadd.f32 %v3186_v55, %v663_v4  ;;  %v979_v9 = vadd.f32 %v3186_v55, %v978_v5  ;;  %v2255_v10 = vpop.f32.mrb[41].mxu0  ;;  %v2350_v14 = vpop.f32.mrb[41].mxu1 }
 0x141   : > { %v707_v15 = vmax.f32 %v664_v8, 0.0  ;;  %v1022_v16 = vmax.f32 %v979_v9, 0.0 }
 0x142   : > { %v668_v17 = vpop.f32.mrb[42].mxu0  ;;  %v983_v18 = vpop.f32.mrb[42].mxu1 }
 0x143   : > { %v3270_v19 = vmax.f32 %v707_v15, %v1022_v16  ;;  %v669_v21 = vadd.f32 %v3186_v55, %v668_v17  ;;  %v984_v22 = vadd.f32 %v3186_v55, %v983_v18  ;;  %v2258_v25 = vpop.f32.mrb[43].mxu0  ;;  %v2353_v26 = vpop.f32.mrb[43].mxu1 }
 0x145   : > { %v708_v27 = vmax.f32 %v669_v21, 0.0  ;;  %v1023_v28 = vmax.f32 %v984_v22, 0.0 }
 0x146   : > { %v673_v30 = vpop.f32.mrb[44].mxu0  ;;  %v988_v31 = vpop.f32.mrb[44].mxu1 }
 0x147   : > { %v3274_v32 = vmax.f32 %v708_v27, %v1023_v28  ;;  %v674_v34 = vadd.f32 %v3186_v55, %v673_v30  ;;  %v989_v36 = vadd.f32 %v3186_v55, %v988_v31  ;;  %v2261_v37 = vpop.f32.mrb[45].mxu0  ;;  %v2356_v39 = vpop.f32.mrb[45].mxu1  ;;  %v3295_v31 = vld [vmem:[%s3485_s6] ss:$0 sm:$0xff] }
 0x148   : > { %v3301_v39 = vld [vmem:[%s3486_s7] ss:$0 sm:$0xff] }
 0x149   : > { %v709_v40 = vmax.f32 %v674_v34, 0.0  ;;  %v1024_v41 = vmax.f32 %v989_v36, 0.0 }
 0x14a   : > { %v678_v42 = vpop.f32.mrb[46].mxu0  ;;  %v993_v44 = vpop.f32.mrb[46].mxu1 }
 0x14b   : > { %v3278_v45 = vmax.f32 %v709_v40, %v1024_v41  ;;  %v679_v48 = vadd.f32 %v3186_v55, %v678_v42  ;;  %v994_v49 = vadd.f32 %v3186_v55, %v993_v44  ;;  %v2264_v50 = vpop.f32.mrb[47].mxu0  ;;  %v2359_v51 = vpop.f32.mrb[47].mxu1 }
 0x14d   : > { %v710_v52 = vmax.f32 %v679_v48, 0.0  ;;  %v1025_v54 = vmax.f32 %v994_v49, 0.0 }
 0x14e   : > { %v683_v56 = vpop.f32.mrb[48].mxu0  ;;  %v998_v58 = vpop.f32.mrb[48].mxu1 }
 0x14f   : > { %v3282_v60 = vmax.f32 %v710_v52, %v1025_v54  ;;  %v684_v61 = vadd.f32 %v3186_v55, %v683_v56  ;;  %v999_v6 = vadd.f32 %v3186_v55, %v998_v58  ;;  %v2267_v62 = vpop.f32.mrb[49].mxu0  ;;  %v2362_v0 = vpop.f32.mrb[49].mxu1 }
 0x151   : > { %v711_v3 = vmax.f32 %v684_v61, 0.0  ;;  %v1026_v4 = vmax.f32 %v999_v6, 0.0 }
 0x152   : > { %v1218_v5 = vpop.f32.mrb[50].mxu0  ;;  %v1533_v8 = vpop.f32.mrb[50].mxu1 }
 0x153   : > { %v3286_v9 = vmax.f32 %v711_v3, %v1026_v4  ;;  %v1219_v10 = vadd.f32 %v3186_v55, %v1218_v5  ;;  %v1534_v14 = vadd.f32 %v3186_v55, %v1533_v8  ;;  %v2385_v15 = vpop.f32.mrb[51].mxu0  ;;  %v2480_v16 = vpop.f32.mrb[51].mxu1 }
 0x155   : > { %v1342_v17 = vmax.f32 %v1219_v10, 0.0  ;;  %v1657_v18 = vmax.f32 %v1534_v14, 0.0 }
 0x156   : > { %v1223_v21 = vpop.f32.mrb[52].mxu0  ;;  %v1538_v22 = vpop.f32.mrb[52].mxu1 }
 0x157   : > { %v1682_v25 = vmax.f32 %v1342_v17, %v1657_v18  ;;  %v1224_v26 = vadd.f32 %v3186_v55, %v1223_v21  ;;  %v1539_v27 = vadd.f32 %v3186_v55, %v1538_v22  ;;  %v2388_v28 = vpop.f32.mrb[53].mxu0  ;;  %v2483_v30 = vpop.f32.mrb[53].mxu1 }
 0x159   : > { %v1707_v34 = vmax.f32 %v3190_v1, %v1682_v25  ;;  %v1343_v36 = vmax.f32 %v1224_v26, 0.0  ;;  %v1658_v37 = vmax.f32 %v1539_v27, 0.0 }
 0x15a   : > { %v1228_v40 = vpop.f32.mrb[54].mxu0  ;;  %v1543_v41 = vpop.f32.mrb[54].mxu1 }
 0x15b   : > { %v1739_v42 = vmul.f32 %v3295_v31, %v1707_v34  ;;  %v1683_v44 = vmax.f32 %v1343_v36, %v1658_v37  ;;  %v1229_v48 = vadd.f32 %v3186_v55, %v1228_v40  ;;  %v1544_v49 = vadd.f32 %v3186_v55, %v1543_v41  ;;  %v2391_v50 = vpop.f32.mrb[55].mxu0  ;;  %v2486_v51 = vpop.f32.mrb[55].mxu1 }
 0x15d   : > { %v1771_v1 = vadd.f32 %v3301_v39, %v1739_v42  ;;  %v1708_v52 = vmax.f32 %v3194_v11, %v1683_v44  ;;  %v1344_v54 = vmax.f32 %v1229_v48, 0.0  ;;  %v1659_v56 = vmax.f32 %v1544_v49, 0.0 }
 0x15e   : > { %v1233_v58 = vpop.f32.mrb[56].mxu0  ;;  %v1548_v61 = vpop.f32.mrb[56].mxu1 }
 0x15f   : > { %1797 = vst.msk [vmem:[%s3310_s30] sm:$0xff] %vm1796_vm5, %v1771_v1  ;;  %v1740_v6 = vmul.f32 %v3295_v31, %v1708_v52  ;;  %v1684_v62 = vmax.f32 %v1344_v54, %v1659_v56  ;;  %v1234_v0 = vadd.f32 %v3186_v55, %v1233_v58  ;;  %v1549_v3 = vadd.f32 %v3186_v55, %v1548_v61  ;;  %v2394_v4 = vpop.f32.mrb[57].mxu0  ;;  %v2489_v5 = vpop.f32.mrb[57].mxu1 }
 0x161   : > { %v1772_v8 = vadd.f32 %v3301_v39, %v1740_v6  ;;  %v1709_v11 = vmax.f32 %v3198_v20, %v1684_v62  ;;  %v1345_v10 = vmax.f32 %v1234_v0, 0.0  ;;  %v1660_v14 = vmax.f32 %v1549_v3, 0.0 }
 0x162   : > { %v1238_v15 = vpop.f32.mrb[58].mxu0  ;;  %v1553_v16 = vpop.f32.mrb[58].mxu1 }
 0x163   : > { %1798 = vst.msk [vmem:[%s3310_s30 + $0x8] sm:$0xff] %vm1796_vm5, %v1772_v8  ;;  %v1741_v17 = vmul.f32 %v3295_v31, %v1709_v11  ;;  %v1685_v18 = vmax.f32 %v1345_v10, %v1660_v14  ;;  %v1239_v21 = vadd.f32 %v3186_v55, %v1238_v15  ;;  %v1554_v22 = vadd.f32 %v3186_v55, %v1553_v16  ;;  %v2397_v25 = vpop.f32.mrb[59].mxu0  ;;  %v2492_v26 = vpop.f32.mrb[59].mxu1 }
 0x165   : > { %v1773_v27 = vadd.f32 %v3301_v39, %v1741_v17  ;;  %v1710_v20 = vmax.f32 %v3202_v29, %v1685_v18  ;;  %v1346_v28 = vmax.f32 %v1239_v21, 0.0  ;;  %v1661_v30 = vmax.f32 %v1554_v22, 0.0 }
 0x166   : > { %v1243_v34 = vpop.f32.mrb[60].mxu0  ;;  %v1558_v36 = vpop.f32.mrb[60].mxu1 }
 0x167   : > { %1799 = vst.msk [vmem:[%s3310_s30 + $0x10] sm:$0xff] %vm1796_vm5, %v1773_v27  ;;  %v1742_v37 = vmul.f32 %v3295_v31, %v1710_v20  ;;  %v1686_v40 = vmax.f32 %v1346_v28, %v1661_v30  ;;  %v1244_v41 = vadd.f32 %v3186_v55, %v1243_v34  ;;  %v1559_v42 = vadd.f32 %v3186_v55, %v1558_v36  ;;  %v2400_v44 = vpop.f32.mrb[61].mxu0  ;;  %v2495_v48 = vpop.f32.mrb[61].mxu1 }
 0x169   : > { %v1774_v49 = vadd.f32 %v3301_v39, %v1742_v37  ;;  %v1711_v29 = vmax.f32 %v3206_v38, %v1686_v40  ;;  %v1347_v50 = vmax.f32 %v1244_v41, 0.0  ;;  %v1662_v51 = vmax.f32 %v1559_v42, 0.0 }
 0x16a   : > { %v1248_v1 = vpop.f32.mrb[62].mxu0  ;;  %v1563_v52 = vpop.f32.mrb[62].mxu1 }
 0x16b   : > { %1800 = vst.msk [vmem:[%s3310_s30 + $0x18] sm:$0xff] %vm1796_vm5, %v1774_v49  ;;  %v1743_v54 = vmul.f32 %v3295_v31, %v1711_v29  ;;  %v1687_v56 = vmax.f32 %v1347_v50, %v1662_v51  ;;  %v1249_v58 = vadd.f32 %v3186_v55, %v1248_v1  ;;  %v1564_v61 = vadd.f32 %v3186_v55, %v1563_v52  ;;  %v2403_v6 = vpop.f32.mrb[63].mxu0  ;;  %v2498_v62 = vpop.f32.mrb[63].mxu1 }
 0x16d   : > { %v1775_v0 = vadd.f32 %v3301_v39, %v1743_v54  ;;  %v1712_v38 = vmax.f32 %v3210_v47, %v1687_v56  ;;  %v1348_v3 = vmax.f32 %v1249_v58, 0.0  ;;  %v1663_v4 = vmax.f32 %v1564_v61, 0.0 }
 0x16e   : > { %v1253_v5 = vpop.f32.mrb[64].mxu0  ;;  %v1568_v8 = vpop.f32.mrb[64].mxu1 }
 0x16f   : > { %1801 = vst.msk [vmem:[%s3310_s30 + $0x20] sm:$0xff] %vm1796_vm5, %v1775_v0  ;;  %v1744_v11 = vmul.f32 %v3295_v31, %v1712_v38  ;;  %v1688_v10 = vmax.f32 %v1348_v3, %v1663_v4  ;;  %v1254_v14 = vadd.f32 %v3186_v55, %v1253_v5  ;;  %v1569_v15 = vadd.f32 %v3186_v55, %v1568_v8  ;;  %v2406_v16 = vpop.f32.mrb[65].mxu0  ;;  %v2501_v17 = vpop.f32.mrb[65].mxu1 }
 0x171   : > { %v1776_v18 = vadd.f32 %v3301_v39, %v1744_v11  ;;  %v1713_v47 = vmax.f32 %v3214_v57, %v1688_v10  ;;  %v1349_v21 = vmax.f32 %v1254_v14, 0.0  ;;  %v1664_v22 = vmax.f32 %v1569_v15, 0.0 }
 0x172   : > { %v1258_v25 = vpop.f32.mrb[66].mxu0  ;;  %v1573_v26 = vpop.f32.mrb[66].mxu1 }
 0x173   : > { %1802 = vst.msk [vmem:[%s3310_s30 + $0x28] sm:$0xff] %vm1796_vm5, %v1776_v18  ;;  %v1745_v27 = vmul.f32 %v3295_v31, %v1713_v47  ;;  %v1689_v20 = vmax.f32 %v1349_v21, %v1664_v22  ;;  %v1259_v28 = vadd.f32 %v3186_v55, %v1258_v25  ;;  %v1574_v30 = vadd.f32 %v3186_v55, %v1573_v26  ;;  %v2409_v34 = vpop.f32.mrb[67].mxu0  ;;  %v2504_v36 = vpop.f32.mrb[67].mxu1 }
 0x175   : > { %v1777_v37 = vadd.f32 %v3301_v39, %v1745_v27  ;;  %v1714_v57 = vmax.f32 %v3218_v2, %v1689_v20  ;;  %v1350_v40 = vmax.f32 %v1259_v28, 0.0  ;;  %v1665_v41 = vmax.f32 %v1574_v30, 0.0 }
 0x176   : > { %v1263_v42 = vpop.f32.mrb[68].mxu0  ;;  %v1578_v44 = vpop.f32.mrb[68].mxu1 }
 0x177   : > { %1803 = vst.msk [vmem:[%s3310_s30 + $0x30] sm:$0xff] %vm1796_vm5, %v1777_v37  ;;  %v1746_v48 = vmul.f32 %v3295_v31, %v1714_v57  ;;  %v1690_v49 = vmax.f32 %v1350_v40, %v1665_v41  ;;  %v1264_v29 = vadd.f32 %v3186_v55, %v1263_v42  ;;  %v1579_v50 = vadd.f32 %v3186_v55, %v1578_v44  ;;  %v2412_v51 = vpop.f32.mrb[69].mxu0  ;;  %v2507_v1 = vpop.f32.mrb[69].mxu1 }
 0x179   : > { %v1778_v52 = vadd.f32 %v3301_v39, %v1746_v48  ;;  %v1715_v2 = vmax.f32 %v3222_v13, %v1690_v49  ;;  %v1351_v54 = vmax.f32 %v1264_v29, 0.0  ;;  %v1666_v56 = vmax.f32 %v1579_v50, 0.0 }
 0x17a   : > { %v1268_v58 = vpop.f32.mrb[70].mxu0  ;;  %v1583_v61 = vpop.f32.mrb[70].mxu1 }
 0x17b   : > { %1804 = vst.msk [vmem:[%s3310_s30 + $0x38] sm:$0xff] %vm1796_vm5, %v1778_v52  ;;  %v1747_v6 = vmul.f32 %v3295_v31, %v1715_v2  ;;  %v1691_v62 = vmax.f32 %v1351_v54, %v1666_v56  ;;  %v1269_v0 = vadd.f32 %v3186_v55, %v1268_v58  ;;  %v1584_v38 = vadd.f32 %v3186_v55, %v1583_v61  ;;  %v2415_v3 = vpop.f32.mrb[71].mxu0  ;;  %v2510_v4 = vpop.f32.mrb[71].mxu1 }
 0x17d   : > { %v1779_v5 = vadd.f32 %v3301_v39, %v1747_v6  ;;  %v1716_v13 = vmax.f32 %v3226_v23, %v1691_v62  ;;  %v1352_v8 = vmax.f32 %v1269_v0, 0.0  ;;  %v1667_v11 = vmax.f32 %v1584_v38, 0.0 }
 0x17e   : > { %v1273_v10 = vpop.f32.mrb[72].mxu0  ;;  %v1588_v14 = vpop.f32.mrb[72].mxu1 }
 0x17f   : > { %1805 = vst.msk [vmem:[%s3310_s30 + $0x40] sm:$0xff] %vm1796_vm5, %v1779_v5  ;;  %v1748_v15 = vmul.f32 %v3295_v31, %v1716_v13  ;;  %v1692_v16 = vmax.f32 %v1352_v8, %v1667_v11  ;;  %v1274_v17 = vadd.f32 %v3186_v55, %v1273_v10  ;;  %v1589_v18 = vadd.f32 %v3186_v55, %v1588_v14  ;;  %v2418_v47 = vpop.f32.mrb[73].mxu0  ;;  %v2513_v21 = vpop.f32.mrb[73].mxu1 }
 0x181   : > { %v1780_v22 = vadd.f32 %v3301_v39, %v1748_v15  ;;  %v1717_v23 = vmax.f32 %v3230_v33, %v1692_v16  ;;  %v1353_v25 = vmax.f32 %v1274_v17, 0.0  ;;  %v1668_v26 = vmax.f32 %v1589_v18, 0.0 }
 0x182   : > { %v1278_v27 = vpop.f32.mrb[74].mxu0  ;;  %v1593_v20 = vpop.f32.mrb[74].mxu1 }
 0x183   : > { %1806 = vst.msk [vmem:[%s3310_s30 + $0x48] sm:$0xff] %vm1796_vm5, %v1780_v22  ;;  %v1749_v28 = vmul.f32 %v3295_v31, %v1717_v23  ;;  %v1693_v30 = vmax.f32 %v1353_v25, %v1668_v26  ;;  %v1279_v34 = vadd.f32 %v3186_v55, %v1278_v27  ;;  %v1594_v36 = vadd.f32 %v3186_v55, %v1593_v20  ;;  %v2421_v37 = vpop.f32.mrb[75].mxu0  ;;  %v2516_v57 = vpop.f32.mrb[75].mxu1 }
 0x185   : > { %v1781_v40 = vadd.f32 %v3301_v39, %v1749_v28  ;;  %v1718_v33 = vmax.f32 %v3234_v43, %v1693_v30  ;;  %v1354_v41 = vmax.f32 %v1279_v34, 0.0  ;;  %v1669_v42 = vmax.f32 %v1594_v36, 0.0 }
 0x186   : > { %v1283_v44 = vpop.f32.mrb[76].mxu0  ;;  %v1598_v48 = vpop.f32.mrb[76].mxu1 }
 0x187   : > { %1807 = vst.msk [vmem:[%s3310_s30 + $0x50] sm:$0xff] %vm1796_vm5, %v1781_v40  ;;  %v1750_v49 = vmul.f32 %v3295_v31, %v1718_v33  ;;  %v1694_v29 = vmax.f32 %v1354_v41, %v1669_v42  ;;  %v1284_v50 = vadd.f32 %v3186_v55, %v1283_v44  ;;  %v1599_v51 = vadd.f32 %v3186_v55, %v1598_v48  ;;  %v2424_v1 = vpop.f32.mrb[77].mxu0  ;;  %v2519_v52 = vpop.f32.mrb[77].mxu1 }
 0x189   : > { %v1782_v2 = vadd.f32 %v3301_v39, %v1750_v49  ;;  %v1719_v43 = vmax.f32 %v3238_v53, %v1694_v29  ;;  %v1355_v54 = vmax.f32 %v1284_v50, 0.0  ;;  %v1670_v56 = vmax.f32 %v1599_v51, 0.0 }
 0x18a   : > { %v1288_v58 = vpop.f32.mrb[78].mxu0  ;;  %v1603_v61 = vpop.f32.mrb[78].mxu1 }
 0x18b   : > { %1808 = vst.msk [vmem:[%s3310_s30 + $0x58] sm:$0xff] %vm1796_vm5, %v1782_v2  ;;  %v1751_v6 = vmul.f32 %v3295_v31, %v1719_v43  ;;  %v1695_v62 = vmax.f32 %v1355_v54, %v1670_v56  ;;  %v1289_v0 = vadd.f32 %v3186_v55, %v1288_v58  ;;  %v1604_v38 = vadd.f32 %v3186_v55, %v1603_v61  ;;  %v2427_v3 = vpop.f32.mrb[79].mxu0  ;;  %v2522_v4 = vpop.f32.mrb[79].mxu1 }
 0x18d   : > { %v1783_v5 = vadd.f32 %v3301_v39, %v1751_v6  ;;  %v1720_v53 = vmax.f32 %v3242_v63, %v1695_v62  ;;  %v1356_v13 = vmax.f32 %v1289_v0, 0.0  ;;  %v1671_v8 = vmax.f32 %v1604_v38, 0.0 }
 0x18e   : > { %v1293_v11 = vpop.f32.mrb[80].mxu0  ;;  %v1608_v10 = vpop.f32.mrb[80].mxu1 }
 0x18f   : > { %1809 = vst.msk [vmem:[%s3310_s30 + $0x60] sm:$0xff] %vm1796_vm5, %v1783_v5  ;;  %v1752_v14 = vmul.f32 %v3295_v31, %v1720_v53  ;;  %v1696_v15 = vmax.f32 %v1356_v13, %v1671_v8  ;;  %v1294_v16 = vadd.f32 %v3186_v55, %v1293_v11  ;;  %v1609_v17 = vadd.f32 %v3186_v55, %v1608_v10  ;;  %v2430_v18 = vpop.f32.mrb[81].mxu0  ;;  %v2525_v47 = vpop.f32.mrb[81].mxu1 }
 0x191   : > { %v1784_v21 = vadd.f32 %v3301_v39, %v1752_v14  ;;  %v1721_v63 = vmax.f32 %v3246_v12, %v1696_v15  ;;  %v1357_v22 = vmax.f32 %v1294_v16, 0.0  ;;  %v1672_v23 = vmax.f32 %v1609_v17, 0.0 }
 0x192   : > { %v1298_v25 = vpop.f32.mrb[82].mxu0  ;;  %v1613_v26 = vpop.f32.mrb[82].mxu1 }
 0x193   : > { %1810 = vst.msk [vmem:[%s3310_s30 + $0x68] sm:$0xff] %vm1796_vm5, %v1784_v21  ;;  %v1753_v27 = vmul.f32 %v3295_v31, %v1721_v63  ;;  %v1697_v20 = vmax.f32 %v1357_v22, %v1672_v23  ;;  %v1299_v28 = vadd.f32 %v3186_v55, %v1298_v25  ;;  %v1614_v30 = vadd.f32 %v3186_v55, %v1613_v26  ;;  %v2433_v34 = vpop.f32.mrb[83].mxu0  ;;  %v2528_v36 = vpop.f32.mrb[83].mxu1 }
 0x195   : > { %v1785_v37 = vadd.f32 %v3301_v39, %v1753_v27  ;;  %v1722_v12 = vmax.f32 %v3250_v24, %v1697_v20  ;;  %v1358_v57 = vmax.f32 %v1299_v28, 0.0  ;;  %v1673_v40 = vmax.f32 %v1614_v30, 0.0 }
 0x196   : > { %v1303_v33 = vpop.f32.mrb[84].mxu0  ;;  %v1618_v41 = vpop.f32.mrb[84].mxu1 }
 0x197   : > { %1811 = vst.msk [vmem:[%s3310_s30 + $0x70] sm:$0xff] %vm1796_vm5, %v1785_v37  ;;  %v1754_v42 = vmul.f32 %v3295_v31, %v1722_v12  ;;  %v1698_v44 = vmax.f32 %v1358_v57, %v1673_v40  ;;  %v1304_v48 = vadd.f32 %v3186_v55, %v1303_v33  ;;  %v1619_v49 = vadd.f32 %v3186_v55, %v1618_v41  ;;  %v2436_v29 = vpop.f32.mrb[85].mxu0  ;;  %v2531_v50 = vpop.f32.mrb[85].mxu1 }
 0x199   : > { %v1786_v51 = vadd.f32 %v3301_v39, %v1754_v42  ;;  %v1723_v24 = vmax.f32 %v3254_v35, %v1698_v44  ;;  %v1359_v1 = vmax.f32 %v1304_v48, 0.0  ;;  %v1674_v52 = vmax.f32 %v1619_v49, 0.0 }
 0x19a   : > { %v1308_v2 = vpop.f32.mrb[86].mxu0  ;;  %v1623_v43 = vpop.f32.mrb[86].mxu1 }
 0x19b   : > { %1812 = vst.msk [vmem:[%s3310_s30 + $0x78] sm:$0xff] %vm1796_vm5, %v1786_v51  ;;  %v1755_v54 = vmul.f32 %v3295_v31, %v1723_v24  ;;  %v1699_v56 = vmax.f32 %v1359_v1, %v1674_v52  ;;  %v1309_v58 = vadd.f32 %v3186_v55, %v1308_v2  ;;  %v1624_v61 = vadd.f32 %v3186_v55, %v1623_v43  ;;  %v2439_v6 = vpop.f32.mrb[87].mxu0  ;;  %v2534_v62 = vpop.f32.mrb[87].mxu1 }
 0x19d   : > { %v1787_v0 = vadd.f32 %v3301_v39, %v1755_v54  ;;  %v1724_v35 = vmax.f32 %v3258_v46, %v1699_v56  ;;  %v1360_v38 = vmax.f32 %v1309_v58, 0.0  ;;  %v1675_v3 = vmax.f32 %v1624_v61, 0.0 }
 0x19e   : > { %v1313_v4 = vpop.f32.mrb[88].mxu0  ;;  %v1628_v5 = vpop.f32.mrb[88].mxu1 }
 0x19f   : > { %1813 = vst.msk [vmem:[%s3310_s30 + $0x80] sm:$0xff] %vm1796_vm5, %v1787_v0  ;;  %v1756_v53 = vmul.f32 %v3295_v31, %v1724_v35  ;;  %v1700_v13 = vmax.f32 %v1360_v38, %v1675_v3  ;;  %v1314_v8 = vadd.f32 %v3186_v55, %v1313_v4  ;;  %v1629_v11 = vadd.f32 %v3186_v55, %v1628_v5  ;;  %v2442_v10 = vpop.f32.mrb[89].mxu0  ;;  %v2537_v14 = vpop.f32.mrb[89].mxu1 }
 0x1a1   : > { %v1788_v15 = vadd.f32 %v3301_v39, %v1756_v53  ;;  %v1725_v46 = vmax.f32 %v3262_v59, %v1700_v13  ;;  %v1361_v16 = vmax.f32 %v1314_v8, 0.0  ;;  %v1676_v17 = vmax.f32 %v1629_v11, 0.0 }
 0x1a2   : > { %v1318_v18 = vpop.f32.mrb[90].mxu0  ;;  %v1633_v47 = vpop.f32.mrb[90].mxu1 }
 0x1a3   : > { %1814 = vst.msk [vmem:[%s3310_s30 + $0x88] sm:$0xff] %vm1796_vm5, %v1788_v15  ;;  %v1757_v21 = vmul.f32 %v3295_v31, %v1725_v46  ;;  %v1701_v63 = vmax.f32 %v1361_v16, %v1676_v17  ;;  %v1319_v22 = vadd.f32 %v3186_v55, %v1318_v18  ;;  %v1634_v23 = vadd.f32 %v3186_v55, %v1633_v47  ;;  %v2445_v25 = vpop.f32.mrb[91].mxu0  ;;  %v2540_v26 = vpop.f32.mrb[91].mxu1 }
 0x1a5   : > { %v1789_v27 = vadd.f32 %v3301_v39, %v1757_v21  ;;  %v1726_v59 = vmax.f32 %v3266_v7, %v1701_v63  ;;  %v1362_v20 = vmax.f32 %v1319_v22, 0.0  ;;  %v1677_v28 = vmax.f32 %v1634_v23, 0.0 }
 0x1a6   : > { %v1323_v30 = vpop.f32.mrb[92].mxu0  ;;  %v1638_v34 = vpop.f32.mrb[92].mxu1 }
 0x1a7   : > { %1815 = vst.msk [vmem:[%s3310_s30 + $0x90] sm:$0xff] %vm1796_vm5, %v1789_v27  ;;  %v1758_v36 = vmul.f32 %v3295_v31, %v1726_v59  ;;  %v1702_v37 = vmax.f32 %v1362_v20, %v1677_v28  ;;  %v1324_v12 = vadd.f32 %v3186_v55, %v1323_v30  ;;  %v1639_v57 = vadd.f32 %v3186_v55, %v1638_v34  ;;  %v2448_v40 = vpop.f32.mrb[93].mxu0  ;;  %v2543_v33 = vpop.f32.mrb[93].mxu1  ;;  %v2629_v55 = vld [vmem:[%s3484_s5] ss:$0 sm:$0xff] }
 0x1a9   : > { %v1790_v41 = vadd.f32 %v3301_v39, %v1758_v36  ;;  %v1727_v7 = vmax.f32 %v3270_v19, %v1702_v37  ;;  %v1363_v42 = vmax.f32 %v1324_v12, 0.0  ;;  %v1678_v44 = vmax.f32 %v1639_v57, 0.0 }
 0x1aa   : > { %v1328_v48 = vpop.f32.mrb[94].mxu0  ;;  %v1643_v49 = vpop.f32.mrb[94].mxu1 }
 0x1ab   : > { %1816 = vst.msk [vmem:[%s3310_s30 + $0x98] sm:$0xff] %vm1796_vm5, %v1790_v41  ;;  %v1759_v29 = vmul.f32 %v3295_v31, %v1727_v7  ;;  %v1703_v50 = vmax.f32 %v1363_v42, %v1678_v44  ;;  %v1329_v51 = vadd.f32 %v2629_v55, %v1328_v48  ;;  %v1644_v24 = vadd.f32 %v2629_v55, %v1643_v49  ;;  %v2451_v1 = vpop.f32.mrb[95].mxu0  ;;  %v2546_v52 = vpop.f32.mrb[95].mxu1 }
 0x1ad   : > { %v1791_v19 = vadd.f32 %v3301_v39, %v1759_v29  ;;  %v1728_v2 = vmax.f32 %v3274_v32, %v1703_v50  ;;  %v1364_v43 = vmax.f32 %v1329_v51, 0.0  ;;  %v1679_v54 = vmax.f32 %v1644_v24, 0.0 }
 0x1ae   : > { %v1333_v56 = vpop.f32.mrb[96].mxu0  ;;  %v1648_v58 = vpop.f32.mrb[96].mxu1 }
 0x1af   : > { %1817 = vst.msk [vmem:[%s3310_s30 + $0xa0] sm:$0xff] %vm1796_vm5, %v1791_v19  ;;  %v1760_v61 = vmul.f32 %v3295_v31, %v1728_v2  ;;  %v1704_v6 = vmax.f32 %v1364_v43, %v1679_v54  ;;  %v1334_v62 = vadd.f32 %v2629_v55, %v1333_v56  ;;  %v1649_v0 = vadd.f32 %v2629_v55, %v1648_v58  ;;  %v2454_v35 = vpop.f32.mrb[97].mxu0  ;;  %v2549_v38 = vpop.f32.mrb[97].mxu1 }
 0x1b1   : > { %v1792_v3 = vadd.f32 %v3301_v39, %v1760_v61  ;;  %v1729_v4 = vmax.f32 %v3278_v45, %v1704_v6  ;;  %v1365_v32 = vmax.f32 %v1334_v62, 0.0  ;;  %v1680_v5 = vmax.f32 %v1649_v0, 0.0 }
 0x1b2   : > { %v1338_v53 = vpop.f32.mrb[98].mxu0  ;;  %v1653_v13 = vpop.f32.mrb[98].mxu1 }
 0x1b3   : > { %1818 = vst.msk [vmem:[%s3310_s30 + $0xa8] sm:$0xff] %vm1796_vm5, %v1792_v3  ;;  %v1761_v8 = vmul.f32 %v3295_v31, %v1729_v4  ;;  %v1705_v11 = vmax.f32 %v1365_v32, %v1680_v5  ;;  %v1339_v10 = vadd.f32 %v2629_v55, %v1338_v53  ;;  %v1654_v14 = vadd.f32 %v2629_v55, %v1653_v13  ;;  %v2457_v15 = vpop.f32.mrb[99].mxu0  ;;  %v2552_v46 = vpop.f32.mrb[99].mxu1 }
 0x1b5   : > { %v1793_v16 = vadd.f32 %v3301_v39, %v1761_v8  ;;  %v1730_v45 = vmax.f32 %v3282_v60, %v1705_v11  ;;  %v1366_v17 = vmax.f32 %v1339_v10, 0.0  ;;  %v1681_v18 = vmax.f32 %v1654_v14, 0.0 }
 0x1b7   : > { %1819 = vst.msk [vmem:[%s3310_s30 + $0xb0] sm:$0xff] %vm1796_vm5, %v1793_v16  ;;  %v1762_v47 = vmul.f32 %v3295_v31, %v1730_v45  ;;  %v1706_v21 = vmax.f32 %v1366_v17, %v1681_v18 }
 0x1b9   : > { %v1794_v63 = vadd.f32 %v3301_v39, %v1762_v47  ;;  %v1731_v22 = vmax.f32 %v3286_v9, %v1706_v21 }
 0x1bb   : > { %1820 = vst.msk [vmem:[%s3310_s30 + $0xb8] sm:$0xff] %vm1796_vm5, %v1794_v63  ;;  %v1763_v23 = vmul.f32 %v3295_v31, %v1731_v22 }
 0x1bd   : > { %v1795_v25 = vadd.f32 %v3301_v39, %v1763_v23 }
 0x1bf   : > { %1821 = vst.msk [vmem:[%s3310_s30 + $0xc0] sm:$0xff] %vm1796_vm5, %v1795_v25 }
 0x1c0 PF: > { %s18_s27 = sadd.s32 1, %s2636_s27  }
 0x1c1   : > { %p15_p4 = scmp.ge.s32.totalorder %s18_s27, 4  }
 0x1c3   :  { %17 = sbr.rel (!%p15_p4) target bundleno = 1 (0x1), region = 91 }

// kernel: ref_cnn_forward.6
= control target key start
LH: loop header
LB: loop body
LE: loop exit
PB: predicated region body
PF: predicated region fallthrough
CT: control target
= control target key end

     0   :  { %s1721_s18 = smov 0   ;;  %s2456_s0 = inlined_call_operand.vmem [shape: f32[288,864], index: 0, kind: input, shape index: {}]   ;;  %s2457_s1 = inlined_call_operand.vmem [shape: f32[864,128], index: 1, kind: input, shape index: {}]   ;;  %s2458_s2 = inlined_call_operand.vmem [shape: f32[1,128], index: 2, kind: input, shape index: {}]   ;;  %s2459_s3 = inlined_call_operand.vmem [shape: f32[1,128], index: 3, kind: input, shape index: {}]   ;;  %s2460_s4 = inlined_call_operand.vmem [shape: f32[1,128], index: 4, kind: input, shape index: {}]   ;;  %s2461_s5 = inlined_call_operand.vmem [shape: f32[288,128], index: 5, kind: output, shape index: {}]  }
   0x1 LB: > { %s1289_s19 = sadd.s32 4294967295, %s1688_s18   ;;  %p1293_p0 = scmp.ge.s32.totalorder %s1688_s18, 1  ;;  %s1688_s18 = sphi %s1721_s18, %s15_s18  }
   0x2   : > { %p189_p1 = scmp.lt.s32.totalorder %s1688_s18, 3 }
   0x4   : > { %p190_p2 = pnand %p1293_p0, %p189_p1 }
   0x5   : > { %v357_v0 = vld [vmem:[%s2457_s1] sm:$0xff] (!%p190_p2)  ;;  %v358_v1 = vld [vmem:[%s2457_s1 + $0x8] sm:$0xff] (!%p190_p2)  ;;  %v1690_v3 = vmov (!%p190_p2), 0.0|0.0   ;;  %v359_v6 = vld [vmem:[%s2457_s1 + $0x10] sm:$0xff] (!%p190_p2)  ;;  %s218_s11 = smul.u32 (!%p190_p2), 18, %s1289_s19  ;;  %vm472_vm0 = vcmask (!%p190_p2), 785408  }
   0x6   : > { %193 = sbr.rel (%p190_p2) target bundleno = 427 (0x1ab), region = 40  ;;  %v389_v2 = vld [vmem:[%s2457_s1 + $0x100] sm:$0xff] (!%p190_p2)  ;;  %1400 = vmatprep.subr.bf16.mxu1 (!%p190_p2), %v1690_v3  ;;  %1448 = vmatprep.subr.bf16.mxu0 (!%p190_p2), %v1690_v3  ;;  %v1401_v4 = vpack.c.bf16 (!%p190_p2), %v358_v1, %v357_v0  ;;  %v390_v5 = vld [vmem:[%s2457_s1 + $0x108] sm:$0xff] (!%p190_p2)  ;;  %v360_v7 = vld [vmem:[%s2457_s1 + $0x18] sm:$0xff] (!%p190_p2) }
   0x7   : > { %v1749_v8 = vpack.c.bf16 (!%p190_p2), %v390_v5, %v389_v2  ;;  %v391_v9 = vld [vmem:[%s2457_s1 + $0x110] sm:$0xff] (!%p190_p2)  ;;  %v392_v10 = vld [vmem:[%s2457_s1 + $0x118] sm:$0xff] (!%p190_p2)  ;;  %v1404_v11 = vpack.c.bf16 (!%p190_p2), %v360_v7, %v359_v6  ;;  %v361_v13 = vld [vmem:[%s2457_s1 + $0x20] sm:$0xff] (!%p190_p2)  ;;  %p219_p3 = scmp.lt.s32.totalorder (!%p190_p2), %s218_s11, 35 }
   0x8   : > { %1402 = vmatpush1.bf16.msra.mxu1 (!%p190_p2), %v1401_v4  ;;  %v1759_v12 = vpack.c.bf16 (!%p190_p2), %v392_v10, %v391_v9  ;;  %v362_v14 = vld [vmem:[%s2457_s1 + $0x28] sm:$0xff] (!%p190_p2)  ;;  %v393_v15 = vld [vmem:[%s2457_s1 + $0x120] sm:$0xff] (!%p190_p2)  ;;  %v363_v19 = vld [vmem:[%s2457_s1 + $0x30] sm:$0xff] (!%p190_p2) }
   0x9   : > { %1450 = vmatpush1.bf16.msra.mxu0 (!%p190_p2), %v1749_v8  ;;  %1403 = vmatprep.subr.bf16.mxu1 (!%p190_p2), %v1690_v3  ;;  %v394_v16 = vld [vmem:[%s2457_s1 + $0x128] sm:$0xff] (!%p190_p2)  ;;  %v1407_v17 = vpack.c.bf16 (!%p190_p2), %v362_v14, %v361_v13  ;;  %v364_v20 = vld [vmem:[%s2457_s1 + $0x38] sm:$0xff] (!%p190_p2)  ;;  %v395_v21 = vld [vmem:[%s2457_s1 + $0x130] sm:$0xff] (!%p190_p2) }
   0xa   : > { %1451 = vmatprep.subr.bf16.mxu0 (!%p190_p2), %v1690_v3  ;;  %v1776_v18 = vpack.c.bf16 (!%p190_p2), %v394_v16, %v393_v15  ;;  %v396_v22 = vld [vmem:[%s2457_s1 + $0x138] sm:$0xff] (!%p190_p2)  ;;  %v1410_v23 = vpack.c.bf16 (!%p190_p2), %v364_v20, %v363_v19  ;;  %v365_v25 = vld [vmem:[%s2457_s1 + $0x40] sm:$0xff] (!%p190_p2)  ;;  %v366_v26 = vld [vmem:[%s2457_s1 + $0x48] sm:$0xff] (!%p190_p2) }
   0xb   : > { %v1795_v24 = vpack.c.bf16 (!%p190_p2), %v396_v22, %v395_v21  ;;  %v397_v27 = vld [vmem:[%s2457_s1 + $0x140] sm:$0xff] (!%p190_p2)  ;;  %v398_v28 = vld [vmem:[%s2457_s1 + $0x148] sm:$0xff] (!%p190_p2)  ;;  %v1413_v29 = vpack.c.bf16 (!%p190_p2), %v366_v26, %v365_v25  ;;  %v367_v31 = vld [vmem:[%s2457_s1 + $0x50] sm:$0xff] (!%p190_p2) }
   0xc   : > { %1405 = vmatpush1.bf16.msra.mxu1 (!%p190_p2), %v1404_v11  ;;  %v1813_v30 = vpack.c.bf16 (!%p190_p2), %v398_v28, %v397_v27  ;;  %v368_v32 = vld [vmem:[%s2457_s1 + $0x58] sm:$0xff] (!%p190_p2)  ;;  %v399_v33 = vld [vmem:[%s2457_s1 + $0x150] sm:$0xff] (!%p190_p2)  ;;  %v369_v37 = vld [vmem:[%s2457_s1 + $0x60] sm:$0xff] (!%p190_p2) }
   0xd   : > { %1453 = vmatpush1.bf16.msra.mxu0 %v1759_v12  ;;  %1406 = vmatprep.subr.bf16.mxu1 %v1690_v3  ;;  %s2463_s11 = smov (!%p219_p3, %s218_s11), 35  ;;  %v400_v34 = vld [vmem:[%s2457_s1 + $0x158] sm:$0xff]  ;;  %v1416_v35 = vpack.c.bf16 %v368_v32, %v367_v31  ;;  %v370_v38 = vld [vmem:[%s2457_s1 + $0x68] sm:$0xff]  ;;  %v401_v39 = vld [vmem:[%s2457_s1 + $0x160] sm:$0xff] }
   0xe   : > { %1454 = vmatprep.subr.bf16.mxu0 %v1690_v3  ;;  %s1672_s13 = smul.u32 56, %s2463_s11  ;;  %v1835_v36 = vpack.c.bf16 %v400_v34, %v399_v33  ;;  %v402_v40 = vld [vmem:[%s2457_s1 + $0x168] sm:$0xff]  ;;  %v1419_v43 = vpack.c.bf16 %v370_v38, %v369_v37  ;;  %v371_v45 = vld [vmem:[%s2457_s1 + $0x70] sm:$0xff]  ;;  %v372_v46 = vld [vmem:[%s2457_s1 + $0x78] sm:$0xff]  ;;  %s1295_s20 = sshll.u32 %s2463_s11, 3 }
   0xf   : > { %v1854_v44 = vpack.c.bf16 %v402_v40, %v401_v39  ;;  %v403_v47 = vld [vmem:[%s2457_s1 + $0x170] sm:$0xff]  ;;  %v404_v48 = vld [vmem:[%s2457_s1 + $0x178] sm:$0xff]  ;;  %v1422_v49 = vpack.c.bf16 %v372_v46, %v371_v45  ;;  %v373_v51 = vld [vmem:[%s2457_s1 + $0x80] sm:$0xff]  ;;  %s2381_s26 = scalar_lea.vmem %s2461_s5, %s1295_s20 }
  0x10   : > { %1408 = vmatpush1.bf16.msra.mxu1 %v1407_v17  ;;  %s1831_s25 = scalar_lea.vmem %s2456_s0, %s1672_s13  ;;  %v1871_v50 = vpack.c.bf16 %v404_v48, %v403_v47  ;;  %v374_v52 = vld [vmem:[%s2457_s1 + $0x88] sm:$0xff]  ;;  %v405_v53 = vld [vmem:[%s2457_s1 + $0x180] sm:$0xff]  ;;  %v375_v57 = vld [vmem:[%s2457_s1 + $0x90] sm:$0xff] }
  0x11   : > { %1456 = vmatpush1.bf16.msra.mxu0 %v1776_v18  ;;  %1409 = vmatprep.subr.bf16.mxu1 %v1690_v3  ;;  %v232_v41 = vld [vmem:[%s1831_s25 + $0x8] sm:$0xff]  ;;  %v234_v42 = vld [vmem:[%s1831_s25 + $0x18] sm:$0xff]  ;;  %v1425_v55 = vpack.c.bf16 %v374_v52, %v373_v51  ;;  %v407_v59 = vld [vmem:[%s2457_s1 + $0x190] sm:$0xff] }
  0x12   : > { %1457 = vmatprep.subr.bf16.mxu0 %v1690_v3  ;;  %591 = vmatprep.mubr.f32.mxu1 %v232_v41  ;;  %v406_v54 = vld [vmem:[%s2457_s1 + $0x188] sm:$0xff]  ;;  %v376_v58 = vld [vmem:[%s2457_s1 + $0x98] sm:$0xff]  ;;  %v377_v63 = vld [vmem:[%s2457_s1 + $0xa0] sm:$0xff] }
  0x13   : > { %746 = vmatprep.mubr.f32.mxu0 %v234_v42  ;;  %v1888_v56 = vpack.c.bf16 %v406_v54, %v405_v53  ;;  %v408_v60 = vld [vmem:[%s2457_s1 + $0x198] sm:$0xff]  ;;  %v1428_v61 = vpack.c.bf16 %v376_v58, %v375_v57  ;;  %v378_v0 = vld [vmem:[%s2457_s1 + $0xa8] sm:$0xff]  ;;  %v409_v1 = vld [vmem:[%s2457_s1 + $0x1a0] sm:$0xff] }
  0x14   : > { %1411 = vmatpush1.bf16.msra.mxu1 %v1410_v23  ;;  %v1905_v62 = vpack.c.bf16 %v408_v60, %v407_v59  ;;  %v410_v2 = vld [vmem:[%s2457_s1 + $0x1a8] sm:$0xff]  ;;  %v1431_v4 = vpack.c.bf16 %v378_v0, %v377_v63  ;;  %v379_v6 = vld [vmem:[%s2457_s1 + $0xb0] sm:$0xff]  ;;  %v380_v7 = vld [vmem:[%s2457_s1 + $0xb8] sm:$0xff] }
  0x15   : > { %1459 = vmatpush1.bf16.msra.mxu0 %v1795_v24  ;;  %1412 = vmatprep.subr.bf16.mxu1 %v1690_v3  ;;  %v1922_v5 = vpack.c.bf16 %v410_v2, %v409_v1  ;;  %v411_v9 = vld [vmem:[%s2457_s1 + $0x1b0] sm:$0xff]  ;;  %v412_v10 = vld [vmem:[%s2457_s1 + $0x1b8] sm:$0xff]  ;;  %v1434_v11 = vpack.c.bf16 %v380_v7, %v379_v6  ;;  %v381_v14 = vld [vmem:[%s2457_s1 + $0xc0] sm:$0xff] }
  0x16   : > { %1460 = vmatprep.subr.bf16.mxu0 %v1690_v3  ;;  %v1939_v13 = vpack.c.bf16 %v412_v10, %v411_v9  ;;  %v382_v15 = vld [vmem:[%s2457_s1 + $0xc8] sm:$0xff]  ;;  %v413_v16 = vld [vmem:[%s2457_s1 + $0x1c0] sm:$0xff]  ;;  %v383_v21 = vld [vmem:[%s2457_s1 + $0xd0] sm:$0xff] }
  0x17   : > { %v414_v17 = vld [vmem:[%s2457_s1 + $0x1c8] sm:$0xff]  ;;  %v1437_v19 = vpack.c.bf16 %v382_v15, %v381_v14  ;;  %v384_v22 = vld [vmem:[%s2457_s1 + $0xd8] sm:$0xff]  ;;  %v415_v23 = vld [vmem:[%s2457_s1 + $0x1d0] sm:$0xff] }
  0x18   : > { %1414 = vmatpush1.bf16.msra.mxu1 %v1413_v29  ;;  %v1956_v20 = vpack.c.bf16 %v414_v17, %v413_v16  ;;  %v416_v25 = vld [vmem:[%s2457_s1 + $0x1d8] sm:$0xff]  ;;  %v1440_v26 = vpack.c.bf16 %v384_v22, %v383_v21  ;;  %v385_v28 = vld [vmem:[%s2457_s1 + $0xe0] sm:$0xff]  ;;  %v386_v29 = vld [vmem:[%s2457_s1 + $0xe8] sm:$0xff] }
  0x19   : > { %1462 = vmatpush1.bf16.msra.mxu0 %v1813_v30  ;;  %1415 = vmatprep.subr.bf16.mxu1 %v1690_v3  ;;  %v1973_v27 = vpack.c.bf16 %v416_v25, %v415_v23  ;;  %v417_v31 = vld [vmem:[%s2457_s1 + $0x1e0] sm:$0xff]  ;;  %v418_v32 = vld [vmem:[%s2457_s1 + $0x1e8] sm:$0xff]  ;;  %v1443_v33 = vpack.c.bf16 %v386_v29, %v385_v28  ;;  %v388_v37 = vld [vmem:[%s2457_s1 + $0xf8] sm:$0xff] }
  0x1a   : > { %1463 = vmatprep.subr.bf16.mxu0 %v1690_v3  ;;  %v1990_v34 = vpack.c.bf16 %v418_v32, %v417_v31  ;;  %v419_v38 = vld [vmem:[%s2457_s1 + $0x1f0] sm:$0xff]  ;;  %v420_v39 = vld [vmem:[%s2457_s1 + $0x1f8] sm:$0xff]  ;;  %v421_v42 = vld [vmem:[%s2457_s1 + $0x200] sm:$0xff] }
  0x1b   : > { %v2007_v41 = vpack.c.bf16 %v420_v39, %v419_v38  ;;  %v231_v45 = vld [vmem:[%s1831_s25] sm:$0xff]  ;;  %v233_v46 = vld [vmem:[%s1831_s25 + $0x10] sm:$0xff]  ;;  %v424_v52 = vld [vmem:[%s2457_s1 + $0x218] sm:$0xff] }
  0x1c   : > { %1417 = vmatpush1.bf16.msra.mxu1 %v1416_v35  ;;  %v387_v35 = vld [vmem:[%s2457_s1 + $0xf0] sm:$0xff]  ;;  %v239_v48 = vld [vmem:[%s1831_s25 + $0x40] sm:$0xff]  ;;  %v238_v53 = vld [vmem:[%s1831_s25 + $0x38] sm:$0xff] }
  0x1d   : > { %1465 = vmatpush1.bf16.msra.mxu0 %v1835_v36  ;;  %1418 = vmatprep.subr.bf16.mxu1 %v1690_v3  ;;  %v1446_v40 = vpack.c.bf16 %v388_v37, %v387_v35  ;;  %v423_v51 = vld [vmem:[%s2457_s1 + $0x210] sm:$0xff]  ;;  %v240_v54 = vld [vmem:[%s1831_s25 + $0x48] sm:$0xff]  ;;  %v246_v57 = vld [vmem:[%s1831_s25 + $0x78] sm:$0xff] }
  0x1e   : > { %1466 = vmatprep.subr.bf16.mxu0 %v1690_v3  ;;  %v248_v58 = vld [vmem:[%s1831_s25 + $0x88] sm:$0xff]  ;;  %v425_v59 = vld [vmem:[%s2457_s1 + $0x220] sm:$0xff]  ;;  %v253_v0 = vld [vmem:[%s1831_s25 + $0xb0] sm:$0xff] }
  0x1f   : > { %v426_v60 = vld [vmem:[%s2457_s1 + $0x228] sm:$0xff]  ;;  %v255_v1 = vld [vmem:[%s1831_s25 + $0xc0] sm:$0xff]  ;;  %v427_v2 = vld [vmem:[%s2457_s1 + $0x230] sm:$0xff] }
  0x20   : > { %1420 = vmatpush1.bf16.msra.mxu1 %v1419_v43  ;;  %v422_v43 = vld [vmem:[%s2457_s1 + $0x208] sm:$0xff]  ;;  %v1503_v63 = vpack.c.bf16 %v426_v60, %v425_v59  ;;  %v254_v7 = vld [vmem:[%s1831_s25 + $0xb8] sm:$0xff]  ;;  %v259_v15 = vld [vmem:[%s1831_s25 + $0xe0] sm:$0xff] }
  0x21   : > { %1468 = vmatpush1.bf16.msra.mxu0 %v1854_v44  ;;  %1421 = vmatprep.subr.bf16.mxu1 %v1690_v3  ;;  %v1497_v47 = vpack.c.bf16 %v422_v43, %v421_v42  ;;  %v252_v6 = vld [vmem:[%s1831_s25 + $0xa8] sm:$0xff]  ;;  %v262_v10 = vld [vmem:[%s1831_s25 + $0xf8] sm:$0xff]  ;;  %v261_v16 = vld [vmem:[%s1831_s25 + $0xf0] sm:$0xff] }
  0x22   : > { %1469 = vmatprep.subr.bf16.mxu0 %v1690_v3  ;;  %v260_v9 = vld [vmem:[%s1831_s25 + $0xe8] sm:$0xff]  ;;  %v267_v17 = vld [vmem:[%s1831_s25 + $0x120] sm:$0xff]  ;;  %v431_v21 = vld [vmem:[%s2457_s1 + $0x250] sm:$0xff] }
  0x23   : > { %v430_v14 = vld [vmem:[%s2457_s1 + $0x248] sm:$0xff]  ;;  %v432_v22 = vld [vmem:[%s2457_s1 + $0x258] sm:$0xff]  ;;  %v433_v29 = vld [vmem:[%s2457_s1 + $0x260] sm:$0xff] }
  0x24   : > { %1423 = vmatpush1.bf16.msra.mxu1 %v1422_v49  ;;  %v241_v49 = vld [vmem:[%s1831_s25 + $0x50] sm:$0xff]  ;;  %v266_v23 = vld [vmem:[%s1831_s25 + $0x118] sm:$0xff]  ;;  %v268_v25 = vld [vmem:[%s1831_s25 + $0x128] sm:$0xff] }
  0x25   : > { %1471 = vmatpush1.bf16.msra.mxu0 %v1871_v50  ;;  %1424 = vmatprep.subr.bf16.mxu1 %v1690_v3  ;;  %v276_v28 = vld [vmem:[%s1831_s25 + $0x168] sm:$0xff]  ;;  %v273_v32 = vld [vmem:[%s1831_s25 + $0x150] sm:$0xff]  ;;  %v283_v37 = vld [vmem:[%s1831_s25 + $0x1a0] sm:$0xff] }
  0x26   : > { %1472 = vmatprep.subr.bf16.mxu0 %v1690_v3  ;;  %v434_v31 = vld [vmem:[%s2457_s1 + $0x268] sm:$0xff]  ;;  %v281_v35 = vld [vmem:[%s1831_s25 + $0x190] sm:$0xff]  ;;  %v436_v39 = vld [vmem:[%s2457_s1 + $0x278] sm:$0xff] }
  0x27   : > { %v435_v38 = vld [vmem:[%s2457_s1 + $0x270] sm:$0xff]  ;;  %v282_v42 = vld [vmem:[%s1831_s25 + $0x198] sm:$0xff]  ;;  %v288_v43 = vld [vmem:[%s1831_s25 + $0x1c8] sm:$0xff] }
  0x28   : > { %1426 = vmatpush1.bf16.msra.mxu1 %v1425_v55  ;;  %v1500_v55 = vpack.c.bf16 %v424_v52, %v423_v51  ;;  %v295_v51 = vld [vmem:[%s1831_s25 + $0x200] sm:$0xff]  ;;  %v297_v52 = vld [vmem:[%s1831_s25 + $0x210] sm:$0xff]  ;;  %v304_v59 = vld [vmem:[%s1831_s25 + $0x248] sm:$0xff] }
  0x29   : > { %1474 = vmatpush1.bf16.msra.mxu0 %v1888_v56  ;;  %1427 = vmatprep.subr.bf16.mxu1 %v1690_v3  ;;  %v441_v60 = vld [vmem:[%s2457_s1 + $0x2a0] sm:$0xff] }
  0x2a   : > { %1475 = vmatprep.subr.bf16.mxu0 %v1690_v3 }
  0x2c   : > { %1429 = vmatpush1.bf16.msra.mxu1 %v1428_v61  ;;  %v245_v61 = vld [vmem:[%s1831_s25 + $0x70] sm:$0xff] }
  0x2d   : > { %1477 = vmatpush1.bf16.msra.mxu0 %v1905_v62  ;;  %1430 = vmatprep.subr.bf16.mxu1 %v1690_v3 }
  0x2e   : > { %1478 = vmatprep.subr.bf16.mxu0 %v1690_v3 }
  0x30   : > { %1432 = vmatpush1.bf16.msra.mxu1 %v1431_v4  ;;  %v428_v4 = vld [vmem:[%s2457_s1 + $0x238] sm:$0xff] }
  0x31   : > { %1480 = vmatpush1.bf16.msra.mxu0 %v1922_v5  ;;  %1433 = vmatprep.subr.bf16.mxu1 %v1690_v3 }
  0x32   : > { %1481 = vmatprep.subr.bf16.mxu0 %v1690_v3 }
  0x34   : > { %1435 = vmatpush1.bf16.msra.mxu1 %v1434_v11  ;;  %v429_v11 = vld [vmem:[%s2457_s1 + $0x240] sm:$0xff] }
  0x35   : > { %1483 = vmatpush1.bf16.msra.mxu0 %v1939_v13  ;;  %1436 = vmatprep.subr.bf16.mxu1 %v1690_v3 }
  0x36   : > { %1484 = vmatprep.subr.bf16.mxu0 %v1690_v3 }
  0x38   : > { %1438 = vmatpush1.bf16.msra.mxu1 %v1437_v19  ;;  %v269_v19 = vld [vmem:[%s1831_s25 + $0x130] sm:$0xff] }
  0x39   : > { %1486 = vmatpush1.bf16.msra.mxu0 %v1956_v20  ;;  %1439 = vmatprep.subr.bf16.mxu1 %v1690_v3 }
  0x3a   : > { %1487 = vmatprep.subr.bf16.mxu0 %v1690_v3 }
  0x3c   : > { %1441 = vmatpush1.bf16.msra.mxu1 %v1440_v26  ;;  %v274_v26 = vld [vmem:[%s1831_s25 + $0x158] sm:$0xff] }
  0x3d   : > { %1489 = vmatpush1.bf16.msra.mxu0 %v1973_v27  ;;  %1442 = vmatprep.subr.bf16.mxu1 %v1690_v3 }
  0x3e   : > { %1490 = vmatprep.subr.bf16.mxu0 %v1690_v3 }
  0x40   : > { %1444 = vmatpush1.bf16.msra.mxu1 %v1443_v33  ;;  %v275_v33 = vld [vmem:[%s1831_s25 + $0x160] sm:$0xff] }
  0x41   : > { %1492 = vmatpush1.bf16.msra.mxu0 %v1990_v34  ;;  %1445 = vmatprep.subr.bf16.mxu1 %v1690_v3 }
  0x42   : > { %1493 = vmatprep.subr.bf16.mxu0 %v1690_v3 }
  0x44   : > { %1447 = vmatpush1.bf16.msra.mxu1 %v1446_v40  ;;  %v280_v40 = vld [vmem:[%s1831_s25 + $0x188] sm:$0xff] }
  0x45   : > { %1495 = vmatpush1.bf16.msra.mxu0 %v2007_v41  ;;  %1568 = vmatprep.subr.bf16.mxu1 %v1690_v3 }
  0x46   : > { %1496 = vmatprep.subr.bf16.mxu0 %v1690_v3 }
  0x47   : > { %592 = vmatmul.mubr.f32.vlgmr.msra.gmra.mrb[0].mxu1 %v231_v45  ;;  %v290_v45 = vld [vmem:[%s1831_s25 + $0x1d8] sm:$0xff] }
  0x48   : > { %747 = vmatmul.mubr.f32.vlgmr.msra.gmra.mrb[0].mxu0 %v233_v46  ;;  %596 = vmatprep.mubr.f32.mxu1 %v239_v48  ;;  %v437_v46 = vld [vmem:[%s2457_s1 + $0x280] sm:$0xff] }
  0x49   : > { %1498 = vmatpush1.bf16.msra.mxu0 %v1497_v47  ;;  %751 = vmatprep.mubr.f32.mxu0 %v241_v49  ;;  %v438_v47 = vld [vmem:[%s2457_s1 + $0x288] sm:$0xff]  ;;  %v287_v48 = vld [vmem:[%s1831_s25 + $0x1c0] sm:$0xff]  ;;  %v289_v49 = vld [vmem:[%s1831_s25 + $0x1d0] sm:$0xff] }
  0x4a   : > { %1499 = vmatprep.subr.bf16.mxu0 %v1690_v3  ;;  %1584 = vmatpush1.bf16.msra.mxu1 %v1749_v8  ;;  %v247_v8 = vld [vmem:[%s1831_s25 + $0x80] sm:$0xff] }
  0x4b   : > { %597 = vmatmul.mubr.f32.gmra.mrb[2].mxu1 %v238_v53  ;;  %1569 = vmatprep.subr.bf16.mxu1 %v1690_v3  ;;  %v439_v53 = vld [vmem:[%s2457_s1 + $0x290] sm:$0xff] }
  0x4c   : > { %752 = vmatmul.mubr.f32.gmra.mrb[2].mxu0 %v240_v54  ;;  %601 = vmatprep.mubr.f32.mxu1 %v246_v57  ;;  %v440_v54 = vld [vmem:[%s2457_s1 + $0x298] sm:$0xff]  ;;  %v296_v57 = vld [vmem:[%s1831_s25 + $0x208] sm:$0xff] }
  0x4d   : > { %1501 = vmatpush1.bf16.msra.mxu0 %v1500_v55  ;;  %756 = vmatprep.mubr.f32.mxu0 %v248_v58  ;;  %v294_v55 = vld [vmem:[%s1831_s25 + $0x1f8] sm:$0xff] }
  0x4e   : > { %1502 = vmatprep.subr.bf16.mxu0 %v1690_v3  ;;  %1585 = vmatpush1.bf16.msra.mxu1 %v1759_v12  ;;  %v1506_v12 = vpack.c.bf16 %v428_v4, %v427_v2  ;;  %v302_v58 = vld [vmem:[%s1831_s25 + $0x238] sm:$0xff]  ;;  %v443_v2 = vld [vmem:[%s2457_s1 + $0x2b0] sm:$0xff] }
  0x4f   : > { %602 = vmatmul.mubr.f32.gmra.mrb[4].mxu1 %v245_v61  ;;  %1570 = vmatprep.subr.bf16.mxu1 %v1690_v3  ;;  %v442_v61 = vld [vmem:[%s2457_s1 + $0x2a8] sm:$0xff]  ;;  %v444_v4 = vld [vmem:[%s2457_s1 + $0x2b8] sm:$0xff] }
  0x50   : > { %757 = vmatmul.mubr.f32.gmra.mrb[4].mxu0 %v247_v8  ;;  %606 = vmatprep.mubr.f32.mxu1 %v253_v0  ;;  %v301_v8 = vld [vmem:[%s1831_s25 + $0x230] sm:$0xff] }
  0x51   : > { %1504 = vmatpush1.bf16.msra.mxu0 %v1503_v63  ;;  %761 = vmatprep.mubr.f32.mxu0 %v255_v1  ;;  %v303_v63 = vld [vmem:[%s1831_s25 + $0x240] sm:$0xff]  ;;  %v309_v0 = vld [vmem:[%s1831_s25 + $0x270] sm:$0xff] }
  0x52   : > { %1505 = vmatprep.subr.bf16.mxu0 %v1690_v3  ;;  %1586 = vmatpush1.bf16.msra.mxu1 %v1776_v18  ;;  %v1509_v18 = vpack.c.bf16 %v430_v14, %v429_v11  ;;  %v311_v1 = vld [vmem:[%s1831_s25 + $0x280] sm:$0xff]  ;;  %v446_v11 = vld [vmem:[%s2457_s1 + $0x2c8] sm:$0xff] }
  0x53   : > { %607 = vmatmul.mubr.f32.gmra.mrb[6].mxu1 %v252_v6  ;;  %1571 = vmatprep.subr.bf16.mxu1 %v1690_v3  ;;  %v308_v6 = vld [vmem:[%s1831_s25 + $0x268] sm:$0xff]  ;;  %v315_v14 = vld [vmem:[%s1831_s25 + $0x2a0] sm:$0xff] }
  0x54   : > { %762 = vmatmul.mubr.f32.gmra.mrb[6].mxu0 %v254_v7  ;;  %611 = vmatprep.mubr.f32.mxu1 %v260_v9  ;;  %v310_v7 = vld [vmem:[%s1831_s25 + $0x278] sm:$0xff] }
  0x55   : > { %1507 = vmatpush1.bf16.msra.mxu0 %v1506_v12  ;;  %766 = vmatprep.mubr.f32.mxu0 %v262_v10  ;;  %v316_v12 = vld [vmem:[%s1831_s25 + $0x2a8] sm:$0xff]  ;;  %v318_v9 = vld [vmem:[%s1831_s25 + $0x2b8] sm:$0xff]  ;;  %v445_v10 = vld [vmem:[%s2457_s1 + $0x2c0] sm:$0xff] }
  0x56   : > { %1508 = vmatprep.subr.bf16.mxu0 %v1690_v3  ;;  %1587 = vmatpush1.bf16.msra.mxu1 %v1795_v24  ;;  %v1512_v24 = vpack.c.bf16 %v432_v22, %v431_v21  ;;  %v322_v21 = vld [vmem:[%s1831_s25 + $0x2d8] sm:$0xff]  ;;  %v324_v22 = vld [vmem:[%s1831_s25 + $0x2e8] sm:$0xff] }
  0x57   : > { %612 = vmatmul.mubr.f32.gmra.mrb[8].mxu1 %v259_v15  ;;  %1572 = vmatprep.subr.bf16.mxu1 %v1690_v3  ;;  %v317_v15 = vld [vmem:[%s1831_s25 + $0x2b0] sm:$0xff] }
  0x58   : > { %767 = vmatmul.mubr.f32.gmra.mrb[8].mxu0 %v261_v16  ;;  %616 = vmatprep.mubr.f32.mxu1 %v267_v17  ;;  %v323_v16 = vld [vmem:[%s1831_s25 + $0x2e0] sm:$0xff]  ;;  %v447_v17 = vld [vmem:[%s2457_s1 + $0x2d0] sm:$0xff] }
  0x59   : > { %1510 = vmatpush1.bf16.msra.mxu0 %v1509_v18  ;;  %771 = vmatprep.mubr.f32.mxu0 %v269_v19  ;;  %v325_v18 = vld [vmem:[%s1831_s25 + $0x2f0] sm:$0xff]  ;;  %v448_v19 = vld [vmem:[%s2457_s1 + $0x2d8] sm:$0xff] }
  0x5a   : > { %1511 = vmatprep.subr.bf16.mxu0 %v1690_v3  ;;  %1588 = vmatpush1.bf16.msra.mxu1 %v1813_v30  ;;  %v1515_v30 = vpack.c.bf16 %v434_v31, %v433_v29  ;;  %v331_v29 = vld [vmem:[%s1831_s25 + $0x320] sm:$0xff] }
  0x5b   : > { %617 = vmatmul.mubr.f32.gmra.mrb[10].mxu1 %v266_v23  ;;  %1573 = vmatprep.subr.bf16.mxu1 %v1690_v3  ;;  %v330_v23 = vld [vmem:[%s1831_s25 + $0x318] sm:$0xff] }
  0x5c   : > { %772 = vmatmul.mubr.f32.gmra.mrb[10].mxu0 %v268_v25  ;;  %621 = vmatprep.mubr.f32.mxu1 %v274_v26  ;;  %v332_v25 = vld [vmem:[%s1831_s25 + $0x328] sm:$0xff] }
  0x5d   : > { %1513 = vmatpush1.bf16.msra.mxu0 %v1512_v24  ;;  %776 = vmatprep.mubr.f32.mxu0 %v276_v28  ;;  %v449_v24 = vld [vmem:[%s2457_s1 + $0x2e0] sm:$0xff]  ;;  %v450_v26 = vld [vmem:[%s2457_s1 + $0x2e8] sm:$0xff]  ;;  %v329_v28 = vld [vmem:[%s1831_s25 + $0x310] sm:$0xff] }
  0x5e   : > { %1514 = vmatprep.subr.bf16.mxu0 %v1690_v3  ;;  %1589 = vmatpush1.bf16.msra.mxu1 %v1835_v36  ;;  %v1518_v36 = vpack.c.bf16 %v436_v39, %v435_v38  ;;  %v1539_v31 = vpack.c.bf16 %v450_v26, %v449_v24  ;;  %v338_v38 = vld [vmem:[%s1831_s25 + $0x358] sm:$0xff]  ;;  %v272_v24 = vld [vmem:[%s1831_s25 + $0x148] sm:$0xff]  ;;  %v305_v26 = vld [vmem:[%s1831_s25 + $0x250] sm:$0xff] }
  0x5f   : > { %622 = vmatmul.mubr.f32.gmra.mrb[12].mxu1 %v273_v32  ;;  %1574 = vmatprep.subr.bf16.mxu1 %v1690_v3  ;;  %v339_v32 = vld [vmem:[%s1831_s25 + $0x360] sm:$0xff] }
  0x60   : > { %777 = vmatmul.mubr.f32.gmra.mrb[12].mxu0 %v275_v33  ;;  %626 = vmatprep.mubr.f32.mxu1 %v281_v35  ;;  %v451_v33 = vld [vmem:[%s2457_s1 + $0x2f0] sm:$0xff]  ;;  %v336_v35 = vld [vmem:[%s1831_s25 + $0x348] sm:$0xff] }
  0x61   : > { %1516 = vmatpush1.bf16.msra.mxu0 %v1515_v30  ;;  %781 = vmatprep.mubr.f32.mxu0 %v283_v37  ;;  %v452_v30 = vld [vmem:[%s2457_s1 + $0x2f8] sm:$0xff]  ;;  %v454_v37 = vld [vmem:[%s2457_s1 + $0x308] sm:$0xff] }
  0x62   : > { %1517 = vmatprep.subr.bf16.mxu0 %v1690_v3  ;;  %1590 = vmatpush1.bf16.msra.mxu1 %v1854_v44  ;;  %v1521_v44 = vpack.c.bf16 %v438_v47, %v437_v46  ;;  %v1542_v39 = vpack.c.bf16 %v452_v30, %v451_v33  ;;  %v351_v46 = vld [vmem:[%s1831_s25 + $0x3c0] sm:$0xff]  ;;  %v320_v33 = vld [vmem:[%s1831_s25 + $0x2c8] sm:$0xff] }
  0x63   : > { %627 = vmatmul.mubr.f32.gmra.mrb[14].mxu1 %v280_v40  ;;  %1575 = vmatprep.subr.bf16.mxu1 %v1690_v3  ;;  %v344_v40 = vld [vmem:[%s1831_s25 + $0x388] sm:$0xff]  ;;  %v243_v47 = vld [vmem:[%s1831_s25 + $0x60] sm:$0xff] }
  0x64   : > { %782 = vmatmul.mubr.f32.gmra.mrb[14].mxu0 %v282_v42  ;;  %631 = vmatprep.mubr.f32.mxu1 %v288_v43  ;;  %v236_v42 = vld [vmem:[%s1831_s25 + $0x28] sm:$0xff]  ;;  %v343_v43 = vld [vmem:[%s1831_s25 + $0x380] sm:$0xff] }
  0x65   : > { %1519 = vmatpush1.bf16.msra.mxu0 %v1518_v36  ;;  %786 = vmatprep.mubr.f32.mxu0 %v290_v45  ;;  %v235_v45 = vld [vmem:[%s1831_s25 + $0x20] sm:$0xff]  ;;  %v300_v30 = vld [vmem:[%s1831_s25 + $0x228] sm:$0xff] }
  0x66   : > { %1520 = vmatprep.subr.bf16.mxu0 %v1690_v3  ;;  %1591 = vmatpush1.bf16.msra.mxu1 %v1871_v50  ;;  %v1524_v50 = vpack.c.bf16 %v440_v54, %v439_v53  ;;  %v353_v53 = vld [vmem:[%s1831_s25 + $0x3d0] sm:$0xff] }
  0x67   : > { %632 = vmatmul.mubr.f32.gmra.mrb[16].mxu1 %v287_v48  ;;  %1576 = vmatprep.subr.bf16.mxu1 %v1690_v3  ;;  %v346_v48 = vld [vmem:[%s1831_s25 + $0x398] sm:$0xff]  ;;  %v257_v54 = vld [vmem:[%s1831_s25 + $0xd0] sm:$0xff] }
  0x68   : > { %787 = vmatmul.mubr.f32.gmra.mrb[16].mxu0 %v289_v49  ;;  %636 = vmatprep.mubr.f32.mxu1 %v295_v51  ;;  %v250_v49 = vld [vmem:[%s1831_s25 + $0x98] sm:$0xff]  ;;  %v345_v51 = vld [vmem:[%s1831_s25 + $0x390] sm:$0xff] }
  0x69   : > { %1522 = vmatpush1.bf16.msra.mxu0 %v1521_v44  ;;  %791 = vmatprep.mubr.f32.mxu0 %v297_v52  ;;  %v455_v44 = vld [vmem:[%s2457_s1 + $0x310] sm:$0xff] }
  0x6a   : > { %1523 = vmatprep.subr.bf16.mxu0 %v1690_v3  ;;  %1592 = vmatpush1.bf16.msra.mxu1 %v1888_v56  ;;  %v1527_v56 = vpack.c.bf16 %v442_v61, %v441_v60  ;;  %v249_v52 = vld [vmem:[%s1831_s25 + $0x90] sm:$0xff]  ;;  %v264_v61 = vld [vmem:[%s1831_s25 + $0x108] sm:$0xff] }
  0x6b   : > { %637 = vmatmul.mubr.f32.gmra.mrb[18].mxu1 %v294_v55  ;;  %1577 = vmatprep.subr.bf16.mxu1 %v1690_v3 }
  0x6c   : > { %792 = vmatmul.mubr.f32.gmra.mrb[18].mxu0 %v296_v57  ;;  %641 = vmatprep.mubr.f32.mxu1 %v302_v58  ;;  %v457_v57 = vld [vmem:[%s2457_s1 + $0x320] sm:$0xff]  ;;  %v352_v58 = vld [vmem:[%s1831_s25 + $0x3c8] sm:$0xff] }
  0x6d   : > { %1525 = vmatpush1.bf16.msra.mxu0 %v1524_v50  ;;  %796 = vmatprep.mubr.f32.mxu0 %v304_v59  ;;  %v458_v50 = vld [vmem:[%s2457_s1 + $0x328] sm:$0xff] }
  0x6e   : > { %1526 = vmatprep.subr.bf16.mxu0 %v1690_v3  ;;  %1593 = vmatpush1.bf16.msra.mxu1 %v1905_v62  ;;  %v1530_v62 = vpack.c.bf16 %v444_v4, %v443_v2  ;;  %v256_v59 = vld [vmem:[%s1831_s25 + $0xc8] sm:$0xff]  ;;  %v1552_v60 = vpack.c.bf16 %v458_v50, %v457_v57  ;;  %v271_v2 = vld [vmem:[%s1831_s25 + $0x140] sm:$0xff] }
  0x6f   : > { %642 = vmatmul.mubr.f32.gmra.mrb[20].mxu1 %v301_v8  ;;  %1578 = vmatprep.subr.bf16.mxu1 %v1690_v3  ;;  %v459_v8 = vld [vmem:[%s2457_s1 + $0x330] sm:$0xff]  ;;  %v461_v4 = vld [vmem:[%s2457_s1 + $0x340] sm:$0xff] }
  0x70   : > { %797 = vmatmul.mubr.f32.gmra.mrb[20].mxu0 %v303_v63  ;;  %646 = vmatprep.mubr.f32.mxu1 %v309_v0  ;;  %v460_v63 = vld [vmem:[%s2457_s1 + $0x338] sm:$0xff]  ;;  %v263_v0 = vld [vmem:[%s1831_s25 + $0x100] sm:$0xff] }
  0x71   : > { %1528 = vmatpush1.bf16.msra.mxu0 %v1527_v56  ;;  %801 = vmatprep.mubr.f32.mxu0 %v311_v1  ;;  %v237_v56 = vld [vmem:[%s1831_s25 + $0x30] sm:$0xff]  ;;  %v1556_v1 = vpack.c.bf16 %v460_v63, %v459_v8 }
  0x72   : > { %1529 = vmatprep.subr.bf16.mxu0 %v1690_v3  ;;  %1594 = vmatpush1.bf16.msra.mxu1 %v1922_v5  ;;  %v1533_v5 = vpack.c.bf16 %v446_v11, %v445_v10  ;;  %v464_v10 = vld [vmem:[%s2457_s1 + $0x358] sm:$0xff]  ;;  %v277_v11 = vld [vmem:[%s1831_s25 + $0x170] sm:$0xff] }
  0x73   : > { %647 = vmatmul.mubr.f32.gmra.mrb[22].mxu1 %v308_v6  ;;  %1579 = vmatprep.subr.bf16.mxu1 %v1690_v3  ;;  %v462_v6 = vld [vmem:[%s2457_s1 + $0x348] sm:$0xff] }
  0x74   : > { %802 = vmatmul.mubr.f32.gmra.mrb[22].mxu0 %v310_v7  ;;  %651 = vmatprep.mubr.f32.mxu1 %v316_v12  ;;  %v270_v7 = vld [vmem:[%s1831_s25 + $0x138] sm:$0xff] }
  0x75   : > { %1531 = vmatpush1.bf16.msra.mxu0 %v1530_v62  ;;  %806 = vmatprep.mubr.f32.mxu0 %v318_v9  ;;  %v1560_v62 = vpack.c.bf16 %v462_v6, %v461_v4  ;;  %v278_v12 = vld [vmem:[%s1831_s25 + $0x178] sm:$0xff]  ;;  %v463_v9 = vld [vmem:[%s2457_s1 + $0x350] sm:$0xff] }
  0x76   : > { %1532 = vmatprep.subr.bf16.mxu0 %v1690_v3  ;;  %1595 = vmatpush1.bf16.msra.mxu1 %v1939_v13  ;;  %v1536_v13 = vpack.c.bf16 %v448_v19, %v447_v17  ;;  %v291_v17 = vld [vmem:[%s1831_s25 + $0x1e0] sm:$0xff] }
  0x77   : > { %652 = vmatmul.mubr.f32.gmra.mrb[24].mxu1 %v315_v14  ;;  %1580 = vmatprep.subr.bf16.mxu1 %v1690_v3  ;;  %v1564_v14 = vpack.c.bf16 %v464_v10, %v463_v9  ;;  %v251_v19 = vld [vmem:[%s1831_s25 + $0xa0] sm:$0xff] }
  0x78   : > { %807 = vmatmul.mubr.f32.gmra.mrb[24].mxu0 %v317_v15  ;;  %656 = vmatprep.mubr.f32.mxu1 %v323_v16  ;;  %v285_v15 = vld [vmem:[%s1831_s25 + $0x1b0] sm:$0xff]  ;;  %v292_v16 = vld [vmem:[%s1831_s25 + $0x1e8] sm:$0xff] }
  0x79   : > { %1534 = vmatpush1.bf16.msra.mxu0 %v1533_v5  ;;  %811 = vmatprep.mubr.f32.mxu0 %v325_v18  ;;  %v284_v5 = vld [vmem:[%s1831_s25 + $0x1a8] sm:$0xff] }
  0x7a   : > { %1535 = vmatprep.subr.bf16.mxu0 %v1690_v3  ;;  %1596 = vmatpush1.bf16.msra.mxu1 %v1956_v20  ;;  %v337_v20 = vld [vmem:[%s1831_s25 + $0x350] sm:$0xff]  ;;  %v244_v18 = vld [vmem:[%s1831_s25 + $0x68] sm:$0xff] }
  0x7b   : > { %657 = vmatmul.mubr.f32.gmra.mrb[26].mxu1 %v322_v21  ;;  %1581 = vmatprep.subr.bf16.mxu1 %v1690_v3  ;;  %v299_v21 = vld [vmem:[%s1831_s25 + $0x220] sm:$0xff] }
  0x7c   : > { %812 = vmatmul.mubr.f32.gmra.mrb[26].mxu0 %v324_v22  ;;  %661 = vmatprep.mubr.f32.mxu1 %v330_v23  ;;  %v258_v22 = vld [vmem:[%s1831_s25 + $0xd8] sm:$0xff]  ;;  %v265_v23 = vld [vmem:[%s1831_s25 + $0x110] sm:$0xff] }
  0x7d   : > { %1537 = vmatpush1.bf16.msra.mxu0 %v1536_v13  ;;  %816 = vmatprep.mubr.f32.mxu0 %v332_v25  ;;  %v298_v13 = vld [vmem:[%s1831_s25 + $0x218] sm:$0xff] }
  0x7e   : > { %1538 = vmatprep.subr.bf16.mxu0 %v1690_v3  ;;  %1597 = vmatpush1.bf16.msra.mxu1 %v1973_v27  ;;  %v453_v27 = vld [vmem:[%s2457_s1 + $0x300] sm:$0xff]  ;;  %v306_v25 = vld [vmem:[%s1831_s25 + $0x258] sm:$0xff] }
  0x7f   : > { %662 = vmatmul.mubr.f32.gmra.mrb[28].mxu1 %v329_v28  ;;  %1582 = vmatprep.subr.bf16.mxu1 %v1690_v3  ;;  %v1544_v36 = vpack.c.bf16 %v454_v37, %v453_v27  ;;  %v279_v28 = vld [vmem:[%s1831_s25 + $0x180] sm:$0xff] }
  0x80   : > { %817 = vmatmul.mubr.f32.gmra.mrb[28].mxu0 %v331_v29  ;;  %666 = vmatprep.mubr.f32.mxu1 %v337_v20  ;;  %v313_v29 = vld [vmem:[%s1831_s25 + $0x290] sm:$0xff]  ;;  %v312_v20 = vld [vmem:[%s1831_s25 + $0x288] sm:$0xff]  ;;  %v307_v27 = vld [vmem:[%s1831_s25 + $0x260] sm:$0xff] }
  0x81   : > { %1540 = vmatpush1.bf16.msra.mxu0 %v1539_v31  ;;  %821 = vmatprep.mubr.f32.mxu0 %v339_v32  ;;  %v286_v31 = vld [vmem:[%s1831_s25 + $0x1b8] sm:$0xff]  ;;  %v293_v32 = vld [vmem:[%s1831_s25 + $0x1f0] sm:$0xff]  ;;  %v327_v37 = vld [vmem:[%s1831_s25 + $0x300] sm:$0xff] }
  0x82   : > { %1541 = vmatprep.subr.bf16.mxu0 %v1690_v3  ;;  %1598 = vmatpush1.bf16.msra.mxu1 %v1990_v34  ;;  %v242_v34 = vld [vmem:[%s1831_s25 + $0x58] sm:$0xff] }
  0x83   : > { %667 = vmatmul.mubr.f32.gmra.mrb[30].mxu1 %v336_v35  ;;  %1583 = vmatprep.subr.bf16.mxu1 %v1690_v3  ;;  %v350_v3 = vld [vmem:[%s1831_s25 + $0x3b8] sm:$0xff]  ;;  %v319_v35 = vld [vmem:[%s1831_s25 + $0x2c0] sm:$0xff] }
  0x84   : > { %822 = vmatmul.mubr.f32.gmra.mrb[30].mxu0 %v338_v38  ;;  %671 = vmatprep.mubr.f32.mxu1 %v344_v40  ;;  %v314_v38 = vld [vmem:[%s1831_s25 + $0x298] sm:$0xff]  ;;  %v321_v40 = vld [vmem:[%s1831_s25 + $0x2d0] sm:$0xff] }
  0x85   : > { %1543 = vmatpush1.bf16.msra.mxu0 %v1542_v39  ;;  %901 = vmatprep.mubr.f32.mxu0 %v236_v42  ;;  %v326_v39 = vld [vmem:[%s1831_s25 + $0x2f8] sm:$0xff] }
  0x86   : > { %1599 = vmatpush1.bf16.msra.mxu1 %v2007_v41  ;;  %v456_v41 = vld [vmem:[%s2457_s1 + $0x318] sm:$0xff] }
  0x87   : > { %672 = vmatmul.mubr.f32.gmra.mrb[32].mxu1 %v343_v43  ;;  %1545 = vmatprep.subr.bf16.mxu1 %v1544_v36  ;;  %v1548_v55 = vpack.c.bf16 %v456_v41, %v455_v44  ;;  %v334_v42 = vld [vmem:[%s1831_s25 + $0x338] sm:$0xff]  ;;  %v333_v43 = vld [vmem:[%s1831_s25 + $0x330] sm:$0xff]  ;;  %v347_v44 = vld [vmem:[%s1831_s25 + $0x3a0] sm:$0xff] }
  0x88   : > { %902 = vmatmul.mubr.f32.vlgmr.msra.gmra.mrb[0].mxu0 %v235_v45  ;;  %676 = vmatprep.mubr.f32.mxu1 %v351_v46  ;;  %v335_v45 = vld [vmem:[%s1831_s25 + $0x340] sm:$0xff]  ;;  %v341_v46 = vld [vmem:[%s1831_s25 + $0x370] sm:$0xff] }
  0x89   : > { %906 = vmatprep.mubr.f32.mxu0 %v243_v47  ;;  %v342_v47 = vld [vmem:[%s1831_s25 + $0x378] sm:$0xff]  ;;  %v355_v41 = vld [vmem:[%s1831_s25 + $0x3e0] sm:$0xff] }
  0x8b   : > { %677 = vmatmul.mubr.f32.gmra.mrb[34].mxu1 %v350_v3  ;;  %v340_v3 = vld [vmem:[%s1831_s25 + $0x368] sm:$0xff] }
  0x8c   : > { %907 = vmatmul.mubr.f32.gmra.mrb[2].mxu0 %v242_v34  ;;  %826 = vmatprep.mubr.f32.mxu1 %v346_v48  ;;  %v349_v34 = vld [vmem:[%s1831_s25 + $0x3b0] sm:$0xff]  ;;  %v348_v48 = vld [vmem:[%s1831_s25 + $0x3a8] sm:$0xff] }
  0x8d   : > { %911 = vmatprep.mubr.f32.mxu0 %v250_v49  ;;  %v356_v49 = vld [vmem:[%s1831_s25 + $0x3e8] sm:$0xff] }
  0x8f   : > { %827 = vmatmul.mubr.f32.vlgmr.msra.gmra.mrb[32].mxu1 %v345_v51  ;;  %v354_v51 = vld [vmem:[%s1831_s25 + $0x3d8] sm:$0xff] }
  0x90   : > { %912 = vmatmul.mubr.f32.gmra.mrb[4].mxu0 %v249_v52  ;;  %1547 = vmatpush3.bf16.msra.mxu1 %v1544_v36  ;;  %v328_v36 = vld [vmem:[%s1831_s25 + $0x308] sm:$0xff] }
  0x91   : > { %831 = vmatprep.mubr.f32.mxu1 %v353_v53  ;;  %916 = vmatprep.mubr.f32.mxu0 %v257_v54 }
  0x92   : > { %1549 = vmatprep.subr.bf16.mxu1 %v1548_v55 }
  0x93   : > { %832 = vmatmul.mubr.f32.gmra.mrb[34].mxu1 %v352_v58 }
  0x94   : > { %917 = vmatmul.mubr.f32.gmra.mrb[6].mxu0 %v256_v59  ;;  %1551 = vmatpush3.bf16.msra.mxu1 %v1548_v55 }
  0x95   : > { %921 = vmatprep.mubr.f32.mxu0 %v264_v61  ;;  %1553 = vmatprep.subr.bf16.mxu1 %v1552_v60 }
  0x96   : > { %1373 = vmatprep.mubr.msk.f32.mxu1 %vm472_vm0, %v237_v56 }
  0x98   : > { %922 = vmatmul.mubr.f32.gmra.mrb[8].mxu0 %v263_v0  ;;  %1555 = vmatpush3.bf16.msra.mxu1 %v1552_v60 }
  0x99   : > { %926 = vmatprep.mubr.f32.mxu0 %v271_v2  ;;  %1557 = vmatprep.subr.bf16.mxu1 %v1556_v1 }
  0x9c   : > { %927 = vmatmul.mubr.f32.gmra.mrb[10].mxu0 %v270_v7  ;;  %1559 = vmatpush3.bf16.msra.mxu1 %v1556_v1 }
  0x9d   : > { %931 = vmatprep.mubr.f32.mxu0 %v278_v12  ;;  %1561 = vmatprep.subr.bf16.mxu1 %v1560_v62 }
  0xa0   : > { %932 = vmatmul.mubr.f32.gmra.mrb[12].mxu0 %v277_v11  ;;  %1563 = vmatpush3.bf16.msra.mxu1 %v1560_v62 }
  0xa1   : > { %936 = vmatprep.mubr.f32.mxu0 %v285_v15  ;;  %1565 = vmatprep.subr.bf16.mxu1 %v1564_v14 }
  0xa4   : > { %937 = vmatmul.mubr.f32.gmra.mrb[14].mxu0 %v284_v5  ;;  %1567 = vmatpush3.bf16.msra.mxu1 %v1564_v14 }
  0xa5   : > { %941 = vmatprep.mubr.f32.mxu0 %v292_v16 }
  0xa7   : > { %1374 = vmatmul.mubr.msk.f32.vlgmr.msra.gmra.mrb[36].mxu1 %vm472_vm0, %v244_v18 }
  0xa8   : > { %942 = vmatmul.mubr.f32.gmra.mrb[16].mxu0 %v291_v17  ;;  %1376 = vmatprep.mubr.msk.f32.mxu1 %vm472_vm0, %v251_v19 }
  0xa9   : > { %946 = vmatprep.mubr.f32.mxu0 %v299_v21  ;;  %v2348_v21 = vld [vmem:[%s2458_s2] ss:$0 sm:$0xff] }
  0xab   : > { %1377 = vmatmul.mubr.msk.f32.gmra.mrb[38].mxu1 %vm472_vm0, %v258_v22 }
  0xac   : > { %947 = vmatmul.mubr.f32.gmra.mrb[18].mxu0 %v298_v13  ;;  %1379 = vmatprep.mubr.msk.f32.mxu1 %vm472_vm0, %v265_v23 }
  0xad   : > { %951 = vmatprep.mubr.f32.mxu0 %v306_v25 }
  0xaf   : > { %1380 = vmatmul.mubr.msk.f32.gmra.mrb[40].mxu1 %vm472_vm0, %v272_v24 }
  0xb0   : > { %952 = vmatmul.mubr.f32.gmra.mrb[20].mxu0 %v305_v26  ;;  %1382 = vmatprep.mubr.msk.f32.mxu1 %vm472_vm0, %v279_v28 }
  0xb1   : > { %956 = vmatprep.mubr.f32.mxu0 %v313_v29 }
  0xb3   : > { %1383 = vmatmul.mubr.msk.f32.gmra.mrb[42].mxu1 %vm472_vm0, %v286_v31 }
  0xb4   : > { %957 = vmatmul.mubr.f32.gmra.mrb[22].mxu0 %v312_v20  ;;  %1385 = vmatprep.mubr.msk.f32.mxu1 %vm472_vm0, %v293_v32 }
  0xb5   : > { %961 = vmatprep.mubr.f32.mxu0 %v320_v33 }
  0xb7   : > { %1386 = vmatmul.mubr.msk.f32.gmra.mrb[44].mxu1 %vm472_vm0, %v300_v30 }
  0xb8   : > { %962 = vmatmul.mubr.f32.gmra.mrb[24].mxu0 %v319_v35  ;;  %1388 = vmatprep.mubr.msk.f32.mxu1 %vm472_vm0, %v307_v27 }
  0xb9   : > { %966 = vmatprep.mubr.f32.mxu0 %v327_v37 }
  0xbb   : > { %1389 = vmatmul.mubr.msk.f32.gmra.mrb[46].mxu1 %vm472_vm0, %v314_v38 }
  0xbc   : > { %967 = vmatmul.mubr.f32.gmra.mrb[26].mxu0 %v326_v39  ;;  %1391 = vmatprep.mubr.msk.f32.mxu1 %vm472_vm0, %v321_v40 }
  0xbd   : > { %971 = vmatprep.mubr.f32.mxu0 %v334_v42 }
  0xbf   : > { %1392 = vmatmul.mubr.msk.f32.gmra.mrb[48].mxu1 %vm472_vm0, %v328_v36 }
  0xc0   : > { %972 = vmatmul.mubr.f32.gmra.mrb[28].mxu0 %v333_v43  ;;  %1394 = vmatprep.mubr.msk.f32.mxu1 %vm472_vm0, %v335_v45 }
  0xc1   : > { %976 = vmatprep.mubr.f32.mxu0 %v341_v46 }
  0xc3   : > { %1395 = vmatmul.mubr.msk.f32.gmra.mrb[50].mxu1 %vm472_vm0, %v342_v47 }
  0xc4   : > { %977 = vmatmul.mubr.f32.gmra.mrb[30].mxu0 %v340_v3  ;;  %1397 = vmatprep.mubr.msk.f32.mxu1 %vm472_vm0, %v349_v34 }
  0xc5   : > { %981 = vmatprep.mubr.f32.mxu0 %v348_v48 }
  0xc7   : > { %1398 = vmatmul.mubr.msk.f32.gmra.mrb[52].mxu1 %vm472_vm0, %v356_v49 }
  0xc8   : > { %982 = vmatmul.mubr.f32.gmra.mrb[32].mxu0 %v347_v44 }
  0xc9   : > { %986 = vmatprep.mubr.f32.mxu0 %v355_v41 }
  0xcc   : > { %987 = vmatmul.mubr.f32.gmra.mrb[34].mxu0 %v354_v51 }
 0x11a   : > { %v593_v52 = vpop.f32.mrb[0].mxu1 }
 0x11b   : > { %v595_v53 = vpop.f32.mrb[1].mxu1  ;;  %v594_v13 = vadd.f32 %v2348_v21, %v593_v52 }
 0x11e   : > { %v598_v54 = vpop.f32.mrb[2].mxu1 }
 0x11f   : > { %v600_v55 = vpop.f32.mrb[3].mxu1  ;;  %v599_v26 = vadd.f32 %v2348_v21, %v598_v54 }
 0x122   : > { %v603_v57 = vpop.f32.mrb[4].mxu1 }
 0x123   : > { %v605_v50 = vpop.f32.mrb[5].mxu1  ;;  %v604_v20 = vadd.f32 %v2348_v21, %v603_v57 }
 0x126   : > { %v608_v58 = vpop.f32.mrb[6].mxu1 }
 0x127   : > { %v610_v59 = vpop.f32.mrb[7].mxu1  ;;  %v609_v37 = vadd.f32 %v2348_v21, %v608_v58 }
 0x12a   : > { %v613_v60 = vpop.f32.mrb[8].mxu1 }
 0x12b   : > { %v615_v61 = vpop.f32.mrb[9].mxu1  ;;  %v614_v43 = vadd.f32 %v2348_v21, %v613_v60 }
 0x12e   : > { %v618_v8 = vpop.f32.mrb[10].mxu1 }
 0x12f   : > { %v620_v63 = vpop.f32.mrb[11].mxu1  ;;  %v619_v3 = vadd.f32 %v2348_v21, %v618_v8  ;;  %v2366_v8 = vld [vmem:[%s2459_s3] ss:$0 sm:$0xff] }
 0x132   : > { %v623_v56 = vpop.f32.mrb[12].mxu1 }
 0x133   : > { %v625_v0 = vpop.f32.mrb[13].mxu1  ;;  %v624_v44 = vadd.f32 %v2348_v21, %v623_v56 }
 0x136   : > { %v628_v1 = vpop.f32.mrb[14].mxu1 }
 0x137   : > { %v630_v2 = vpop.f32.mrb[15].mxu1  ;;  %v629_v53 = vadd.f32 %v2348_v21, %v628_v1 }
 0x13a   : > { %v633_v4 = vpop.f32.mrb[16].mxu1 }
 0x13b   : > { %v635_v6 = vpop.f32.mrb[17].mxu1  ;;  %v634_v50 = vadd.f32 %v2348_v21, %v633_v4  ;;  %v2375_v4 = vld [vmem:[%s2460_s4] ss:$0 sm:$0xff] }
 0x13e   : > { %v638_v7 = vpop.f32.mrb[18].mxu1 }
 0x13f   : > { %v640_v62 = vpop.f32.mrb[19].mxu1  ;;  %v639_v2 = vadd.f32 %v2348_v21, %v638_v7 }
 0x142   : > { %v2333_v12 = vpop.f32.mrb[20].mxu1 }
 0x143   : > { %v645_v9 = vpop.f32.mrb[21].mxu1 }
 0x146   : > { %v2335_v10 = vpop.f32.mrb[22].mxu1 }
 0x147   : > { %v650_v11 = vpop.f32.mrb[23].mxu1 }
 0x14a   : > { %v2337_v14 = vpop.f32.mrb[24].mxu1 }
 0x14b   : > { %v655_v15 = vpop.f32.mrb[25].mxu1 }
 0x14e   : > { %v2339_v5 = vpop.f32.mrb[26].mxu1 }
 0x14f   : > { %v660_v16 = vpop.f32.mrb[27].mxu1 }
 0x152   : > { %v2341_v18 = vpop.f32.mrb[28].mxu1 }
 0x153   : > { %v665_v17 = vpop.f32.mrb[29].mxu1 }
 0x156   : > { %v2343_v19 = vpop.f32.mrb[30].mxu1 }
 0x157   : > { %v670_v22 = vpop.f32.mrb[31].mxu1 }
 0x15b   : > { %v903_v23 = vpop.f32.mrb[0].mxu0 }
 0x15c   : > { %v1601_v25 = vadd.f32 %v903_v23, %v594_v13  ;;  %v905_v24 = vpop.f32.mrb[1].mxu0 }
 0x15d   : > { %v644_v24 = vadd.f32 %v2348_v21, %v2333_v12 }
 0x15f   : > { %v908_v28 = vpop.f32.mrb[2].mxu0 }
 0x160   : > { %v1603_v29 = vadd.f32 %v908_v28, %v599_v26  ;;  %v910_v31 = vpop.f32.mrb[3].mxu0 }
 0x162   : > { %v2353_v32 = vpop.f32.mrb[32].mxu1 }
 0x163   : > { %v913_v33 = vpop.f32.mrb[4].mxu0  ;;  %v830_v30 = vpop.f32.mrb[33].mxu1 }
 0x164   : > { %v1605_v35 = vadd.f32 %v913_v33, %v604_v20  ;;  %v915_v27 = vpop.f32.mrb[5].mxu0 }
 0x166   : > { %v2356_v38 = vpop.f32.mrb[34].mxu1 }
 0x167   : > { %v918_v39 = vpop.f32.mrb[6].mxu0  ;;  %v835_v40 = vpop.f32.mrb[35].mxu1 }
 0x168   : > { %v1607_v42 = vadd.f32 %v918_v39, %v609_v37  ;;  %v920_v36 = vpop.f32.mrb[7].mxu0 }
 0x16b   : > { %v923_v45 = vpop.f32.mrb[8].mxu0 }
 0x16c   : > { %v1609_v46 = vadd.f32 %v923_v45, %v614_v43  ;;  %v925_v47 = vpop.f32.mrb[9].mxu0 }
 0x16f   : > { %v928_v34 = vpop.f32.mrb[10].mxu0 }
 0x170   : > { %v1611_v48 = vadd.f32 %v928_v34, %v619_v3  ;;  %v930_v49 = vpop.f32.mrb[11].mxu0 }
 0x173   : > { %v933_v41 = vpop.f32.mrb[12].mxu0 }
 0x174   : > { %v1613_v51 = vadd.f32 %v933_v41, %v624_v44  ;;  %v935_v52 = vpop.f32.mrb[13].mxu0 }
 0x177   : > { %v938_v54 = vpop.f32.mrb[14].mxu0 }
 0x178   : > { %v1615_v55 = vadd.f32 %v938_v54, %v629_v53  ;;  %v940_v57 = vpop.f32.mrb[15].mxu0  ;;  %v654_v53 = vadd.f32 %v2348_v21, %v2337_v14 }
 0x17a   : > { %v1375_v58 = vpop.f32.mrb[36].mxu1 }
 0x17b   : > { %v1064_v59 = vadd.f32 %v1603_v29, %v1375_v58  ;;  %v943_v60 = vpop.f32.mrb[16].mxu0  ;;  %v1058_v61 = vpop.f32.mrb[37].mxu1 }
 0x17c   : > { %v2368_v63 = vadd.f32 %v943_v60, %v634_v50  ;;  %v1059_v56 = vadd.f32 %v1601_v25, %v1058_v61  ;;  %v945_v0 = vpop.f32.mrb[17].mxu0 }
 0x17d   : > { %v1148_v1 = vmax.f32 %v1064_v59, 0.0 }
 0x17e   : > { %v1147_v6 = vmax.f32 %v1059_v56, 0.0  ;;  %v1378_v62 = vpop.f32.mrb[38].mxu1 }
 0x17f   : > { %v1173_v9 = vmul.f32 %v2366_v8, %v1148_v1  ;;  %v1074_v11 = vadd.f32 %v1607_v42, %v1378_v62  ;;  %v948_v15 = vpop.f32.mrb[18].mxu0  ;;  %v1068_v16 = vpop.f32.mrb[39].mxu1  ;;  %v649_v42 = vadd.f32 %v2348_v21, %v2335_v10 }
 0x180   : > { %v1172_v7 = vmul.f32 %v2366_v8, %v1147_v6  ;;  %v1619_v17 = vadd.f32 %v948_v15, %v639_v2  ;;  %v1069_v22 = vadd.f32 %v1605_v35, %v1068_v16  ;;  %v950_v13 = vpop.f32.mrb[19].mxu0  ;;  %v659_v2 = vadd.f32 %v2348_v21, %v2339_v5 }
 0x181   : > { %v1198_v23 = vadd.f32 %v2375_v4, %v1173_v9  ;;  %v1150_v25 = vmax.f32 %v1074_v11, 0.0 }
 0x182   : > { %v1197_v26 = vadd.f32 %v2375_v4, %v1172_v7  ;;  %v1149_v28 = vmax.f32 %v1069_v22, 0.0  ;;  %v1381_v29 = vpop.f32.mrb[40].mxu1 }
 0x183   : > { %1216 = vst [vmem:[%s2381_s26 + $0x8] sm:$0xff] %v1198_v23  ;;  %v1175_v31 = vmul.f32 %v2366_v8, %v1150_v25  ;;  %v1084_v20 = vadd.f32 %v1611_v48, %v1381_v29  ;;  %v953_v33 = vpop.f32.mrb[20].mxu0  ;;  %v1078_v30 = vpop.f32.mrb[41].mxu1  ;;  %v664_v25 = vadd.f32 %v2348_v21, %v2341_v18 }
 0x184   : > { %1215 = vst [vmem:[%s2381_s26] sm:$0xff] %v1197_v26  ;;  %v1174_v35 = vmul.f32 %v2366_v8, %v1149_v28  ;;  %v1621_v27 = vadd.f32 %v953_v33, %v644_v24  ;;  %v1079_v37 = vadd.f32 %v1609_v46, %v1078_v30  ;;  %v955_v39 = vpop.f32.mrb[21].mxu0 }
 0x185   : > { %v1200_v12 = vadd.f32 %v2375_v4, %v1175_v31  ;;  %v1152_v40 = vmax.f32 %v1084_v20, 0.0 }
 0x186   : > { %v1199_v36 = vadd.f32 %v2375_v4, %v1174_v35  ;;  %v1151_v43 = vmax.f32 %v1079_v37, 0.0  ;;  %v1384_v45 = vpop.f32.mrb[42].mxu1 }
 0x187   : > { %1218 = vst [vmem:[%s2381_s26 + $0x18] sm:$0xff] %v1200_v12  ;;  %v1177_v47 = vmul.f32 %v2366_v8, %v1152_v40  ;;  %v1094_v3 = vadd.f32 %v1615_v55, %v1384_v45  ;;  %v958_v34 = vpop.f32.mrb[22].mxu0  ;;  %v1088_v48 = vpop.f32.mrb[43].mxu1  ;;  %v669_v12 = vadd.f32 %v2348_v21, %v2343_v19  ;;  %v1632_v19 = vadd.f32 %v2348_v21, %v2353_v32 }
 0x188   : > { %1217 = vst [vmem:[%s2381_s26 + $0x10] sm:$0xff] %v1199_v36  ;;  %v1176_v46 = vmul.f32 %v2366_v8, %v1151_v43  ;;  %v1623_v49 = vadd.f32 %v958_v34, %v649_v42  ;;  %v1089_v44 = vadd.f32 %v1613_v51, %v1088_v48  ;;  %v960_v41 = vpop.f32.mrb[23].mxu0  ;;  %v1634_v32 = vadd.f32 %v2348_v21, %v2356_v38 }
 0x189   : > { %v1202_v10 = vadd.f32 %v2375_v4, %v1177_v47  ;;  %v1154_v52 = vmax.f32 %v1094_v3, 0.0 }
 0x18a   : > { %v1201_v54 = vadd.f32 %v2375_v4, %v1176_v46  ;;  %v1153_v57 = vmax.f32 %v1089_v44, 0.0  ;;  %v1387_v50 = vpop.f32.mrb[44].mxu1 }
 0x18b   : > { %1220 = vst [vmem:[%s2381_s26 + $0x28] sm:$0xff] %v1202_v10  ;;  %v1179_v55 = vmul.f32 %v2366_v8, %v1154_v52  ;;  %v1104_v58 = vadd.f32 %v1619_v17, %v1387_v50  ;;  %v963_v59 = vpop.f32.mrb[24].mxu0  ;;  %v1098_v60 = vpop.f32.mrb[45].mxu1 }
 0x18c   : > { %1219 = vst [vmem:[%s2381_s26 + $0x20] sm:$0xff] %v1201_v54  ;;  %v1178_v51 = vmul.f32 %v2366_v8, %v1153_v57  ;;  %v1625_v61 = vadd.f32 %v963_v59, %v654_v53  ;;  %v1099_v56 = vadd.f32 %v2368_v63, %v1098_v60  ;;  %v965_v0 = vpop.f32.mrb[25].mxu0 }
 0x18d   : > { %v1204_v14 = vadd.f32 %v2375_v4, %v1179_v55  ;;  %v1156_v1 = vmax.f32 %v1104_v58, 0.0 }
 0x18e   : > { %v1203_v6 = vadd.f32 %v2375_v4, %v1178_v51  ;;  %v1155_v62 = vmax.f32 %v1099_v56, 0.0  ;;  %v1390_v9 = vpop.f32.mrb[46].mxu1 }
 0x18f   : > { %1222 = vst [vmem:[%s2381_s26 + $0x38] sm:$0xff] %v1204_v14  ;;  %v1181_v11 = vmul.f32 %v2366_v8, %v1156_v1  ;;  %v1114_v15 = vadd.f32 %v1623_v49, %v1390_v9  ;;  %v968_v16 = vpop.f32.mrb[26].mxu0  ;;  %v1108_v7 = vpop.f32.mrb[47].mxu1 }
 0x190   : > { %1221 = vst [vmem:[%s2381_s26 + $0x30] sm:$0xff] %v1203_v6  ;;  %v1180_v63 = vmul.f32 %v2366_v8, %v1155_v62  ;;  %v1627_v17 = vadd.f32 %v968_v16, %v659_v2  ;;  %v1109_v22 = vadd.f32 %v1621_v27, %v1108_v7  ;;  %v970_v13 = vpop.f32.mrb[27].mxu0 }
 0x191   : > { %v1206_v5 = vadd.f32 %v2375_v4, %v1181_v11  ;;  %v1158_v23 = vmax.f32 %v1114_v15, 0.0 }
 0x192   : > { %v1205_v24 = vadd.f32 %v2375_v4, %v1180_v63  ;;  %v1157_v26 = vmax.f32 %v1109_v22, 0.0  ;;  %v1393_v28 = vpop.f32.mrb[48].mxu1 }
 0x193   : > { %1224 = vst [vmem:[%s2381_s26 + $0x48] sm:$0xff] %v1206_v5  ;;  %v1183_v29 = vmul.f32 %v2366_v8, %v1158_v23  ;;  %v1124_v31 = vadd.f32 %v1627_v17, %v1393_v28  ;;  %v973_v20 = vpop.f32.mrb[28].mxu0  ;;  %v1118_v33 = vpop.f32.mrb[49].mxu1 }
 0x194   : > { %1223 = vst [vmem:[%s2381_s26 + $0x40] sm:$0xff] %v1205_v24  ;;  %v1182_v30 = vmul.f32 %v2366_v8, %v1157_v26  ;;  %v1629_v35 = vadd.f32 %v973_v20, %v664_v25  ;;  %v1119_v27 = vadd.f32 %v1625_v61, %v1118_v33  ;;  %v975_v37 = vpop.f32.mrb[29].mxu0 }
 0x195   : > { %v1208_v18 = vadd.f32 %v2375_v4, %v1183_v29  ;;  %v1160_v39 = vmax.f32 %v1124_v31, 0.0 }
 0x196   : > { %v1207_v40 = vadd.f32 %v2375_v4, %v1182_v30  ;;  %v1159_v42 = vmax.f32 %v1119_v27, 0.0  ;;  %v1396_v36 = vpop.f32.mrb[50].mxu1 }
 0x197   : > { %1226 = vst [vmem:[%s2381_s26 + $0x58] sm:$0xff] %v1208_v18  ;;  %v1185_v43 = vmul.f32 %v2366_v8, %v1160_v39  ;;  %v978_v45 = vpop.f32.mrb[30].mxu0  ;;  %v1128_v47 = vpop.f32.mrb[51].mxu1 }
 0x198   : > { %1225 = vst [vmem:[%s2381_s26 + $0x50] sm:$0xff] %v1207_v40  ;;  %v1184_v3 = vmul.f32 %v2366_v8, %v1159_v42  ;;  %v1631_v34 = vadd.f32 %v978_v45, %v669_v12  ;;  %v1129_v48 = vadd.f32 %v1629_v35, %v1128_v47  ;;  %v980_v46 = vpop.f32.mrb[31].mxu0 }
 0x199   : > { %v1210_v49 = vadd.f32 %v2375_v4, %v1185_v43 }
 0x19a   : > { %v1209_v44 = vadd.f32 %v2375_v4, %v1184_v3  ;;  %v1134_v41 = vadd.f32 %v1631_v34, %v1396_v36  ;;  %v1161_v10 = vmax.f32 %v1129_v48, 0.0  ;;  %v1399_v52 = vpop.f32.mrb[52].mxu1 }
 0x19b   : > { %1228 = vst [vmem:[%s2381_s26 + $0x68] sm:$0xff] %v1210_v49  ;;  %v983_v53 = vpop.f32.mrb[32].mxu0  ;;  %v1138_v54 = vpop.f32.mrb[53].mxu1 }
 0x19c   : > { %1227 = vst [vmem:[%s2381_s26 + $0x60] sm:$0xff] %v1209_v44  ;;  %v1162_v57 = vmax.f32 %v1134_v41, 0.0  ;;  %v1186_v50 = vmul.f32 %v2366_v8, %v1161_v10  ;;  %v1633_v55 = vadd.f32 %v1632_v19, %v983_v53  ;;  %v985_v58 = vpop.f32.mrb[33].mxu0 }
 0x19e   : > { %v1187_v59 = vmul.f32 %v2366_v8, %v1162_v57  ;;  %v1211_v60 = vadd.f32 %v2375_v4, %v1186_v50  ;;  %v1139_v51 = vadd.f32 %v1633_v55, %v1138_v54 }
 0x19f   : > { %v988_v61 = vpop.f32.mrb[34].mxu0 }
 0x1a0   : > { %v1212_v56 = vadd.f32 %v2375_v4, %v1187_v59  ;;  %1229 = vst [vmem:[%s2381_s26 + $0x70] sm:$0xff] %v1211_v60  ;;  %v1163_v0 = vmax.f32 %v1139_v51, 0.0  ;;  %v1635_v14 = vadd.f32 %v1634_v32, %v988_v61  ;;  %v990_v1 = vpop.f32.mrb[35].mxu0 }
 0x1a2   : > { %1230 = vst [vmem:[%s2381_s26 + $0x78] sm:$0xff] %v1212_v56  ;;  %v1188_v2 = vmul.f32 %v2366_v8, %v1163_v0  ;;  %v1144_v6 = vadd.f32 %v1635_v14, %v1399_v52 }
 0x1a4   : > { %v1213_v62 = vadd.f32 %v2375_v4, %v1188_v2  ;;  %v1164_v21 = vmax.f32 %v1144_v6, 0.0 }
 0x1a6   : > { %1231 = vst [vmem:[%s2381_s26 + $0x80] sm:$0xff] %v1213_v62  ;;  %v1189_v38 = vmul.f32 %v2366_v8, %v1164_v21 }
 0x1a8   : > { %v1214_v9 = vadd.f32 %v2375_v4, %v1189_v38 }
 0x1aa   : > { %1232 = vst [vmem:[%s2381_s26 + $0x88] sm:$0xff] %v1214_v9 }
 0x1ab PF: > { %s15_s18 = sadd.s32 1, %s1688_s18  }
 0x1ac   : > { %p12_p4 = scmp.ge.s32.totalorder %s15_s18, 4  }
 0x1ae   :  { %14 = sbr.rel (!%p12_p4) target bundleno = 1 (0x1), region = 70 }

// kernel: ref_cnn_forward.7
= control target key start
LH: loop header
LB: loop body
LE: loop exit
PB: predicated region body
PF: predicated region fallthrough
CT: control target
= control target key end

     0   :  { %vm2872_vm0 = vcmask 523264   ;;  %s7087_s4 = inlined_call_operand.vmem [shape: f32[1152,192], index: 4, kind: input, shape index: {}]   ;;  %s7088_s0 = inlined_call_operand.vmem [shape: f32[56,1152], index: 0, kind: input, shape index: {}]   ;;  %s7089_s1 = inlined_call_operand.vmem [shape: f32[56,1152], index: 1, kind: input, shape index: {}]   ;;  %s7090_s2 = inlined_call_operand.vmem [shape: f32[56,1152], index: 2, kind: input, shape index: {}]   ;;  %s7091_s3 = inlined_call_operand.vmem [shape: f32[56,1152], index: 3, kind: input, shape index: {}]   ;;  %s7092_s5 = inlined_call_operand.vmem [shape: f32[1,192], index: 5, kind: input, shape index: {}]   ;;  %s7093_s6 = inlined_call_operand.vmem [shape: f32[1,192], index: 6, kind: input, shape index: {}]   ;;  %s7094_s7 = inlined_call_operand.vmem [shape: f32[1,192], index: 7, kind: input, shape index: {}]   ;;  %s7095_s8 = inlined_call_operand.vmem [shape: f32[56,192], index: 8, kind: output, shape index: {}]  }
   0x1   :  { %v30_v0 = vld [vmem:[%s7087_s4 + $0x8] sm:$0xff]  ;;  %v32_v1 = vld [vmem:[%s7087_s4 + $0x18] sm:$0xff]  ;;  %v29_v2 = vld [vmem:[%s7087_s4] sm:$0xff] }
   0x2   :  { %v4378_v3 = vpack.c.bf16 %v32_v1, %v30_v0  ;;  %v31_v4 = vld [vmem:[%s7087_s4 + $0x10] sm:$0xff]  ;;  %v34_v5 = vld [vmem:[%s7087_s4 + $0x28] sm:$0xff]  ;;  %v36_v6 = vld [vmem:[%s7087_s4 + $0x38] sm:$0xff] }
   0x3   :  { %v4389_v7 = vpack.c.bf16 %v31_v4, %v29_v2  ;;  %v4391_v8 = vpack.c.bf16 %v36_v6, %v34_v5  ;;  %v33_v9 = vld [vmem:[%s7087_s4 + $0x20] sm:$0xff]  ;;  %v35_v10 = vld [vmem:[%s7087_s4 + $0x30] sm:$0xff]  ;;  %v38_v11 = vld [vmem:[%s7087_s4 + $0x48] sm:$0xff] }
   0x4   :  { %2891 = vmatprep.subr.bf16.mxu0 %v4378_v3  ;;  %3179 = vmatprep.subr.bf16.mxu1 %v4378_v3  ;;  %v40_v12 = vld [vmem:[%s7087_s4 + $0x58] sm:$0xff]  ;;  %v4409_v13 = vpack.c.bf16 %v35_v10, %v33_v9  ;;  %v37_v15 = vld [vmem:[%s7087_s4 + $0x40] sm:$0xff]  ;;  %v39_v16 = vld [vmem:[%s7087_s4 + $0x50] sm:$0xff] }
   0x5   :  { %2893 = vmatpush1.bf16.msra.mxu0 %v4389_v7  ;;  %3181 = vmatpush1.bf16.msra.mxu1 %v4389_v7  ;;  %v4413_v14 = vpack.c.bf16 %v40_v12, %v38_v11  ;;  %v42_v17 = vld [vmem:[%s7087_s4 + $0x68] sm:$0xff]  ;;  %v44_v18 = vld [vmem:[%s7087_s4 + $0x78] sm:$0xff]  ;;  %v4429_v19 = vpack.c.bf16 %v39_v16, %v37_v15  ;;  %v41_v21 = vld [vmem:[%s7087_s4 + $0x60] sm:$0xff] }
   0x6   :  { %2895 = vmatprep.subr.bf16.mxu0 %v4391_v8  ;;  %3183 = vmatprep.subr.bf16.mxu1 %v4391_v8  ;;  %v4433_v20 = vpack.c.bf16 %v44_v18, %v42_v17  ;;  %v43_v22 = vld [vmem:[%s7087_s4 + $0x70] sm:$0xff]  ;;  %v46_v23 = vld [vmem:[%s7087_s4 + $0x88] sm:$0xff]  ;;  %v48_v24 = vld [vmem:[%s7087_s4 + $0x98] sm:$0xff] }
   0x7   :  { %v4449_v25 = vpack.c.bf16 %v43_v22, %v41_v21  ;;  %v4453_v26 = vpack.c.bf16 %v48_v24, %v46_v23  ;;  %v45_v27 = vld [vmem:[%s7087_s4 + $0x80] sm:$0xff]  ;;  %v47_v28 = vld [vmem:[%s7087_s4 + $0x90] sm:$0xff]  ;;  %v50_v29 = vld [vmem:[%s7087_s4 + $0xa8] sm:$0xff] }
   0x8   :  { %v52_v30 = vld [vmem:[%s7087_s4 + $0xb8] sm:$0xff]  ;;  %v4469_v31 = vpack.c.bf16 %v47_v28, %v45_v27  ;;  %v49_v33 = vld [vmem:[%s7087_s4 + $0xa0] sm:$0xff]  ;;  %v51_v34 = vld [vmem:[%s7087_s4 + $0xb0] sm:$0xff] }
   0x9   :  { %2897 = vmatpush1.bf16.msra.mxu0 %v4409_v13  ;;  %3185 = vmatpush1.bf16.msra.mxu1 %v4409_v13  ;;  %v4473_v32 = vpack.c.bf16 %v52_v30, %v50_v29  ;;  %v54_v35 = vld [vmem:[%s7087_s4 + $0xc8] sm:$0xff]  ;;  %v56_v36 = vld [vmem:[%s7087_s4 + $0xd8] sm:$0xff]  ;;  %v4489_v37 = vpack.c.bf16 %v51_v34, %v49_v33  ;;  %v53_v39 = vld [vmem:[%s7087_s4 + $0xc0] sm:$0xff] }
   0xa   :  { %2899 = vmatprep.subr.bf16.mxu0 %v4413_v14  ;;  %3187 = vmatprep.subr.bf16.mxu1 %v4413_v14  ;;  %v4493_v38 = vpack.c.bf16 %v56_v36, %v54_v35  ;;  %v55_v40 = vld [vmem:[%s7087_s4 + $0xd0] sm:$0xff]  ;;  %v319_v41 = vld [vmem:[%s7088_s0 + $0x8] sm:$0xff]  ;;  %v60_v43 = vld [vmem:[%s7087_s4 + $0xf8] sm:$0xff] }
   0xb   :  { %v58_v42 = vld [vmem:[%s7087_s4 + $0xe8] sm:$0xff]  ;;  %456 = vmatprep.mubr.f32.mxu0 %v319_v41  ;;  %v4515_v45 = vpack.c.bf16 %v55_v40, %v53_v39  ;;  %v57_v47 = vld [vmem:[%s7087_s4 + $0xe0] sm:$0xff]  ;;  %v59_v48 = vld [vmem:[%s7087_s4 + $0xf0] sm:$0xff] }
   0xc   :  { %v942_v44 = vld [vmem:[%s7089_s1 + $0x8] sm:$0xff]  ;;  %v4519_v46 = vpack.c.bf16 %v60_v43, %v58_v42  ;;  %v64_v50 = vld [vmem:[%s7087_s4 + $0x118] sm:$0xff]  ;;  %v4535_v51 = vpack.c.bf16 %v59_v48, %v57_v47  ;;  %v61_v53 = vld [vmem:[%s7087_s4 + $0x100] sm:$0xff] }
   0xd   :  { %2901 = vmatpush1.bf16.msra.mxu0 %v4429_v19  ;;  %3189 = vmatpush1.bf16.msra.mxu1 %v4429_v19  ;;  %v62_v49 = vld [vmem:[%s7087_s4 + $0x108] sm:$0xff]  ;;  %v63_v54 = vld [vmem:[%s7087_s4 + $0x110] sm:$0xff]  ;;  %v68_v56 = vld [vmem:[%s7087_s4 + $0x138] sm:$0xff] }
   0xe   :  { %2903 = vmatprep.subr.bf16.mxu0 %v4433_v20  ;;  %3191 = vmatprep.subr.bf16.mxu1 %v4433_v20  ;;  %v4539_v52 = vpack.c.bf16 %v64_v50, %v62_v49  ;;  %v66_v55 = vld [vmem:[%s7087_s4 + $0x128] sm:$0xff]  ;;  %v4555_v57 = vpack.c.bf16 %v63_v54, %v61_v53  ;;  %v65_v59 = vld [vmem:[%s7087_s4 + $0x120] sm:$0xff]  ;;  %v67_v60 = vld [vmem:[%s7087_s4 + $0x130] sm:$0xff] }
   0xf   :  { %1068 = vmatprep.mubr.f32.mxu1 %v942_v44  ;;  %v4559_v58 = vpack.c.bf16 %v68_v56, %v66_v55  ;;  %v70_v61 = vld [vmem:[%s7087_s4 + $0x148] sm:$0xff]  ;;  %v72_v62 = vld [vmem:[%s7087_s4 + $0x158] sm:$0xff]  ;;  %v4575_v63 = vpack.c.bf16 %v67_v60, %v65_v59  ;;  %v69_v1 = vld [vmem:[%s7087_s4 + $0x140] sm:$0xff] }
  0x10   :  { %v4579_v0 = vpack.c.bf16 %v72_v62, %v70_v61  ;;  %v71_v2 = vld [vmem:[%s7087_s4 + $0x150] sm:$0xff]  ;;  %v74_v4 = vld [vmem:[%s7087_s4 + $0x168] sm:$0xff]  ;;  %v76_v5 = vld [vmem:[%s7087_s4 + $0x178] sm:$0xff] }
  0x11   :  { %2905 = vmatpush1.bf16.msra.mxu0 %v4449_v25  ;;  %3193 = vmatpush1.bf16.msra.mxu1 %v4449_v25  ;;  %v4595_v6 = vpack.c.bf16 %v71_v2, %v69_v1  ;;  %v4599_v9 = vpack.c.bf16 %v76_v5, %v74_v4  ;;  %v73_v10 = vld [vmem:[%s7087_s4 + $0x160] sm:$0xff]  ;;  %v75_v11 = vld [vmem:[%s7087_s4 + $0x170] sm:$0xff]  ;;  %v78_v12 = vld [vmem:[%s7087_s4 + $0x188] sm:$0xff] }
  0x12   :  { %2907 = vmatprep.subr.bf16.mxu0 %v4453_v26  ;;  %3195 = vmatprep.subr.bf16.mxu1 %v4453_v26  ;;  %v80_v15 = vld [vmem:[%s7087_s4 + $0x198] sm:$0xff]  ;;  %v4615_v16 = vpack.c.bf16 %v75_v11, %v73_v10  ;;  %v77_v18 = vld [vmem:[%s7087_s4 + $0x180] sm:$0xff]  ;;  %v79_v21 = vld [vmem:[%s7087_s4 + $0x190] sm:$0xff] }
  0x13   :  { %v4619_v17 = vpack.c.bf16 %v80_v15, %v78_v12  ;;  %v82_v22 = vld [vmem:[%s7087_s4 + $0x1a8] sm:$0xff]  ;;  %v84_v23 = vld [vmem:[%s7087_s4 + $0x1b8] sm:$0xff]  ;;  %v4635_v24 = vpack.c.bf16 %v79_v21, %v77_v18  ;;  %v81_v28 = vld [vmem:[%s7087_s4 + $0x1a0] sm:$0xff] }
  0x14   :  { %v4639_v27 = vpack.c.bf16 %v84_v23, %v82_v22  ;;  %v83_v29 = vld [vmem:[%s7087_s4 + $0x1b0] sm:$0xff]  ;;  %v86_v30 = vld [vmem:[%s7087_s4 + $0x1c8] sm:$0xff]  ;;  %v88_v33 = vld [vmem:[%s7087_s4 + $0x1d8] sm:$0xff] }
  0x15   :  { %2909 = vmatpush1.bf16.msra.mxu0 %v4469_v31  ;;  %3197 = vmatpush1.bf16.msra.mxu1 %v4469_v31  ;;  %v4655_v34 = vpack.c.bf16 %v83_v29, %v81_v28  ;;  %v4659_v35 = vpack.c.bf16 %v88_v33, %v86_v30  ;;  %v85_v36 = vld [vmem:[%s7087_s4 + $0x1c0] sm:$0xff]  ;;  %v87_v39 = vld [vmem:[%s7087_s4 + $0x1d0] sm:$0xff]  ;;  %v90_v40 = vld [vmem:[%s7087_s4 + $0x1e8] sm:$0xff] }
  0x16   :  { %2911 = vmatprep.subr.bf16.mxu0 %v4473_v32  ;;  %3199 = vmatprep.subr.bf16.mxu1 %v4473_v32  ;;  %v92_v41 = vld [vmem:[%s7087_s4 + $0x1f8] sm:$0xff]  ;;  %v4675_v42 = vpack.c.bf16 %v87_v39, %v85_v36  ;;  %v89_v44 = vld [vmem:[%s7087_s4 + $0x1e0] sm:$0xff]  ;;  %v91_v47 = vld [vmem:[%s7087_s4 + $0x1f0] sm:$0xff] }
  0x17   :  { %v4679_v43 = vpack.c.bf16 %v92_v41, %v90_v40  ;;  %v94_v48 = vld [vmem:[%s7087_s4 + $0x208] sm:$0xff]  ;;  %v96_v49 = vld [vmem:[%s7087_s4 + $0x218] sm:$0xff]  ;;  %v4695_v50 = vpack.c.bf16 %v91_v47, %v89_v44  ;;  %v93_v54 = vld [vmem:[%s7087_s4 + $0x200] sm:$0xff] }
  0x18   :  { %v4699_v53 = vpack.c.bf16 %v96_v49, %v94_v48  ;;  %v95_v55 = vld [vmem:[%s7087_s4 + $0x210] sm:$0xff]  ;;  %v98_v56 = vld [vmem:[%s7087_s4 + $0x228] sm:$0xff]  ;;  %v100_v59 = vld [vmem:[%s7087_s4 + $0x238] sm:$0xff] }
  0x19   :  { %2913 = vmatpush1.bf16.msra.mxu0 %v4489_v37  ;;  %3201 = vmatpush1.bf16.msra.mxu1 %v4489_v37  ;;  %v318_v60 = vld [vmem:[%s7088_s0] sm:$0xff]  ;;  %v4718_v61 = vpack.c.bf16 %v95_v55, %v93_v54  ;;  %v4725_v1 = vpack.c.bf16 %v100_v59, %v98_v56  ;;  %v99_v4 = vld [vmem:[%s7087_s4 + $0x230] sm:$0xff]  ;;  %v102_v5 = vld [vmem:[%s7087_s4 + $0x248] sm:$0xff] }
  0x1a   :  { %2915 = vmatprep.subr.bf16.mxu0 %v4493_v38  ;;  %3203 = vmatprep.subr.bf16.mxu1 %v4493_v38  ;;  %v941_v62 = vld [vmem:[%s7089_s1] sm:$0xff]  ;;  %v104_v10 = vld [vmem:[%s7087_s4 + $0x258] sm:$0xff]  ;;  %v328_v11 = vld [vmem:[%s7088_s0 + $0x50] sm:$0xff] }
  0x1b   :  { %v97_v2 = vld [vmem:[%s7087_s4 + $0x220] sm:$0xff]  ;;  %v951_v12 = vld [vmem:[%s7089_s1 + $0x50] sm:$0xff]  ;;  %v327_v18 = vld [vmem:[%s7088_s0 + $0x48] sm:$0xff]  ;;  %v4757_v22 = vpack.c.bf16 %v104_v10, %v102_v5 }
  0x1c   :  { %v4747_v15 = vpack.c.bf16 %v99_v4, %v97_v2  ;;  %v950_v21 = vld [vmem:[%s7089_s1 + $0x48] sm:$0xff]  ;;  %v101_v23 = vld [vmem:[%s7087_s4 + $0x240] sm:$0xff]  ;;  %v103_v28 = vld [vmem:[%s7087_s4 + $0x250] sm:$0xff] }
  0x1d   :  { %2917 = vmatpush1.bf16.msra.mxu0 %v4515_v45  ;;  %3205 = vmatpush1.bf16.msra.mxu1 %v4515_v45  ;;  %v106_v29 = vld [vmem:[%s7087_s4 + $0x268] sm:$0xff]  ;;  %v108_v30 = vld [vmem:[%s7087_s4 + $0x278] sm:$0xff]  ;;  %v4779_v39 = vpack.c.bf16 %v103_v28, %v101_v23  ;;  %v336_v40 = vld [vmem:[%s7088_s0 + $0x90] sm:$0xff] }
  0x1e   :  { %2919 = vmatprep.subr.bf16.mxu0 %v4519_v46  ;;  %3207 = vmatprep.subr.bf16.mxu1 %v4519_v46  ;;  %v337_v33 = vld [vmem:[%s7088_s0 + $0x98] sm:$0xff]  ;;  %v959_v41 = vld [vmem:[%s7089_s1 + $0x90] sm:$0xff]  ;;  %v4789_v44 = vpack.c.bf16 %v108_v30, %v106_v29  ;;  %v105_v47 = vld [vmem:[%s7087_s4 + $0x260] sm:$0xff] }
  0x1f   :  { %v960_v36 = vld [vmem:[%s7089_s1 + $0x98] sm:$0xff]  ;;  %v107_v48 = vld [vmem:[%s7087_s4 + $0x270] sm:$0xff]  ;;  %v110_v49 = vld [vmem:[%s7087_s4 + $0x288] sm:$0xff] }
  0x20   :  { %v112_v54 = vld [vmem:[%s7087_s4 + $0x298] sm:$0xff]  ;;  %v346_v55 = vld [vmem:[%s7088_s0 + $0xe0] sm:$0xff]  ;;  %v4811_v59 = vpack.c.bf16 %v107_v48, %v105_v47  ;;  %v111_v5 = vld [vmem:[%s7087_s4 + $0x290] sm:$0xff] }
  0x21   :  { %2921 = vmatpush1.bf16.msra.mxu0 %v4535_v51  ;;  %3209 = vmatpush1.bf16.msra.mxu1 %v4535_v51  ;;  %v969_v56 = vld [vmem:[%s7089_s1 + $0xe0] sm:$0xff]  ;;  %v4821_v2 = vpack.c.bf16 %v112_v54, %v110_v49  ;;  %v114_v10 = vld [vmem:[%s7087_s4 + $0x2a8] sm:$0xff]  ;;  %v987_v47 = vld [vmem:[%s7089_s1 + $0x170] sm:$0xff] }
  0x22   :  { %2923 = vmatprep.subr.bf16.mxu0 %v4539_v52  ;;  %3211 = vmatprep.subr.bf16.mxu1 %v4539_v52  ;;  %v109_v4 = vld [vmem:[%s7087_s4 + $0x280] sm:$0xff]  ;;  %v363_v49 = vld [vmem:[%s7088_s0 + $0x168] sm:$0xff] }
  0x23   :  { %v354_v23 = vld [vmem:[%s7088_s0 + $0x120] sm:$0xff]  ;;  %v986_v54 = vld [vmem:[%s7089_s1 + $0x168] sm:$0xff] }
  0x24   :  { %v977_v28 = vld [vmem:[%s7089_s1 + $0x120] sm:$0xff] }
  0x25   :  { %2925 = vmatpush1.bf16.msra.mxu0 %v4555_v57  ;;  %3213 = vmatpush1.bf16.msra.mxu1 %v4555_v57  ;;  %v113_v30 = vld [vmem:[%s7087_s4 + $0x2a0] sm:$0xff] }
  0x26   :  { %2927 = vmatprep.subr.bf16.mxu0 %v4559_v58  ;;  %3215 = vmatprep.subr.bf16.mxu1 %v4559_v58 }
  0x29   :  { %2929 = vmatpush1.bf16.msra.mxu0 %v4575_v63  ;;  %3217 = vmatpush1.bf16.msra.mxu1 %v4575_v63 }
  0x2a   :  { %2931 = vmatprep.subr.bf16.mxu0 %v4579_v0  ;;  %3219 = vmatprep.subr.bf16.mxu1 %v4579_v0 }
  0x2d   :  { %2933 = vmatpush1.bf16.msra.mxu0 %v4595_v6  ;;  %3221 = vmatpush1.bf16.msra.mxu1 %v4595_v6 }
  0x2e   :  { %2935 = vmatprep.subr.bf16.mxu0 %v4599_v9  ;;  %3223 = vmatprep.subr.bf16.mxu1 %v4599_v9 }
  0x31   :  { %2937 = vmatpush1.bf16.msra.mxu0 %v4615_v16  ;;  %3225 = vmatpush1.bf16.msra.mxu1 %v4615_v16 }
  0x32   :  { %2939 = vmatprep.subr.bf16.mxu0 %v4619_v17  ;;  %3227 = vmatprep.subr.bf16.mxu1 %v4619_v17 }
  0x35   :  { %2941 = vmatpush1.bf16.msra.mxu0 %v4635_v24  ;;  %3229 = vmatpush1.bf16.msra.mxu1 %v4635_v24 }
  0x36   :  { %2943 = vmatprep.subr.bf16.mxu0 %v4639_v27  ;;  %3231 = vmatprep.subr.bf16.mxu1 %v4639_v27 }
  0x39   :  { %2945 = vmatpush1.bf16.msra.mxu0 %v4655_v34  ;;  %3233 = vmatpush1.bf16.msra.mxu1 %v4655_v34 }
  0x3a   :  { %2947 = vmatprep.subr.bf16.mxu0 %v4659_v35  ;;  %3235 = vmatprep.subr.bf16.mxu1 %v4659_v35 }
  0x3d   :  { %2949 = vmatpush1.bf16.msra.mxu0 %v4675_v42  ;;  %3237 = vmatpush1.bf16.msra.mxu1 %v4675_v42 }
  0x3e   :  { %2951 = vmatprep.subr.bf16.mxu0 %v4679_v43  ;;  %3239 = vmatprep.subr.bf16.mxu1 %v4679_v43 }
  0x41   :  { %2953 = vmatpush1.bf16.msra.mxu0 %v4695_v50  ;;  %3241 = vmatpush1.bf16.msra.mxu1 %v4695_v50 }
  0x42   :  { %2955 = vmatprep.subr.bf16.mxu0 %v4699_v53  ;;  %3243 = vmatprep.subr.bf16.mxu1 %v4699_v53 }
  0x44   :  { %457 = vmatmul.mubr.f32.vlgmr.msra.gmra.mrb[0].mxu0 %v318_v60  ;;  %1069 = vmatmul.mubr.f32.vlgmr.msra.gmra.mrb[0].mxu1 %v941_v62  ;;  %v345_v60 = vld [vmem:[%s7088_s0 + $0xd8] sm:$0xff] }
  0x45   :  { %2957 = vmatpush1.bf16.msra.mxu0 %v4718_v61  ;;  %3245 = vmatpush1.bf16.msra.mxu1 %v4718_v61  ;;  %v968_v62 = vld [vmem:[%s7089_s1 + $0xd8] sm:$0xff] }
  0x46   :  { %2959 = vmatprep.subr.bf16.mxu0 %v4725_v1  ;;  %3247 = vmatprep.subr.bf16.mxu1 %v4725_v1 }
  0x47   :  { %462 = vmatprep.mubr.f32.mxu0 %v328_v11  ;;  %1074 = vmatprep.mubr.f32.mxu1 %v951_v12  ;;  %v116_v11 = vld [vmem:[%s7087_s4 + $0x2b8] sm:$0xff]  ;;  %v355_v12 = vld [vmem:[%s7088_s0 + $0x128] sm:$0xff] }
  0x48   :  { %463 = vmatmul.mubr.f32.gmra.mrb[2].mxu0 %v327_v18  ;;  %1075 = vmatmul.mubr.f32.gmra.mrb[2].mxu1 %v950_v21  ;;  %v978_v18 = vld [vmem:[%s7089_s1 + $0x128] sm:$0xff]  ;;  %v4843_v21 = vpack.c.bf16 %v111_v5, %v109_v4  ;;  %v4853_v29 = vpack.c.bf16 %v116_v11, %v114_v10  ;;  %v124_v4 = vld [vmem:[%s7087_s4 + $0x2f8] sm:$0xff] }
  0x49   :  { %2961 = vmatpush1.bf16.msra.mxu0 %v4747_v15  ;;  %3249 = vmatpush1.bf16.msra.mxu1 %v4747_v15  ;;  %v373_v5 = vld [vmem:[%s7088_s0 + $0x1b8] sm:$0xff] }
  0x4a   :  { %2963 = vmatprep.subr.bf16.mxu0 %v4757_v22  ;;  %3251 = vmatprep.subr.bf16.mxu1 %v4757_v22  ;;  %v996_v10 = vld [vmem:[%s7089_s1 + $0x1b8] sm:$0xff] }
  0x4b   :  { %468 = vmatprep.mubr.f32.mxu0 %v337_v33  ;;  %1080 = vmatprep.mubr.f32.mxu1 %v960_v36  ;;  %v115_v33 = vld [vmem:[%s7087_s4 + $0x2b0] sm:$0xff]  ;;  %v118_v36 = vld [vmem:[%s7087_s4 + $0x2c8] sm:$0xff] }
  0x4c   :  { %469 = vmatmul.mubr.f32.gmra.mrb[4].mxu0 %v336_v40  ;;  %1081 = vmatmul.mubr.f32.gmra.mrb[4].mxu1 %v959_v41  ;;  %v120_v40 = vld [vmem:[%s7087_s4 + $0x2d8] sm:$0xff]  ;;  %v364_v41 = vld [vmem:[%s7088_s0 + $0x170] sm:$0xff]  ;;  %v4875_v48 = vpack.c.bf16 %v115_v33, %v113_v30  ;;  %v126_v33 = vld [vmem:[%s7087_s4 + $0x308] sm:$0xff] }
  0x4d   :  { %2965 = vmatpush1.bf16.msra.mxu0 %v4779_v39  ;;  %3253 = vmatpush1.bf16.msra.mxu1 %v4779_v39  ;;  %v123_v30 = vld [vmem:[%s7087_s4 + $0x2f0] sm:$0xff] }
  0x4e   :  { %2967 = vmatprep.subr.bf16.mxu0 %v4789_v44  ;;  %3255 = vmatprep.subr.bf16.mxu1 %v4789_v44 }
  0x4f   :  { %474 = vmatprep.mubr.f32.mxu0 %v346_v55  ;;  %1086 = vmatprep.mubr.f32.mxu1 %v969_v56  ;;  %v4885_v55 = vpack.c.bf16 %v120_v40, %v118_v36  ;;  %v117_v56 = vld [vmem:[%s7087_s4 + $0x2c0] sm:$0xff]  ;;  %v128_v36 = vld [vmem:[%s7087_s4 + $0x318] sm:$0xff] }
  0x50   :  { %475 = vmatmul.mubr.f32.gmra.mrb[6].mxu0 %v345_v60  ;;  %1087 = vmatmul.mubr.f32.gmra.mrb[6].mxu1 %v968_v62  ;;  %v119_v60 = vld [vmem:[%s7087_s4 + $0x2d0] sm:$0xff]  ;;  %v122_v62 = vld [vmem:[%s7087_s4 + $0x2e8] sm:$0xff]  ;;  %v321_v40 = vld [vmem:[%s7088_s0 + $0x18] sm:$0xff] }
  0x51   :  { %2969 = vmatpush1.bf16.msra.mxu0 %v4811_v59  ;;  %3257 = vmatpush1.bf16.msra.mxu1 %v4811_v59  ;;  %v4907_v11 = vpack.c.bf16 %v119_v60, %v117_v56  ;;  %v127_v56 = vld [vmem:[%s7087_s4 + $0x310] sm:$0xff]  ;;  %v130_v60 = vld [vmem:[%s7087_s4 + $0x328] sm:$0xff] }
  0x52   :  { %2971 = vmatprep.subr.bf16.mxu0 %v4821_v2  ;;  %3259 = vmatprep.subr.bf16.mxu1 %v4821_v2 }
  0x53   :  { %480 = vmatprep.mubr.f32.mxu0 %v355_v12  ;;  %1092 = vmatprep.mubr.f32.mxu1 %v978_v18  ;;  %v372_v12 = vld [vmem:[%s7088_s0 + $0x1b0] sm:$0xff] }
  0x54   :  { %481 = vmatmul.mubr.f32.gmra.mrb[8].mxu0 %v354_v23  ;;  %1093 = vmatmul.mubr.f32.gmra.mrb[8].mxu1 %v977_v28  ;;  %v995_v18 = vld [vmem:[%s7089_s1 + $0x1b0] sm:$0xff]  ;;  %v4917_v23 = vpack.c.bf16 %v124_v4, %v122_v62  ;;  %v121_v28 = vld [vmem:[%s7087_s4 + $0x2e0] sm:$0xff]  ;;  %v132_v62 = vld [vmem:[%s7087_s4 + $0x338] sm:$0xff] }
  0x55   :  { %2973 = vmatpush1.bf16.msra.mxu0 %v4843_v21  ;;  %3261 = vmatpush1.bf16.msra.mxu1 %v4843_v21 }
  0x56   :  { %2975 = vmatprep.subr.bf16.mxu0 %v4853_v29  ;;  %3263 = vmatprep.subr.bf16.mxu1 %v4853_v29 }
  0x57   :  { %486 = vmatprep.mubr.f32.mxu0 %v364_v41  ;;  %1098 = vmatprep.mubr.f32.mxu1 %v987_v47  ;;  %v944_v41 = vld [vmem:[%s7089_s1 + $0x18] sm:$0xff]  ;;  %v4939_v47 = vpack.c.bf16 %v123_v30, %v121_v28 }
  0x58   :  { %487 = vmatmul.mubr.f32.gmra.mrb[10].mxu0 %v363_v49  ;;  %1099 = vmatmul.mubr.f32.gmra.mrb[10].mxu1 %v986_v54  ;;  %v4943_v49 = vpack.c.bf16 %v128_v36, %v126_v33  ;;  %v125_v54 = vld [vmem:[%s7087_s4 + $0x300] sm:$0xff]  ;;  %v136_v28 = vld [vmem:[%s7087_s4 + $0x358] sm:$0xff] }
  0x59   :  { %2977 = vmatpush1.bf16.msra.mxu0 %v4875_v48  ;;  %3265 = vmatpush1.bf16.msra.mxu1 %v4875_v48  ;;  %v4959_v4 = vpack.c.bf16 %v127_v56, %v125_v54  ;;  %v133_v36 = vld [vmem:[%s7087_s4 + $0x340] sm:$0xff]  ;;  %v140_v54 = vld [vmem:[%s7087_s4 + $0x378] sm:$0xff] }
  0x5a   :  { %2979 = vmatprep.subr.bf16.mxu0 %v4885_v55  ;;  %3267 = vmatprep.subr.bf16.mxu1 %v4885_v55 }
  0x5b   :  { %492 = vmatprep.mubr.f32.mxu0 %v373_v5  ;;  %1104 = vmatprep.mubr.f32.mxu1 %v996_v10  ;;  %v4963_v5 = vpack.c.bf16 %v132_v62, %v130_v60  ;;  %v129_v10 = vld [vmem:[%s7087_s4 + $0x320] sm:$0xff] }
  0x5c   :  { %493 = vmatmul.mubr.f32.gmra.mrb[12].mxu0 %v372_v12  ;;  %1105 = vmatmul.mubr.f32.gmra.mrb[12].mxu1 %v995_v18  ;;  %v131_v12 = vld [vmem:[%s7087_s4 + $0x330] sm:$0xff]  ;;  %v134_v18 = vld [vmem:[%s7087_s4 + $0x348] sm:$0xff]  ;;  %v137_v62 = vld [vmem:[%s7087_s4 + $0x360] sm:$0xff] }
  0x5d   :  { %2981 = vmatpush1.bf16.msra.mxu0 %v4907_v11  ;;  %3269 = vmatpush1.bf16.msra.mxu1 %v4907_v11  ;;  %v4979_v30 = vpack.c.bf16 %v131_v12, %v129_v10  ;;  %v4983_v33 = vpack.c.bf16 %v136_v28, %v134_v18  ;;  %v139_v10 = vld [vmem:[%s7087_s4 + $0x370] sm:$0xff]  ;;  %v142_v12 = vld [vmem:[%s7087_s4 + $0x388] sm:$0xff]  ;;  %v144_v18 = vld [vmem:[%s7087_s4 + $0x398] sm:$0xff] }
  0x5e   :  { %2983 = vmatprep.subr.bf16.mxu0 %v4917_v23  ;;  %3271 = vmatprep.subr.bf16.mxu1 %v4917_v23  ;;  %v5019_v28 = vpack.c.bf16 %v139_v10, %v137_v62  ;;  %v148_v62 = vld [vmem:[%s7087_s4 + $0x3b8] sm:$0xff] }
  0x5f   :  { %563 = vmatprep.mubr.f32.mxu0 %v321_v40  ;;  %1175 = vmatprep.mubr.f32.mxu1 %v944_v41  ;;  %7272 = vst [vmem:[#allocation2_spill] sm:$0xff] %v4979_v30  ;;  %7273 = vst [vmem:[#allocation3_spill] sm:$0xff] %v4983_v33  ;;  %v135_v40 = vld [vmem:[%s7087_s4 + $0x350] sm:$0xff]  ;;  %v138_v41 = vld [vmem:[%s7087_s4 + $0x368] sm:$0xff] }
  0x60   :  { %v4999_v56 = vpack.c.bf16 %v135_v40, %v133_v36  ;;  %v5003_v60 = vpack.c.bf16 %v140_v54, %v138_v41  ;;  %7276 = vst [vmem:[#allocation6_spill] sm:$0xff] %v5019_v28  ;;  %v5023_v36 = vpack.c.bf16 %v144_v18, %v142_v12  ;;  %v141_v40 = vld [vmem:[%s7087_s4 + $0x380] sm:$0xff]  ;;  %v143_v41 = vld [vmem:[%s7087_s4 + $0x390] sm:$0xff]  ;;  %v146_v54 = vld [vmem:[%s7087_s4 + $0x3a8] sm:$0xff] }
  0x61   :  { %2985 = vmatpush1.bf16.msra.mxu0 %v4939_v47  ;;  %3273 = vmatpush1.bf16.msra.mxu1 %v4939_v47  ;;  %v5039_v10 = vpack.c.bf16 %v143_v41, %v141_v40  ;;  %v5043_v12 = vpack.c.bf16 %v148_v62, %v146_v54  ;;  %v145_v18 = vld [vmem:[%s7087_s4 + $0x3a0] sm:$0xff]  ;;  %v152_v40 = vld [vmem:[%s7087_s4 + $0x3d8] sm:$0xff] }
  0x62   :  { %2987 = vmatprep.subr.bf16.mxu0 %v4943_v49  ;;  %3275 = vmatprep.subr.bf16.mxu1 %v4943_v49  ;;  %7274 = vst [vmem:[#allocation4_spill] sm:$0xff] %v4999_v56  ;;  %7275 = vst [vmem:[#allocation5_spill] sm:$0xff] %v5003_v60  ;;  %v149_v62 = vld [vmem:[%s7087_s4 + $0x3c0] sm:$0xff] }
  0x63   :  { %7277 = vst [vmem:[#allocation7_spill] sm:$0xff] %v5023_v36  ;;  %7278 = vst [vmem:[#allocation8_spill] sm:$0xff] %v5039_v10 }
  0x64   :  { %7279 = vst [vmem:[#allocation9_spill] sm:$0xff] %v5043_v12 }
  0x65   :  { %2989 = vmatpush1.bf16.msra.mxu0 %v4959_v4  ;;  %3277 = vmatpush1.bf16.msra.mxu1 %v4959_v4 }
  0x66   :  { %2991 = vmatprep.subr.bf16.mxu0 %v4963_v5  ;;  %3279 = vmatprep.subr.bf16.mxu1 %v4963_v5 }
  0x69   :  { %2993 = vmatpush1.bf16.msra.mxu0 %v4979_v30  ;;  %3281 = vmatpush1.bf16.msra.mxu1 %v4979_v30  ;;  %v172_v30 = vld [vmem:[%s7087_s4 + $0x478] sm:$0xff] }
  0x6a   :  { %2995 = vmatprep.subr.bf16.mxu0 %v4983_v33  ;;  %3283 = vmatprep.subr.bf16.mxu1 %v4983_v33  ;;  %v329_v33 = vld [vmem:[%s7088_s0 + $0x58] sm:$0xff] }
  0x6d   :  { %2997 = vmatpush1.bf16.msra.mxu0 %v4999_v56  ;;  %3285 = vmatpush1.bf16.msra.mxu1 %v4999_v56  ;;  %v163_v56 = vld [vmem:[%s7087_s4 + $0x430] sm:$0xff] }
  0x6e   :  { %2999 = vmatprep.subr.bf16.mxu0 %v5003_v60  ;;  %3287 = vmatprep.subr.bf16.mxu1 %v5003_v60  ;;  %v147_v60 = vld [vmem:[%s7087_s4 + $0x3b0] sm:$0xff] }
  0x6f   :  { %v5059_v41 = vpack.c.bf16 %v147_v60, %v145_v18  ;;  %v156_v60 = vld [vmem:[%s7087_s4 + $0x3f8] sm:$0xff] }
  0x71   :  { %3001 = vmatpush1.bf16.msra.mxu0 %v5019_v28  ;;  %3289 = vmatpush1.bf16.msra.mxu1 %v5019_v28  ;;  %v150_v28 = vld [vmem:[%s7087_s4 + $0x3c8] sm:$0xff]  ;;  %7280 = vst [vmem:[#allocation10_spill] sm:$0xff] %v5059_v41 }
  0x72   :  { %3003 = vmatprep.subr.bf16.mxu0 %v5023_v36  ;;  %3291 = vmatprep.subr.bf16.mxu1 %v5023_v36  ;;  %v5063_v54 = vpack.c.bf16 %v152_v40, %v150_v28  ;;  %v151_v36 = vld [vmem:[%s7087_s4 + $0x3d0] sm:$0xff]  ;;  %v153_v40 = vld [vmem:[%s7087_s4 + $0x3e0] sm:$0xff] }
  0x73   :  { %v5079_v28 = vpack.c.bf16 %v151_v36, %v149_v62  ;;  %v160_v36 = vld [vmem:[%s7087_s4 + $0x418] sm:$0xff] }
  0x74   :  { %7281 = vst [vmem:[#allocation11_spill] sm:$0xff] %v5063_v54 }
  0x75   :  { %3005 = vmatpush1.bf16.msra.mxu0 %v5039_v10  ;;  %3293 = vmatpush1.bf16.msra.mxu1 %v5039_v10  ;;  %v154_v10 = vld [vmem:[%s7087_s4 + $0x3e8] sm:$0xff]  ;;  %7282 = vst [vmem:[#allocation12_spill] sm:$0xff] %v5079_v28 }
  0x76   :  { %3007 = vmatprep.subr.bf16.mxu0 %v5043_v12  ;;  %3295 = vmatprep.subr.bf16.mxu1 %v5043_v12  ;;  %v5083_v18 = vpack.c.bf16 %v156_v60, %v154_v10  ;;  %v155_v12 = vld [vmem:[%s7087_s4 + $0x3f0] sm:$0xff]  ;;  %v157_v60 = vld [vmem:[%s7087_s4 + $0x400] sm:$0xff] }
  0x77   :  { %v5099_v10 = vpack.c.bf16 %v155_v12, %v153_v40  ;;  %v164_v12 = vld [vmem:[%s7087_s4 + $0x438] sm:$0xff] }
  0x78   :  { %7283 = vst [vmem:[#allocation13_spill] sm:$0xff] %v5083_v18 }
  0x79   :  { %3009 = vmatpush1.bf16.msra.mxu0 %v5059_v41  ;;  %3297 = vmatpush1.bf16.msra.mxu1 %v5059_v41  ;;  %v158_v41 = vld [vmem:[%s7087_s4 + $0x408] sm:$0xff]  ;;  %7284 = vst [vmem:[#allocation14_spill] sm:$0xff] %v5099_v10 }
  0x7a   :  { %3011 = vmatprep.subr.bf16.mxu0 %v5063_v54  ;;  %3299 = vmatprep.subr.bf16.mxu1 %v5063_v54  ;;  %v5103_v62 = vpack.c.bf16 %v160_v36, %v158_v41  ;;  %v159_v54 = vld [vmem:[%s7087_s4 + $0x410] sm:$0xff] }
  0x7b   :  { %v320_v41 = vld [vmem:[%s7088_s0 + $0x10] sm:$0xff]  ;;  %v5122_v40 = vpack.c.bf16 %v159_v54, %v157_v60  ;;  %v166_v54 = vld [vmem:[%s7087_s4 + $0x448] sm:$0xff]  ;;  %v168_v60 = vld [vmem:[%s7087_s4 + $0x458] sm:$0xff] }
  0x7c   :  { %7285 = vst [vmem:[#allocation15_spill] sm:$0xff] %v5103_v62  ;;  %v943_v36 = vld [vmem:[%s7089_s1 + $0x10] sm:$0xff] }
  0x7d   :  { %3013 = vmatpush1.bf16.msra.mxu0 %v5079_v28  ;;  %3301 = vmatpush1.bf16.msra.mxu1 %v5079_v28  ;;  %v162_v28 = vld [vmem:[%s7087_s4 + $0x428] sm:$0xff]  ;;  %7286 = vst [vmem:[#allocation16_spill] sm:$0xff] %v5122_v40 }
  0x7e   :  { %3015 = vmatprep.subr.bf16.mxu0 %v5083_v18  ;;  %3303 = vmatprep.subr.bf16.mxu1 %v5083_v18  ;;  %v5129_v18 = vpack.c.bf16 %v164_v12, %v162_v28  ;;  %v330_v28 = vld [vmem:[%s7088_s0 + $0x60] sm:$0xff] }
  0x7f   :  { %v953_v12 = vld [vmem:[%s7089_s1 + $0x60] sm:$0xff] }
  0x80   :  { %7287 = vst [vmem:[#allocation17_spill] sm:$0xff] %v5129_v18 }
  0x81   :  { %3017 = vmatpush1.bf16.msra.mxu0 %v5099_v10  ;;  %3305 = vmatpush1.bf16.msra.mxu1 %v5099_v10  ;;  %v161_v10 = vld [vmem:[%s7087_s4 + $0x420] sm:$0xff] }
  0x82   :  { %3019 = vmatprep.subr.bf16.mxu0 %v5103_v62  ;;  %3307 = vmatprep.subr.bf16.mxu1 %v5103_v62  ;;  %v5151_v62 = vpack.c.bf16 %v163_v56, %v161_v10  ;;  %v167_v56 = vld [vmem:[%s7087_s4 + $0x450] sm:$0xff]  ;;  %v170_v10 = vld [vmem:[%s7087_s4 + $0x468] sm:$0xff] }
  0x84   :  { %564 = vmatmul.mubr.f32.vlgmr.msra.gmra.mrb[0].mxu0 %v320_v41  ;;  %1176 = vmatmul.mubr.f32.vlgmr.msra.gmra.mrb[0].mxu1 %v943_v36  ;;  %7288 = vst [vmem:[#allocation18_spill] sm:$0xff] %v5151_v62  ;;  %v952_v41 = vld [vmem:[%s7089_s1 + $0x58] sm:$0xff]  ;;  %v5161_v36 = vpack.c.bf16 %v168_v60, %v166_v54  ;;  %v339_v54 = vld [vmem:[%s7088_s0 + $0xa8] sm:$0xff] }
  0x85   :  { %3021 = vmatpush1.bf16.msra.mxu0 %v5122_v40  ;;  %3309 = vmatpush1.bf16.msra.mxu1 %v5122_v40  ;;  %v165_v40 = vld [vmem:[%s7087_s4 + $0x440] sm:$0xff]  ;;  %v962_v60 = vld [vmem:[%s7089_s1 + $0xa8] sm:$0xff] }
  0x86   :  { %3023 = vmatprep.subr.bf16.mxu0 %v5129_v18  ;;  %3311 = vmatprep.subr.bf16.mxu1 %v5129_v18  ;;  %7289 = vst [vmem:[#allocation19_spill] sm:$0xff] %v5161_v36  ;;  %v5183_v18 = vpack.c.bf16 %v167_v56, %v165_v40  ;;  %v171_v40 = vld [vmem:[%s7087_s4 + $0x470] sm:$0xff]  ;;  %v174_v56 = vld [vmem:[%s7087_s4 + $0x488] sm:$0xff] }
  0x87   :  { %569 = vmatprep.mubr.f32.mxu0 %v330_v28  ;;  %1181 = vmatprep.mubr.f32.mxu1 %v953_v12  ;;  %v338_v28 = vld [vmem:[%s7088_s0 + $0xa0] sm:$0xff]  ;;  %v5193_v12 = vpack.c.bf16 %v172_v30, %v170_v10  ;;  %v348_v30 = vld [vmem:[%s7088_s0 + $0xf0] sm:$0xff] }
  0x88   :  { %570 = vmatmul.mubr.f32.gmra.mrb[2].mxu0 %v329_v33  ;;  %1182 = vmatmul.mubr.f32.gmra.mrb[2].mxu1 %v952_v41  ;;  %7290 = vst [vmem:[#allocation20_spill] sm:$0xff] %v5183_v18  ;;  %v961_v33 = vld [vmem:[%s7089_s1 + $0xa0] sm:$0xff]  ;;  %v971_v10 = vld [vmem:[%s7089_s1 + $0xf0] sm:$0xff] }
  0x89   :  { %3025 = vmatpush1.bf16.msra.mxu0 %v5151_v62  ;;  %3313 = vmatpush1.bf16.msra.mxu1 %v5151_v62  ;;  %7291 = vst [vmem:[#allocation21_spill] sm:$0xff] %v5193_v12  ;;  %v169_v41 = vld [vmem:[%s7087_s4 + $0x460] sm:$0xff]  ;;  %v176_v62 = vld [vmem:[%s7087_s4 + $0x498] sm:$0xff] }
  0x8a   :  { %3027 = vmatprep.subr.bf16.mxu0 %v5161_v36  ;;  %3315 = vmatprep.subr.bf16.mxu1 %v5161_v36  ;;  %v5215_v36 = vpack.c.bf16 %v171_v40, %v169_v41  ;;  %v175_v41 = vld [vmem:[%s7087_s4 + $0x490] sm:$0xff]  ;;  %v178_v40 = vld [vmem:[%s7087_s4 + $0x4a8] sm:$0xff] }
  0x8b   :  { %575 = vmatprep.mubr.f32.mxu0 %v339_v54  ;;  %1187 = vmatprep.mubr.f32.mxu1 %v962_v60  ;;  %v347_v54 = vld [vmem:[%s7088_s0 + $0xe8] sm:$0xff] }
  0x8c   :  { %576 = vmatmul.mubr.f32.gmra.mrb[4].mxu0 %v338_v28  ;;  %1188 = vmatmul.mubr.f32.gmra.mrb[4].mxu1 %v961_v33  ;;  %7292 = vst [vmem:[#allocation22_spill] sm:$0xff] %v5215_v36  ;;  %v970_v60 = vld [vmem:[%s7089_s1 + $0xe8] sm:$0xff]  ;;  %v5225_v28 = vpack.c.bf16 %v176_v62, %v174_v56  ;;  %v173_v33 = vld [vmem:[%s7087_s4 + $0x480] sm:$0xff]  ;;  %v357_v62 = vld [vmem:[%s7088_s0 + $0x138] sm:$0xff] }
  0x8d   :  { %3029 = vmatpush1.bf16.msra.mxu0 %v5183_v18  ;;  %3317 = vmatpush1.bf16.msra.mxu1 %v5183_v18  ;;  %v180_v18 = vld [vmem:[%s7087_s4 + $0x4b8] sm:$0xff] }
  0x8e   :  { %3031 = vmatprep.subr.bf16.mxu0 %v5193_v12  ;;  %3319 = vmatprep.subr.bf16.mxu1 %v5193_v12  ;;  %7293 = vst [vmem:[#allocation23_spill] sm:$0xff] %v5225_v28  ;;  %v980_v56 = vld [vmem:[%s7089_s1 + $0x138] sm:$0xff]  ;;  %v5247_v12 = vpack.c.bf16 %v175_v41, %v173_v33  ;;  %v179_v33 = vld [vmem:[%s7087_s4 + $0x4b0] sm:$0xff]  ;;  %v182_v41 = vld [vmem:[%s7087_s4 + $0x4c8] sm:$0xff] }
  0x8f   :  { %581 = vmatprep.mubr.f32.mxu0 %v348_v30  ;;  %1193 = vmatprep.mubr.f32.mxu1 %v971_v10  ;;  %v356_v30 = vld [vmem:[%s7088_s0 + $0x130] sm:$0xff] }
  0x90   :  { %582 = vmatmul.mubr.f32.gmra.mrb[6].mxu0 %v347_v54  ;;  %1194 = vmatmul.mubr.f32.gmra.mrb[6].mxu1 %v970_v60  ;;  %7294 = vst [vmem:[#allocation24_spill] sm:$0xff] %v5247_v12  ;;  %v979_v10 = vld [vmem:[%s7089_s1 + $0x130] sm:$0xff]  ;;  %v5257_v54 = vpack.c.bf16 %v180_v18, %v178_v40  ;;  %v177_v60 = vld [vmem:[%s7087_s4 + $0x4a0] sm:$0xff] }
  0x91   :  { %3033 = vmatpush1.bf16.msra.mxu0 %v5215_v36  ;;  %3321 = vmatpush1.bf16.msra.mxu1 %v5215_v36  ;;  %v184_v36 = vld [vmem:[%s7087_s4 + $0x4d8] sm:$0xff]  ;;  %v366_v18 = vld [vmem:[%s7088_s0 + $0x180] sm:$0xff] }
  0x92   :  { %3035 = vmatprep.subr.bf16.mxu0 %v5225_v28  ;;  %3323 = vmatprep.subr.bf16.mxu1 %v5225_v28  ;;  %7295 = vst [vmem:[#allocation25_spill] sm:$0xff] %v5257_v54  ;;  %v989_v40 = vld [vmem:[%s7089_s1 + $0x180] sm:$0xff]  ;;  %v5279_v28 = vpack.c.bf16 %v179_v33, %v177_v60  ;;  %v183_v60 = vld [vmem:[%s7087_s4 + $0x4d0] sm:$0xff]  ;;  %v186_v33 = vld [vmem:[%s7087_s4 + $0x4e8] sm:$0xff] }
  0x93   :  { %587 = vmatprep.mubr.f32.mxu0 %v357_v62  ;;  %1199 = vmatprep.mubr.f32.mxu1 %v980_v56  ;;  %v365_v62 = vld [vmem:[%s7088_s0 + $0x178] sm:$0xff] }
  0x94   :  { %588 = vmatmul.mubr.f32.gmra.mrb[8].mxu0 %v356_v30  ;;  %1200 = vmatmul.mubr.f32.gmra.mrb[8].mxu1 %v979_v10  ;;  %7296 = vst [vmem:[#allocation26_spill] sm:$0xff] %v5279_v28  ;;  %v988_v56 = vld [vmem:[%s7089_s1 + $0x178] sm:$0xff]  ;;  %v5289_v30 = vpack.c.bf16 %v184_v36, %v182_v41  ;;  %v181_v10 = vld [vmem:[%s7087_s4 + $0x4c0] sm:$0xff]  ;;  %v375_v36 = vld [vmem:[%s7088_s0 + $0x1c8] sm:$0xff] }
  0x95   :  { %3037 = vmatpush1.bf16.msra.mxu0 %v5247_v12  ;;  %3325 = vmatpush1.bf16.msra.mxu1 %v5247_v12  ;;  %v188_v12 = vld [vmem:[%s7087_s4 + $0x4f8] sm:$0xff]  ;;  %v998_v41 = vld [vmem:[%s7089_s1 + $0x1c8] sm:$0xff] }
  0x96   :  { %3039 = vmatprep.subr.bf16.mxu0 %v5257_v54  ;;  %3327 = vmatprep.subr.bf16.mxu1 %v5257_v54  ;;  %7297 = vst [vmem:[#allocation27_spill] sm:$0xff] %v5289_v30  ;;  %v5311_v54 = vpack.c.bf16 %v183_v60, %v181_v10  ;;  %v187_v10 = vld [vmem:[%s7087_s4 + $0x4f0] sm:$0xff]  ;;  %v190_v60 = vld [vmem:[%s7087_s4 + $0x508] sm:$0xff] }
  0x97   :  { %593 = vmatprep.mubr.f32.mxu0 %v366_v18  ;;  %1205 = vmatprep.mubr.f32.mxu1 %v989_v40  ;;  %v374_v18 = vld [vmem:[%s7088_s0 + $0x1c0] sm:$0xff] }
  0x98   :  { %594 = vmatmul.mubr.f32.gmra.mrb[10].mxu0 %v365_v62  ;;  %1206 = vmatmul.mubr.f32.gmra.mrb[10].mxu1 %v988_v56  ;;  %7298 = vst [vmem:[#allocation28_spill] sm:$0xff] %v5311_v54  ;;  %v997_v40 = vld [vmem:[%s7089_s1 + $0x1c0] sm:$0xff]  ;;  %v5321_v62 = vpack.c.bf16 %v188_v12, %v186_v33  ;;  %v323_v12 = vld [vmem:[%s7088_s0 + $0x28] sm:$0xff] }
  0x99   :  { %3041 = vmatpush1.bf16.msra.mxu0 %v5279_v28  ;;  %3329 = vmatpush1.bf16.msra.mxu1 %v5279_v28  ;;  %v185_v56 = vld [vmem:[%s7087_s4 + $0x4e0] sm:$0xff]  ;;  %v192_v28 = vld [vmem:[%s7087_s4 + $0x518] sm:$0xff]  ;;  %v946_v33 = vld [vmem:[%s7089_s1 + $0x28] sm:$0xff] }
  0x9a   :  { %3043 = vmatprep.subr.bf16.mxu0 %v5289_v30  ;;  %3331 = vmatprep.subr.bf16.mxu1 %v5289_v30  ;;  %7299 = vst [vmem:[#allocation29_spill] sm:$0xff] %v5321_v62  ;;  %v5343_v30 = vpack.c.bf16 %v187_v10, %v185_v56  ;;  %v196_v56 = vld [vmem:[%s7087_s4 + $0x538] sm:$0xff] }
  0x9b   :  { %599 = vmatprep.mubr.f32.mxu0 %v375_v36  ;;  %1211 = vmatprep.mubr.f32.mxu1 %v998_v41  ;;  %v5347_v36 = vpack.c.bf16 %v192_v28, %v190_v60  ;;  %v189_v41 = vld [vmem:[%s7087_s4 + $0x500] sm:$0xff] }
  0x9c   :  { %600 = vmatmul.mubr.f32.gmra.mrb[12].mxu0 %v374_v18  ;;  %1212 = vmatmul.mubr.f32.gmra.mrb[12].mxu1 %v997_v40  ;;  %7300 = vst [vmem:[#allocation30_spill] sm:$0xff] %v5343_v30  ;;  %v191_v18 = vld [vmem:[%s7087_s4 + $0x510] sm:$0xff]  ;;  %v194_v40 = vld [vmem:[%s7087_s4 + $0x528] sm:$0xff]  ;;  %v193_v60 = vld [vmem:[%s7087_s4 + $0x520] sm:$0xff] }
  0x9d   :  { %3045 = vmatpush1.bf16.msra.mxu0 %v5311_v54  ;;  %3333 = vmatpush1.bf16.msra.mxu1 %v5311_v54  ;;  %7301 = vst [vmem:[#allocation31_spill] sm:$0xff] %v5347_v36  ;;  %v5363_v28 = vpack.c.bf16 %v191_v18, %v189_v41  ;;  %v5367_v10 = vpack.c.bf16 %v196_v56, %v194_v40  ;;  %v200_v41 = vld [vmem:[%s7087_s4 + $0x558] sm:$0xff]  ;;  %v197_v56 = vld [vmem:[%s7087_s4 + $0x540] sm:$0xff] }
  0x9e   :  { %3047 = vmatprep.subr.bf16.mxu0 %v5321_v62  ;;  %3335 = vmatprep.subr.bf16.mxu1 %v5321_v62  ;;  %v331_v62 = vld [vmem:[%s7088_s0 + $0x68] sm:$0xff]  ;;  %v236_v54 = vld [vmem:[%s7087_s4 + $0x678] sm:$0xff] }
  0x9f   :  { %670 = vmatprep.mubr.f32.mxu0 %v323_v12  ;;  %1282 = vmatprep.mubr.f32.mxu1 %v946_v33  ;;  %7302 = vst [vmem:[#allocation32_spill] sm:$0xff] %v5363_v28  ;;  %7303 = vst [vmem:[#allocation33_spill] sm:$0xff] %v5367_v10  ;;  %v195_v12 = vld [vmem:[%s7087_s4 + $0x530] sm:$0xff]  ;;  %v198_v33 = vld [vmem:[%s7087_s4 + $0x548] sm:$0xff] }
  0xa0   :  { %v5383_v18 = vpack.c.bf16 %v195_v12, %v193_v60  ;;  %v5387_v40 = vpack.c.bf16 %v200_v41, %v198_v33  ;;  %v204_v60 = vld [vmem:[%s7087_s4 + $0x578] sm:$0xff]  ;;  %v201_v41 = vld [vmem:[%s7087_s4 + $0x560] sm:$0xff] }
  0xa1   :  { %3049 = vmatpush1.bf16.msra.mxu0 %v5343_v30  ;;  %3337 = vmatpush1.bf16.msra.mxu1 %v5343_v30  ;;  %v227_v30 = vld [vmem:[%s7087_s4 + $0x630] sm:$0xff] }
  0xa2   :  { %3051 = vmatprep.subr.bf16.mxu0 %v5347_v36  ;;  %3339 = vmatprep.subr.bf16.mxu1 %v5347_v36  ;;  %7304 = vst [vmem:[#allocation34_spill] sm:$0xff] %v5383_v18  ;;  %7305 = vst [vmem:[#allocation35_spill] sm:$0xff] %v5387_v40  ;;  %v199_v36 = vld [vmem:[%s7087_s4 + $0x550] sm:$0xff] }
  0xa3   :  { %v5403_v12 = vpack.c.bf16 %v199_v36, %v197_v56  ;;  %v208_v36 = vld [vmem:[%s7087_s4 + $0x598] sm:$0xff] }
  0xa5   :  { %3053 = vmatpush1.bf16.msra.mxu0 %v5363_v28  ;;  %3341 = vmatpush1.bf16.msra.mxu1 %v5363_v28  ;;  %v202_v28 = vld [vmem:[%s7087_s4 + $0x568] sm:$0xff]  ;;  %7306 = vst [vmem:[#allocation36_spill] sm:$0xff] %v5403_v12 }
  0xa6   :  { %3055 = vmatprep.subr.bf16.mxu0 %v5367_v10  ;;  %3343 = vmatprep.subr.bf16.mxu1 %v5367_v10  ;;  %v5407_v33 = vpack.c.bf16 %v204_v60, %v202_v28  ;;  %v203_v10 = vld [vmem:[%s7087_s4 + $0x570] sm:$0xff]  ;;  %v205_v60 = vld [vmem:[%s7087_s4 + $0x580] sm:$0xff] }
  0xa7   :  { %v5423_v28 = vpack.c.bf16 %v203_v10, %v201_v41  ;;  %v212_v10 = vld [vmem:[%s7087_s4 + $0x5b8] sm:$0xff] }
  0xa8   :  { %7307 = vst [vmem:[#allocation37_spill] sm:$0xff] %v5407_v33 }
  0xa9   :  { %3057 = vmatpush1.bf16.msra.mxu0 %v5383_v18  ;;  %3345 = vmatpush1.bf16.msra.mxu1 %v5383_v18  ;;  %v206_v18 = vld [vmem:[%s7087_s4 + $0x588] sm:$0xff]  ;;  %7308 = vst [vmem:[#allocation38_spill] sm:$0xff] %v5423_v28 }
  0xaa   :  { %3059 = vmatprep.subr.bf16.mxu0 %v5387_v40  ;;  %3347 = vmatprep.subr.bf16.mxu1 %v5387_v40  ;;  %v5427_v56 = vpack.c.bf16 %v208_v36, %v206_v18  ;;  %v207_v40 = vld [vmem:[%s7087_s4 + $0x590] sm:$0xff]  ;;  %v209_v36 = vld [vmem:[%s7087_s4 + $0x5a0] sm:$0xff] }
  0xab   :  { %v5443_v18 = vpack.c.bf16 %v207_v40, %v205_v60  ;;  %v216_v40 = vld [vmem:[%s7087_s4 + $0x5d8] sm:$0xff] }
  0xac   :  { %7309 = vst [vmem:[#allocation39_spill] sm:$0xff] %v5427_v56 }
  0xad   :  { %3061 = vmatpush1.bf16.msra.mxu0 %v5403_v12  ;;  %3349 = vmatpush1.bf16.msra.mxu1 %v5403_v12  ;;  %v210_v12 = vld [vmem:[%s7087_s4 + $0x5a8] sm:$0xff]  ;;  %7310 = vst [vmem:[#allocation40_spill] sm:$0xff] %v5443_v18 }
  0xae   :  { %3063 = vmatprep.subr.bf16.mxu0 %v5407_v33  ;;  %3351 = vmatprep.subr.bf16.mxu1 %v5407_v33  ;;  %v5447_v41 = vpack.c.bf16 %v212_v10, %v210_v12  ;;  %v211_v33 = vld [vmem:[%s7087_s4 + $0x5b0] sm:$0xff]  ;;  %v213_v10 = vld [vmem:[%s7087_s4 + $0x5c0] sm:$0xff] }
  0xaf   :  { %v5463_v12 = vpack.c.bf16 %v211_v33, %v209_v36  ;;  %v220_v33 = vld [vmem:[%s7087_s4 + $0x5f8] sm:$0xff] }
  0xb0   :  { %7311 = vst [vmem:[#allocation41_spill] sm:$0xff] %v5447_v41 }
  0xb1   :  { %3065 = vmatpush1.bf16.msra.mxu0 %v5423_v28  ;;  %3353 = vmatpush1.bf16.msra.mxu1 %v5423_v28  ;;  %v214_v28 = vld [vmem:[%s7087_s4 + $0x5c8] sm:$0xff]  ;;  %7312 = vst [vmem:[#allocation42_spill] sm:$0xff] %v5463_v12 }
  0xb2   :  { %3067 = vmatprep.subr.bf16.mxu0 %v5427_v56  ;;  %3355 = vmatprep.subr.bf16.mxu1 %v5427_v56  ;;  %v5467_v60 = vpack.c.bf16 %v216_v40, %v214_v28  ;;  %v215_v56 = vld [vmem:[%s7087_s4 + $0x5d0] sm:$0xff]  ;;  %v217_v40 = vld [vmem:[%s7087_s4 + $0x5e0] sm:$0xff] }
  0xb3   :  { %v5483_v28 = vpack.c.bf16 %v215_v56, %v213_v10  ;;  %v224_v56 = vld [vmem:[%s7087_s4 + $0x618] sm:$0xff] }
  0xb4   :  { %7313 = vst [vmem:[#allocation43_spill] sm:$0xff] %v5467_v60 }
  0xb5   :  { %3069 = vmatpush1.bf16.msra.mxu0 %v5443_v18  ;;  %3357 = vmatpush1.bf16.msra.mxu1 %v5443_v18  ;;  %v218_v18 = vld [vmem:[%s7087_s4 + $0x5e8] sm:$0xff]  ;;  %7314 = vst [vmem:[#allocation44_spill] sm:$0xff] %v5483_v28 }
  0xb6   :  { %3071 = vmatprep.subr.bf16.mxu0 %v5447_v41  ;;  %3359 = vmatprep.subr.bf16.mxu1 %v5447_v41  ;;  %v5487_v36 = vpack.c.bf16 %v220_v33, %v218_v18  ;;  %v219_v41 = vld [vmem:[%s7087_s4 + $0x5f0] sm:$0xff]  ;;  %v221_v33 = vld [vmem:[%s7087_s4 + $0x600] sm:$0xff] }
  0xb7   :  { %v5503_v18 = vpack.c.bf16 %v219_v41, %v217_v40  ;;  %v228_v41 = vld [vmem:[%s7087_s4 + $0x638] sm:$0xff] }
  0xb8   :  { %7315 = vst [vmem:[#allocation45_spill] sm:$0xff] %v5487_v36 }
  0xb9   :  { %3073 = vmatpush1.bf16.msra.mxu0 %v5463_v12  ;;  %3361 = vmatpush1.bf16.msra.mxu1 %v5463_v12  ;;  %v222_v12 = vld [vmem:[%s7087_s4 + $0x608] sm:$0xff]  ;;  %7316 = vst [vmem:[#allocation46_spill] sm:$0xff] %v5503_v18 }
  0xba   :  { %3075 = vmatprep.subr.bf16.mxu0 %v5467_v60  ;;  %3363 = vmatprep.subr.bf16.mxu1 %v5467_v60  ;;  %v5507_v10 = vpack.c.bf16 %v224_v56, %v222_v12  ;;  %v223_v60 = vld [vmem:[%s7087_s4 + $0x610] sm:$0xff]  ;;  %v322_v12 = vld [vmem:[%s7088_s0 + $0x20] sm:$0xff] }
  0xbb   :  { %v5526_v40 = vpack.c.bf16 %v223_v60, %v221_v33  ;;  %v945_v56 = vld [vmem:[%s7089_s1 + $0x20] sm:$0xff]  ;;  %v230_v60 = vld [vmem:[%s7087_s4 + $0x648] sm:$0xff]  ;;  %v232_v33 = vld [vmem:[%s7087_s4 + $0x658] sm:$0xff] }
  0xbc   :  { %7317 = vst [vmem:[#allocation47_spill] sm:$0xff] %v5507_v10 }
  0xbd   :  { %3077 = vmatpush1.bf16.msra.mxu0 %v5483_v28  ;;  %3365 = vmatpush1.bf16.msra.mxu1 %v5483_v28  ;;  %v226_v28 = vld [vmem:[%s7087_s4 + $0x628] sm:$0xff]  ;;  %7318 = vst [vmem:[#allocation48_spill] sm:$0xff] %v5526_v40 }
  0xbe   :  { %3079 = vmatprep.subr.bf16.mxu0 %v5487_v36  ;;  %3367 = vmatprep.subr.bf16.mxu1 %v5487_v36  ;;  %v5533_v36 = vpack.c.bf16 %v228_v41, %v226_v28  ;;  %v332_v28 = vld [vmem:[%s7088_s0 + $0x70] sm:$0xff] }
  0xbf   :  { %v955_v41 = vld [vmem:[%s7089_s1 + $0x70] sm:$0xff] }
  0xc0   :  { %7319 = vst [vmem:[#allocation49_spill] sm:$0xff] %v5533_v36 }
  0xc1   :  { %3081 = vmatpush1.bf16.msra.mxu0 %v5503_v18  ;;  %3369 = vmatpush1.bf16.msra.mxu1 %v5503_v18  ;;  %v225_v18 = vld [vmem:[%s7087_s4 + $0x620] sm:$0xff] }
  0xc2   :  { %3083 = vmatprep.subr.bf16.mxu0 %v5507_v10  ;;  %3371 = vmatprep.subr.bf16.mxu1 %v5507_v10  ;;  %v5555_v10 = vpack.c.bf16 %v227_v30, %v225_v18  ;;  %v231_v30 = vld [vmem:[%s7087_s4 + $0x650] sm:$0xff]  ;;  %v234_v18 = vld [vmem:[%s7087_s4 + $0x668] sm:$0xff] }
  0xc4   :  { %671 = vmatmul.mubr.f32.vlgmr.msra.gmra.mrb[0].mxu0 %v322_v12  ;;  %1283 = vmatmul.mubr.f32.vlgmr.msra.gmra.mrb[0].mxu1 %v945_v56  ;;  %7320 = vst [vmem:[#allocation50_spill] sm:$0xff] %v5555_v10  ;;  %v954_v12 = vld [vmem:[%s7089_s1 + $0x68] sm:$0xff]  ;;  %v5565_v56 = vpack.c.bf16 %v232_v33, %v230_v60  ;;  %v341_v60 = vld [vmem:[%s7088_s0 + $0xb8] sm:$0xff] }
  0xc5   :  { %3085 = vmatpush1.bf16.msra.mxu0 %v5526_v40  ;;  %3373 = vmatpush1.bf16.msra.mxu1 %v5526_v40  ;;  %v229_v40 = vld [vmem:[%s7087_s4 + $0x640] sm:$0xff]  ;;  %v964_v33 = vld [vmem:[%s7089_s1 + $0xb8] sm:$0xff] }
  0xc6   :  { %3087 = vmatprep.subr.bf16.mxu0 %v5533_v36  ;;  %3375 = vmatprep.subr.bf16.mxu1 %v5533_v36  ;;  %7321 = vst [vmem:[#allocation51_spill] sm:$0xff] %v5565_v56  ;;  %v5587_v36 = vpack.c.bf16 %v231_v30, %v229_v40  ;;  %v235_v40 = vld [vmem:[%s7087_s4 + $0x670] sm:$0xff]  ;;  %v238_v30 = vld [vmem:[%s7087_s4 + $0x688] sm:$0xff] }
  0xc7   :  { %676 = vmatprep.mubr.f32.mxu0 %v332_v28  ;;  %1288 = vmatprep.mubr.f32.mxu1 %v955_v41  ;;  %v340_v28 = vld [vmem:[%s7088_s0 + $0xb0] sm:$0xff]  ;;  %v5597_v41 = vpack.c.bf16 %v236_v54, %v234_v18  ;;  %v350_v54 = vld [vmem:[%s7088_s0 + $0x100] sm:$0xff] }
  0xc8   :  { %677 = vmatmul.mubr.f32.gmra.mrb[2].mxu0 %v331_v62  ;;  %1289 = vmatmul.mubr.f32.gmra.mrb[2].mxu1 %v954_v12  ;;  %7322 = vst [vmem:[#allocation52_spill] sm:$0xff] %v5587_v36  ;;  %v963_v62 = vld [vmem:[%s7089_s1 + $0xb0] sm:$0xff]  ;;  %v233_v12 = vld [vmem:[%s7087_s4 + $0x660] sm:$0xff] }
  0xc9   :  { %3089 = vmatpush1.bf16.msra.mxu0 %v5555_v10  ;;  %3377 = vmatpush1.bf16.msra.mxu1 %v5555_v10  ;;  %7323 = vst [vmem:[#allocation53_spill] sm:$0xff] %v5597_v41  ;;  %v240_v10 = vld [vmem:[%s7087_s4 + $0x698] sm:$0xff]  ;;  %v973_v18 = vld [vmem:[%s7089_s1 + $0x100] sm:$0xff] }
  0xca   :  { %3091 = vmatprep.subr.bf16.mxu0 %v5565_v56  ;;  %3379 = vmatprep.subr.bf16.mxu1 %v5565_v56  ;;  %v5619_v56 = vpack.c.bf16 %v235_v40, %v233_v12  ;;  %v239_v12 = vld [vmem:[%s7087_s4 + $0x690] sm:$0xff]  ;;  %v242_v40 = vld [vmem:[%s7087_s4 + $0x6a8] sm:$0xff] }
  0xcb   :  { %682 = vmatprep.mubr.f32.mxu0 %v341_v60  ;;  %1294 = vmatprep.mubr.f32.mxu1 %v964_v33  ;;  %v349_v60 = vld [vmem:[%s7088_s0 + $0xf8] sm:$0xff] }
  0xcc   :  { %683 = vmatmul.mubr.f32.gmra.mrb[4].mxu0 %v340_v28  ;;  %1295 = vmatmul.mubr.f32.gmra.mrb[4].mxu1 %v963_v62  ;;  %7324 = vst [vmem:[#allocation54_spill] sm:$0xff] %v5619_v56  ;;  %v972_v33 = vld [vmem:[%s7089_s1 + $0xf8] sm:$0xff]  ;;  %v5629_v28 = vpack.c.bf16 %v240_v10, %v238_v30  ;;  %v237_v62 = vld [vmem:[%s7087_s4 + $0x680] sm:$0xff]  ;;  %v359_v10 = vld [vmem:[%s7088_s0 + $0x148] sm:$0xff] }
  0xcd   :  { %3093 = vmatpush1.bf16.msra.mxu0 %v5587_v36  ;;  %3381 = vmatpush1.bf16.msra.mxu1 %v5587_v36  ;;  %v244_v36 = vld [vmem:[%s7087_s4 + $0x6b8] sm:$0xff]  ;;  %v982_v30 = vld [vmem:[%s7089_s1 + $0x148] sm:$0xff] }
  0xce   :  { %3095 = vmatprep.subr.bf16.mxu0 %v5597_v41  ;;  %3383 = vmatprep.subr.bf16.mxu1 %v5597_v41  ;;  %7325 = vst [vmem:[#allocation55_spill] sm:$0xff] %v5629_v28  ;;  %v5651_v41 = vpack.c.bf16 %v239_v12, %v237_v62  ;;  %v243_v62 = vld [vmem:[%s7087_s4 + $0x6b0] sm:$0xff]  ;;  %v246_v12 = vld [vmem:[%s7087_s4 + $0x6c8] sm:$0xff] }
  0xcf   :  { %688 = vmatprep.mubr.f32.mxu0 %v350_v54  ;;  %1300 = vmatprep.mubr.f32.mxu1 %v973_v18  ;;  %v358_v54 = vld [vmem:[%s7088_s0 + $0x140] sm:$0xff] }
  0xd0   :  { %689 = vmatmul.mubr.f32.gmra.mrb[6].mxu0 %v349_v60  ;;  %1301 = vmatmul.mubr.f32.gmra.mrb[6].mxu1 %v972_v33  ;;  %7326 = vst [vmem:[#allocation56_spill] sm:$0xff] %v5651_v41  ;;  %v981_v18 = vld [vmem:[%s7089_s1 + $0x140] sm:$0xff]  ;;  %v5661_v60 = vpack.c.bf16 %v244_v36, %v242_v40  ;;  %v368_v36 = vld [vmem:[%s7088_s0 + $0x190] sm:$0xff] }
  0xd1   :  { %3097 = vmatpush1.bf16.msra.mxu0 %v5619_v56  ;;  %3385 = vmatpush1.bf16.msra.mxu1 %v5619_v56  ;;  %v241_v33 = vld [vmem:[%s7087_s4 + $0x6a0] sm:$0xff]  ;;  %v248_v56 = vld [vmem:[%s7087_s4 + $0x6d8] sm:$0xff]  ;;  %v991_v40 = vld [vmem:[%s7089_s1 + $0x190] sm:$0xff] }
  0xd2   :  { %3099 = vmatprep.subr.bf16.mxu0 %v5629_v28  ;;  %3387 = vmatprep.subr.bf16.mxu1 %v5629_v28  ;;  %7327 = vst [vmem:[#allocation57_spill] sm:$0xff] %v5661_v60  ;;  %v5683_v28 = vpack.c.bf16 %v243_v62, %v241_v33  ;;  %v247_v33 = vld [vmem:[%s7087_s4 + $0x6d0] sm:$0xff]  ;;  %v250_v62 = vld [vmem:[%s7087_s4 + $0x6e8] sm:$0xff] }
  0xd3   :  { %694 = vmatprep.mubr.f32.mxu0 %v359_v10  ;;  %1306 = vmatprep.mubr.f32.mxu1 %v982_v30  ;;  %v367_v10 = vld [vmem:[%s7088_s0 + $0x188] sm:$0xff] }
  0xd4   :  { %695 = vmatmul.mubr.f32.gmra.mrb[8].mxu0 %v358_v54  ;;  %1307 = vmatmul.mubr.f32.gmra.mrb[8].mxu1 %v981_v18  ;;  %7328 = vst [vmem:[#allocation58_spill] sm:$0xff] %v5683_v28  ;;  %v990_v30 = vld [vmem:[%s7089_s1 + $0x188] sm:$0xff]  ;;  %v5693_v54 = vpack.c.bf16 %v248_v56, %v246_v12  ;;  %v245_v18 = vld [vmem:[%s7087_s4 + $0x6c0] sm:$0xff]  ;;  %v377_v56 = vld [vmem:[%s7088_s0 + $0x1d8] sm:$0xff] }
  0xd5   :  { %3101 = vmatpush1.bf16.msra.mxu0 %v5651_v41  ;;  %3389 = vmatpush1.bf16.msra.mxu1 %v5651_v41  ;;  %v252_v41 = vld [vmem:[%s7087_s4 + $0x6f8] sm:$0xff] }
  0xd6   :  { %3103 = vmatprep.subr.bf16.mxu0 %v5661_v60  ;;  %3391 = vmatprep.subr.bf16.mxu1 %v5661_v60  ;;  %7329 = vst [vmem:[#allocation59_spill] sm:$0xff] %v5693_v54  ;;  %v1000_v12 = vld [vmem:[%s7089_s1 + $0x1d8] sm:$0xff]  ;;  %v5715_v60 = vpack.c.bf16 %v247_v33, %v245_v18  ;;  %v251_v18 = vld [vmem:[%s7087_s4 + $0x6f0] sm:$0xff]  ;;  %v254_v33 = vld [vmem:[%s7087_s4 + $0x708] sm:$0xff] }
  0xd7   :  { %700 = vmatprep.mubr.f32.mxu0 %v368_v36  ;;  %1312 = vmatprep.mubr.f32.mxu1 %v991_v40  ;;  %v376_v36 = vld [vmem:[%s7088_s0 + $0x1d0] sm:$0xff] }
  0xd8   :  { %701 = vmatmul.mubr.f32.gmra.mrb[10].mxu0 %v367_v10  ;;  %1313 = vmatmul.mubr.f32.gmra.mrb[10].mxu1 %v990_v30  ;;  %v999_v40 = vld [vmem:[%s7089_s1 + $0x1d0] sm:$0xff]  ;;  %v5725_v10 = vpack.c.bf16 %v252_v41, %v250_v62  ;;  %v249_v30 = vld [vmem:[%s7087_s4 + $0x6e0] sm:$0xff]  ;;  %v325_v41 = vld [vmem:[%s7088_s0 + $0x38] sm:$0xff] }
  0xd9   :  { %3105 = vmatpush1.bf16.msra.mxu0 %v5683_v28  ;;  %3393 = vmatpush1.bf16.msra.mxu1 %v5683_v28  ;;  %v256_v28 = vld [vmem:[%s7087_s4 + $0x718] sm:$0xff] }
  0xda   :  { %3107 = vmatprep.subr.bf16.mxu0 %v5693_v54  ;;  %3395 = vmatprep.subr.bf16.mxu1 %v5693_v54  ;;  %7330 = vst [vmem:[#allocation60_spill] sm:$0xff] %v5725_v10  ;;  %v948_v62 = vld [vmem:[%s7089_s1 + $0x38] sm:$0xff]  ;;  %v5747_v54 = vpack.c.bf16 %v251_v18, %v249_v30 }
  0xdb   :  { %706 = vmatprep.mubr.f32.mxu0 %v377_v56  ;;  %1318 = vmatprep.mubr.f32.mxu1 %v1000_v12  ;;  %v5751_v56 = vpack.c.bf16 %v256_v28, %v254_v33  ;;  %v253_v12 = vld [vmem:[%s7087_s4 + $0x700] sm:$0xff]  ;;  %v260_v30 = vld [vmem:[%s7087_s4 + $0x738] sm:$0xff] }
  0xdc   :  { %707 = vmatmul.mubr.f32.gmra.mrb[12].mxu0 %v376_v36  ;;  %1319 = vmatmul.mubr.f32.gmra.mrb[12].mxu1 %v999_v40  ;;  %7331 = vst [vmem:[#allocation61_spill] sm:$0xff] %v5747_v54  ;;  %v255_v36 = vld [vmem:[%s7087_s4 + $0x710] sm:$0xff]  ;;  %v258_v40 = vld [vmem:[%s7087_s4 + $0x728] sm:$0xff]  ;;  %v257_v33 = vld [vmem:[%s7087_s4 + $0x720] sm:$0xff] }
  0xdd   :  { %3109 = vmatpush1.bf16.msra.mxu0 %v5715_v60  ;;  %3397 = vmatpush1.bf16.msra.mxu1 %v5715_v60  ;;  %7332 = vst [vmem:[#allocation62_spill] sm:$0xff] %v5751_v56  ;;  %v5767_v28 = vpack.c.bf16 %v255_v36, %v253_v12  ;;  %v5771_v18 = vpack.c.bf16 %v260_v30, %v258_v40  ;;  %v264_v12 = vld [vmem:[%s7087_s4 + $0x758] sm:$0xff]  ;;  %v261_v30 = vld [vmem:[%s7087_s4 + $0x740] sm:$0xff] }
  0xde   :  { %3111 = vmatprep.subr.bf16.mxu0 %v5725_v10  ;;  %3399 = vmatprep.subr.bf16.mxu1 %v5725_v10  ;;  %v333_v10 = vld [vmem:[%s7088_s0 + $0x78] sm:$0xff] }
  0xdf   :  { %777 = vmatprep.mubr.f32.mxu0 %v325_v41  ;;  %1389 = vmatprep.mubr.f32.mxu1 %v948_v62  ;;  %7333 = vst [vmem:[#allocation63_spill] sm:$0xff] %v5767_v28  ;;  %7334 = vst [vmem:[#allocation64_spill] sm:$0xff] %v5771_v18  ;;  %v259_v41 = vld [vmem:[%s7087_s4 + $0x730] sm:$0xff]  ;;  %v262_v62 = vld [vmem:[%s7087_s4 + $0x748] sm:$0xff] }
  0xe0   :  { %v5787_v36 = vpack.c.bf16 %v259_v41, %v257_v33  ;;  %v5791_v40 = vpack.c.bf16 %v264_v12, %v262_v62  ;;  %v268_v33 = vld [vmem:[%s7087_s4 + $0x778] sm:$0xff]  ;;  %v265_v12 = vld [vmem:[%s7087_s4 + $0x760] sm:$0xff] }
  0xe1   :  { %3113 = vmatpush1.bf16.msra.mxu0 %v5747_v54  ;;  %3401 = vmatpush1.bf16.msra.mxu1 %v5747_v54  ;;  %v291_v54 = vld [vmem:[%s7087_s4 + $0x830] sm:$0xff] }
  0xe2   :  { %3115 = vmatprep.subr.bf16.mxu0 %v5751_v56  ;;  %3403 = vmatprep.subr.bf16.mxu1 %v5751_v56  ;;  %7335 = vst [vmem:[#allocation65_spill] sm:$0xff] %v5787_v36  ;;  %7336 = vst [vmem:[#allocation66_spill] sm:$0xff] %v5791_v40  ;;  %v263_v56 = vld [vmem:[%s7087_s4 + $0x750] sm:$0xff] }
  0xe3   :  { %v5807_v41 = vpack.c.bf16 %v263_v56, %v261_v30  ;;  %v272_v56 = vld [vmem:[%s7087_s4 + $0x798] sm:$0xff] }
  0xe5   :  { %3117 = vmatpush1.bf16.msra.mxu0 %v5767_v28  ;;  %3405 = vmatpush1.bf16.msra.mxu1 %v5767_v28  ;;  %v266_v28 = vld [vmem:[%s7087_s4 + $0x768] sm:$0xff]  ;;  %7337 = vst [vmem:[#allocation67_spill] sm:$0xff] %v5807_v41 }
  0xe6   :  { %3119 = vmatprep.subr.bf16.mxu0 %v5771_v18  ;;  %3407 = vmatprep.subr.bf16.mxu1 %v5771_v18  ;;  %v5811_v62 = vpack.c.bf16 %v268_v33, %v266_v28  ;;  %v267_v18 = vld [vmem:[%s7087_s4 + $0x770] sm:$0xff]  ;;  %v269_v33 = vld [vmem:[%s7087_s4 + $0x780] sm:$0xff] }
  0xe7   :  { %v5827_v28 = vpack.c.bf16 %v267_v18, %v265_v12  ;;  %v276_v18 = vld [vmem:[%s7087_s4 + $0x7b8] sm:$0xff] }
  0xe8   :  { %7338 = vst [vmem:[#allocation68_spill] sm:$0xff] %v5811_v62 }
  0xe9   :  { %3121 = vmatpush1.bf16.msra.mxu0 %v5787_v36  ;;  %3409 = vmatpush1.bf16.msra.mxu1 %v5787_v36  ;;  %v270_v36 = vld [vmem:[%s7087_s4 + $0x788] sm:$0xff]  ;;  %7339 = vst [vmem:[#allocation69_spill] sm:$0xff] %v5827_v28 }
  0xea   :  { %3123 = vmatprep.subr.bf16.mxu0 %v5791_v40  ;;  %3411 = vmatprep.subr.bf16.mxu1 %v5791_v40  ;;  %v5831_v30 = vpack.c.bf16 %v272_v56, %v270_v36  ;;  %v271_v40 = vld [vmem:[%s7087_s4 + $0x790] sm:$0xff]  ;;  %v273_v56 = vld [vmem:[%s7087_s4 + $0x7a0] sm:$0xff] }
  0xeb   :  { %v5847_v36 = vpack.c.bf16 %v271_v40, %v269_v33  ;;  %v280_v40 = vld [vmem:[%s7087_s4 + $0x7d8] sm:$0xff] }
  0xec   :  { %7340 = vst [vmem:[#allocation70_spill] sm:$0xff] %v5831_v30 }
  0xed   :  { %3125 = vmatpush1.bf16.msra.mxu0 %v5807_v41  ;;  %3413 = vmatpush1.bf16.msra.mxu1 %v5807_v41  ;;  %v274_v41 = vld [vmem:[%s7087_s4 + $0x7a8] sm:$0xff]  ;;  %7341 = vst [vmem:[#allocation71_spill] sm:$0xff] %v5847_v36 }
  0xee   :  { %3127 = vmatprep.subr.bf16.mxu0 %v5811_v62  ;;  %3415 = vmatprep.subr.bf16.mxu1 %v5811_v62  ;;  %v5851_v12 = vpack.c.bf16 %v276_v18, %v274_v41  ;;  %v275_v62 = vld [vmem:[%s7087_s4 + $0x7b0] sm:$0xff]  ;;  %v277_v18 = vld [vmem:[%s7087_s4 + $0x7c0] sm:$0xff] }
  0xef   :  { %v5867_v41 = vpack.c.bf16 %v275_v62, %v273_v56  ;;  %v284_v62 = vld [vmem:[%s7087_s4 + $0x7f8] sm:$0xff] }
  0xf0   :  { %7342 = vst [vmem:[#allocation72_spill] sm:$0xff] %v5851_v12 }
  0xf1   :  { %3129 = vmatpush1.bf16.msra.mxu0 %v5827_v28  ;;  %3417 = vmatpush1.bf16.msra.mxu1 %v5827_v28  ;;  %v278_v28 = vld [vmem:[%s7087_s4 + $0x7c8] sm:$0xff]  ;;  %7343 = vst [vmem:[#allocation73_spill] sm:$0xff] %v5867_v41 }
  0xf2   :  { %3131 = vmatprep.subr.bf16.mxu0 %v5831_v30  ;;  %3419 = vmatprep.subr.bf16.mxu1 %v5831_v30  ;;  %v5871_v33 = vpack.c.bf16 %v280_v40, %v278_v28  ;;  %v279_v30 = vld [vmem:[%s7087_s4 + $0x7d0] sm:$0xff]  ;;  %v281_v40 = vld [vmem:[%s7087_s4 + $0x7e0] sm:$0xff] }
  0xf3   :  { %v5887_v28 = vpack.c.bf16 %v279_v30, %v277_v18  ;;  %v288_v30 = vld [vmem:[%s7087_s4 + $0x818] sm:$0xff] }
  0xf4   :  { %7344 = vst [vmem:[#allocation74_spill] sm:$0xff] %v5871_v33 }
  0xf5   :  { %3133 = vmatpush1.bf16.msra.mxu0 %v5847_v36  ;;  %3421 = vmatpush1.bf16.msra.mxu1 %v5847_v36  ;;  %v282_v36 = vld [vmem:[%s7087_s4 + $0x7e8] sm:$0xff]  ;;  %7345 = vst [vmem:[#allocation75_spill] sm:$0xff] %v5887_v28 }
  0xf6   :  { %3135 = vmatprep.subr.bf16.mxu0 %v5851_v12  ;;  %3423 = vmatprep.subr.bf16.mxu1 %v5851_v12  ;;  %v5891_v56 = vpack.c.bf16 %v284_v62, %v282_v36  ;;  %v283_v12 = vld [vmem:[%s7087_s4 + $0x7f0] sm:$0xff]  ;;  %v285_v62 = vld [vmem:[%s7087_s4 + $0x800] sm:$0xff] }
  0xf7   :  { %v5907_v36 = vpack.c.bf16 %v283_v12, %v281_v40  ;;  %v292_v12 = vld [vmem:[%s7087_s4 + $0x838] sm:$0xff] }
  0xf8   :  { %7346 = vst [vmem:[#allocation76_spill] sm:$0xff] %v5891_v56 }
  0xf9   :  { %3137 = vmatpush1.bf16.msra.mxu0 %v5867_v41  ;;  %3425 = vmatpush1.bf16.msra.mxu1 %v5867_v41  ;;  %v286_v41 = vld [vmem:[%s7087_s4 + $0x808] sm:$0xff]  ;;  %7347 = vst [vmem:[#allocation77_spill] sm:$0xff] %v5907_v36 }
  0xfa   :  { %3139 = vmatprep.subr.bf16.mxu0 %v5871_v33  ;;  %3427 = vmatprep.subr.bf16.mxu1 %v5871_v33  ;;  %v5911_v18 = vpack.c.bf16 %v288_v30, %v286_v41  ;;  %v287_v33 = vld [vmem:[%s7087_s4 + $0x810] sm:$0xff] }
  0xfb   :  { %v324_v41 = vld [vmem:[%s7088_s0 + $0x30] sm:$0xff]  ;;  %v5930_v40 = vpack.c.bf16 %v287_v33, %v285_v62  ;;  %v294_v33 = vld [vmem:[%s7087_s4 + $0x848] sm:$0xff]  ;;  %v296_v62 = vld [vmem:[%s7087_s4 + $0x858] sm:$0xff] }
  0xfc   :  { %7348 = vst [vmem:[#allocation78_spill] sm:$0xff] %v5911_v18  ;;  %v947_v30 = vld [vmem:[%s7089_s1 + $0x30] sm:$0xff] }
  0xfd   :  { %3141 = vmatpush1.bf16.msra.mxu0 %v5887_v28  ;;  %3429 = vmatpush1.bf16.msra.mxu1 %v5887_v28  ;;  %v290_v28 = vld [vmem:[%s7087_s4 + $0x828] sm:$0xff]  ;;  %7349 = vst [vmem:[#allocation79_spill] sm:$0xff] %v5930_v40 }
  0xfe   :  { %3143 = vmatprep.subr.bf16.mxu0 %v5891_v56  ;;  %3431 = vmatprep.subr.bf16.mxu1 %v5891_v56  ;;  %v5937_v56 = vpack.c.bf16 %v292_v12, %v290_v28  ;;  %v334_v28 = vld [vmem:[%s7088_s0 + $0x80] sm:$0xff] }
  0xff   :  { %v957_v12 = vld [vmem:[%s7089_s1 + $0x80] sm:$0xff] }
 0x100   :  { %7350 = vst [vmem:[#allocation80_spill] sm:$0xff] %v5937_v56 }
 0x101   :  { %3145 = vmatpush1.bf16.msra.mxu0 %v5907_v36  ;;  %3433 = vmatpush1.bf16.msra.mxu1 %v5907_v36  ;;  %v289_v36 = vld [vmem:[%s7087_s4 + $0x820] sm:$0xff] }
 0x102   :  { %3147 = vmatprep.subr.bf16.mxu0 %v5911_v18  ;;  %3435 = vmatprep.subr.bf16.mxu1 %v5911_v18  ;;  %v5959_v18 = vpack.c.bf16 %v291_v54, %v289_v36  ;;  %v295_v54 = vld [vmem:[%s7087_s4 + $0x850] sm:$0xff]  ;;  %v298_v36 = vld [vmem:[%s7087_s4 + $0x868] sm:$0xff] }
 0x104   :  { %778 = vmatmul.mubr.f32.vlgmr.msra.gmra.mrb[0].mxu0 %v324_v41  ;;  %1390 = vmatmul.mubr.f32.vlgmr.msra.gmra.mrb[0].mxu1 %v947_v30  ;;  %7351 = vst [vmem:[#allocation81_spill] sm:$0xff] %v5959_v18  ;;  %v956_v41 = vld [vmem:[%s7089_s1 + $0x78] sm:$0xff]  ;;  %v5969_v30 = vpack.c.bf16 %v296_v62, %v294_v33  ;;  %v343_v33 = vld [vmem:[%s7088_s0 + $0xc8] sm:$0xff] }
 0x105   :  { %3149 = vmatpush1.bf16.msra.mxu0 %v5930_v40  ;;  %3437 = vmatpush1.bf16.msra.mxu1 %v5930_v40  ;;  %v293_v40 = vld [vmem:[%s7087_s4 + $0x840] sm:$0xff]  ;;  %v966_v62 = vld [vmem:[%s7089_s1 + $0xc8] sm:$0xff] }
 0x106   :  { %3151 = vmatprep.subr.bf16.mxu0 %v5937_v56  ;;  %3439 = vmatprep.subr.bf16.mxu1 %v5937_v56  ;;  %7352 = vst [vmem:[#allocation82_spill] sm:$0xff] %v5969_v30  ;;  %v300_v56 = vld [vmem:[%s7087_s4 + $0x878] sm:$0xff] }
 0x107   :  { %783 = vmatprep.mubr.f32.mxu0 %v334_v28  ;;  %1395 = vmatprep.mubr.f32.mxu1 %v957_v12  ;;  %v5991_v28 = vpack.c.bf16 %v295_v54, %v293_v40  ;;  %v342_v12 = vld [vmem:[%s7088_s0 + $0xc0] sm:$0xff]  ;;  %v299_v40 = vld [vmem:[%s7087_s4 + $0x870] sm:$0xff]  ;;  %v302_v54 = vld [vmem:[%s7087_s4 + $0x888] sm:$0xff] }
 0x108   :  { %784 = vmatmul.mubr.f32.gmra.mrb[2].mxu0 %v333_v10  ;;  %1396 = vmatmul.mubr.f32.gmra.mrb[2].mxu1 %v956_v41  ;;  %v965_v10 = vld [vmem:[%s7089_s1 + $0xc0] sm:$0xff]  ;;  %v6001_v41 = vpack.c.bf16 %v300_v56, %v298_v36  ;;  %v352_v56 = vld [vmem:[%s7088_s0 + $0x110] sm:$0xff] }
 0x109   :  { %3153 = vmatpush1.bf16.msra.mxu0 %v5959_v18  ;;  %3441 = vmatpush1.bf16.msra.mxu1 %v5959_v18  ;;  %7353 = vst [vmem:[#allocation83_spill] sm:$0xff] %v5991_v28  ;;  %v297_v18 = vld [vmem:[%s7087_s4 + $0x860] sm:$0xff]  ;;  %v975_v36 = vld [vmem:[%s7089_s1 + $0x110] sm:$0xff] }
 0x10a   :  { %3155 = vmatprep.subr.bf16.mxu0 %v5969_v30  ;;  %3443 = vmatprep.subr.bf16.mxu1 %v5969_v30  ;;  %7354 = vst [vmem:[#allocation84_spill] sm:$0xff] %v6001_v41  ;;  %v304_v30 = vld [vmem:[%s7087_s4 + $0x898] sm:$0xff] }
 0x10b   :  { %789 = vmatprep.mubr.f32.mxu0 %v343_v33  ;;  %1401 = vmatprep.mubr.f32.mxu1 %v966_v62  ;;  %v6023_v33 = vpack.c.bf16 %v299_v40, %v297_v18  ;;  %v351_v62 = vld [vmem:[%s7088_s0 + $0x108] sm:$0xff]  ;;  %v303_v18 = vld [vmem:[%s7087_s4 + $0x890] sm:$0xff] }
 0x10c   :  { %790 = vmatmul.mubr.f32.gmra.mrb[4].mxu0 %v342_v12  ;;  %1402 = vmatmul.mubr.f32.gmra.mrb[4].mxu1 %v965_v10  ;;  %v974_v12 = vld [vmem:[%s7089_s1 + $0x108] sm:$0xff]  ;;  %v6033_v10 = vpack.c.bf16 %v304_v30, %v302_v54  ;;  %v361_v30 = vld [vmem:[%s7088_s0 + $0x158] sm:$0xff] }
 0x10d   :  { %3157 = vmatpush1.bf16.msra.mxu0 %v5991_v28  ;;  %3445 = vmatpush1.bf16.msra.mxu1 %v5991_v28  ;;  %7355 = vst [vmem:[#allocation85_spill] sm:$0xff] %v6023_v33  ;;  %v301_v28 = vld [vmem:[%s7087_s4 + $0x880] sm:$0xff]  ;;  %v306_v40 = vld [vmem:[%s7087_s4 + $0x8a8] sm:$0xff]  ;;  %v984_v54 = vld [vmem:[%s7089_s1 + $0x158] sm:$0xff] }
 0x10e   :  { %3159 = vmatprep.subr.bf16.mxu0 %v6001_v41  ;;  %3447 = vmatprep.subr.bf16.mxu1 %v6001_v41  ;;  %7356 = vst [vmem:[#allocation86_spill] sm:$0xff] %v6033_v10  ;;  %v308_v41 = vld [vmem:[%s7087_s4 + $0x8b8] sm:$0xff] }
 0x10f   :  { %795 = vmatprep.mubr.f32.mxu0 %v352_v56  ;;  %1407 = vmatprep.mubr.f32.mxu1 %v975_v36  ;;  %v6055_v56 = vpack.c.bf16 %v303_v18, %v301_v28  ;;  %v360_v36 = vld [vmem:[%s7088_s0 + $0x150] sm:$0xff]  ;;  %v310_v18 = vld [vmem:[%s7087_s4 + $0x8c8] sm:$0xff] }
 0x110   :  { %796 = vmatmul.mubr.f32.gmra.mrb[6].mxu0 %v351_v62  ;;  %1408 = vmatmul.mubr.f32.gmra.mrb[6].mxu1 %v974_v12  ;;  %v983_v62 = vld [vmem:[%s7089_s1 + $0x150] sm:$0xff]  ;;  %v6065_v12 = vpack.c.bf16 %v308_v41, %v306_v40  ;;  %v370_v41 = vld [vmem:[%s7088_s0 + $0x1a0] sm:$0xff] }
 0x111   :  { %3161 = vmatpush1.bf16.msra.mxu0 %v6023_v33  ;;  %3449 = vmatpush1.bf16.msra.mxu1 %v6023_v33  ;;  %7357 = vst [vmem:[#allocation87_spill] sm:$0xff] %v6055_v56  ;;  %v305_v33 = vld [vmem:[%s7087_s4 + $0x8a0] sm:$0xff]  ;;  %v307_v28 = vld [vmem:[%s7087_s4 + $0x8b0] sm:$0xff] }
 0x112   :  { %3163 = vmatprep.subr.bf16.mxu0 %v6033_v10  ;;  %3451 = vmatprep.subr.bf16.mxu1 %v6033_v10  ;;  %7358 = vst [vmem:[#allocation88_spill] sm:$0xff] %v6065_v12  ;;  %v312_v10 = vld [vmem:[%s7087_s4 + $0x8d8] sm:$0xff]  ;;  %v993_v40 = vld [vmem:[%s7089_s1 + $0x1a0] sm:$0xff] }
 0x113   :  { %801 = vmatprep.mubr.f32.mxu0 %v361_v30  ;;  %1413 = vmatprep.mubr.f32.mxu1 %v984_v54  ;;  %v6087_v30 = vpack.c.bf16 %v307_v28, %v305_v33  ;;  %v369_v54 = vld [vmem:[%s7088_s0 + $0x198] sm:$0xff]  ;;  %v311_v33 = vld [vmem:[%s7087_s4 + $0x8d0] sm:$0xff]  ;;  %v314_v28 = vld [vmem:[%s7087_s4 + $0x8e8] sm:$0xff] }
 0x114   :  { %802 = vmatmul.mubr.f32.gmra.mrb[8].mxu0 %v360_v36  ;;  %1414 = vmatmul.mubr.f32.gmra.mrb[8].mxu1 %v983_v62  ;;  %v992_v36 = vld [vmem:[%s7089_s1 + $0x198] sm:$0xff]  ;;  %v6097_v62 = vpack.c.bf16 %v312_v10, %v310_v18  ;;  %v379_v10 = vld [vmem:[%s7088_s0 + $0x1e8] sm:$0xff] }
 0x115   :  { %3165 = vmatpush1.bf16.msra.mxu0 %v6055_v56  ;;  %3453 = vmatpush1.bf16.msra.mxu1 %v6055_v56  ;;  %7359 = vst [vmem:[#allocation89_spill] sm:$0xff] %v6087_v30  ;;  %v309_v56 = vld [vmem:[%s7087_s4 + $0x8c0] sm:$0xff]  ;;  %v1002_v18 = vld [vmem:[%s7089_s1 + $0x1e8] sm:$0xff] }
 0x116   :  { %3167 = vmatprep.subr.bf16.mxu0 %v6065_v12  ;;  %3455 = vmatprep.subr.bf16.mxu1 %v6065_v12  ;;  %v316_v12 = vld [vmem:[%s7087_s4 + $0x8f8] sm:$0xff] }
 0x117   :  { %807 = vmatprep.mubr.f32.mxu0 %v370_v41  ;;  %1419 = vmatprep.mubr.f32.mxu1 %v993_v40  ;;  %v6119_v41 = vpack.c.bf16 %v311_v33, %v309_v56  ;;  %v378_v40 = vld [vmem:[%s7088_s0 + $0x1e0] sm:$0xff]  ;;  %v315_v56 = vld [vmem:[%s7087_s4 + $0x8f0] sm:$0xff] }
 0x118   :  { %808 = vmatmul.mubr.f32.gmra.mrb[10].mxu0 %v369_v54  ;;  %1420 = vmatmul.mubr.f32.gmra.mrb[10].mxu1 %v992_v36  ;;  %v1001_v54 = vld [vmem:[%s7089_s1 + $0x1e0] sm:$0xff]  ;;  %v6129_v36 = vpack.c.bf16 %v316_v12, %v314_v28  ;;  %v4323_v12 = vmov 0.0  }
 0x119   :  { %3169 = vmatpush1.bf16.msra.mxu0 %v6087_v30  ;;  %3457 = vmatpush1.bf16.msra.mxu1 %v6087_v30  ;;  %v313_v30 = vld [vmem:[%s7087_s4 + $0x8e0] sm:$0xff] }
 0x11a   :  { %3171 = vmatprep.subr.bf16.mxu0 %v6097_v62  ;;  %3459 = vmatprep.subr.bf16.mxu1 %v6097_v62  ;;  %v6139_v33 = vpack.c.bf16 %v315_v56, %v313_v30  ;;  %v326_v28 = vld [vmem:[%s7088_s0 + $0x40] sm:$0xff]  ;;  %v1569_v56 = vld [vmem:[%s7090_s2 + $0x10] sm:$0xff] }
 0x11b   :  { %813 = vmatprep.mubr.f32.mxu0 %v379_v10  ;;  %1425 = vmatprep.mubr.f32.mxu1 %v1002_v18  ;;  %v949_v30 = vld [vmem:[%s7089_s1 + $0x40] sm:$0xff]  ;;  %v335_v10 = vld [vmem:[%s7088_s0 + $0x88] sm:$0xff] }
 0x11c   :  { %814 = vmatmul.mubr.f32.gmra.mrb[12].mxu0 %v378_v40  ;;  %1426 = vmatmul.mubr.f32.gmra.mrb[12].mxu1 %v1001_v54  ;;  %v958_v18 = vld [vmem:[%s7089_s1 + $0x88] sm:$0xff]  ;;  %v7371_v40 = vld [vmem:[#allocation13_spill] sm:$0xff]  ;;  %v7372_v54 = vld [vmem:[#allocation14_spill] sm:$0xff] }
 0x11d   :  { %3173 = vmatpush1.bf16.msra.mxu0 %v6119_v41  ;;  %3461 = vmatpush1.bf16.msra.mxu1 %v6119_v41 }
 0x11e   :  { %3175 = vmatprep.subr.bf16.mxu0 %v6129_v36  ;;  %3463 = vmatprep.subr.bf16.mxu1 %v6129_v36 }
 0x11f   :  { %884 = vmatprep.mubr.f32.mxu0 %v4323_v12  ;;  %1496 = vmatprep.mubr.f32.mxu1 %v4323_v12 }
 0x121   :  { %3177 = vmatpush1.bf16.msra.mxu0 %v6139_v33  ;;  %3465 = vmatpush1.bf16.msra.mxu1 %v6139_v33 }
 0x122   :  { %3467 = vmatprep.subr.bf16.mxu0 %v4378_v3  ;;  %3755 = vmatprep.subr.bf16.mxu1 %v4378_v3  ;;  %v344_v3 = vld [vmem:[%s7088_s0 + $0xd0] sm:$0xff] }
 0x124   :  { %885 = vmatmul.mubr.f32.vlgmr.msra.gmra.mrb[0].mxu0 %v326_v28  ;;  %1497 = vmatmul.mubr.f32.vlgmr.msra.gmra.mrb[0].mxu1 %v949_v30  ;;  %v2181_v28 = vld [vmem:[%s7091_s3 + $0x10] sm:$0xff]  ;;  %v7373_v30 = vld [vmem:[#allocation15_spill] sm:$0xff] }
 0x125   :  { %3469 = vmatpush1.bf16.msra.mxu0 %v4389_v7  ;;  %3757 = vmatpush1.bf16.msra.mxu1 %v4389_v7  ;;  %v967_v7 = vld [vmem:[%s7089_s1 + $0xd0] sm:$0xff] }
 0x126   :  { %890 = vmatprep.mubr.f32.mxu0 %v4323_v12  ;;  %1502 = vmatprep.mubr.f32.mxu1 %v4323_v12 }
 0x127   :  { %3471 = vmatprep.subr.bf16.mxu0 %v4391_v8  ;;  %3759 = vmatprep.subr.bf16.mxu1 %v4391_v8  ;;  %v353_v8 = vld [vmem:[%s7088_s0 + $0x118] sm:$0xff] }
 0x128   :  { %891 = vmatmul.mubr.f32.gmra.mrb[2].mxu0 %v335_v10  ;;  %1503 = vmatmul.mubr.f32.gmra.mrb[2].mxu1 %v958_v18  ;;  %v1579_v10 = vld [vmem:[%s7090_s2 + $0x60] sm:$0xff] }
 0x129   :  { %3473 = vmatpush1.bf16.msra.mxu0 %v4409_v13  ;;  %3761 = vmatpush1.bf16.msra.mxu1 %v4409_v13  ;;  %v976_v13 = vld [vmem:[%s7089_s1 + $0x118] sm:$0xff]  ;;  %v2191_v18 = vld [vmem:[%s7091_s3 + $0x60] sm:$0xff] }
 0x12a   :  { %896 = vmatprep.mubr.f32.mxu0 %v4323_v12  ;;  %1508 = vmatprep.mubr.f32.mxu1 %v4323_v12 }
 0x12b   :  { %3475 = vmatprep.subr.bf16.mxu0 %v4413_v14  ;;  %3763 = vmatprep.subr.bf16.mxu1 %v4413_v14  ;;  %v362_v14 = vld [vmem:[%s7088_s0 + $0x160] sm:$0xff] }
 0x12c   :  { %897 = vmatmul.mubr.f32.gmra.mrb[4].mxu0 %v344_v3  ;;  %1509 = vmatmul.mubr.f32.gmra.mrb[4].mxu1 %v967_v7  ;;  %v7374_v3 = vld [vmem:[#allocation16_spill] sm:$0xff]  ;;  %v1578_v7 = vld [vmem:[%s7090_s2 + $0x58] sm:$0xff] }
 0x12d   :  { %3477 = vmatpush1.bf16.msra.mxu0 %v4429_v19  ;;  %3765 = vmatpush1.bf16.msra.mxu1 %v4429_v19  ;;  %v985_v19 = vld [vmem:[%s7089_s1 + $0x160] sm:$0xff] }
 0x12e   :  { %902 = vmatprep.mubr.f32.mxu0 %v4323_v12  ;;  %1514 = vmatprep.mubr.f32.mxu1 %v4323_v12 }
 0x12f   :  { %3479 = vmatprep.subr.bf16.mxu0 %v4433_v20  ;;  %3767 = vmatprep.subr.bf16.mxu1 %v4433_v20  ;;  %v371_v20 = vld [vmem:[%s7088_s0 + $0x1a8] sm:$0xff] }
 0x130   :  { %903 = vmatmul.mubr.f32.gmra.mrb[6].mxu0 %v353_v8  ;;  %1515 = vmatmul.mubr.f32.gmra.mrb[6].mxu1 %v976_v13  ;;  %v2190_v8 = vld [vmem:[%s7091_s3 + $0x58] sm:$0xff] }
 0x131   :  { %3481 = vmatpush1.bf16.msra.mxu0 %v4449_v25  ;;  %3769 = vmatpush1.bf16.msra.mxu1 %v4449_v25  ;;  %v994_v25 = vld [vmem:[%s7089_s1 + $0x1a8] sm:$0xff]  ;;  %v7375_v13 = vld [vmem:[#allocation17_spill] sm:$0xff] }
 0x132   :  { %908 = vmatprep.mubr.f32.mxu0 %v4323_v12  ;;  %1520 = vmatprep.mubr.f32.mxu1 %v4323_v12 }
 0x133   :  { %3483 = vmatprep.subr.bf16.mxu0 %v4453_v26  ;;  %3771 = vmatprep.subr.bf16.mxu1 %v4453_v26  ;;  %v380_v26 = vld [vmem:[%s7088_s0 + $0x1f0] sm:$0xff] }
 0x134   :  { %909 = vmatmul.mubr.f32.gmra.mrb[8].mxu0 %v362_v14  ;;  %1521 = vmatmul.mubr.f32.gmra.mrb[8].mxu1 %v985_v19  ;;  %v1588_v14 = vld [vmem:[%s7090_s2 + $0xa8] sm:$0xff] }
 0x135   :  { %3485 = vmatpush1.bf16.msra.mxu0 %v4469_v31  ;;  %3773 = vmatpush1.bf16.msra.mxu1 %v4469_v31  ;;  %v1003_v31 = vld [vmem:[%s7089_s1 + $0x1f0] sm:$0xff]  ;;  %v2200_v19 = vld [vmem:[%s7091_s3 + $0xa8] sm:$0xff] }
 0x136   :  { %914 = vmatprep.mubr.f32.mxu0 %v4323_v12  ;;  %1526 = vmatprep.mubr.f32.mxu1 %v4323_v12 }
 0x137   :  { %3487 = vmatprep.subr.bf16.mxu0 %v4473_v32  ;;  %3775 = vmatprep.subr.bf16.mxu1 %v4473_v32  ;;  %v1568_v32 = vld [vmem:[%s7090_s2 + $0x8] sm:$0xff] }
 0x138   :  { %915 = vmatmul.mubr.f32.gmra.mrb[10].mxu0 %v371_v20  ;;  %1527 = vmatmul.mubr.f32.gmra.mrb[10].mxu1 %v994_v25  ;;  %v7376_v20 = vld [vmem:[#allocation18_spill] sm:$0xff] }
 0x139   :  { %3489 = vmatpush1.bf16.msra.mxu0 %v4489_v37  ;;  %3777 = vmatpush1.bf16.msra.mxu1 %v4489_v37  ;;  %v2180_v37 = vld [vmem:[%s7091_s3 + $0x8] sm:$0xff]  ;;  %v1587_v25 = vld [vmem:[%s7090_s2 + $0xa0] sm:$0xff] }
 0x13a   :  { %920 = vmatprep.mubr.f32.mxu0 %v4323_v12  ;;  %1532 = vmatprep.mubr.f32.mxu1 %v4323_v12 }
 0x13b   :  { %3491 = vmatprep.subr.bf16.mxu0 %v4493_v38  ;;  %3779 = vmatprep.subr.bf16.mxu1 %v4493_v38  ;;  %v1567_v38 = vld [vmem:[%s7090_s2] sm:$0xff] }
 0x13c   :  { %921 = vmatmul.mubr.f32.gmra.mrb[12].mxu0 %v380_v26  ;;  %1533 = vmatmul.mubr.f32.gmra.mrb[12].mxu1 %v1003_v31  ;;  %v2199_v26 = vld [vmem:[%s7091_s3 + $0xa0] sm:$0xff]  ;;  %v7377_v31 = vld [vmem:[#allocation19_spill] sm:$0xff] }
 0x13d   :  { %3493 = vmatpush1.bf16.msra.mxu0 %v4515_v45  ;;  %3781 = vmatpush1.bf16.msra.mxu1 %v4515_v45  ;;  %v2179_v45 = vld [vmem:[%s7091_s3] sm:$0xff] }
 0x13e   :  { %3495 = vmatprep.subr.bf16.mxu0 %v4519_v46  ;;  %3783 = vmatprep.subr.bf16.mxu1 %v4519_v46  ;;  %v1577_v46 = vld [vmem:[%s7090_s2 + $0x50] sm:$0xff] }
 0x13f   :  { %1694 = vmatprep.mubr.f32.mxu0 %v1568_v32  ;;  %2306 = vmatprep.mubr.f32.mxu1 %v2180_v37  ;;  %v1597_v32 = vld [vmem:[%s7090_s2 + $0xf0] sm:$0xff] }
 0x140   :  { %v2209_v37 = vld [vmem:[%s7091_s3 + $0xf0] sm:$0xff] }
 0x141   :  { %3497 = vmatpush1.bf16.msra.mxu0 %v4535_v51  ;;  %3785 = vmatpush1.bf16.msra.mxu1 %v4535_v51  ;;  %v2189_v51 = vld [vmem:[%s7091_s3 + $0x50] sm:$0xff] }
 0x142   :  { %3499 = vmatprep.subr.bf16.mxu0 %v4539_v52  ;;  %3787 = vmatprep.subr.bf16.mxu1 %v4539_v52  ;;  %v1576_v52 = vld [vmem:[%s7090_s2 + $0x48] sm:$0xff] }
 0x145   :  { %3501 = vmatpush1.bf16.msra.mxu0 %v4555_v57  ;;  %3789 = vmatpush1.bf16.msra.mxu1 %v4555_v57  ;;  %v2188_v57 = vld [vmem:[%s7091_s3 + $0x48] sm:$0xff] }
 0x146   :  { %3503 = vmatprep.subr.bf16.mxu0 %v4559_v58  ;;  %3791 = vmatprep.subr.bf16.mxu1 %v4559_v58  ;;  %v1586_v58 = vld [vmem:[%s7090_s2 + $0x98] sm:$0xff] }
 0x149   :  { %3505 = vmatpush1.bf16.msra.mxu0 %v4575_v63  ;;  %3793 = vmatpush1.bf16.msra.mxu1 %v4575_v63  ;;  %v2198_v63 = vld [vmem:[%s7091_s3 + $0x98] sm:$0xff] }
 0x14a   :  { %3507 = vmatprep.subr.bf16.mxu0 %v4579_v0  ;;  %3795 = vmatprep.subr.bf16.mxu1 %v4579_v0  ;;  %v1585_v0 = vld [vmem:[%s7090_s2 + $0x90] sm:$0xff] }
 0x14d   :  { %3509 = vmatpush1.bf16.msra.mxu0 %v4595_v6  ;;  %3797 = vmatpush1.bf16.msra.mxu1 %v4595_v6  ;;  %v2197_v6 = vld [vmem:[%s7091_s3 + $0x90] sm:$0xff] }
 0x14e   :  { %3511 = vmatprep.subr.bf16.mxu0 %v4599_v9  ;;  %3799 = vmatprep.subr.bf16.mxu1 %v4599_v9  ;;  %v1595_v9 = vld [vmem:[%s7090_s2 + $0xe0] sm:$0xff] }
 0x151   :  { %3513 = vmatpush1.bf16.msra.mxu0 %v4615_v16  ;;  %3801 = vmatpush1.bf16.msra.mxu1 %v4615_v16  ;;  %v2207_v16 = vld [vmem:[%s7091_s3 + $0xe0] sm:$0xff] }
 0x152   :  { %3515 = vmatprep.subr.bf16.mxu0 %v4619_v17  ;;  %3803 = vmatprep.subr.bf16.mxu1 %v4619_v17  ;;  %v1594_v17 = vld [vmem:[%s7090_s2 + $0xd8] sm:$0xff] }
 0x155   :  { %3517 = vmatpush1.bf16.msra.mxu0 %v4635_v24  ;;  %3805 = vmatpush1.bf16.msra.mxu1 %v4635_v24  ;;  %v2206_v24 = vld [vmem:[%s7091_s3 + $0xd8] sm:$0xff] }
 0x156   :  { %3519 = vmatprep.subr.bf16.mxu0 %v4639_v27  ;;  %3807 = vmatprep.subr.bf16.mxu1 %v4639_v27  ;;  %v1604_v27 = vld [vmem:[%s7090_s2 + $0x128] sm:$0xff] }
 0x159   :  { %3521 = vmatpush1.bf16.msra.mxu0 %v4655_v34  ;;  %3809 = vmatpush1.bf16.msra.mxu1 %v4655_v34  ;;  %v2216_v34 = vld [vmem:[%s7091_s3 + $0x128] sm:$0xff] }
 0x15a   :  { %3523 = vmatprep.subr.bf16.mxu0 %v4659_v35  ;;  %3811 = vmatprep.subr.bf16.mxu1 %v4659_v35  ;;  %v1603_v35 = vld [vmem:[%s7090_s2 + $0x120] sm:$0xff] }
 0x15d   :  { %3525 = vmatpush1.bf16.msra.mxu0 %v4675_v42  ;;  %3813 = vmatpush1.bf16.msra.mxu1 %v4675_v42  ;;  %v2215_v42 = vld [vmem:[%s7091_s3 + $0x120] sm:$0xff] }
 0x15e   :  { %3527 = vmatprep.subr.bf16.mxu0 %v4679_v43  ;;  %3815 = vmatprep.subr.bf16.mxu1 %v4679_v43  ;;  %v1613_v43 = vld [vmem:[%s7090_s2 + $0x170] sm:$0xff] }
 0x161   :  { %3529 = vmatpush1.bf16.msra.mxu0 %v4695_v50  ;;  %3817 = vmatpush1.bf16.msra.mxu1 %v4695_v50  ;;  %v2225_v50 = vld [vmem:[%s7091_s3 + $0x170] sm:$0xff] }
 0x162   :  { %3531 = vmatprep.subr.bf16.mxu0 %v4699_v53  ;;  %3819 = vmatprep.subr.bf16.mxu1 %v4699_v53  ;;  %v1612_v53 = vld [vmem:[%s7090_s2 + $0x168] sm:$0xff] }
 0x164   :  { %1695 = vmatmul.mubr.f32.vlgmr.msra.gmra.mrb[14].mxu0 %v1567_v38  ;;  %2307 = vmatmul.mubr.f32.vlgmr.msra.gmra.mrb[14].mxu1 %v2179_v45  ;;  %v7378_v38 = vld [vmem:[#allocation20_spill] sm:$0xff]  ;;  %v1596_v45 = vld [vmem:[%s7090_s2 + $0xe8] sm:$0xff] }
 0x165   :  { %3533 = vmatpush1.bf16.msra.mxu0 %v4718_v61  ;;  %3821 = vmatpush1.bf16.msra.mxu1 %v4718_v61  ;;  %v2224_v61 = vld [vmem:[%s7091_s3 + $0x168] sm:$0xff] }
 0x166   :  { %3535 = vmatprep.subr.bf16.mxu0 %v4725_v1  ;;  %3823 = vmatprep.subr.bf16.mxu1 %v4725_v1  ;;  %v1622_v1 = vld [vmem:[%s7090_s2 + $0x1b8] sm:$0xff] }
 0x167   :  { %1700 = vmatprep.mubr.f32.mxu0 %v1577_v46  ;;  %2312 = vmatprep.mubr.f32.mxu1 %v2189_v51  ;;  %v2208_v46 = vld [vmem:[%s7091_s3 + $0xe8] sm:$0xff]  ;;  %v7379_v51 = vld [vmem:[#allocation21_spill] sm:$0xff] }
 0x168   :  { %1701 = vmatmul.mubr.f32.gmra.mrb[16].mxu0 %v1576_v52  ;;  %2313 = vmatmul.mubr.f32.gmra.mrb[16].mxu1 %v2188_v57  ;;  %v1606_v52 = vld [vmem:[%s7090_s2 + $0x138] sm:$0xff] }
 0x169   :  { %3537 = vmatpush1.bf16.msra.mxu0 %v4747_v15  ;;  %3825 = vmatpush1.bf16.msra.mxu1 %v4747_v15  ;;  %v2234_v15 = vld [vmem:[%s7091_s3 + $0x1b8] sm:$0xff] }
 0x16a   :  { %3539 = vmatprep.subr.bf16.mxu0 %v4757_v22  ;;  %3827 = vmatprep.subr.bf16.mxu1 %v4757_v22  ;;  %v1621_v22 = vld [vmem:[%s7090_s2 + $0x1b0] sm:$0xff]  ;;  %v2218_v57 = vld [vmem:[%s7091_s3 + $0x138] sm:$0xff] }
 0x16b   :  { %1706 = vmatprep.mubr.f32.mxu0 %v1586_v58  ;;  %2318 = vmatprep.mubr.f32.mxu1 %v2198_v63  ;;  %v7380_v58 = vld [vmem:[#allocation22_spill] sm:$0xff]  ;;  %v1605_v63 = vld [vmem:[%s7090_s2 + $0x130] sm:$0xff] }
 0x16c   :  { %1707 = vmatmul.mubr.f32.gmra.mrb[18].mxu0 %v1585_v0  ;;  %2319 = vmatmul.mubr.f32.gmra.mrb[18].mxu1 %v2197_v6  ;;  %v2217_v0 = vld [vmem:[%s7091_s3 + $0x130] sm:$0xff]  ;;  %v7381_v6 = vld [vmem:[#allocation23_spill] sm:$0xff] }
 0x16d   :  { %3541 = vmatpush1.bf16.msra.mxu0 %v4779_v39  ;;  %3829 = vmatpush1.bf16.msra.mxu1 %v4779_v39  ;;  %v2233_v39 = vld [vmem:[%s7091_s3 + $0x1b0] sm:$0xff] }
 0x16e   :  { %3543 = vmatprep.subr.bf16.mxu0 %v4789_v44  ;;  %3831 = vmatprep.subr.bf16.mxu1 %v4789_v44  ;;  %v1570_v44 = vld [vmem:[%s7090_s2 + $0x18] sm:$0xff] }
 0x16f   :  { %1712 = vmatprep.mubr.f32.mxu0 %v1595_v9  ;;  %2324 = vmatprep.mubr.f32.mxu1 %v2207_v16  ;;  %v1615_v9 = vld [vmem:[%s7090_s2 + $0x180] sm:$0xff] }
 0x170   :  { %1713 = vmatmul.mubr.f32.gmra.mrb[20].mxu0 %v1594_v17  ;;  %2325 = vmatmul.mubr.f32.gmra.mrb[20].mxu1 %v2206_v24  ;;  %v2227_v16 = vld [vmem:[%s7091_s3 + $0x180] sm:$0xff]  ;;  %v7382_v17 = vld [vmem:[#allocation24_spill] sm:$0xff]  ;;  %v1614_v24 = vld [vmem:[%s7090_s2 + $0x178] sm:$0xff] }
 0x171   :  { %3545 = vmatpush1.bf16.msra.mxu0 %v4811_v59  ;;  %3833 = vmatpush1.bf16.msra.mxu1 %v4811_v59  ;;  %v2182_v59 = vld [vmem:[%s7091_s3 + $0x18] sm:$0xff] }
 0x172   :  { %3547 = vmatprep.subr.bf16.mxu0 %v4821_v2  ;;  %3835 = vmatprep.subr.bf16.mxu1 %v4821_v2  ;;  %v7360_v2 = vld [vmem:[#allocation2_spill] sm:$0xff] }
 0x173   :  { %1718 = vmatprep.mubr.f32.mxu0 %v1604_v27  ;;  %2330 = vmatprep.mubr.f32.mxu1 %v2216_v34  ;;  %v2226_v27 = vld [vmem:[%s7091_s3 + $0x178] sm:$0xff] }
 0x174   :  { %1719 = vmatmul.mubr.f32.gmra.mrb[22].mxu0 %v1603_v35  ;;  %2331 = vmatmul.mubr.f32.gmra.mrb[22].mxu1 %v2215_v42  ;;  %v7383_v34 = vld [vmem:[#allocation25_spill] sm:$0xff]  ;;  %v1624_v35 = vld [vmem:[%s7090_s2 + $0x1c8] sm:$0xff] }
 0x175   :  { %3549 = vmatpush1.bf16.msra.mxu0 %v4843_v21  ;;  %3837 = vmatpush1.bf16.msra.mxu1 %v4843_v21  ;;  %v7361_v21 = vld [vmem:[#allocation3_spill] sm:$0xff] }
 0x176   :  { %3551 = vmatprep.subr.bf16.mxu0 %v4853_v29  ;;  %3839 = vmatprep.subr.bf16.mxu1 %v4853_v29  ;;  %v7362_v29 = vld [vmem:[#allocation4_spill] sm:$0xff]  ;;  %v2236_v42 = vld [vmem:[%s7091_s3 + $0x1c8] sm:$0xff] }
 0x177   :  { %1724 = vmatprep.mubr.f32.mxu0 %v1613_v43  ;;  %2336 = vmatprep.mubr.f32.mxu1 %v2225_v50  ;;  %v7384_v43 = vld [vmem:[#allocation26_spill] sm:$0xff] }
 0x178   :  { %1725 = vmatmul.mubr.f32.gmra.mrb[24].mxu0 %v1612_v53  ;;  %2337 = vmatmul.mubr.f32.gmra.mrb[24].mxu1 %v2224_v61  ;;  %v1623_v50 = vld [vmem:[%s7090_s2 + $0x1c0] sm:$0xff]  ;;  %v7385_v61 = vld [vmem:[#allocation27_spill] sm:$0xff] }
 0x179   :  { %3553 = vmatpush1.bf16.msra.mxu0 %v4875_v48  ;;  %3841 = vmatpush1.bf16.msra.mxu1 %v4875_v48  ;;  %v7363_v48 = vld [vmem:[#allocation5_spill] sm:$0xff]  ;;  %v2235_v53 = vld [vmem:[%s7091_s3 + $0x1c0] sm:$0xff] }
 0x17a   :  { %3555 = vmatprep.subr.bf16.mxu0 %v4885_v55  ;;  %3843 = vmatprep.subr.bf16.mxu1 %v4885_v55  ;;  %v7364_v55 = vld [vmem:[#allocation6_spill] sm:$0xff] }
 0x17b   :  { %1730 = vmatprep.mubr.f32.mxu0 %v1622_v1  ;;  %2342 = vmatprep.mubr.f32.mxu1 %v2234_v15  ;;  %v1572_v1 = vld [vmem:[%s7090_s2 + $0x28] sm:$0xff] }
 0x17c   :  { %1731 = vmatmul.mubr.f32.gmra.mrb[26].mxu0 %v1621_v22  ;;  %2343 = vmatmul.mubr.f32.gmra.mrb[26].mxu1 %v2233_v39  ;;  %v2184_v15 = vld [vmem:[%s7091_s3 + $0x28] sm:$0xff]  ;;  %v7386_v22 = vld [vmem:[#allocation28_spill] sm:$0xff]  ;;  %v7387_v39 = vld [vmem:[#allocation29_spill] sm:$0xff] }
 0x17d   :  { %3557 = vmatpush1.bf16.msra.mxu0 %v4907_v11  ;;  %3845 = vmatpush1.bf16.msra.mxu1 %v4907_v11  ;;  %v7365_v11 = vld [vmem:[#allocation7_spill] sm:$0xff] }
 0x17e   :  { %3559 = vmatprep.subr.bf16.mxu0 %v4917_v23  ;;  %3847 = vmatprep.subr.bf16.mxu1 %v4917_v23  ;;  %v7366_v23 = vld [vmem:[#allocation8_spill] sm:$0xff] }
 0x17f   :  { %1801 = vmatprep.mubr.f32.mxu0 %v1570_v44  ;;  %2413 = vmatprep.mubr.f32.mxu1 %v2182_v59  ;;  %v7388_v44 = vld [vmem:[#allocation30_spill] sm:$0xff]  ;;  %v7389_v59 = vld [vmem:[#allocation31_spill] sm:$0xff] }
 0x181   :  { %3561 = vmatpush1.bf16.msra.mxu0 %v4939_v47  ;;  %3849 = vmatpush1.bf16.msra.mxu1 %v4939_v47  ;;  %v7367_v47 = vld [vmem:[#allocation9_spill] sm:$0xff] }
 0x182   :  { %3563 = vmatprep.subr.bf16.mxu0 %v4943_v49  ;;  %3851 = vmatprep.subr.bf16.mxu1 %v4943_v49  ;;  %v7368_v49 = vld [vmem:[#allocation10_spill] sm:$0xff] }
 0x185   :  { %3565 = vmatpush1.bf16.msra.mxu0 %v4959_v4  ;;  %3853 = vmatpush1.bf16.msra.mxu1 %v4959_v4  ;;  %v7369_v4 = vld [vmem:[#allocation11_spill] sm:$0xff] }
 0x186   :  { %3567 = vmatprep.subr.bf16.mxu0 %v4963_v5  ;;  %3855 = vmatprep.subr.bf16.mxu1 %v4963_v5  ;;  %v7370_v5 = vld [vmem:[#allocation12_spill] sm:$0xff] }
 0x189   :  { %3569 = vmatpush1.bf16.msra.mxu0 %v7360_v2  ;;  %3857 = vmatpush1.bf16.msra.mxu1 %v7360_v2  ;;  %v7390_v2 = vld [vmem:[#allocation32_spill] sm:$0xff] }
 0x18a   :  { %3571 = vmatprep.subr.bf16.mxu0 %v7361_v21  ;;  %3859 = vmatprep.subr.bf16.mxu1 %v7361_v21  ;;  %v7391_v21 = vld [vmem:[#allocation33_spill] sm:$0xff] }
 0x18d   :  { %3573 = vmatpush1.bf16.msra.mxu0 %v7362_v29  ;;  %3861 = vmatpush1.bf16.msra.mxu1 %v7362_v29  ;;  %v7392_v29 = vld [vmem:[#allocation34_spill] sm:$0xff] }
 0x18e   :  { %3575 = vmatprep.subr.bf16.mxu0 %v7363_v48  ;;  %3863 = vmatprep.subr.bf16.mxu1 %v7363_v48  ;;  %v7393_v48 = vld [vmem:[#allocation35_spill] sm:$0xff] }
 0x191   :  { %3577 = vmatpush1.bf16.msra.mxu0 %v7364_v55  ;;  %3865 = vmatpush1.bf16.msra.mxu1 %v7364_v55  ;;  %v7394_v55 = vld [vmem:[#allocation36_spill] sm:$0xff] }
 0x192   :  { %3579 = vmatprep.subr.bf16.mxu0 %v7365_v11  ;;  %3867 = vmatprep.subr.bf16.mxu1 %v7365_v11  ;;  %v7395_v11 = vld [vmem:[#allocation37_spill] sm:$0xff] }
 0x195   :  { %3581 = vmatpush1.bf16.msra.mxu0 %v7366_v23  ;;  %3869 = vmatpush1.bf16.msra.mxu1 %v7366_v23  ;;  %v7396_v23 = vld [vmem:[#allocation38_spill] sm:$0xff] }
 0x196   :  { %3583 = vmatprep.subr.bf16.mxu0 %v7367_v47  ;;  %3871 = vmatprep.subr.bf16.mxu1 %v7367_v47  ;;  %v7397_v47 = vld [vmem:[#allocation39_spill] sm:$0xff] }
 0x199   :  { %3585 = vmatpush1.bf16.msra.mxu0 %v7368_v49  ;;  %3873 = vmatpush1.bf16.msra.mxu1 %v7368_v49  ;;  %v7398_v49 = vld [vmem:[#allocation40_spill] sm:$0xff] }
 0x19a   :  { %3587 = vmatprep.subr.bf16.mxu0 %v7369_v4  ;;  %3875 = vmatprep.subr.bf16.mxu1 %v7369_v4  ;;  %v7399_v4 = vld [vmem:[#allocation41_spill] sm:$0xff] }
 0x19d   :  { %3589 = vmatpush1.bf16.msra.mxu0 %v7370_v5  ;;  %3877 = vmatpush1.bf16.msra.mxu1 %v7370_v5  ;;  %v7400_v5 = vld [vmem:[#allocation42_spill] sm:$0xff] }
 0x19e   :  { %3591 = vmatprep.subr.bf16.mxu0 %v7371_v40  ;;  %3879 = vmatprep.subr.bf16.mxu1 %v7371_v40  ;;  %v7401_v40 = vld [vmem:[#allocation43_spill] sm:$0xff] }
 0x1a1   :  { %3593 = vmatpush1.bf16.msra.mxu0 %v7372_v54  ;;  %3881 = vmatpush1.bf16.msra.mxu1 %v7372_v54  ;;  %v7402_v54 = vld [vmem:[#allocation44_spill] sm:$0xff] }
 0x1a2   :  { %3595 = vmatprep.subr.bf16.mxu0 %v7373_v30  ;;  %3883 = vmatprep.subr.bf16.mxu1 %v7373_v30  ;;  %v1571_v30 = vld [vmem:[%s7090_s2 + $0x20] sm:$0xff] }
 0x1a4   :  { %1802 = vmatmul.mubr.f32.vlgmr.msra.gmra.mrb[14].mxu0 %v1569_v56  ;;  %2414 = vmatmul.mubr.f32.vlgmr.msra.gmra.mrb[14].mxu1 %v2181_v28  ;;  %v7403_v56 = vld [vmem:[#allocation45_spill] sm:$0xff]  ;;  %v7404_v28 = vld [vmem:[#allocation46_spill] sm:$0xff] }
 0x1a5   :  { %3597 = vmatpush1.bf16.msra.mxu0 %v7374_v3  ;;  %3885 = vmatpush1.bf16.msra.mxu1 %v7374_v3  ;;  %v1581_v3 = vld [vmem:[%s7090_s2 + $0x70] sm:$0xff] }
 0x1a6   :  { %3599 = vmatprep.subr.bf16.mxu0 %v7375_v13  ;;  %3887 = vmatprep.subr.bf16.mxu1 %v7375_v13  ;;  %v1580_v13 = vld [vmem:[%s7090_s2 + $0x68] sm:$0xff] }
 0x1a7   :  { %1807 = vmatprep.mubr.f32.mxu0 %v1579_v10  ;;  %2419 = vmatprep.mubr.f32.mxu1 %v2191_v18  ;;  %v2183_v10 = vld [vmem:[%s7091_s3 + $0x20] sm:$0xff]  ;;  %v7405_v18 = vld [vmem:[#allocation47_spill] sm:$0xff] }
 0x1a8   :  { %1808 = vmatmul.mubr.f32.gmra.mrb[16].mxu0 %v1578_v7  ;;  %2420 = vmatmul.mubr.f32.gmra.mrb[16].mxu1 %v2190_v8  ;;  %v2193_v7 = vld [vmem:[%s7091_s3 + $0x70] sm:$0xff] }
 0x1a9   :  { %3601 = vmatpush1.bf16.msra.mxu0 %v7376_v20  ;;  %3889 = vmatpush1.bf16.msra.mxu1 %v7376_v20  ;;  %v7406_v8 = vld [vmem:[#allocation48_spill] sm:$0xff]  ;;  %v382_v20 = vlaneseq }
 0x1aa   :  { %3603 = vmatprep.subr.bf16.mxu0 %v7377_v31  ;;  %3891 = vmatprep.subr.bf16.mxu1 %v7377_v31  ;;  %v7408_v31 = vld [vmem:[#allocation50_spill] sm:$0xff] }
 0x1ab   :  { %1813 = vmatprep.mubr.f32.mxu0 %v1588_v14  ;;  %2425 = vmatprep.mubr.f32.mxu1 %v2200_v19  ;;  %v2192_v14 = vld [vmem:[%s7091_s3 + $0x68] sm:$0xff]  ;;  %v7407_v19 = vld [vmem:[#allocation49_spill] sm:$0xff] }
 0x1ac   :  { %1814 = vmatmul.mubr.f32.gmra.mrb[18].mxu0 %v1587_v25  ;;  %2426 = vmatmul.mubr.f32.gmra.mrb[18].mxu1 %v2199_v26  ;;  %v1590_v25 = vld [vmem:[%s7090_s2 + $0xb8] sm:$0xff] }
 0x1ad   :  { %3605 = vmatpush1.bf16.msra.mxu0 %v7378_v38  ;;  %3893 = vmatpush1.bf16.msra.mxu1 %v7378_v38  ;;  %v2202_v26 = vld [vmem:[%s7091_s3 + $0xb8] sm:$0xff]  ;;  %v7409_v38 = vld [vmem:[#allocation51_spill] sm:$0xff] }
 0x1ae   :  { %3607 = vmatprep.subr.bf16.mxu0 %v7379_v51  ;;  %3895 = vmatprep.subr.bf16.mxu1 %v7379_v51  ;;  %v2211_v51 = vld [vmem:[%s7091_s3 + $0x100] sm:$0xff] }
 0x1af   :  { %1819 = vmatprep.mubr.f32.mxu0 %v1597_v32  ;;  %2431 = vmatprep.mubr.f32.mxu1 %v2209_v37  ;;  %v1589_v32 = vld [vmem:[%s7090_s2 + $0xb0] sm:$0xff] }
 0x1b0   :  { %1820 = vmatmul.mubr.f32.gmra.mrb[20].mxu0 %v1596_v45  ;;  %2432 = vmatmul.mubr.f32.gmra.mrb[20].mxu1 %v2208_v46  ;;  %v2201_v37 = vld [vmem:[%s7091_s3 + $0xb0] sm:$0xff]  ;;  %v383_v45 = vshrl.u32 %v382_v20, 7  ;;  %v1599_v46 = vld [vmem:[%s7090_s2 + $0x100] sm:$0xff] }
 0x1b1   :  { %3609 = vmatpush1.bf16.msra.mxu0 %v7380_v58  ;;  %3897 = vmatpush1.bf16.msra.mxu1 %v7380_v58  ;;  %v2210_v58 = vld [vmem:[%s7091_s3 + $0xf8] sm:$0xff] }
 0x1b2   :  { %3611 = vmatprep.subr.bf16.mxu0 %v7381_v6  ;;  %3899 = vmatprep.subr.bf16.mxu1 %v7381_v6  ;;  %v1608_v6 = vld [vmem:[%s7090_s2 + $0x148] sm:$0xff] }
 0x1b3   :  { %1825 = vmatprep.mubr.f32.mxu0 %v1606_v52  ;;  %2437 = vmatprep.mubr.f32.mxu1 %v2218_v57  ;;  %v7410_v52 = vld [vmem:[#allocation52_spill] sm:$0xff]  ;;  %v1598_v57 = vld [vmem:[%s7090_s2 + $0xf8] sm:$0xff] }
 0x1b4   :  { %1826 = vmatmul.mubr.f32.gmra.mrb[22].mxu0 %v1605_v63  ;;  %2438 = vmatmul.mubr.f32.gmra.mrb[22].mxu1 %v2217_v0  ;;  %v7411_v63 = vld [vmem:[#allocation53_spill] sm:$0xff]  ;;  %v6623_v0 = vsub.s32 0, %v383_v45 }
 0x1b5   :  { %3613 = vmatpush1.bf16.msra.mxu0 %v7382_v17  ;;  %3901 = vmatpush1.bf16.msra.mxu1 %v7382_v17  ;;  %v317_v17 = vld [vmem:[%s7092_s5] sm:$0x3] }
 0x1b6   :  { %3615 = vmatprep.subr.bf16.mxu0 %v7383_v34  ;;  %3903 = vmatprep.subr.bf16.mxu1 %v7383_v34  ;;  %v2219_v34 = vld [vmem:[%s7091_s3 + $0x140] sm:$0xff] }
 0x1b7   :  { %1831 = vmatprep.mubr.f32.mxu0 %v1615_v9  ;;  %2443 = vmatprep.mubr.f32.mxu1 %v2227_v16  ;;  %v2220_v9 = vld [vmem:[%s7091_s3 + $0x148] sm:$0xff]  ;;  %v7412_v16 = vld [vmem:[#allocation54_spill] sm:$0xff] }
 0x1b8   :  { %1832 = vmatmul.mubr.f32.gmra.mrb[24].mxu0 %v1614_v24  ;;  %2444 = vmatmul.mubr.f32.gmra.mrb[24].mxu1 %v2226_v27  ;;  %v6636_v24 = vsub.s32 1, %v383_v45  ;;  %v1607_v27 = vld [vmem:[%s7090_s2 + $0x140] sm:$0xff] }
 0x1b9   :  { %3617 = vmatpush1.bf16.msra.mxu0 %v7384_v43  ;;  %3905 = vmatpush1.bf16.msra.mxu1 %v7384_v43  ;;  %v1617_v43 = vld [vmem:[%s7090_s2 + $0x190] sm:$0xff] }
 0x1ba   :  { %3619 = vmatprep.subr.bf16.mxu0 %v7385_v61  ;;  %3907 = vmatprep.subr.bf16.mxu1 %v7385_v61  ;;  %v6658_v61 = vrot.slane %v317_v17, %v6636_v24 }
 0x1bb   :  { %1837 = vmatprep.mubr.f32.mxu0 %v1624_v35  ;;  %2449 = vmatprep.mubr.f32.mxu1 %v2236_v42  ;;  %v7413_v35 = vld [vmem:[#allocation55_spill] sm:$0xff]  ;;  %v6647_v42 = vrot.slane %v317_v17, %v6623_v0  ;;  %v7419_v17 = vld [vmem:[#allocation61_spill] sm:$0xff] }
 0x1bc   :  { %1838 = vmatmul.mubr.f32.gmra.mrb[26].mxu0 %v1623_v50  ;;  %2450 = vmatmul.mubr.f32.gmra.mrb[26].mxu1 %v2235_v53  ;;  %v2229_v50 = vld [vmem:[%s7091_s3 + $0x190] sm:$0xff] }
 0x1bd   :  { %3621 = vmatpush1.bf16.msra.mxu0 %v7386_v22  ;;  %3909 = vmatpush1.bf16.msra.mxu1 %v7386_v22  ;;  %v7414_v53 = vld [vmem:[#allocation56_spill] sm:$0xff]  ;;  %v7415_v22 = vld [vmem:[#allocation57_spill] sm:$0xff] }
 0x1be   :  { %3623 = vmatprep.subr.bf16.mxu0 %v7387_v39  ;;  %3911 = vmatprep.subr.bf16.mxu1 %v7387_v39 }
 0x1bf   :  { %1908 = vmatprep.mubr.f32.mxu0 %v1572_v1  ;;  %2520 = vmatprep.mubr.f32.mxu1 %v2184_v15  ;;  %v1616_v1 = vld [vmem:[%s7090_s2 + $0x188] sm:$0xff] }
 0x1c0   :  { %v2228_v15 = vld [vmem:[%s7091_s3 + $0x188] sm:$0xff] }
 0x1c1   :  { %3625 = vmatpush1.bf16.msra.mxu0 %v7388_v44  ;;  %3913 = vmatpush1.bf16.msra.mxu1 %v7388_v44 }
 0x1c2   :  { %3627 = vmatprep.subr.bf16.mxu0 %v7389_v59  ;;  %3915 = vmatprep.subr.bf16.mxu1 %v7389_v59 }
 0x1c5   :  { %3629 = vmatpush1.bf16.msra.mxu0 %v7390_v2  ;;  %3917 = vmatpush1.bf16.msra.mxu1 %v7390_v2 }
 0x1c6   :  { %3631 = vmatprep.subr.bf16.mxu0 %v7391_v21  ;;  %3919 = vmatprep.subr.bf16.mxu1 %v7391_v21 }
 0x1c9   :  { %3633 = vmatpush1.bf16.msra.mxu0 %v7392_v29  ;;  %3921 = vmatpush1.bf16.msra.mxu1 %v7392_v29 }
 0x1ca   :  { %3635 = vmatprep.subr.bf16.mxu0 %v7393_v48  ;;  %3923 = vmatprep.subr.bf16.mxu1 %v7393_v48  ;;  %v1626_v48 = vld [vmem:[%s7090_s2 + $0x1d8] sm:$0xff] }
 0x1cd   :  { %3637 = vmatpush1.bf16.msra.mxu0 %v7394_v55  ;;  %3925 = vmatpush1.bf16.msra.mxu1 %v7394_v55  ;;  %v2238_v55 = vld [vmem:[%s7091_s3 + $0x1d8] sm:$0xff] }
 0x1ce   :  { %3639 = vmatprep.subr.bf16.mxu0 %v7395_v11  ;;  %3927 = vmatprep.subr.bf16.mxu1 %v7395_v11 }
 0x1d1   :  { %3641 = vmatpush1.bf16.msra.mxu0 %v7396_v23  ;;  %3929 = vmatpush1.bf16.msra.mxu1 %v7396_v23 }
 0x1d2   :  { %3643 = vmatprep.subr.bf16.mxu0 %v7397_v47  ;;  %3931 = vmatprep.subr.bf16.mxu1 %v7397_v47  ;;  %v7416_v47 = vld [vmem:[#allocation58_spill] sm:$0xff] }
 0x1d5   :  { %3645 = vmatpush1.bf16.msra.mxu0 %v7398_v49  ;;  %3933 = vmatpush1.bf16.msra.mxu1 %v7398_v49  ;;  %v1625_v49 = vld [vmem:[%s7090_s2 + $0x1d0] sm:$0xff] }
 0x1d6   :  { %3647 = vmatprep.subr.bf16.mxu0 %v7399_v4  ;;  %3935 = vmatprep.subr.bf16.mxu1 %v7399_v4  ;;  %v2237_v4 = vld [vmem:[%s7091_s3 + $0x1d0] sm:$0xff] }
 0x1d9   :  { %3649 = vmatpush1.bf16.msra.mxu0 %v7400_v5  ;;  %3937 = vmatpush1.bf16.msra.mxu1 %v7400_v5 }
 0x1da   :  { %3651 = vmatprep.subr.bf16.mxu0 %v7401_v40  ;;  %3939 = vmatprep.subr.bf16.mxu1 %v7401_v40 }
 0x1dd   :  { %3653 = vmatpush1.bf16.msra.mxu0 %v7402_v54  ;;  %3941 = vmatpush1.bf16.msra.mxu1 %v7402_v54  ;;  %v7417_v54 = vld [vmem:[#allocation59_spill] sm:$0xff] }
 0x1de   :  { %3655 = vmatprep.subr.bf16.mxu0 %v7403_v56  ;;  %3943 = vmatprep.subr.bf16.mxu1 %v7403_v56 }
 0x1e1   :  { %3657 = vmatpush1.bf16.msra.mxu0 %v7404_v28  ;;  %3945 = vmatpush1.bf16.msra.mxu1 %v7404_v28 }
 0x1e2   :  { %3659 = vmatprep.subr.bf16.mxu0 %v7405_v18  ;;  %3947 = vmatprep.subr.bf16.mxu1 %v7405_v18 }
 0x1e4   :  { %1909 = vmatmul.mubr.f32.vlgmr.msra.gmra.mrb[14].mxu0 %v1571_v30  ;;  %2521 = vmatmul.mubr.f32.vlgmr.msra.gmra.mrb[14].mxu1 %v2183_v10 }
 0x1e5   :  { %3661 = vmatpush1.bf16.msra.mxu0 %v7406_v8  ;;  %3949 = vmatpush1.bf16.msra.mxu1 %v7406_v8 }
 0x1e6   :  { %3663 = vmatprep.subr.bf16.mxu0 %v7407_v19  ;;  %3951 = vmatprep.subr.bf16.mxu1 %v7407_v19  ;;  %v2186_v19 = vld [vmem:[%s7091_s3 + $0x38] sm:$0xff] }
 0x1e7   :  { %1914 = vmatprep.mubr.f32.mxu0 %v1581_v3  ;;  %2526 = vmatprep.mubr.f32.mxu1 %v2193_v7 }
 0x1e8   :  { %1915 = vmatmul.mubr.f32.gmra.mrb[16].mxu0 %v1580_v13  ;;  %2527 = vmatmul.mubr.f32.gmra.mrb[16].mxu1 %v2192_v14  ;;  %v1574_v14 = vld [vmem:[%s7090_s2 + $0x38] sm:$0xff] }
 0x1e9   :  { %3665 = vmatpush1.bf16.msra.mxu0 %v7408_v31  ;;  %3953 = vmatpush1.bf16.msra.mxu1 %v7408_v31 }
 0x1ea   :  { %3667 = vmatprep.subr.bf16.mxu0 %v7409_v38  ;;  %3955 = vmatprep.subr.bf16.mxu1 %v7409_v38 }
 0x1eb   :  { %1920 = vmatprep.mubr.f32.mxu0 %v1590_v25  ;;  %2532 = vmatprep.mubr.f32.mxu1 %v2202_v26 }
 0x1ec   :  { %1921 = vmatmul.mubr.f32.gmra.mrb[18].mxu0 %v1589_v32  ;;  %2533 = vmatmul.mubr.f32.gmra.mrb[18].mxu1 %v2201_v37  ;;  %v7418_v37 = vld [vmem:[#allocation60_spill] sm:$0xff] }
 0x1ed   :  { %3669 = vmatpush1.bf16.msra.mxu0 %v7410_v52  ;;  %3957 = vmatpush1.bf16.msra.mxu1 %v7410_v52 }
 0x1ee   :  { %3671 = vmatprep.subr.bf16.mxu0 %v7411_v63  ;;  %3959 = vmatprep.subr.bf16.mxu1 %v7411_v63 }
 0x1ef   :  { %1926 = vmatprep.mubr.f32.mxu0 %v1599_v46  ;;  %2538 = vmatprep.mubr.f32.mxu1 %v2211_v51 }
 0x1f0   :  { %1927 = vmatmul.mubr.f32.gmra.mrb[20].mxu0 %v1598_v57  ;;  %2539 = vmatmul.mubr.f32.gmra.mrb[20].mxu1 %v2210_v58 }
 0x1f1   :  { %3673 = vmatpush1.bf16.msra.mxu0 %v7412_v16  ;;  %3961 = vmatpush1.bf16.msra.mxu1 %v7412_v16 }
 0x1f2   :  { %3675 = vmatprep.subr.bf16.mxu0 %v7413_v35  ;;  %3963 = vmatprep.subr.bf16.mxu1 %v7413_v35  ;;  %v7420_v35 = vld [vmem:[#allocation62_spill] sm:$0xff] }
 0x1f3   :  { %1932 = vmatprep.mubr.f32.mxu0 %v1608_v6  ;;  %2544 = vmatprep.mubr.f32.mxu1 %v2220_v9 }
 0x1f4   :  { %1933 = vmatmul.mubr.f32.gmra.mrb[22].mxu0 %v1607_v27  ;;  %2545 = vmatmul.mubr.f32.gmra.mrb[22].mxu1 %v2219_v34 }
 0x1f5   :  { %3677 = vmatpush1.bf16.msra.mxu0 %v7414_v53  ;;  %3965 = vmatpush1.bf16.msra.mxu1 %v7414_v53 }
 0x1f6   :  { %3679 = vmatprep.subr.bf16.mxu0 %v7415_v22  ;;  %3967 = vmatprep.subr.bf16.mxu1 %v7415_v22 }
 0x1f7   :  { %v886_v39 = vpop.f32.mrb[0].mxu0  ;;  %v1498_v44 = vpop.f32.mrb[0].mxu1  ;;  %1938 = vmatprep.mubr.f32.mxu0 %v1617_v43  ;;  %2550 = vmatprep.mubr.f32.mxu1 %v2229_v50 }
 0x1f8   :  { %v4042_v59 = vadd.f32 %v886_v39, %v6647_v42  ;;  %v4056_v2 = vadd.f32 %v1498_v44, %v6647_v42  ;;  %v888_v21 = vpop.f32.mrb[1].mxu0  ;;  %v1500_v29 = vpop.f32.mrb[1].mxu1  ;;  %1939 = vmatmul.mubr.f32.gmra.mrb[24].mxu0 %v1616_v1  ;;  %2551 = vmatmul.mubr.f32.gmra.mrb[24].mxu1 %v2228_v15 }
 0x1f9   :  { %v4043_v11 = vadd.f32 %v888_v21, %v6658_v61  ;;  %v4057_v23 = vadd.f32 %v1500_v29, %v6658_v61  ;;  %3681 = vmatpush1.bf16.msra.mxu0 %v7416_v47  ;;  %3969 = vmatpush1.bf16.msra.mxu1 %v7416_v47 }
 0x1fa   :  { %v927_v5 = vmax.f32 %v4042_v59, 0.0  ;;  %v1539_v40 = vmax.f32 %v4056_v2, 0.0  ;;  %3683 = vmatprep.subr.bf16.mxu0 %v7417_v54  ;;  %3971 = vmatprep.subr.bf16.mxu1 %v7417_v54 }
 0x1fb   :  { %v928_v56 = vmax.f32 %v4043_v11, 0.0  ;;  %v1540_v28 = vmax.f32 %v4057_v23, 0.0  ;;  %v892_v30 = vpop.f32.mrb[2].mxu0  ;;  %v1504_v10 = vpop.f32.mrb[2].mxu1  ;;  %1944 = vmatprep.mubr.f32.mxu0 %v1626_v48  ;;  %2556 = vmatprep.mubr.f32.mxu1 %v2238_v55  ;;  %v7421_v48 = vld [vmem:[#allocation63_spill] sm:$0xff]  ;;  %v7422_v23 = vld [vmem:[#allocation64_spill] sm:$0xff] }
 0x1fc   :  { %v6688_v18 = vmax.f32 %v927_v5, %v1539_v40  ;;  %v4044_v3 = vadd.f32 %v892_v30, %v6647_v42  ;;  %v4058_v7 = vadd.f32 %v1504_v10, %v6647_v42  ;;  %v894_v8 = vpop.f32.mrb[3].mxu0  ;;  %v1506_v13 = vpop.f32.mrb[3].mxu1  ;;  %1945 = vmatmul.mubr.f32.gmra.mrb[26].mxu0 %v1625_v49  ;;  %2557 = vmatmul.mubr.f32.gmra.mrb[26].mxu1 %v2237_v4 }
 0x1fd   :  { %v6698_v20 = vmax.f32 %v928_v56, %v1540_v28  ;;  %v4045_v25 = vadd.f32 %v894_v8, %v6658_v61  ;;  %v4059_v26 = vadd.f32 %v1506_v13, %v6658_v61  ;;  %3685 = vmatpush1.bf16.msra.mxu0 %v5715_v60  ;;  %3973 = vmatpush1.bf16.msra.mxu1 %v5715_v60  ;;  %v7423_v8 = vld [vmem:[#allocation65_spill] sm:$0xff] }
 0x1fe   :  { %v929_v31 = vmax.f32 %v4044_v3, 0.0  ;;  %v1541_v32 = vmax.f32 %v4058_v7, 0.0  ;;  %3687 = vmatprep.subr.bf16.mxu0 %v7418_v37  ;;  %3975 = vmatprep.subr.bf16.mxu1 %v7418_v37 }
 0x1ff   :  { %v930_v38 = vmax.f32 %v4045_v25, 0.0  ;;  %v1542_v45 = vmax.f32 %v4059_v26, 0.0  ;;  %v898_v46 = vpop.f32.mrb[4].mxu0  ;;  %v1510_v51 = vpop.f32.mrb[4].mxu1  ;;  %2015 = vmatprep.mubr.f32.mxu0 %v1574_v14  ;;  %2627 = vmatprep.mubr.f32.mxu1 %v2186_v19  ;;  %v7424_v19 = vld [vmem:[#allocation66_spill] sm:$0xff] }
 0x200   :  { %v6706_v52 = vmax.f32 %v929_v31, %v1541_v32  ;;  %v4046_v57 = vadd.f32 %v898_v46, %v6647_v42  ;;  %v4060_v58 = vadd.f32 %v1510_v51, %v6647_v42  ;;  %v900_v63 = vpop.f32.mrb[5].mxu0  ;;  %v1512_v60 = vpop.f32.mrb[5].mxu1 }
 0x201   :  { %v6710_v6 = vmax.f32 %v930_v38, %v1542_v45  ;;  %v4047_v9 = vadd.f32 %v900_v63, %v6658_v61  ;;  %v4061_v16 = vadd.f32 %v1512_v60, %v6658_v61  ;;  %3689 = vmatpush1.bf16.msra.mxu0 %v7419_v17  ;;  %3977 = vmatpush1.bf16.msra.mxu1 %v7419_v17  ;;  %v7425_v60 = vld [vmem:[#allocation67_spill] sm:$0xff]  ;;  %v7426_v17 = vld [vmem:[#allocation68_spill] sm:$0xff] }
 0x202   :  { %v931_v27 = vmax.f32 %v4046_v57, 0.0  ;;  %v1543_v34 = vmax.f32 %v4060_v58, 0.0  ;;  %3691 = vmatprep.subr.bf16.mxu0 %v7420_v35  ;;  %3979 = vmatprep.subr.bf16.mxu1 %v7420_v35 }
 0x203   :  { %v932_v43 = vmax.f32 %v4047_v9, 0.0  ;;  %v1544_v50 = vmax.f32 %v4061_v16, 0.0  ;;  %v904_v53 = vpop.f32.mrb[6].mxu0  ;;  %v1516_v1 = vpop.f32.mrb[6].mxu1 }
 0x204   :  { %v6718_v15 = vmax.f32 %v931_v27, %v1543_v34  ;;  %v4048_v22 = vadd.f32 %v904_v53, %v6647_v42  ;;  %v4062_v39 = vadd.f32 %v1516_v1, %v6647_v42  ;;  %v906_v44 = vpop.f32.mrb[7].mxu0  ;;  %v1518_v59 = vpop.f32.mrb[7].mxu1 }
 0x205   :  { %v6722_v2 = vmax.f32 %v932_v43, %v1544_v50  ;;  %v4049_v21 = vadd.f32 %v906_v44, %v6658_v61  ;;  %v4063_v29 = vadd.f32 %v1518_v59, %v6658_v61  ;;  %3693 = vmatpush1.bf16.msra.mxu0 %v7421_v48  ;;  %3981 = vmatpush1.bf16.msra.mxu1 %v7421_v48 }
 0x206   :  { %v933_v55 = vmax.f32 %v4048_v22, 0.0  ;;  %v1545_v11 = vmax.f32 %v4062_v39, 0.0  ;;  %3695 = vmatprep.subr.bf16.mxu0 %v7422_v23  ;;  %3983 = vmatprep.subr.bf16.mxu1 %v7422_v23 }
 0x207   :  { %v934_v47 = vmax.f32 %v4049_v21, 0.0  ;;  %v1546_v49 = vmax.f32 %v4063_v29, 0.0  ;;  %v910_v4 = vpop.f32.mrb[8].mxu0  ;;  %v1522_v5 = vpop.f32.mrb[8].mxu1  ;;  %v7427_v29 = vld [vmem:[#allocation69_spill] sm:$0xff] }
 0x208   :  { %v6730_v40 = vmax.f32 %v933_v55, %v1545_v11  ;;  %v4050_v54 = vadd.f32 %v910_v4, %v6647_v42  ;;  %v4064_v56 = vadd.f32 %v1522_v5, %v6647_v42  ;;  %v912_v28 = vpop.f32.mrb[9].mxu0  ;;  %v1524_v30 = vpop.f32.mrb[9].mxu1  ;;  %v7428_v11 = vld [vmem:[#allocation70_spill] sm:$0xff]  ;;  %v7429_v5 = vld [vmem:[#allocation71_spill] sm:$0xff] }
 0x209   :  { %v6734_v10 = vmax.f32 %v934_v47, %v1546_v49  ;;  %v4051_v3 = vadd.f32 %v912_v28, %v6658_v61  ;;  %v4065_v7 = vadd.f32 %v1524_v30, %v6658_v61  ;;  %3697 = vmatpush1.bf16.msra.mxu0 %v7423_v8  ;;  %3985 = vmatpush1.bf16.msra.mxu1 %v7423_v8  ;;  %v7432_v28 = vld [vmem:[#allocation74_spill] sm:$0xff]  ;;  %v7433_v30 = vld [vmem:[#allocation75_spill] sm:$0xff]  ;;  %v1573_v8 = vld [vmem:[%s7090_s2 + $0x30] sm:$0xff] }
 0x20a   :  { %v935_v13 = vmax.f32 %v4050_v54, 0.0  ;;  %v1547_v14 = vmax.f32 %v4064_v56, 0.0  ;;  %3699 = vmatprep.subr.bf16.mxu0 %v7424_v19  ;;  %3987 = vmatprep.subr.bf16.mxu1 %v7424_v19  ;;  %v7430_v54 = vld [vmem:[#allocation72_spill] sm:$0xff]  ;;  %v7431_v56 = vld [vmem:[#allocation73_spill] sm:$0xff]  ;;  %v1583_v19 = vld [vmem:[%s7090_s2 + $0x80] sm:$0xff] }
 0x20b   :  { %v936_v25 = vmax.f32 %v4051_v3, 0.0  ;;  %v1548_v26 = vmax.f32 %v4065_v7, 0.0  ;;  %v916_v31 = vpop.f32.mrb[10].mxu0  ;;  %v1528_v32 = vpop.f32.mrb[10].mxu1  ;;  %v7434_v3 = vld [vmem:[#allocation76_spill] sm:$0xff]  ;;  %v7435_v7 = vld [vmem:[#allocation77_spill] sm:$0xff] }
 0x20c   :  { %v6742_v37 = vmax.f32 %v935_v13, %v1547_v14  ;;  %v4052_v38 = vadd.f32 %v916_v31, %v6647_v42  ;;  %v4066_v45 = vadd.f32 %v1528_v32, %v6647_v42  ;;  %v918_v46 = vpop.f32.mrb[11].mxu0  ;;  %v1530_v51 = vpop.f32.mrb[11].mxu1  ;;  %v2185_v13 = vld [vmem:[%s7091_s3 + $0x30] sm:$0xff]  ;;  %v7436_v14 = vld [vmem:[#allocation78_spill] sm:$0xff]  ;;  %v1582_v31 = vld [vmem:[%s7090_s2 + $0x78] sm:$0xff] }
 0x20d   :  { %v6746_v57 = vmax.f32 %v936_v25, %v1548_v26  ;;  %v4053_v58 = vadd.f32 %v918_v46, %v6658_v61  ;;  %v4067_v63 = vadd.f32 %v1530_v51, %v6658_v61  ;;  %3701 = vmatpush1.bf16.msra.mxu0 %v7425_v60  ;;  %3989 = vmatpush1.bf16.msra.mxu1 %v7425_v60  ;;  %v2195_v25 = vld [vmem:[%s7091_s3 + $0x80] sm:$0xff]  ;;  %v7437_v26 = vld [vmem:[#allocation79_spill] sm:$0xff]  ;;  %v2194_v32 = vld [vmem:[%s7091_s3 + $0x78] sm:$0xff] }
 0x20e   :  { %v937_v9 = vmax.f32 %v4052_v38, 0.0  ;;  %v1549_v16 = vmax.f32 %v4066_v45, 0.0  ;;  %3703 = vmatprep.subr.bf16.mxu0 %v7426_v17  ;;  %3991 = vmatprep.subr.bf16.mxu1 %v7426_v17  ;;  %v7438_v38 = vld [vmem:[#allocation80_spill] sm:$0xff]  ;;  %v1592_v45 = vld [vmem:[%s7090_s2 + $0xc8] sm:$0xff]  ;;  %v7439_v51 = vld [vmem:[#allocation81_spill] sm:$0xff] }
 0x20f   :  { %v938_v27 = vmax.f32 %v4053_v58, 0.0  ;;  %v1550_v34 = vmax.f32 %v4067_v63, 0.0  ;;  %v922_v35 = vpop.f32.mrb[12].mxu0  ;;  %v1534_v43 = vpop.f32.mrb[12].mxu1  ;;  %v2204_v46 = vld [vmem:[%s7091_s3 + $0xc8] sm:$0xff]  ;;  %v1591_v58 = vld [vmem:[%s7090_s2 + $0xc0] sm:$0xff] }
 0x210   :  { %v6754_v50 = vmax.f32 %v937_v9, %v1549_v16  ;;  %v4054_v53 = vadd.f32 %v922_v35, %v6647_v42  ;;  %v4068_v1 = vadd.f32 %v1534_v43, %v6647_v42  ;;  %v924_v22 = vpop.f32.mrb[13].mxu0  ;;  %v1536_v39 = vpop.f32.mrb[13].mxu1  ;;  %v2203_v63 = vld [vmem:[%s7091_s3 + $0xc0] sm:$0xff]  ;;  %v1601_v9 = vld [vmem:[%s7090_s2 + $0x110] sm:$0xff]  ;;  %v7441_v17 = vld [vmem:[#allocation83_spill] sm:$0xff] }
 0x211   :  { %v6758_v44 = vmax.f32 %v938_v27, %v1550_v34  ;;  %v4055_v59 = vadd.f32 %v924_v22, %v6658_v61  ;;  %v4069_v21 = vadd.f32 %v1536_v39, %v6658_v61  ;;  %3705 = vmatpush1.bf16.msra.mxu0 %v7427_v29  ;;  %3993 = vmatpush1.bf16.msra.mxu1 %v7427_v29  ;;  %v7440_v60 = vld [vmem:[#allocation82_spill] sm:$0xff]  ;;  %v2213_v16 = vld [vmem:[%s7091_s3 + $0x110] sm:$0xff]  ;;  %v1600_v27 = vld [vmem:[%s7090_s2 + $0x108] sm:$0xff] }
 0x212   :  { %v939_v48 = vmax.f32 %v4054_v53, 0.0  ;;  %v1551_v55 = vmax.f32 %v4068_v1, 0.0  ;;  %3707 = vmatprep.subr.bf16.mxu0 %v7428_v11  ;;  %3995 = vmatprep.subr.bf16.mxu1 %v7428_v11  ;;  %v2212_v34 = vld [vmem:[%s7091_s3 + $0x108] sm:$0xff]  ;;  %v7442_v35 = vld [vmem:[#allocation84_spill] sm:$0xff]  ;;  %v1610_v43 = vld [vmem:[%s7090_s2 + $0x158] sm:$0xff] }
 0x213   :  { %v940_v23 = vmax.f32 %v4055_v59, 0.0  ;;  %v1552_v47 = vmax.f32 %v4069_v21, 0.0  ;;  %v2222_v53 = vld [vmem:[%s7091_s3 + $0x158] sm:$0xff]  ;;  %v1609_v22 = vld [vmem:[%s7090_s2 + $0x150] sm:$0xff]  ;;  %v7444_v59 = vld [vmem:[#allocation86_spill] sm:$0xff] }
 0x214   :  { %v6766_v49 = vmax.f32 %v939_v48, %v1551_v55  ;;  %v7443_v1 = vld [vmem:[#allocation85_spill] sm:$0xff]  ;;  %v2221_v39 = vld [vmem:[%s7091_s3 + $0x150] sm:$0xff]  ;;  %v1619_v21 = vld [vmem:[%s7090_s2 + $0x1a0] sm:$0xff] }
 0x215   :  { %v6768_v4 = vmax.f32 %v940_v23, %v1552_v47  ;;  %3709 = vmatpush1.bf16.msra.mxu0 %v7429_v5  ;;  %3997 = vmatpush1.bf16.msra.mxu1 %v7429_v5  ;;  %v2231_v29 = vld [vmem:[%s7091_s3 + $0x1a0] sm:$0xff]  ;;  %v7445_v48 = vld [vmem:[#allocation87_spill] sm:$0xff]  ;;  %v1618_v55 = vld [vmem:[%s7090_s2 + $0x198] sm:$0xff] }
 0x216   :  { %3711 = vmatprep.subr.bf16.mxu0 %v7430_v54  ;;  %3999 = vmatprep.subr.bf16.mxu1 %v7430_v54  ;;  %v2230_v11 = vld [vmem:[%s7091_s3 + $0x198] sm:$0xff]  ;;  %v7446_v23 = vld [vmem:[#allocation88_spill] sm:$0xff]  ;;  %v1628_v47 = vld [vmem:[%s7090_s2 + $0x1e8] sm:$0xff] }
 0x217   :  { %v2240_v5 = vld [vmem:[%s7091_s3 + $0x1e8] sm:$0xff]  ;;  %v7447_v54 = vld [vmem:[#allocation89_spill] sm:$0xff] }
 0x219   :  { %3713 = vmatpush1.bf16.msra.mxu0 %v7431_v56  ;;  %4001 = vmatpush1.bf16.msra.mxu1 %v7431_v56  ;;  %v1627_v56 = vld [vmem:[%s7090_s2 + $0x1e0] sm:$0xff] }
 0x21a   :  { %3715 = vmatprep.subr.bf16.mxu0 %v7432_v28  ;;  %4003 = vmatprep.subr.bf16.mxu1 %v7432_v28  ;;  %v2239_v28 = vld [vmem:[%s7091_s3 + $0x1e0] sm:$0xff] }
 0x21d   :  { %3717 = vmatpush1.bf16.msra.mxu0 %v7433_v30  ;;  %4005 = vmatpush1.bf16.msra.mxu1 %v7433_v30  ;;  %v1593_v30 = vld [vmem:[%s7090_s2 + $0xd0] sm:$0xff] }
 0x21e   :  { %3719 = vmatprep.subr.bf16.mxu0 %v7434_v3  ;;  %4007 = vmatprep.subr.bf16.mxu1 %v7434_v3  ;;  %v2205_v3 = vld [vmem:[%s7091_s3 + $0xd0] sm:$0xff] }
 0x221   :  { %3721 = vmatpush1.bf16.msra.mxu0 %v7435_v7  ;;  %4009 = vmatpush1.bf16.msra.mxu1 %v7435_v7  ;;  %v1602_v7 = vld [vmem:[%s7090_s2 + $0x118] sm:$0xff] }
 0x222   :  { %3723 = vmatprep.subr.bf16.mxu0 %v7436_v14  ;;  %4011 = vmatprep.subr.bf16.mxu1 %v7436_v14  ;;  %v2223_v14 = vld [vmem:[%s7091_s3 + $0x160] sm:$0xff] }
 0x224   :  { %2016 = vmatmul.mubr.f32.vlgmr.msra.gmra.mrb[14].mxu0 %v1573_v8  ;;  %2628 = vmatmul.mubr.f32.vlgmr.msra.gmra.mrb[14].mxu1 %v2185_v13  ;;  %v2214_v8 = vld [vmem:[%s7091_s3 + $0x118] sm:$0xff]  ;;  %v1611_v13 = vld [vmem:[%s7090_s2 + $0x160] sm:$0xff] }
 0x225   :  { %3725 = vmatpush1.bf16.msra.mxu0 %v7437_v26  ;;  %4013 = vmatpush1.bf16.msra.mxu1 %v7437_v26  ;;  %v1629_v26 = vld [vmem:[%s7090_s2 + $0x1f0] sm:$0xff] }
 0x226   :  { %3727 = vmatprep.subr.bf16.mxu0 %v7438_v38  ;;  %4015 = vmatprep.subr.bf16.mxu1 %v7438_v38 }
 0x227   :  { %2021 = vmatprep.mubr.f32.mxu0 %v1583_v19  ;;  %2633 = vmatprep.mubr.f32.mxu1 %v2195_v25  ;;  %v1620_v19 = vld [vmem:[%s7090_s2 + $0x1a8] sm:$0xff] }
 0x228   :  { %2022 = vmatmul.mubr.f32.gmra.mrb[16].mxu0 %v1582_v31  ;;  %2634 = vmatmul.mubr.f32.gmra.mrb[16].mxu1 %v2194_v32  ;;  %v2232_v25 = vld [vmem:[%s7091_s3 + $0x1a8] sm:$0xff]  ;;  %v2241_v31 = vld [vmem:[%s7091_s3 + $0x1f0] sm:$0xff] }
 0x229   :  { %3729 = vmatpush1.bf16.msra.mxu0 %v7439_v51  ;;  %4017 = vmatpush1.bf16.msra.mxu1 %v7439_v51 }
 0x22a   :  { %3731 = vmatprep.subr.bf16.mxu0 %v7440_v60  ;;  %4019 = vmatprep.subr.bf16.mxu1 %v7440_v60 }
 0x22b   :  { %2027 = vmatprep.mubr.f32.mxu0 %v1592_v45  ;;  %2639 = vmatprep.mubr.f32.mxu1 %v2204_v46 }
 0x22c   :  { %2028 = vmatmul.mubr.f32.gmra.mrb[18].mxu0 %v1591_v58  ;;  %2640 = vmatmul.mubr.f32.gmra.mrb[18].mxu1 %v2203_v63 }
 0x22d   :  { %3733 = vmatpush1.bf16.msra.mxu0 %v7441_v17  ;;  %4021 = vmatpush1.bf16.msra.mxu1 %v7441_v17  ;;  %v2845_v17 = vld [vmem:[%s7094_s7] sm:$0x3] }
 0x22e   :  { %3735 = vmatprep.subr.bf16.mxu0 %v7442_v35  ;;  %4023 = vmatprep.subr.bf16.mxu1 %v7442_v35 }
 0x22f   :  { %2033 = vmatprep.mubr.f32.mxu0 %v1601_v9  ;;  %2645 = vmatprep.mubr.f32.mxu1 %v2213_v16 }
 0x230   :  { %2034 = vmatmul.mubr.f32.gmra.mrb[20].mxu0 %v1600_v27  ;;  %2646 = vmatmul.mubr.f32.gmra.mrb[20].mxu1 %v2212_v34 }
 0x231   :  { %3737 = vmatpush1.bf16.msra.mxu0 %v7443_v1  ;;  %4025 = vmatpush1.bf16.msra.mxu1 %v7443_v1 }
 0x232   :  { %3739 = vmatprep.subr.bf16.mxu0 %v7444_v59  ;;  %4027 = vmatprep.subr.bf16.mxu1 %v7444_v59 }
 0x233   :  { %2039 = vmatprep.mubr.f32.mxu0 %v1610_v43  ;;  %2651 = vmatprep.mubr.f32.mxu1 %v2222_v53 }
 0x234   :  { %2040 = vmatmul.mubr.f32.gmra.mrb[22].mxu0 %v1609_v22  ;;  %2652 = vmatmul.mubr.f32.gmra.mrb[22].mxu1 %v2221_v39 }
 0x235   :  { %3741 = vmatpush1.bf16.msra.mxu0 %v7445_v48  ;;  %4029 = vmatpush1.bf16.msra.mxu1 %v7445_v48  ;;  %v6969_v48 = vrot.slane %v2845_v17, %v6623_v0 }
 0x236   :  { %3743 = vmatprep.subr.bf16.mxu0 %v7446_v23  ;;  %4031 = vmatprep.subr.bf16.mxu1 %v7446_v23 }
 0x237   :  { %2045 = vmatprep.mubr.f32.mxu0 %v1619_v21  ;;  %2657 = vmatprep.mubr.f32.mxu1 %v2231_v29 }
 0x238   :  { %2046 = vmatmul.mubr.f32.gmra.mrb[24].mxu0 %v1618_v55  ;;  %2658 = vmatmul.mubr.f32.gmra.mrb[24].mxu1 %v2230_v11 }
 0x239   :  { %3745 = vmatpush1.bf16.msra.mxu0 %v7447_v54  ;;  %4033 = vmatpush1.bf16.msra.mxu1 %v7447_v54 }
 0x23a   :  { %3747 = vmatprep.subr.bf16.mxu0 %v6097_v62  ;;  %4035 = vmatprep.subr.bf16.mxu1 %v6097_v62  ;;  %v1575_v62 = vld [vmem:[%s7090_s2 + $0x40] sm:$0xff] }
 0x23b   :  { %2051 = vmatprep.mubr.f32.mxu0 %v1628_v47  ;;  %2663 = vmatprep.mubr.f32.mxu1 %v2240_v5  ;;  %v6975_v5 = vrot.slane %v2845_v17, %v6636_v24 }
 0x23c   :  { %2052 = vmatmul.mubr.f32.gmra.mrb[26].mxu0 %v1627_v56  ;;  %2664 = vmatmul.mubr.f32.gmra.mrb[26].mxu1 %v2239_v28 }
 0x23d   :  { %3749 = vmatpush1.bf16.msra.mxu0 %v6119_v41  ;;  %4037 = vmatpush1.bf16.msra.mxu1 %v6119_v41  ;;  %v2187_v41 = vld [vmem:[%s7091_s3 + $0x40] sm:$0xff] }
 0x23e   :  { %3751 = vmatprep.subr.bf16.mxu0 %v6129_v36  ;;  %4039 = vmatprep.subr.bf16.mxu1 %v6129_v36  ;;  %v1584_v36 = vld [vmem:[%s7090_s2 + $0x88] sm:$0xff] }
 0x23f   :  { %2122 = vmatprep.mubr.f32.mxu0 %v4323_v12  ;;  %2734 = vmatprep.mubr.f32.mxu1 %v4323_v12 }
 0x241   :  { %3753 = vmatpush1.bf16.msra.mxu0 %v6139_v33  ;;  %4041 = vmatpush1.bf16.msra.mxu1 %v6139_v33  ;;  %v2196_v33 = vld [vmem:[%s7091_s3 + $0x88] sm:$0xff] }
 0x244   :  { %2123 = vmatmul.mubr.f32.vlgmr.msra.gmra.mrb[14].mxu0 %v1575_v62  ;;  %2735 = vmatmul.mubr.f32.vlgmr.msra.gmra.mrb[14].mxu1 %v2187_v41 }
 0x245   :  { %2128 = vmatprep.mubr.f32.mxu0 %v4323_v12  ;;  %2740 = vmatprep.mubr.f32.mxu1 %v4323_v12 }
 0x248   :  { %2129 = vmatmul.mubr.f32.gmra.mrb[16].mxu0 %v1584_v36  ;;  %2741 = vmatmul.mubr.f32.gmra.mrb[16].mxu1 %v2196_v33 }
 0x249   :  { %2134 = vmatprep.mubr.f32.mxu0 %v4323_v12  ;;  %2746 = vmatprep.mubr.f32.mxu1 %v4323_v12 }
 0x24c   :  { %2135 = vmatmul.mubr.f32.gmra.mrb[18].mxu0 %v1593_v30  ;;  %2747 = vmatmul.mubr.f32.gmra.mrb[18].mxu1 %v2205_v3 }
 0x24d   :  { %2140 = vmatprep.mubr.f32.mxu0 %v4323_v12  ;;  %2752 = vmatprep.mubr.f32.mxu1 %v4323_v12 }
 0x250   :  { %2141 = vmatmul.mubr.f32.gmra.mrb[20].mxu0 %v1602_v7  ;;  %2753 = vmatmul.mubr.f32.gmra.mrb[20].mxu1 %v2214_v8 }
 0x251   :  { %2146 = vmatprep.mubr.f32.mxu0 %v4323_v12  ;;  %2758 = vmatprep.mubr.f32.mxu1 %v4323_v12 }
 0x254   :  { %2147 = vmatmul.mubr.f32.gmra.mrb[22].mxu0 %v1611_v13  ;;  %2759 = vmatmul.mubr.f32.gmra.mrb[22].mxu1 %v2223_v14 }
 0x255   :  { %2152 = vmatprep.mubr.f32.mxu0 %v4323_v12  ;;  %2764 = vmatprep.mubr.f32.mxu1 %v4323_v12 }
 0x258   :  { %2153 = vmatmul.mubr.f32.gmra.mrb[24].mxu0 %v1620_v19  ;;  %2765 = vmatmul.mubr.f32.gmra.mrb[24].mxu1 %v2232_v25 }
 0x259   :  { %2158 = vmatprep.mubr.f32.mxu0 %v4323_v12  ;;  %2770 = vmatprep.mubr.f32.mxu1 %v4323_v12  ;;  %v2819_v12 = vld [vmem:[%s7093_s6] sm:$0x3] }
 0x25a   :  { %v6961_v27 = vrot.slane %v2819_v12, %v6623_v0  ;;  %v6964_v22 = vrot.slane %v2819_v12, %v6636_v24 }
 0x25c   :  { %2159 = vmatmul.mubr.f32.gmra.mrb[26].mxu0 %v1629_v26  ;;  %2771 = vmatmul.mubr.f32.gmra.mrb[26].mxu1 %v2241_v31 }
 0x317   :  { %v2124_v32 = vpop.f32.mrb[14].mxu0  ;;  %v2736_v38 = vpop.f32.mrb[14].mxu1 }
 0x318   :  { %v4070_v45 = vadd.f32 %v2124_v32, %v6647_v42  ;;  %v4084_v46 = vadd.f32 %v2736_v38, %v6647_v42  ;;  %v2126_v51 = vpop.f32.mrb[15].mxu0  ;;  %v2738_v58 = vpop.f32.mrb[15].mxu1 }
 0x319   :  { %v4071_v63 = vadd.f32 %v2126_v51, %v6658_v61  ;;  %v4085_v60 = vadd.f32 %v2738_v58, %v6658_v61 }
 0x31a   :  { %v2165_v9 = vmax.f32 %v4070_v45, 0.0  ;;  %v2777_v16 = vmax.f32 %v4084_v46, 0.0 }
 0x31b   :  { %v2166_v34 = vmax.f32 %v4071_v63, 0.0  ;;  %v2778_v35 = vmax.f32 %v4085_v60, 0.0  ;;  %v2130_v43 = vpop.f32.mrb[16].mxu0  ;;  %v2742_v53 = vpop.f32.mrb[16].mxu1 }
 0x31c   :  { %v2791_v1 = vmax.f32 %v2165_v9, %v2777_v16  ;;  %v4072_v39 = vadd.f32 %v2130_v43, %v6647_v42  ;;  %v4086_v59 = vadd.f32 %v2742_v53, %v6647_v42  ;;  %v2132_v21 = vpop.f32.mrb[17].mxu0  ;;  %v2744_v29 = vpop.f32.mrb[17].mxu1 }
 0x31d   :  { %v2792_v55 = vmax.f32 %v2166_v34, %v2778_v35  ;;  %v4073_v11 = vadd.f32 %v2132_v21, %v6658_v61  ;;  %v4087_v23 = vadd.f32 %v2744_v29, %v6658_v61 }
 0x31e   :  { %v2805_v47 = vmax.f32 %v6688_v18, %v2791_v1  ;;  %v2167_v54 = vmax.f32 %v4072_v39, 0.0  ;;  %v2779_v56 = vmax.f32 %v4086_v59, 0.0 }
 0x31f   :  { %v2806_v28 = vmax.f32 %v6698_v20, %v2792_v55  ;;  %v2168_v62 = vmax.f32 %v4073_v11, 0.0  ;;  %v2780_v41 = vmax.f32 %v4087_v23, 0.0  ;;  %v2136_v36 = vpop.f32.mrb[18].mxu0  ;;  %v2748_v0 = vpop.f32.mrb[18].mxu1 }
 0x320   :  { %v2831_v33 = vmul.f32 %v6961_v27, %v2805_v47  ;;  %v2793_v30 = vmax.f32 %v2167_v54, %v2779_v56  ;;  %v4074_v3 = vadd.f32 %v2136_v36, %v6647_v42  ;;  %v4088_v7 = vadd.f32 %v2748_v0, %v6647_v42  ;;  %v2138_v18 = vpop.f32.mrb[19].mxu0  ;;  %v2750_v8 = vpop.f32.mrb[19].mxu1 }
 0x321   :  { %v2832_v24 = vmul.f32 %v6964_v22, %v2806_v28  ;;  %v2794_v13 = vmax.f32 %v2168_v62, %v2780_v41  ;;  %v4075_v14 = vadd.f32 %v2138_v18, %v6658_v61  ;;  %v4089_v20 = vadd.f32 %v2750_v8, %v6658_v61 }
 0x322   :  { %v2857_v19 = vadd.f32 %v6969_v48, %v2831_v33  ;;  %v2807_v25 = vmax.f32 %v6706_v52, %v2793_v30  ;;  %v2169_v26 = vmax.f32 %v4074_v3, 0.0  ;;  %v2781_v31 = vmax.f32 %v4088_v7, 0.0 }
 0x323   :  { %v2858_v32 = vadd.f32 %v6975_v5, %v2832_v24  ;;  %v2808_v38 = vmax.f32 %v6710_v6, %v2794_v13  ;;  %v2170_v45 = vmax.f32 %v4075_v14, 0.0  ;;  %v2782_v46 = vmax.f32 %v4089_v20, 0.0  ;;  %v2142_v12 = vpop.f32.mrb[20].mxu0  ;;  %v2754_v51 = vpop.f32.mrb[20].mxu1 }
 0x324   :  { %2871 = vst [vmem:[%s7095_s8] sm:$0xff] %v2857_v19  ;;  %v2833_v58 = vmul.f32 %v6961_v27, %v2807_v25  ;;  %v2795_v63 = vmax.f32 %v2169_v26, %v2781_v31  ;;  %v4076_v60 = vadd.f32 %v2142_v12, %v6647_v42  ;;  %v4090_v52 = vadd.f32 %v2754_v51, %v6647_v42  ;;  %v2144_v9 = vpop.f32.mrb[21].mxu0  ;;  %v2756_v16 = vpop.f32.mrb[21].mxu1 }
 0x325   :  { %2873 = vst.msk [vmem:[%s7095_s8 + $0x8] sm:$0xff] %vm2872_vm0, %v2858_v32  ;;  %v2834_v6 = vmul.f32 %v6964_v22, %v2808_v38  ;;  %v2796_v17 = vmax.f32 %v2170_v45, %v2782_v46  ;;  %v4077_v34 = vadd.f32 %v2144_v9, %v6658_v61  ;;  %v4091_v35 = vadd.f32 %v2756_v16, %v6658_v61 }
 0x326   :  { %v2859_v43 = vadd.f32 %v6969_v48, %v2833_v58  ;;  %v2809_v53 = vmax.f32 %v6718_v15, %v2795_v63  ;;  %v2171_v1 = vmax.f32 %v4076_v60, 0.0  ;;  %v2783_v39 = vmax.f32 %v4090_v52, 0.0 }
 0x327   :  { %v2860_v59 = vadd.f32 %v6975_v5, %v2834_v6  ;;  %v2810_v21 = vmax.f32 %v6722_v2, %v2796_v17  ;;  %v2172_v29 = vmax.f32 %v4077_v34, 0.0  ;;  %v2784_v55 = vmax.f32 %v4091_v35, 0.0  ;;  %v2148_v11 = vpop.f32.mrb[22].mxu0  ;;  %v2760_v23 = vpop.f32.mrb[22].mxu1 }
 0x328   :  { %2874 = vst [vmem:[%s7095_s8 + $0x10] sm:$0xff] %v2859_v43  ;;  %v2835_v47 = vmul.f32 %v6961_v27, %v2809_v53  ;;  %v2797_v54 = vmax.f32 %v2171_v1, %v2783_v39  ;;  %v4078_v56 = vadd.f32 %v2148_v11, %v6647_v42  ;;  %v4092_v15 = vadd.f32 %v2760_v23, %v6647_v42  ;;  %v2150_v28 = vpop.f32.mrb[23].mxu0  ;;  %v2762_v62 = vpop.f32.mrb[23].mxu1 }
 0x329   :  { %2875 = vst.msk [vmem:[%s7095_s8 + $0x18] sm:$0xff] %vm2872_vm0, %v2860_v59  ;;  %v2836_v2 = vmul.f32 %v6964_v22, %v2810_v21  ;;  %v2798_v41 = vmax.f32 %v2172_v29, %v2784_v55  ;;  %v4079_v36 = vadd.f32 %v2150_v28, %v6658_v61  ;;  %v4093_v0 = vadd.f32 %v2762_v62, %v6658_v61 }
 0x32a   :  { %v2861_v33 = vadd.f32 %v6969_v48, %v2835_v47  ;;  %v2811_v30 = vmax.f32 %v6730_v40, %v2797_v54  ;;  %v2173_v3 = vmax.f32 %v4078_v56, 0.0  ;;  %v2785_v7 = vmax.f32 %v4092_v15, 0.0 }
 0x32b   :  { %v2862_v18 = vadd.f32 %v6975_v5, %v2836_v2  ;;  %v2812_v8 = vmax.f32 %v6734_v10, %v2798_v41  ;;  %v2174_v24 = vmax.f32 %v4079_v36, 0.0  ;;  %v2786_v13 = vmax.f32 %v4093_v0, 0.0  ;;  %v2154_v14 = vpop.f32.mrb[24].mxu0  ;;  %v2766_v20 = vpop.f32.mrb[24].mxu1 }
 0x32c   :  { %2876 = vst [vmem:[%s7095_s8 + $0x20] sm:$0xff] %v2861_v33  ;;  %v2837_v19 = vmul.f32 %v6961_v27, %v2811_v30  ;;  %v2799_v25 = vmax.f32 %v2173_v3, %v2785_v7  ;;  %v4080_v26 = vadd.f32 %v2154_v14, %v6647_v42  ;;  %v4094_v40 = vadd.f32 %v2766_v20, %v6647_v42  ;;  %v2156_v31 = vpop.f32.mrb[25].mxu0  ;;  %v2768_v32 = vpop.f32.mrb[25].mxu1 }
 0x32d   :  { %2877 = vst.msk [vmem:[%s7095_s8 + $0x28] sm:$0xff] %vm2872_vm0, %v2862_v18  ;;  %v2838_v10 = vmul.f32 %v6964_v22, %v2812_v8  ;;  %v2800_v38 = vmax.f32 %v2174_v24, %v2786_v13  ;;  %v4081_v45 = vadd.f32 %v2156_v31, %v6658_v61  ;;  %v4095_v46 = vadd.f32 %v2768_v32, %v6658_v61 }
 0x32e   :  { %v2863_v12 = vadd.f32 %v6969_v48, %v2837_v19  ;;  %v2813_v51 = vmax.f32 %v6742_v37, %v2799_v25  ;;  %v2175_v58 = vmax.f32 %v4080_v26, 0.0  ;;  %v2787_v63 = vmax.f32 %v4094_v40, 0.0 }
 0x32f   :  { %v2864_v60 = vadd.f32 %v6975_v5, %v2838_v10  ;;  %v2814_v52 = vmax.f32 %v6746_v57, %v2800_v38  ;;  %v2176_v9 = vmax.f32 %v4081_v45, 0.0  ;;  %v2788_v16 = vmax.f32 %v4095_v46, 0.0  ;;  %v2160_v6 = vpop.f32.mrb[26].mxu0  ;;  %v2772_v17 = vpop.f32.mrb[26].mxu1 }
 0x330   :  { %2878 = vst [vmem:[%s7095_s8 + $0x30] sm:$0xff] %v2863_v12  ;;  %v2839_v34 = vmul.f32 %v6961_v27, %v2813_v51  ;;  %v2801_v35 = vmax.f32 %v2175_v58, %v2787_v63  ;;  %v4082_v43 = vadd.f32 %v2160_v6, %v6647_v42  ;;  %v4096_v37 = vadd.f32 %v2772_v17, %v6647_v42  ;;  %v2162_v53 = vpop.f32.mrb[27].mxu0  ;;  %v2774_v1 = vpop.f32.mrb[27].mxu1 }
 0x331   :  { %2879 = vst.msk [vmem:[%s7095_s8 + $0x38] sm:$0xff] %vm2872_vm0, %v2864_v60  ;;  %v2840_v57 = vmul.f32 %v6964_v22, %v2814_v52  ;;  %v2802_v39 = vmax.f32 %v2176_v9, %v2788_v16  ;;  %v4083_v59 = vadd.f32 %v2162_v53, %v6658_v61  ;;  %v4097_v21 = vadd.f32 %v2774_v1, %v6658_v61 }
 0x332   :  { %v2865_v29 = vadd.f32 %v6969_v48, %v2839_v34  ;;  %v2815_v55 = vmax.f32 %v6754_v50, %v2801_v35  ;;  %v2177_v11 = vmax.f32 %v4082_v43, 0.0  ;;  %v2789_v42 = vmax.f32 %v4096_v37, 0.0 }
 0x333   :  { %v2866_v23 = vadd.f32 %v6975_v5, %v2840_v57  ;;  %v2816_v47 = vmax.f32 %v6758_v44, %v2802_v39  ;;  %v2178_v54 = vmax.f32 %v4083_v59, 0.0  ;;  %v2790_v56 = vmax.f32 %v4097_v21, 0.0 }
 0x334   :  { %2880 = vst [vmem:[%s7095_s8 + $0x40] sm:$0xff] %v2865_v29  ;;  %v2841_v15 = vmul.f32 %v6961_v27, %v2815_v55  ;;  %v2803_v28 = vmax.f32 %v2177_v11, %v2789_v42 }
 0x335   :  { %2881 = vst.msk [vmem:[%s7095_s8 + $0x48] sm:$0xff] %vm2872_vm0, %v2866_v23  ;;  %v2842_v61 = vmul.f32 %v6964_v22, %v2816_v47  ;;  %v2804_v50 = vmax.f32 %v2178_v54, %v2790_v56 }
 0x336   :  { %v2867_v62 = vadd.f32 %v6969_v48, %v2841_v15  ;;  %v2817_v44 = vmax.f32 %v6766_v49, %v2803_v28 }
 0x337   :  { %v2868_v2 = vadd.f32 %v6975_v5, %v2842_v61  ;;  %v2818_v41 = vmax.f32 %v6768_v4, %v2804_v50 }
 0x338   :  { %2882 = vst [vmem:[%s7095_s8 + $0x50] sm:$0xff] %v2867_v62  ;;  %v2843_v36 = vmul.f32 %v6961_v27, %v2817_v44 }
 0x339   :  { %2883 = vst.msk [vmem:[%s7095_s8 + $0x58] sm:$0xff] %vm2872_vm0, %v2868_v2  ;;  %v2844_v0 = vmul.f32 %v6964_v22, %v2818_v41 }
 0x33a   :  { %v2869_v33 = vadd.f32 %v6969_v48, %v2843_v36 }
 0x33b   :  { %v2870_v49 = vadd.f32 %v6975_v5, %v2844_v0 }
 0x33c   :  { %2884 = vst [vmem:[%s7095_s8 + $0x60] sm:$0xff] %v2869_v33 }
 0x33d   :  { %2885 = vst.msk [vmem:[%s7095_s8 + $0x68] sm:$0xff] %vm2872_vm0, %v2870_v49 }

// kernel: ref_cnn_forward.8
= control target key start
LH: loop header
LB: loop body
LE: loop exit
PB: predicated region body
PF: predicated region fallthrough
CT: control target
= control target key end

     0   :  { %vm506_vm0 = vcmask 523264   ;;  %s3132_s1 = inlined_call_operand.vmem [shape: f32[1728,256], index: 1, kind: input, shape index: {}]   ;;  %s3133_s0 = inlined_call_operand.vmem [shape: f32[24,1728], index: 0, kind: input, shape index: {}]   ;;  %s3134_s2 = inlined_call_operand.vmem [shape: f32[1,256], index: 2, kind: input, shape index: {}]   ;;  %s3135_s3 = inlined_call_operand.vmem [shape: f32[1,256], index: 3, kind: input, shape index: {}]   ;;  %s3136_s4 = inlined_call_operand.vmem [shape: f32[1,256], index: 4, kind: input, shape index: {}]   ;;  %s3137_s5 = inlined_call_operand.vmem [shape: f32[24,256], index: 5, kind: output, shape index: {}]  }
   0x1   :  { %v63_v0 = vld [vmem:[%s3132_s1 + $0x8] sm:$0xff]  ;;  %v65_v1 = vld [vmem:[%s3132_s1 + $0x18] sm:$0xff]  ;;  %v62_v5 = vld [vmem:[%s3132_s1] sm:$0xff] }
   0x2   :  { %v255_v2 = vld [vmem:[%s3132_s1 + $0x608] sm:$0xff]  ;;  %v1152_v3 = vpack.c.bf16 %v65_v1, %v63_v0  ;;  %v257_v4 = vld [vmem:[%s3132_s1 + $0x618] sm:$0xff]  ;;  %v64_v6 = vld [vmem:[%s3132_s1 + $0x10] sm:$0xff] }
   0x3   :  { %v1344_v7 = vpack.c.bf16 %v257_v4, %v255_v2  ;;  %v1154_v8 = vpack.c.bf16 %v64_v6, %v62_v5  ;;  %v254_v9 = vld [vmem:[%s3132_s1 + $0x600] sm:$0xff]  ;;  %v256_v10 = vld [vmem:[%s3132_s1 + $0x610] sm:$0xff]  ;;  %v67_v11 = vld [vmem:[%s3132_s1 + $0x28] sm:$0xff] }
   0x4   :  { %1153 = vmatprep.subr.bf16.mxu1 %v1152_v3  ;;  %v1346_v12 = vpack.c.bf16 %v256_v10, %v254_v9  ;;  %v69_v13 = vld [vmem:[%s3132_s1 + $0x38] sm:$0xff]  ;;  %v259_v14 = vld [vmem:[%s3132_s1 + $0x628] sm:$0xff]  ;;  %v66_v18 = vld [vmem:[%s3132_s1 + $0x20] sm:$0xff] }
   0x5   :  { %v261_v15 = vld [vmem:[%s3132_s1 + $0x638] sm:$0xff]  ;;  %1345 = vmatprep.subr.bf16.mxu0 %v1344_v7  ;;  %1155 = vmatpush1.bf16.msra.mxu1 %v1154_v8  ;;  %v1156_v16 = vpack.c.bf16 %v69_v13, %v67_v11  ;;  %v68_v19 = vld [vmem:[%s3132_s1 + $0x30] sm:$0xff]  ;;  %v258_v20 = vld [vmem:[%s3132_s1 + $0x620] sm:$0xff] }
   0x6   :  { %v1348_v17 = vpack.c.bf16 %v261_v15, %v259_v14  ;;  %1347 = vmatpush1.bf16.msra.mxu0 %v1346_v12  ;;  %v1158_v21 = vpack.c.bf16 %v68_v19, %v66_v18  ;;  %v260_v22 = vld [vmem:[%s3132_s1 + $0x630] sm:$0xff]  ;;  %v71_v23 = vld [vmem:[%s3132_s1 + $0x48] sm:$0xff]  ;;  %v73_v24 = vld [vmem:[%s3132_s1 + $0x58] sm:$0xff] }
   0x7   :  { %1157 = vmatprep.subr.bf16.mxu1 %v1156_v16  ;;  %v1350_v25 = vpack.c.bf16 %v260_v22, %v258_v20  ;;  %v1160_v26 = vpack.c.bf16 %v73_v24, %v71_v23  ;;  %v263_v27 = vld [vmem:[%s3132_s1 + $0x648] sm:$0xff]  ;;  %v265_v28 = vld [vmem:[%s3132_s1 + $0x658] sm:$0xff]  ;;  %v70_v29 = vld [vmem:[%s3132_s1 + $0x40] sm:$0xff] }
   0x8   :  { %1349 = vmatprep.subr.bf16.mxu0 %v1348_v17  ;;  %v1352_v30 = vpack.c.bf16 %v265_v28, %v263_v27  ;;  %v72_v31 = vld [vmem:[%s3132_s1 + $0x50] sm:$0xff]  ;;  %v262_v32 = vld [vmem:[%s3132_s1 + $0x640] sm:$0xff]  ;;  %v75_v35 = vld [vmem:[%s3132_s1 + $0x68] sm:$0xff] }
   0x9   :  { %v264_v33 = vld [vmem:[%s3132_s1 + $0x650] sm:$0xff]  ;;  %1159 = vmatpush1.bf16.msra.mxu1 %v1158_v21  ;;  %v1162_v34 = vpack.c.bf16 %v72_v31, %v70_v29  ;;  %v77_v36 = vld [vmem:[%s3132_s1 + $0x78] sm:$0xff]  ;;  %v267_v37 = vld [vmem:[%s3132_s1 + $0x668] sm:$0xff] }
   0xa   :  { %1351 = vmatpush1.bf16.msra.mxu0 %v1350_v25  ;;  %1161 = vmatprep.subr.bf16.mxu1 %v1160_v26  ;;  %v1354_v38 = vpack.c.bf16 %v264_v33, %v262_v32  ;;  %v1164_v39 = vpack.c.bf16 %v77_v36, %v75_v35  ;;  %v269_v40 = vld [vmem:[%s3132_s1 + $0x678] sm:$0xff]  ;;  %v74_v41 = vld [vmem:[%s3132_s1 + $0x60] sm:$0xff]  ;;  %v76_v42 = vld [vmem:[%s3132_s1 + $0x70] sm:$0xff] }
   0xb   :  { %1353 = vmatprep.subr.bf16.mxu0 %v1352_v30  ;;  %v1356_v43 = vpack.c.bf16 %v269_v40, %v267_v37  ;;  %v266_v44 = vld [vmem:[%s3132_s1 + $0x660] sm:$0xff]  ;;  %v268_v45 = vld [vmem:[%s3132_s1 + $0x670] sm:$0xff]  ;;  %v79_v46 = vld [vmem:[%s3132_s1 + $0x88] sm:$0xff]  ;;  %v1166_v50 = vpack.c.bf16 %v76_v42, %v74_v41 }
   0xc   :  { %v81_v47 = vld [vmem:[%s3132_s1 + $0x98] sm:$0xff]  ;;  %v271_v48 = vld [vmem:[%s3132_s1 + $0x688] sm:$0xff]  ;;  %v1358_v51 = vpack.c.bf16 %v268_v45, %v266_v44  ;;  %v78_v53 = vld [vmem:[%s3132_s1 + $0x80] sm:$0xff] }
   0xd   :  { %v273_v49 = vld [vmem:[%s3132_s1 + $0x698] sm:$0xff]  ;;  %1163 = vmatpush1.bf16.msra.mxu1 %v1162_v34  ;;  %v1168_v52 = vpack.c.bf16 %v81_v47, %v79_v46  ;;  %v80_v54 = vld [vmem:[%s3132_s1 + $0x90] sm:$0xff]  ;;  %v270_v55 = vld [vmem:[%s3132_s1 + $0x680] sm:$0xff] }
   0xe   :  { %1355 = vmatpush1.bf16.msra.mxu0 %v1354_v38  ;;  %1165 = vmatprep.subr.bf16.mxu1 %v1164_v39  ;;  %v1360_v56 = vpack.c.bf16 %v273_v49, %v271_v48  ;;  %v272_v57 = vld [vmem:[%s3132_s1 + $0x690] sm:$0xff]  ;;  %v83_v58 = vld [vmem:[%s3132_s1 + $0xa8] sm:$0xff]  ;;  %v85_v59 = vld [vmem:[%s3132_s1 + $0xb8] sm:$0xff]  ;;  %v1170_v62 = vpack.c.bf16 %v80_v54, %v78_v53 }
   0xf   :  { %1357 = vmatprep.subr.bf16.mxu0 %v1356_v43  ;;  %v275_v60 = vld [vmem:[%s3132_s1 + $0x6a8] sm:$0xff]  ;;  %v277_v61 = vld [vmem:[%s3132_s1 + $0x6b8] sm:$0xff]  ;;  %v1362_v63 = vpack.c.bf16 %v272_v57, %v270_v55  ;;  %v1172_v0 = vpack.c.bf16 %v85_v59, %v83_v58  ;;  %v82_v1 = vld [vmem:[%s3132_s1 + $0xa0] sm:$0xff] }
  0x10   :  { %v84_v2 = vld [vmem:[%s3132_s1 + $0xb0] sm:$0xff]  ;;  %v274_v3 = vld [vmem:[%s3132_s1 + $0x6a0] sm:$0xff]  ;;  %v1364_v4 = vpack.c.bf16 %v277_v61, %v275_v60  ;;  %v87_v6 = vld [vmem:[%s3132_s1 + $0xc8] sm:$0xff] }
  0x11   :  { %1167 = vmatpush1.bf16.msra.mxu1 %v1166_v50  ;;  %v276_v5 = vld [vmem:[%s3132_s1 + $0x6b0] sm:$0xff]  ;;  %v89_v7 = vld [vmem:[%s3132_s1 + $0xd8] sm:$0xff]  ;;  %v279_v8 = vld [vmem:[%s3132_s1 + $0x6c8] sm:$0xff]  ;;  %v1174_v10 = vpack.c.bf16 %v84_v2, %v82_v1 }
  0x12   :  { %1359 = vmatpush1.bf16.msra.mxu0 %v1358_v51  ;;  %1169 = vmatprep.subr.bf16.mxu1 %v1168_v52  ;;  %v281_v9 = vld [vmem:[%s3132_s1 + $0x6d8] sm:$0xff]  ;;  %v1366_v11 = vpack.c.bf16 %v276_v5, %v274_v3  ;;  %v1176_v12 = vpack.c.bf16 %v89_v7, %v87_v6  ;;  %v86_v13 = vld [vmem:[%s3132_s1 + $0xc0] sm:$0xff]  ;;  %v88_v14 = vld [vmem:[%s3132_s1 + $0xd0] sm:$0xff] }
  0x13   :  { %1361 = vmatprep.subr.bf16.mxu0 %v1360_v56  ;;  %v278_v15 = vld [vmem:[%s3132_s1 + $0x6c0] sm:$0xff]  ;;  %v1368_v16 = vpack.c.bf16 %v281_v9, %v279_v8  ;;  %v280_v17 = vld [vmem:[%s3132_s1 + $0x6d0] sm:$0xff]  ;;  %v91_v18 = vld [vmem:[%s3132_s1 + $0xe8] sm:$0xff]  ;;  %v1178_v22 = vpack.c.bf16 %v88_v14, %v86_v13 }
  0x14   :  { %v93_v19 = vld [vmem:[%s3132_s1 + $0xf8] sm:$0xff]  ;;  %v283_v20 = vld [vmem:[%s3132_s1 + $0x6e8] sm:$0xff]  ;;  %v1370_v23 = vpack.c.bf16 %v280_v17, %v278_v15  ;;  %v90_v25 = vld [vmem:[%s3132_s1 + $0xe0] sm:$0xff] }
  0x15   :  { %1171 = vmatpush1.bf16.msra.mxu1 %v1170_v62  ;;  %v285_v21 = vld [vmem:[%s3132_s1 + $0x6f8] sm:$0xff]  ;;  %v1180_v24 = vpack.c.bf16 %v93_v19, %v91_v18  ;;  %v92_v26 = vld [vmem:[%s3132_s1 + $0xf0] sm:$0xff]  ;;  %v282_v27 = vld [vmem:[%s3132_s1 + $0x6e0] sm:$0xff] }
  0x16   :  { %1363 = vmatpush1.bf16.msra.mxu0 %v1362_v63  ;;  %1173 = vmatprep.subr.bf16.mxu1 %v1172_v0  ;;  %v1372_v28 = vpack.c.bf16 %v285_v21, %v283_v20  ;;  %v284_v29 = vld [vmem:[%s3132_s1 + $0x6f0] sm:$0xff]  ;;  %v95_v30 = vld [vmem:[%s3132_s1 + $0x108] sm:$0xff]  ;;  %v97_v31 = vld [vmem:[%s3132_s1 + $0x118] sm:$0xff]  ;;  %v1182_v34 = vpack.c.bf16 %v92_v26, %v90_v25 }
  0x17   :  { %1365 = vmatprep.subr.bf16.mxu0 %v1364_v4  ;;  %v287_v32 = vld [vmem:[%s3132_s1 + $0x708] sm:$0xff]  ;;  %v289_v33 = vld [vmem:[%s3132_s1 + $0x718] sm:$0xff]  ;;  %v1374_v35 = vpack.c.bf16 %v284_v29, %v282_v27  ;;  %v1184_v36 = vpack.c.bf16 %v97_v31, %v95_v30  ;;  %v94_v37 = vld [vmem:[%s3132_s1 + $0x100] sm:$0xff] }
  0x18   :  { %v96_v38 = vld [vmem:[%s3132_s1 + $0x110] sm:$0xff]  ;;  %v286_v39 = vld [vmem:[%s3132_s1 + $0x700] sm:$0xff]  ;;  %v1376_v40 = vpack.c.bf16 %v289_v33, %v287_v32  ;;  %v99_v42 = vld [vmem:[%s3132_s1 + $0x128] sm:$0xff] }
  0x19   :  { %1175 = vmatpush1.bf16.msra.mxu1 %v1174_v10  ;;  %v288_v41 = vld [vmem:[%s3132_s1 + $0x710] sm:$0xff]  ;;  %v101_v43 = vld [vmem:[%s3132_s1 + $0x138] sm:$0xff]  ;;  %v291_v44 = vld [vmem:[%s3132_s1 + $0x728] sm:$0xff]  ;;  %v1186_v46 = vpack.c.bf16 %v96_v38, %v94_v37 }
  0x1a   :  { %1367 = vmatpush1.bf16.msra.mxu0 %v1366_v11  ;;  %1177 = vmatprep.subr.bf16.mxu1 %v1176_v12  ;;  %v293_v45 = vld [vmem:[%s3132_s1 + $0x738] sm:$0xff]  ;;  %v1378_v47 = vpack.c.bf16 %v288_v41, %v286_v39  ;;  %v1188_v48 = vpack.c.bf16 %v101_v43, %v99_v42  ;;  %v98_v49 = vld [vmem:[%s3132_s1 + $0x120] sm:$0xff]  ;;  %v100_v50 = vld [vmem:[%s3132_s1 + $0x130] sm:$0xff] }
  0x1b   :  { %1369 = vmatprep.subr.bf16.mxu0 %v1368_v16  ;;  %v290_v51 = vld [vmem:[%s3132_s1 + $0x720] sm:$0xff]  ;;  %v1380_v52 = vpack.c.bf16 %v293_v45, %v291_v44  ;;  %v292_v53 = vld [vmem:[%s3132_s1 + $0x730] sm:$0xff]  ;;  %v103_v54 = vld [vmem:[%s3132_s1 + $0x148] sm:$0xff]  ;;  %v1190_v58 = vpack.c.bf16 %v100_v50, %v98_v49 }
  0x1c   :  { %v105_v55 = vld [vmem:[%s3132_s1 + $0x158] sm:$0xff]  ;;  %v295_v56 = vld [vmem:[%s3132_s1 + $0x748] sm:$0xff]  ;;  %v1382_v59 = vpack.c.bf16 %v292_v53, %v290_v51  ;;  %v102_v61 = vld [vmem:[%s3132_s1 + $0x140] sm:$0xff] }
  0x1d   :  { %1179 = vmatpush1.bf16.msra.mxu1 %v1178_v22  ;;  %v297_v57 = vld [vmem:[%s3132_s1 + $0x758] sm:$0xff]  ;;  %v1192_v60 = vpack.c.bf16 %v105_v55, %v103_v54  ;;  %v104_v62 = vld [vmem:[%s3132_s1 + $0x150] sm:$0xff]  ;;  %v294_v63 = vld [vmem:[%s3132_s1 + $0x740] sm:$0xff] }
  0x1e   :  { %1371 = vmatpush1.bf16.msra.mxu0 %v1370_v23  ;;  %1181 = vmatprep.subr.bf16.mxu1 %v1180_v24  ;;  %v1384_v0 = vpack.c.bf16 %v297_v57, %v295_v56  ;;  %v296_v1 = vld [vmem:[%s3132_s1 + $0x750] sm:$0xff]  ;;  %v107_v2 = vld [vmem:[%s3132_s1 + $0x168] sm:$0xff]  ;;  %v109_v3 = vld [vmem:[%s3132_s1 + $0x178] sm:$0xff]  ;;  %v1194_v6 = vpack.c.bf16 %v104_v62, %v102_v61 }
  0x1f   :  { %1373 = vmatprep.subr.bf16.mxu0 %v1372_v28  ;;  %v299_v4 = vld [vmem:[%s3132_s1 + $0x768] sm:$0xff]  ;;  %v301_v5 = vld [vmem:[%s3132_s1 + $0x778] sm:$0xff]  ;;  %v106_v7 = vld [vmem:[%s3132_s1 + $0x160] sm:$0xff]  ;;  %v1386_v8 = vpack.c.bf16 %v296_v1, %v294_v63  ;;  %v1196_v9 = vpack.c.bf16 %v109_v3, %v107_v2 }
  0x20   :  { %v108_v10 = vld [vmem:[%s3132_s1 + $0x170] sm:$0xff]  ;;  %v298_v11 = vld [vmem:[%s3132_s1 + $0x760] sm:$0xff]  ;;  %v1388_v13 = vpack.c.bf16 %v301_v5, %v299_v4  ;;  %v111_v14 = vld [vmem:[%s3132_s1 + $0x188] sm:$0xff] }
  0x21   :  { %1183 = vmatpush1.bf16.msra.mxu1 %v1182_v34  ;;  %v300_v12 = vld [vmem:[%s3132_s1 + $0x770] sm:$0xff]  ;;  %v113_v15 = vld [vmem:[%s3132_s1 + $0x198] sm:$0xff]  ;;  %v21_v16 = vld [vmem:[%s3133_s0 + $0x8] sm:$0xff]  ;;  %v1198_v20 = vpack.c.bf16 %v108_v10, %v106_v7 }
  0x22   :  { %1375 = vmatpush1.bf16.msra.mxu0 %v1374_v35  ;;  %1185 = vmatprep.subr.bf16.mxu1 %v1184_v36  ;;  %v303_v17 = vld [vmem:[%s3132_s1 + $0x788] sm:$0xff]  ;;  %v305_v18 = vld [vmem:[%s3132_s1 + $0x798] sm:$0xff]  ;;  %v1390_v21 = vpack.c.bf16 %v300_v12, %v298_v11  ;;  %v1200_v22 = vpack.c.bf16 %v113_v15, %v111_v14  ;;  %v110_v23 = vld [vmem:[%s3132_s1 + $0x180] sm:$0xff] }
  0x23   :  { %1377 = vmatprep.subr.bf16.mxu0 %v1376_v40  ;;  %580 = vmatprep.mubr.f32.mxu1 %v21_v16  ;;  %v27_v19 = vld [vmem:[%s3133_s0 + $0x38] sm:$0xff]  ;;  %v112_v24 = vld [vmem:[%s3132_s1 + $0x190] sm:$0xff]  ;;  %v302_v25 = vld [vmem:[%s3132_s1 + $0x780] sm:$0xff]  ;;  %v1392_v26 = vpack.c.bf16 %v305_v18, %v303_v17 }
  0x24   :  { %829 = vmatprep.mubr.f32.mxu0 %v27_v19  ;;  %v304_v27 = vld [vmem:[%s3132_s1 + $0x790] sm:$0xff]  ;;  %v115_v28 = vld [vmem:[%s3132_s1 + $0x1a8] sm:$0xff]  ;;  %v117_v29 = vld [vmem:[%s3132_s1 + $0x1b8] sm:$0xff]  ;;  %v1202_v32 = vpack.c.bf16 %v112_v24, %v110_v23 }
  0x25   :  { %1187 = vmatpush1.bf16.msra.mxu1 %v1186_v46  ;;  %v307_v30 = vld [vmem:[%s3132_s1 + $0x7a8] sm:$0xff]  ;;  %v309_v31 = vld [vmem:[%s3132_s1 + $0x7b8] sm:$0xff]  ;;  %v1394_v33 = vpack.c.bf16 %v304_v27, %v302_v25  ;;  %v1204_v34 = vpack.c.bf16 %v117_v29, %v115_v28  ;;  %v114_v35 = vld [vmem:[%s3132_s1 + $0x1a0] sm:$0xff] }
  0x26   :  { %1379 = vmatpush1.bf16.msra.mxu0 %v1378_v47  ;;  %1189 = vmatprep.subr.bf16.mxu1 %v1188_v48  ;;  %v116_v36 = vld [vmem:[%s3132_s1 + $0x1b0] sm:$0xff]  ;;  %v306_v37 = vld [vmem:[%s3132_s1 + $0x7a0] sm:$0xff]  ;;  %v1396_v38 = vpack.c.bf16 %v309_v31, %v307_v30  ;;  %v119_v40 = vld [vmem:[%s3132_s1 + $0x1c8] sm:$0xff] }
  0x27   :  { %1381 = vmatprep.subr.bf16.mxu0 %v1380_v52  ;;  %v308_v39 = vld [vmem:[%s3132_s1 + $0x7b0] sm:$0xff]  ;;  %v121_v41 = vld [vmem:[%s3132_s1 + $0x1d8] sm:$0xff]  ;;  %v311_v42 = vld [vmem:[%s3132_s1 + $0x7c8] sm:$0xff]  ;;  %v1206_v44 = vpack.c.bf16 %v116_v36, %v114_v35 }
  0x28   :  { %v313_v43 = vld [vmem:[%s3132_s1 + $0x7d8] sm:$0xff]  ;;  %v1398_v45 = vpack.c.bf16 %v308_v39, %v306_v37  ;;  %v1208_v46 = vpack.c.bf16 %v121_v41, %v119_v40  ;;  %v118_v47 = vld [vmem:[%s3132_s1 + $0x1c0] sm:$0xff]  ;;  %v120_v48 = vld [vmem:[%s3132_s1 + $0x1d0] sm:$0xff] }
  0x29   :  { %1191 = vmatpush1.bf16.msra.mxu1 %v1190_v58  ;;  %v310_v49 = vld [vmem:[%s3132_s1 + $0x7c0] sm:$0xff]  ;;  %v1400_v50 = vpack.c.bf16 %v313_v43, %v311_v42  ;;  %v312_v51 = vld [vmem:[%s3132_s1 + $0x7d0] sm:$0xff]  ;;  %v123_v52 = vld [vmem:[%s3132_s1 + $0x1e8] sm:$0xff]  ;;  %v1210_v56 = vpack.c.bf16 %v120_v48, %v118_v47 }
  0x2a   :  { %1383 = vmatpush1.bf16.msra.mxu0 %v1382_v59  ;;  %1193 = vmatprep.subr.bf16.mxu1 %v1192_v60  ;;  %v125_v53 = vld [vmem:[%s3132_s1 + $0x1f8] sm:$0xff]  ;;  %v315_v54 = vld [vmem:[%s3132_s1 + $0x7e8] sm:$0xff]  ;;  %v1402_v57 = vpack.c.bf16 %v312_v51, %v310_v49  ;;  %v122_v59 = vld [vmem:[%s3132_s1 + $0x1e0] sm:$0xff] }
  0x2b   :  { %1385 = vmatprep.subr.bf16.mxu0 %v1384_v0  ;;  %v317_v55 = vld [vmem:[%s3132_s1 + $0x7f8] sm:$0xff]  ;;  %v1212_v58 = vpack.c.bf16 %v125_v53, %v123_v52  ;;  %v124_v60 = vld [vmem:[%s3132_s1 + $0x1f0] sm:$0xff]  ;;  %v314_v61 = vld [vmem:[%s3132_s1 + $0x7e0] sm:$0xff] }
  0x2c   :  { %v1404_v62 = vpack.c.bf16 %v317_v55, %v315_v54  ;;  %v316_v63 = vld [vmem:[%s3132_s1 + $0x7f0] sm:$0xff]  ;;  %v127_v0 = vld [vmem:[%s3132_s1 + $0x208] sm:$0xff]  ;;  %v129_v1 = vld [vmem:[%s3132_s1 + $0x218] sm:$0xff]  ;;  %v1214_v4 = vpack.c.bf16 %v124_v60, %v122_v59 }
  0x2d   :  { %1195 = vmatpush1.bf16.msra.mxu1 %v1194_v6  ;;  %v319_v2 = vld [vmem:[%s3132_s1 + $0x808] sm:$0xff]  ;;  %v321_v3 = vld [vmem:[%s3132_s1 + $0x818] sm:$0xff]  ;;  %v1406_v5 = vpack.c.bf16 %v316_v63, %v314_v61  ;;  %v1216_v6 = vpack.c.bf16 %v129_v1, %v127_v0  ;;  %v126_v7 = vld [vmem:[%s3132_s1 + $0x200] sm:$0xff] }
  0x2e   :  { %1387 = vmatpush1.bf16.msra.mxu0 %v1386_v8  ;;  %1197 = vmatprep.subr.bf16.mxu1 %v1196_v9  ;;  %v128_v8 = vld [vmem:[%s3132_s1 + $0x210] sm:$0xff]  ;;  %v318_v9 = vld [vmem:[%s3132_s1 + $0x800] sm:$0xff]  ;;  %v1408_v10 = vpack.c.bf16 %v321_v3, %v319_v2  ;;  %v131_v12 = vld [vmem:[%s3132_s1 + $0x228] sm:$0xff] }
  0x2f   :  { %1389 = vmatprep.subr.bf16.mxu0 %v1388_v13  ;;  %v320_v11 = vld [vmem:[%s3132_s1 + $0x810] sm:$0xff]  ;;  %v133_v13 = vld [vmem:[%s3132_s1 + $0x238] sm:$0xff]  ;;  %v323_v14 = vld [vmem:[%s3132_s1 + $0x828] sm:$0xff]  ;;  %v1218_v17 = vpack.c.bf16 %v128_v8, %v126_v7 }
  0x30   :  { %v325_v15 = vld [vmem:[%s3132_s1 + $0x838] sm:$0xff]  ;;  %v20_v16 = vld [vmem:[%s3133_s0] sm:$0xff]  ;;  %v26_v18 = vld [vmem:[%s3133_s0 + $0x30] sm:$0xff]  ;;  %v1410_v19 = vpack.c.bf16 %v320_v11, %v318_v9 }
  0x31   :  { %1199 = vmatpush1.bf16.msra.mxu1 %v1198_v20  ;;  %v1220_v20 = vpack.c.bf16 %v133_v13, %v131_v12  ;;  %v322_v23 = vld [vmem:[%s3132_s1 + $0x820] sm:$0xff]  ;;  %v1412_v24 = vpack.c.bf16 %v325_v15, %v323_v14  ;;  %v324_v25 = vld [vmem:[%s3132_s1 + $0x830] sm:$0xff]  ;;  %v137_v27 = vld [vmem:[%s3132_s1 + $0x258] sm:$0xff] }
  0x32   :  { %1391 = vmatpush1.bf16.msra.mxu0 %v1390_v21  ;;  %1201 = vmatprep.subr.bf16.mxu1 %v1200_v22  ;;  %v130_v21 = vld [vmem:[%s3132_s1 + $0x220] sm:$0xff]  ;;  %v132_v22 = vld [vmem:[%s3132_s1 + $0x230] sm:$0xff]  ;;  %v327_v28 = vld [vmem:[%s3132_s1 + $0x848] sm:$0xff]  ;;  %v1414_v31 = vpack.c.bf16 %v324_v25, %v322_v23 }
  0x33   :  { %1393 = vmatprep.subr.bf16.mxu0 %v1392_v26  ;;  %v135_v26 = vld [vmem:[%s3132_s1 + $0x248] sm:$0xff]  ;;  %v329_v29 = vld [vmem:[%s3132_s1 + $0x858] sm:$0xff]  ;;  %v1222_v30 = vpack.c.bf16 %v132_v22, %v130_v21  ;;  %v326_v35 = vld [vmem:[%s3132_s1 + $0x840] sm:$0xff] }
  0x34   :  { %v1416_v36 = vpack.c.bf16 %v329_v29, %v327_v28  ;;  %v328_v37 = vld [vmem:[%s3132_s1 + $0x850] sm:$0xff]  ;;  %v141_v39 = vld [vmem:[%s3132_s1 + $0x278] sm:$0xff]  ;;  %v331_v40 = vld [vmem:[%s3132_s1 + $0x868] sm:$0xff] }
  0x35   :  { %1203 = vmatpush1.bf16.msra.mxu1 %v1202_v32  ;;  %v1224_v32 = vpack.c.bf16 %v137_v27, %v135_v26  ;;  %v333_v41 = vld [vmem:[%s3132_s1 + $0x878] sm:$0xff]  ;;  %v1418_v43 = vpack.c.bf16 %v328_v37, %v326_v35  ;;  %v330_v47 = vld [vmem:[%s3132_s1 + $0x860] sm:$0xff]  ;;  %v332_v49 = vld [vmem:[%s3132_s1 + $0x870] sm:$0xff] }
  0x36   :  { %1395 = vmatpush1.bf16.msra.mxu0 %v1394_v33  ;;  %1205 = vmatprep.subr.bf16.mxu1 %v1204_v34  ;;  %v134_v33 = vld [vmem:[%s3132_s1 + $0x240] sm:$0xff]  ;;  %v136_v34 = vld [vmem:[%s3132_s1 + $0x250] sm:$0xff]  ;;  %v1420_v48 = vpack.c.bf16 %v333_v41, %v331_v40  ;;  %v145_v51 = vld [vmem:[%s3132_s1 + $0x298] sm:$0xff]  ;;  %v1422_v55 = vpack.c.bf16 %v332_v49, %v330_v47 }
  0x37   :  { %1397 = vmatprep.subr.bf16.mxu0 %v1396_v38  ;;  %v139_v38 = vld [vmem:[%s3132_s1 + $0x268] sm:$0xff]  ;;  %v1226_v42 = vpack.c.bf16 %v136_v34, %v134_v33  ;;  %v337_v53 = vld [vmem:[%s3132_s1 + $0x898] sm:$0xff]  ;;  %v334_v59 = vld [vmem:[%s3132_s1 + $0x880] sm:$0xff] }
  0x38   :  { %v335_v52 = vld [vmem:[%s3132_s1 + $0x888] sm:$0xff]  ;;  %v336_v61 = vld [vmem:[%s3132_s1 + $0x890] sm:$0xff]  ;;  %v149_v63 = vld [vmem:[%s3132_s1 + $0x2b8] sm:$0xff] }
  0x39   :  { %1207 = vmatpush1.bf16.msra.mxu1 %v1206_v44  ;;  %v1228_v44 = vpack.c.bf16 %v141_v39, %v139_v38  ;;  %v1424_v60 = vpack.c.bf16 %v337_v53, %v335_v52  ;;  %v339_v0 = vld [vmem:[%s3132_s1 + $0x8a8] sm:$0xff]  ;;  %v341_v1 = vld [vmem:[%s3132_s1 + $0x8b8] sm:$0xff]  ;;  %v146_v3 = vld [vmem:[%s3132_s1 + $0x2a0] sm:$0xff] }
  0x3a   :  { %1399 = vmatpush1.bf16.msra.mxu0 %v1398_v45  ;;  %1209 = vmatprep.subr.bf16.mxu1 %v1208_v46  ;;  %v138_v45 = vld [vmem:[%s3132_s1 + $0x260] sm:$0xff]  ;;  %v140_v46 = vld [vmem:[%s3132_s1 + $0x270] sm:$0xff]  ;;  %v35_v9 = vld [vmem:[%s3133_s0 + $0x78] sm:$0xff] }
  0x3b   :  { %1401 = vmatprep.subr.bf16.mxu0 %v1400_v50  ;;  %v143_v50 = vld [vmem:[%s3132_s1 + $0x288] sm:$0xff]  ;;  %v1230_v54 = vpack.c.bf16 %v140_v46, %v138_v45  ;;  %v338_v7 = vld [vmem:[%s3132_s1 + $0x8a0] sm:$0xff]  ;;  %v340_v8 = vld [vmem:[%s3132_s1 + $0x8b0] sm:$0xff] }
  0x3c   :  { %v151_v11 = vld [vmem:[%s3132_s1 + $0x2c8] sm:$0xff]  ;;  %v153_v12 = vld [vmem:[%s3132_s1 + $0x2d8] sm:$0xff]  ;;  %v1430_v21 = vpack.c.bf16 %v340_v8, %v338_v7  ;;  %v342_v23 = vld [vmem:[%s3132_s1 + $0x8c0] sm:$0xff] }
  0x3d   :  { %1211 = vmatpush1.bf16.msra.mxu1 %v1210_v56  ;;  %v1232_v56 = vpack.c.bf16 %v145_v51, %v143_v50  ;;  %v41_v13 = vld [vmem:[%s3133_s0 + $0xa8] sm:$0xff]  ;;  %v345_v15 = vld [vmem:[%s3132_s1 + $0x8d8] sm:$0xff]  ;;  %v1240_v22 = vpack.c.bf16 %v153_v12, %v151_v11  ;;  %v154_v34 = vld [vmem:[%s3132_s1 + $0x2e0] sm:$0xff] }
  0x3e   :  { %1403 = vmatpush1.bf16.msra.mxu0 %v1402_v57  ;;  %1213 = vmatprep.subr.bf16.mxu1 %v1212_v58  ;;  %v142_v57 = vld [vmem:[%s3132_s1 + $0x280] sm:$0xff]  ;;  %v144_v58 = vld [vmem:[%s3132_s1 + $0x290] sm:$0xff]  ;;  %v343_v14 = vld [vmem:[%s3132_s1 + $0x8c8] sm:$0xff] }
  0x3f   :  { %1405 = vmatprep.subr.bf16.mxu0 %v1404_v62  ;;  %v147_v62 = vld [vmem:[%s3132_s1 + $0x2a8] sm:$0xff]  ;;  %v1234_v2 = vpack.c.bf16 %v144_v58, %v142_v57  ;;  %v1432_v26 = vpack.c.bf16 %v345_v15, %v343_v14  ;;  %v157_v28 = vld [vmem:[%s3132_s1 + $0x2f8] sm:$0xff]  ;;  %v156_v35 = vld [vmem:[%s3132_s1 + $0x2f0] sm:$0xff] }
  0x40   :  { %v49_v25 = vld [vmem:[%s3133_s0 + $0xe8] sm:$0xff]  ;;  %v55_v29 = vld [vmem:[%s3133_s0 + $0x118] sm:$0xff]  ;;  %v346_v39 = vld [vmem:[%s3132_s1 + $0x8e0] sm:$0xff] }
  0x41   :  { %1215 = vmatpush1.bf16.msra.mxu1 %v1214_v4  ;;  %v148_v4 = vld [vmem:[%s3132_s1 + $0x2b0] sm:$0xff]  ;;  %v155_v27 = vld [vmem:[%s3132_s1 + $0x2e8] sm:$0xff]  ;;  %v23_v41 = vld [vmem:[%s3133_s0 + $0x18] sm:$0xff] }
  0x42   :  { %1407 = vmatpush1.bf16.msra.mxu0 %v1406_v5  ;;  %1217 = vmatprep.subr.bf16.mxu1 %v1216_v6  ;;  %v1426_v5 = vpack.c.bf16 %v336_v61, %v334_v59  ;;  %v1236_v6 = vpack.c.bf16 %v149_v63, %v147_v62  ;;  %v1244_v38 = vpack.c.bf16 %v157_v28, %v155_v27  ;;  %v348_v40 = vld [vmem:[%s3132_s1 + $0x8f0] sm:$0xff]  ;;  %v29_v45 = vld [vmem:[%s3133_s0 + $0x48] sm:$0xff]  ;;  %v353_v47 = vld [vmem:[%s3132_s1 + $0x918] sm:$0xff] }
  0x43   :  { %1409 = vmatprep.subr.bf16.mxu0 %v1408_v10  ;;  %v1428_v10 = vpack.c.bf16 %v341_v1, %v339_v0  ;;  %v351_v46 = vld [vmem:[%s3132_s1 + $0x908] sm:$0xff]  ;;  %v1438_v49 = vpack.c.bf16 %v348_v40, %v346_v39  ;;  %v158_v51 = vld [vmem:[%s3132_s1 + $0x300] sm:$0xff]  ;;  %v160_v52 = vld [vmem:[%s3132_s1 + $0x310] sm:$0xff] }
  0x44   :  { %581 = vmatmul.mubr.f32.vlgmr.msra.gmra.mrb[0].mxu1 %v20_v16  ;;  %v34_v16 = vld [vmem:[%s3133_s0 + $0x70] sm:$0xff]  ;;  %v350_v53 = vld [vmem:[%s3132_s1 + $0x900] sm:$0xff]  ;;  %v165_v57 = vld [vmem:[%s3132_s1 + $0x338] sm:$0xff] }
  0x45   :  { %1219 = vmatpush1.bf16.msra.mxu1 %v1218_v17  ;;  %830 = vmatmul.mubr.f32.vlgmr.msra.gmra.mrb[0].mxu0 %v26_v18  ;;  %v1238_v17 = vpack.c.bf16 %v148_v4, %v146_v3  ;;  %v150_v18 = vld [vmem:[%s3132_s1 + $0x2c0] sm:$0xff]  ;;  %v355_v58 = vld [vmem:[%s3132_s1 + $0x928] sm:$0xff]  ;;  %v357_v59 = vld [vmem:[%s3132_s1 + $0x938] sm:$0xff] }
  0x46   :  { %1411 = vmatpush1.bf16.msra.mxu0 %v1410_v19  ;;  %1221 = vmatprep.subr.bf16.mxu1 %v1220_v20  ;;  %v152_v19 = vld [vmem:[%s3132_s1 + $0x2d0] sm:$0xff]  ;;  %v40_v20 = vld [vmem:[%s3133_s0 + $0xa0] sm:$0xff]  ;;  %v167_v4 = vld [vmem:[%s3132_s1 + $0x348] sm:$0xff] }
  0x47   :  { %1413 = vmatprep.subr.bf16.mxu0 %v1412_v24  ;;  %586 = vmatprep.mubr.f32.mxu1 %v35_v9  ;;  %v344_v24 = vld [vmem:[%s3132_s1 + $0x8d0] sm:$0xff]  ;;  %v1242_v33 = vpack.c.bf16 %v152_v19, %v150_v18  ;;  %v162_v63 = vld [vmem:[%s3132_s1 + $0x320] sm:$0xff]  ;;  %v361_v7 = vld [vmem:[%s3132_s1 + $0x958] sm:$0xff] }
  0x48   :  { %835 = vmatprep.mubr.f32.mxu0 %v41_v13  ;;  %587 = vmatmul.mubr.f32.gmra.mrb[2].mxu1 %v34_v16  ;;  %v1434_v37 = vpack.c.bf16 %v344_v24, %v342_v23  ;;  %v164_v0 = vld [vmem:[%s3132_s1 + $0x330] sm:$0xff]  ;;  %v354_v1 = vld [vmem:[%s3132_s1 + $0x920] sm:$0xff]  ;;  %v171_v16 = vld [vmem:[%s3132_s1 + $0x368] sm:$0xff] }
  0x49   :  { %1223 = vmatpush1.bf16.msra.mxu1 %v1222_v30  ;;  %v347_v30 = vld [vmem:[%s3132_s1 + $0x8e8] sm:$0xff]  ;;  %836 = vmatmul.mubr.f32.gmra.mrb[2].mxu0 %v40_v20  ;;  %v356_v3 = vld [vmem:[%s3132_s1 + $0x930] sm:$0xff]  ;;  %v1254_v8 = vpack.c.bf16 %v164_v0, %v162_v63  ;;  %v166_v11 = vld [vmem:[%s3132_s1 + $0x340] sm:$0xff] }
  0x4a   :  { %1415 = vmatpush1.bf16.msra.mxu0 %v1414_v31  ;;  %1225 = vmatprep.subr.bf16.mxu1 %v1224_v32  ;;  %v349_v31 = vld [vmem:[%s3132_s1 + $0x8f8] sm:$0xff]  ;;  %v48_v32 = vld [vmem:[%s3133_s0 + $0xe0] sm:$0xff]  ;;  %v1446_v9 = vpack.c.bf16 %v356_v3, %v354_v1  ;;  %v168_v12 = vld [vmem:[%s3132_s1 + $0x350] sm:$0xff] }
  0x4b   :  { %1417 = vmatprep.subr.bf16.mxu0 %v1416_v36  ;;  %592 = vmatprep.mubr.f32.mxu1 %v49_v25  ;;  %v54_v36 = vld [vmem:[%s3133_s0 + $0x110] sm:$0xff]  ;;  %v358_v13 = vld [vmem:[%s3132_s1 + $0x940] sm:$0xff]  ;;  %v363_v18 = vld [vmem:[%s3132_s1 + $0x968] sm:$0xff]  ;;  %v1258_v20 = vpack.c.bf16 %v168_v12, %v166_v11 }
  0x4c   :  { %841 = vmatprep.mubr.f32.mxu0 %v55_v29  ;;  %593 = vmatmul.mubr.f32.gmra.mrb[4].mxu1 %v48_v32  ;;  %v360_v15 = vld [vmem:[%s3132_s1 + $0x950] sm:$0xff]  ;;  %v365_v19 = vld [vmem:[%s3132_s1 + $0x978] sm:$0xff]  ;;  %v170_v23 = vld [vmem:[%s3132_s1 + $0x360] sm:$0xff] }
  0x4d   :  { %1227 = vmatpush1.bf16.msra.mxu1 %v1226_v42  ;;  %v1436_v42 = vpack.c.bf16 %v349_v31, %v347_v30  ;;  %842 = vmatmul.mubr.f32.gmra.mrb[4].mxu0 %v54_v36  ;;  %v172_v24 = vld [vmem:[%s3132_s1 + $0x370] sm:$0xff]  ;;  %v362_v25 = vld [vmem:[%s3132_s1 + $0x960] sm:$0xff]  ;;  %v175_v28 = vld [vmem:[%s3132_s1 + $0x388] sm:$0xff] }
  0x4e   :  { %1419 = vmatpush1.bf16.msra.mxu0 %v1418_v43  ;;  %1229 = vmatprep.subr.bf16.mxu1 %v1228_v44  ;;  %v159_v43 = vld [vmem:[%s3132_s1 + $0x308] sm:$0xff]  ;;  %v161_v44 = vld [vmem:[%s3132_s1 + $0x318] sm:$0xff]  ;;  %v364_v27 = vld [vmem:[%s3132_s1 + $0x970] sm:$0xff]  ;;  %v1262_v32 = vpack.c.bf16 %v172_v24, %v170_v23 }
  0x4f   :  { %1421 = vmatprep.subr.bf16.mxu0 %v1420_v48  ;;  %663 = vmatprep.mubr.f32.mxu1 %v23_v41  ;;  %v1246_v48 = vpack.c.bf16 %v156_v35, %v154_v34  ;;  %v1248_v50 = vpack.c.bf16 %v161_v44, %v159_v43  ;;  %v177_v29 = vld [vmem:[%s3132_s1 + $0x398] sm:$0xff]  ;;  %v367_v30 = vld [vmem:[%s3132_s1 + $0x988] sm:$0xff]  ;;  %v174_v35 = vld [vmem:[%s3132_s1 + $0x380] sm:$0xff] }
  0x50   :  { %912 = vmatprep.mubr.f32.mxu0 %v29_v45  ;;  %v369_v31 = vld [vmem:[%s3132_s1 + $0x998] sm:$0xff]  ;;  %v1264_v34 = vpack.c.bf16 %v177_v29, %v175_v28  ;;  %v176_v36 = vld [vmem:[%s3132_s1 + $0x390] sm:$0xff]  ;;  %v179_v40 = vld [vmem:[%s3132_s1 + $0x3a8] sm:$0xff] }
  0x51   :  { %1231 = vmatpush1.bf16.msra.mxu1 %v1230_v54  ;;  %v1440_v54 = vpack.c.bf16 %v353_v47, %v351_v46  ;;  %v368_v39 = vld [vmem:[%s3132_s1 + $0x990] sm:$0xff]  ;;  %v181_v41 = vld [vmem:[%s3132_s1 + $0x3b8] sm:$0xff]  ;;  %v1266_v44 = vpack.c.bf16 %v176_v36, %v174_v35  ;;  %v178_v47 = vld [vmem:[%s3132_s1 + $0x3a0] sm:$0xff] }
  0x52   :  { %1423 = vmatpush1.bf16.msra.mxu0 %v1422_v55  ;;  %1233 = vmatprep.subr.bf16.mxu1 %v1232_v56  ;;  %v352_v55 = vld [vmem:[%s3132_s1 + $0x910] sm:$0xff]  ;;  %v163_v56 = vld [vmem:[%s3132_s1 + $0x328] sm:$0xff]  ;;  %v373_v43 = vld [vmem:[%s3132_s1 + $0x9b8] sm:$0xff]  ;;  %v1268_v46 = vpack.c.bf16 %v181_v41, %v179_v40 }
  0x53   :  { %1425 = vmatprep.subr.bf16.mxu0 %v1424_v60  ;;  %v1250_v60 = vpack.c.bf16 %v160_v52, %v158_v51  ;;  %v1442_v61 = vpack.c.bf16 %v352_v55, %v350_v53  ;;  %v1252_v62 = vpack.c.bf16 %v165_v57, %v163_v56  ;;  %v372_v51 = vld [vmem:[%s3132_s1 + $0x9b0] sm:$0xff]  ;;  %v183_v52 = vld [vmem:[%s3132_s1 + $0x3c8] sm:$0xff]  ;;  %v185_v53 = vld [vmem:[%s3132_s1 + $0x3d8] sm:$0xff] }
  0x54   :  { %v377_v55 = vld [vmem:[%s3132_s1 + $0x9d8] sm:$0xff]  ;;  %v376_v63 = vld [vmem:[%s3132_s1 + $0x9d0] sm:$0xff]  ;;  %v187_v0 = vld [vmem:[%s3132_s1 + $0x3e8] sm:$0xff] }
  0x55   :  { %1235 = vmatpush1.bf16.msra.mxu1 %v1234_v2  ;;  %v1444_v2 = vpack.c.bf16 %v357_v59, %v355_v58  ;;  %v1272_v58 = vpack.c.bf16 %v185_v53, %v183_v52  ;;  %v182_v59 = vld [vmem:[%s3132_s1 + $0x3c0] sm:$0xff]  ;;  %v189_v1 = vld [vmem:[%s3132_s1 + $0x3f8] sm:$0xff]  ;;  %v380_v11 = vld [vmem:[%s3132_s1 + $0x9f0] sm:$0xff] }
  0x56   :  { %1427 = vmatpush1.bf16.msra.mxu0 %v1426_v5  ;;  %1237 = vmatprep.subr.bf16.mxu1 %v1236_v6  ;;  %v169_v5 = vld [vmem:[%s3132_s1 + $0x358] sm:$0xff]  ;;  %v359_v6 = vld [vmem:[%s3132_s1 + $0x948] sm:$0xff]  ;;  %v384_v23 = vld [vmem:[%s3132_s1 + $0xa10] sm:$0xff] }
  0x57   :  { %1429 = vmatprep.subr.bf16.mxu0 %v1428_v10  ;;  %v1256_v10 = vpack.c.bf16 %v169_v5, %v167_v4  ;;  %v1448_v14 = vpack.c.bf16 %v361_v7, %v359_v6  ;;  %v381_v3 = vld [vmem:[%s3132_s1 + $0x9f8] sm:$0xff]  ;;  %v1276_v6 = vpack.c.bf16 %v189_v1, %v187_v0  ;;  %v186_v7 = vld [vmem:[%s3132_s1 + $0x3e0] sm:$0xff]  ;;  %v191_v12 = vld [vmem:[%s3132_s1 + $0x408] sm:$0xff] }
  0x58   :  { %v195_v24 = vld [vmem:[%s3132_s1 + $0x428] sm:$0xff]  ;;  %v22_v28 = vld [vmem:[%s3133_s0 + $0x10] sm:$0xff]  ;;  %v386_v35 = vld [vmem:[%s3132_s1 + $0xa20] sm:$0xff] }
  0x59   :  { %1239 = vmatpush1.bf16.msra.mxu1 %v1238_v17  ;;  %v173_v17 = vld [vmem:[%s3132_s1 + $0x378] sm:$0xff]  ;;  %v391_v40 = vld [vmem:[%s3132_s1 + $0xa48] sm:$0xff]  ;;  %v392_v53 = vld [vmem:[%s3132_s1 + $0xa50] sm:$0xff] }
  0x5a   :  { %1431 = vmatpush1.bf16.msra.mxu0 %v1430_v21  ;;  %1241 = vmatprep.subr.bf16.mxu1 %v1240_v22  ;;  %v1450_v21 = vpack.c.bf16 %v360_v15, %v358_v13  ;;  %v1260_v22 = vpack.c.bf16 %v173_v17, %v171_v16  ;;  %v193_v13 = vld [vmem:[%s3132_s1 + $0x418] sm:$0xff]  ;;  %v204_v1 = vld [vmem:[%s3132_s1 + $0x470] sm:$0xff] }
  0x5b   :  { %1433 = vmatprep.subr.bf16.mxu0 %v1432_v26  ;;  %v1452_v26 = vpack.c.bf16 %v365_v19, %v363_v18  ;;  %v385_v15 = vld [vmem:[%s3132_s1 + $0xa18] sm:$0xff]  ;;  %v1280_v18 = vpack.c.bf16 %v193_v13, %v191_v12  ;;  %v190_v19 = vld [vmem:[%s3132_s1 + $0x400] sm:$0xff] }
  0x5c   :  { %v393_v41 = vld [vmem:[%s3132_s1 + $0xa58] sm:$0xff] }
  0x5d   :  { %1243 = vmatpush1.bf16.msra.mxu1 %v1242_v33  ;;  %v1454_v33 = vpack.c.bf16 %v364_v27, %v362_v25  ;;  %v197_v25 = vld [vmem:[%s3132_s1 + $0x438] sm:$0xff]  ;;  %v1480_v52 = vpack.c.bf16 %v393_v41, %v391_v40  ;;  %v216_v40 = vld [vmem:[%s3132_s1 + $0x4d0] sm:$0xff]  ;;  %v406_v41 = vld [vmem:[%s3132_s1 + $0xac0] sm:$0xff] }
  0x5e   :  { %1435 = vmatpush1.bf16.msra.mxu0 %v1434_v37  ;;  %1245 = vmatprep.subr.bf16.mxu1 %v1244_v38  ;;  %v366_v37 = vld [vmem:[%s3132_s1 + $0x980] sm:$0xff]  ;;  %v1456_v38 = vpack.c.bf16 %v369_v31, %v367_v30  ;;  %v389_v27 = vld [vmem:[%s3132_s1 + $0xa38] sm:$0xff] }
  0x5f   :  { %1437 = vmatprep.subr.bf16.mxu0 %v1436_v42  ;;  %v371_v42 = vld [vmem:[%s3132_s1 + $0x9a8] sm:$0xff]  ;;  %v1458_v45 = vpack.c.bf16 %v368_v39, %v366_v37  ;;  %v28_v30 = vld [vmem:[%s3133_s0 + $0x40] sm:$0xff]  ;;  %v388_v37 = vld [vmem:[%s3132_s1 + $0xa30] sm:$0xff] }
  0x60   :  { %v201_v39 = vld [vmem:[%s3132_s1 + $0x458] sm:$0xff] }
  0x61   :  { %1247 = vmatpush1.bf16.msra.mxu1 %v1246_v48  ;;  %v180_v48 = vld [vmem:[%s3132_s1 + $0x3b0] sm:$0xff]  ;;  %v31_v12 = vld [vmem:[%s3133_s0 + $0x58] sm:$0xff] }
  0x62   :  { %1439 = vmatpush1.bf16.msra.mxu0 %v1438_v49  ;;  %1249 = vmatprep.subr.bf16.mxu1 %v1248_v50  ;;  %v370_v49 = vld [vmem:[%s3132_s1 + $0x9a0] sm:$0xff]  ;;  %v1460_v50 = vpack.c.bf16 %v373_v43, %v371_v42  ;;  %v1270_v56 = vpack.c.bf16 %v180_v48, %v178_v47  ;;  %v37_v42 = vld [vmem:[%s3133_s0 + $0x88] sm:$0xff]  ;;  %v1478_v47 = vpack.c.bf16 %v388_v37, %v386_v35  ;;  %v409_v35 = vld [vmem:[%s3132_s1 + $0xad8] sm:$0xff] }
  0x63   :  { %1441 = vmatprep.subr.bf16.mxu0 %v1440_v54  ;;  %v375_v54 = vld [vmem:[%s3132_s1 + $0x9c8] sm:$0xff]  ;;  %v1462_v57 = vpack.c.bf16 %v372_v51, %v370_v49  ;;  %v200_v49 = vld [vmem:[%s3132_s1 + $0x450] sm:$0xff] }
  0x64   :  { %v42_v51 = vld [vmem:[%s3133_s0 + $0xb0] sm:$0xff] }
  0x65   :  { %1251 = vmatpush1.bf16.msra.mxu1 %v1250_v60  ;;  %v184_v60 = vld [vmem:[%s3132_s1 + $0x3d0] sm:$0xff] }
  0x66   :  { %1443 = vmatpush1.bf16.msra.mxu0 %v1442_v61  ;;  %1253 = vmatprep.subr.bf16.mxu1 %v1252_v62  ;;  %v374_v61 = vld [vmem:[%s3132_s1 + $0x9c0] sm:$0xff]  ;;  %v1464_v62 = vpack.c.bf16 %v377_v55, %v375_v54  ;;  %v1274_v4 = vpack.c.bf16 %v184_v60, %v182_v59  ;;  %v203_v54 = vld [vmem:[%s3132_s1 + $0x468] sm:$0xff]  ;;  %v205_v55 = vld [vmem:[%s3132_s1 + $0x478] sm:$0xff] }
  0x67   :  { %1445 = vmatprep.subr.bf16.mxu0 %v1444_v2  ;;  %v379_v2 = vld [vmem:[%s3132_s1 + $0x9e8] sm:$0xff]  ;;  %v1466_v5 = vpack.c.bf16 %v376_v63, %v374_v61  ;;  %v202_v60 = vld [vmem:[%s3132_s1 + $0x460] sm:$0xff]  ;;  %v1292_v0 = vpack.c.bf16 %v205_v55, %v203_v54  ;;  %v412_v55 = vld [vmem:[%s3132_s1 + $0xaf0] sm:$0xff] }
  0x68   :  { %v57_v61 = vld [vmem:[%s3133_s0 + $0x128] sm:$0xff] }
  0x69   :  { %1255 = vmatpush1.bf16.msra.mxu1 %v1254_v8  ;;  %v188_v8 = vld [vmem:[%s3132_s1 + $0x3f0] sm:$0xff] }
  0x6a   :  { %1447 = vmatpush1.bf16.msra.mxu0 %v1446_v9  ;;  %1257 = vmatprep.subr.bf16.mxu1 %v1256_v10  ;;  %v378_v9 = vld [vmem:[%s3132_s1 + $0x9e0] sm:$0xff]  ;;  %v1468_v10 = vpack.c.bf16 %v381_v3, %v379_v2  ;;  %v1278_v16 = vpack.c.bf16 %v188_v8, %v186_v7  ;;  %v209_v7 = vld [vmem:[%s3132_s1 + $0x498] sm:$0xff]  ;;  %v399_v8 = vld [vmem:[%s3132_s1 + $0xa88] sm:$0xff] }
  0x6b   :  { %1449 = vmatprep.subr.bf16.mxu0 %v1448_v14  ;;  %v383_v14 = vld [vmem:[%s3132_s1 + $0xa08] sm:$0xff]  ;;  %v1470_v17 = vpack.c.bf16 %v380_v11, %v378_v9  ;;  %v394_v2 = vld [vmem:[%s3132_s1 + $0xa60] sm:$0xff]  ;;  %v401_v9 = vld [vmem:[%s3132_s1 + $0xa98] sm:$0xff]  ;;  %v1294_v11 = vpack.c.bf16 %v204_v1, %v202_v60 }
  0x6c   :  { %v56_v3 = vld [vmem:[%s3133_s0 + $0x120] sm:$0xff] }
  0x6d   :  { %1259 = vmatpush1.bf16.msra.mxu1 %v1258_v20  ;;  %v192_v20 = vld [vmem:[%s3132_s1 + $0x410] sm:$0xff]  ;;  %v414_v1 = vld [vmem:[%s3132_s1 + $0xb00] sm:$0xff] }
  0x6e   :  { %1451 = vmatpush1.bf16.msra.mxu0 %v1450_v21  ;;  %1261 = vmatprep.subr.bf16.mxu1 %v1260_v22  ;;  %v382_v21 = vld [vmem:[%s3132_s1 + $0xa00] sm:$0xff]  ;;  %v1472_v22 = vpack.c.bf16 %v385_v15, %v383_v14  ;;  %v1282_v29 = vpack.c.bf16 %v192_v20, %v190_v19  ;;  %v400_v19 = vld [vmem:[%s3132_s1 + $0xa90] sm:$0xff]  ;;  %v211_v20 = vld [vmem:[%s3132_s1 + $0x4a8] sm:$0xff] }
  0x6f   :  { %1453 = vmatprep.subr.bf16.mxu0 %v1452_v26  ;;  %v387_v26 = vld [vmem:[%s3132_s1 + $0xa28] sm:$0xff]  ;;  %v1474_v31 = vpack.c.bf16 %v384_v23, %v382_v21  ;;  %v206_v15 = vld [vmem:[%s3132_s1 + $0x480] sm:$0xff]  ;;  %v213_v21 = vld [vmem:[%s3132_s1 + $0x4b8] sm:$0xff] }
  0x70   :  { %v1476_v36 = vpack.c.bf16 %v389_v27, %v387_v26  ;;  %v405_v23 = vld [vmem:[%s3132_s1 + $0xab8] sm:$0xff]  ;;  %v1300_v26 = vpack.c.bf16 %v213_v21, %v211_v20  ;;  %v210_v27 = vld [vmem:[%s3132_s1 + $0x4a0] sm:$0xff] }
  0x71   :  { %1263 = vmatpush1.bf16.msra.mxu1 %v1262_v32  ;;  %v1284_v32 = vpack.c.bf16 %v197_v25, %v195_v24 }
  0x72   :  { %1455 = vmatpush1.bf16.msra.mxu0 %v1454_v33  ;;  %1265 = vmatprep.subr.bf16.mxu1 %v1264_v34  ;;  %v194_v33 = vld [vmem:[%s3132_s1 + $0x420] sm:$0xff]  ;;  %v196_v34 = vld [vmem:[%s3132_s1 + $0x430] sm:$0xff] }
  0x73   :  { %1457 = vmatprep.subr.bf16.mxu0 %v1456_v38  ;;  %v199_v38 = vld [vmem:[%s3132_s1 + $0x448] sm:$0xff]  ;;  %v1286_v43 = vpack.c.bf16 %v196_v34, %v194_v33  ;;  %v217_v33 = vld [vmem:[%s3132_s1 + $0x4d8] sm:$0xff] }
  0x74   :  { %v1288_v48 = vpack.c.bf16 %v201_v39, %v199_v38  ;;  %v407_v34 = vld [vmem:[%s3132_s1 + $0xac8] sm:$0xff]  ;;  %v214_v39 = vld [vmem:[%s3132_s1 + $0x4c0] sm:$0xff] }
  0x75   :  { %1267 = vmatpush1.bf16.msra.mxu1 %v1266_v44  ;;  %v198_v44 = vld [vmem:[%s3132_s1 + $0x440] sm:$0xff] }
  0x76   :  { %1459 = vmatpush1.bf16.msra.mxu0 %v1458_v45  ;;  %1269 = vmatprep.subr.bf16.mxu1 %v1268_v46  ;;  %v43_v45 = vld [vmem:[%s3133_s0 + $0xb8] sm:$0xff]  ;;  %v36_v46 = vld [vmem:[%s3133_s0 + $0x80] sm:$0xff]  ;;  %v1290_v59 = vpack.c.bf16 %v200_v49, %v198_v44  ;;  %v219_v44 = vld [vmem:[%s3132_s1 + $0x4e8] sm:$0xff] }
  0x77   :  { %1461 = vmatprep.subr.bf16.mxu0 %v1460_v50  ;;  %v390_v50 = vld [vmem:[%s3132_s1 + $0xa40] sm:$0xff] }
  0x78   :  { %v1482_v63 = vpack.c.bf16 %v392_v53, %v390_v50  ;;  %v410_v53 = vld [vmem:[%s3132_s1 + $0xae0] sm:$0xff] }
  0x79   :  { %1271 = vmatpush1.bf16.msra.mxu1 %v1270_v56  ;;  %v395_v56 = vld [vmem:[%s3132_s1 + $0xa68] sm:$0xff] }
  0x7a   :  { %1463 = vmatpush1.bf16.msra.mxu0 %v1462_v57  ;;  %1273 = vmatprep.subr.bf16.mxu1 %v1272_v58  ;;  %v397_v57 = vld [vmem:[%s3132_s1 + $0xa78] sm:$0xff] }
  0x7b   :  { %1465 = vmatprep.subr.bf16.mxu0 %v1464_v62  ;;  %v51_v58 = vld [vmem:[%s3133_s0 + $0xf8] sm:$0xff]  ;;  %v50_v62 = vld [vmem:[%s3133_s0 + $0xf0] sm:$0xff] }
  0x7d   :  { %1275 = vmatpush1.bf16.msra.mxu1 %v1274_v4  ;;  %v1484_v4 = vpack.c.bf16 %v397_v57, %v395_v56  ;;  %v223_v56 = vld [vmem:[%s3132_s1 + $0x508] sm:$0xff]  ;;  %v225_v57 = vld [vmem:[%s3132_s1 + $0x518] sm:$0xff] }
  0x7e   :  { %1467 = vmatpush1.bf16.msra.mxu0 %v1466_v5  ;;  %1277 = vmatprep.subr.bf16.mxu1 %v1276_v6  ;;  %v396_v5 = vld [vmem:[%s3132_s1 + $0xa70] sm:$0xff]  ;;  %v207_v6 = vld [vmem:[%s3132_s1 + $0x488] sm:$0xff] }
  0x7f   :  { %1469 = vmatprep.subr.bf16.mxu0 %v1468_v10  ;;  %v25_v10 = vld [vmem:[%s3133_s0 + $0x28] sm:$0xff]  ;;  %v1486_v13 = vpack.c.bf16 %v396_v5, %v394_v2  ;;  %v1296_v14 = vpack.c.bf16 %v209_v7, %v207_v6  ;;  %v229_v5 = vld [vmem:[%s3132_s1 + $0x538] sm:$0xff] }
  0x80   :  { %v419_v6 = vld [vmem:[%s3132_s1 + $0xb28] sm:$0xff]  ;;  %v421_v7 = vld [vmem:[%s3132_s1 + $0xb38] sm:$0xff] }
  0x81   :  { %1279 = vmatpush1.bf16.msra.mxu1 %v1278_v16  ;;  %v208_v16 = vld [vmem:[%s3132_s1 + $0x490] sm:$0xff] }
  0x82   :  { %1471 = vmatpush1.bf16.msra.mxu0 %v1470_v17  ;;  %1281 = vmatprep.subr.bf16.mxu1 %v1280_v18  ;;  %v398_v17 = vld [vmem:[%s3132_s1 + $0xa80] sm:$0xff]  ;;  %v1488_v18 = vpack.c.bf16 %v401_v9, %v399_v8  ;;  %v1298_v24 = vpack.c.bf16 %v208_v16, %v206_v15  ;;  %v420_v15 = vld [vmem:[%s3132_s1 + $0xb30] sm:$0xff]  ;;  %v231_v16 = vld [vmem:[%s3132_s1 + $0x548] sm:$0xff] }
  0x83   :  { %1473 = vmatprep.subr.bf16.mxu0 %v1472_v22  ;;  %v403_v22 = vld [vmem:[%s3132_s1 + $0xaa8] sm:$0xff]  ;;  %v1490_v25 = vpack.c.bf16 %v400_v19, %v398_v17  ;;  %v233_v17 = vld [vmem:[%s3132_s1 + $0x558] sm:$0xff] }
  0x84   :  { %664 = vmatmul.mubr.f32.vlgmr.msra.gmra.mrb[0].mxu1 %v22_v28  ;;  %v212_v28 = vld [vmem:[%s3132_s1 + $0x4b0] sm:$0xff]  ;;  %v425_v19 = vld [vmem:[%s3132_s1 + $0xb58] sm:$0xff] }
  0x85   :  { %1283 = vmatpush1.bf16.msra.mxu1 %v1282_v29  ;;  %913 = vmatmul.mubr.f32.vlgmr.msra.gmra.mrb[0].mxu0 %v28_v30  ;;  %v402_v29 = vld [vmem:[%s3132_s1 + $0xaa0] sm:$0xff]  ;;  %v1492_v30 = vpack.c.bf16 %v405_v23, %v403_v22  ;;  %v1320_v22 = vpack.c.bf16 %v233_v17, %v231_v16 }
  0x86   :  { %1475 = vmatpush1.bf16.msra.mxu0 %v1474_v31  ;;  %1285 = vmatprep.subr.bf16.mxu1 %v1284_v32  ;;  %v404_v31 = vld [vmem:[%s3132_s1 + $0xab0] sm:$0xff]  ;;  %v215_v32 = vld [vmem:[%s3132_s1 + $0x4c8] sm:$0xff]  ;;  %v230_v23 = vld [vmem:[%s3132_s1 + $0x540] sm:$0xff] }
  0x87   :  { %1477 = vmatprep.subr.bf16.mxu0 %v1476_v36  ;;  %669 = vmatprep.mubr.f32.mxu1 %v37_v42  ;;  %v1302_v36 = vpack.c.bf16 %v212_v28, %v210_v27  ;;  %v1494_v37 = vpack.c.bf16 %v404_v31, %v402_v29  ;;  %v1304_v38 = vpack.c.bf16 %v217_v33, %v215_v32  ;;  %v424_v27 = vld [vmem:[%s3132_s1 + $0xb50] sm:$0xff]  ;;  %v235_v28 = vld [vmem:[%s3132_s1 + $0x568] sm:$0xff]  ;;  %v237_v29 = vld [vmem:[%s3132_s1 + $0x578] sm:$0xff] }
  0x88   :  { %918 = vmatprep.mubr.f32.mxu0 %v43_v45  ;;  %670 = vmatmul.mubr.f32.gmra.mrb[2].mxu1 %v36_v46  ;;  %v1496_v42 = vpack.c.bf16 %v409_v35, %v407_v34  ;;  %v221_v45 = vld [vmem:[%s3132_s1 + $0x4f8] sm:$0xff]  ;;  %v411_v46 = vld [vmem:[%s3132_s1 + $0xae8] sm:$0xff]  ;;  %v1324_v34 = vpack.c.bf16 %v237_v29, %v235_v28  ;;  %v234_v35 = vld [vmem:[%s3132_s1 + $0x560] sm:$0xff] }
  0x89   :  { %1287 = vmatpush1.bf16.msra.mxu1 %v1286_v43  ;;  %919 = vmatmul.mubr.f32.gmra.mrb[2].mxu0 %v42_v51  ;;  %v408_v43 = vld [vmem:[%s3132_s1 + $0xad0] sm:$0xff]  ;;  %v1308_v50 = vpack.c.bf16 %v221_v45, %v219_v44  ;;  %v218_v51 = vld [vmem:[%s3132_s1 + $0x4e0] sm:$0xff]  ;;  %v429_v31 = vld [vmem:[%s3132_s1 + $0xb78] sm:$0xff] }
  0x8a   :  { %1479 = vmatpush1.bf16.msra.mxu0 %v1478_v47  ;;  %1289 = vmatprep.subr.bf16.mxu1 %v1288_v48  ;;  %v413_v47 = vld [vmem:[%s3132_s1 + $0xaf8] sm:$0xff]  ;;  %v1306_v48 = vpack.c.bf16 %v216_v40, %v214_v39  ;;  %v1498_v49 = vpack.c.bf16 %v408_v43, %v406_v41  ;;  %v428_v39 = vld [vmem:[%s3132_s1 + $0xb70] sm:$0xff]  ;;  %v239_v40 = vld [vmem:[%s3132_s1 + $0x588] sm:$0xff] }
  0x8b   :  { %1481 = vmatprep.subr.bf16.mxu0 %v1480_v52  ;;  %675 = vmatprep.mubr.f32.mxu1 %v51_v58  ;;  %v220_v52 = vld [vmem:[%s3132_s1 + $0x4f0] sm:$0xff]  ;;  %v1500_v54 = vpack.c.bf16 %v413_v47, %v411_v46  ;;  %v415_v58 = vld [vmem:[%s3132_s1 + $0xb08] sm:$0xff]  ;;  %v241_v41 = vld [vmem:[%s3132_s1 + $0x598] sm:$0xff] }
  0x8c   :  { %924 = vmatprep.mubr.f32.mxu0 %v57_v61  ;;  %676 = vmatmul.mubr.f32.gmra.mrb[4].mxu1 %v50_v62  ;;  %v1310_v60 = vpack.c.bf16 %v220_v52, %v218_v51  ;;  %v1502_v61 = vpack.c.bf16 %v412_v55, %v410_v53  ;;  %v1312_v62 = vpack.c.bf16 %v225_v57, %v223_v56  ;;  %v433_v43 = vld [vmem:[%s3132_s1 + $0xb98] sm:$0xff]  ;;  %v238_v47 = vld [vmem:[%s3132_s1 + $0x580] sm:$0xff]  ;;  %v432_v51 = vld [vmem:[%s3132_s1 + $0xb90] sm:$0xff] }
  0x8d   :  { %1291 = vmatpush1.bf16.msra.mxu1 %v1290_v59  ;;  %925 = vmatmul.mubr.f32.gmra.mrb[4].mxu0 %v56_v3  ;;  %v417_v59 = vld [vmem:[%s3132_s1 + $0xb18] sm:$0xff]  ;;  %v416_v3 = vld [vmem:[%s3132_s1 + $0xb10] sm:$0xff]  ;;  %v1328_v46 = vpack.c.bf16 %v241_v41, %v239_v40  ;;  %v243_v52 = vld [vmem:[%s3132_s1 + $0x5a8] sm:$0xff] }
  0x8e   :  { %1483 = vmatpush1.bf16.msra.mxu0 %v1482_v63  ;;  %1293 = vmatprep.subr.bf16.mxu1 %v1292_v0  ;;  %v222_v63 = vld [vmem:[%s3132_s1 + $0x500] sm:$0xff]  ;;  %v224_v0 = vld [vmem:[%s3132_s1 + $0x510] sm:$0xff]  ;;  %v1504_v2 = vpack.c.bf16 %v417_v59, %v415_v58  ;;  %v1506_v9 = vpack.c.bf16 %v416_v3, %v414_v1  ;;  %v245_v53 = vld [vmem:[%s3132_s1 + $0x5b8] sm:$0xff] }
  0x8f   :  { %1485 = vmatprep.subr.bf16.mxu0 %v1484_v4  ;;  %746 = vmatprep.mubr.f32.mxu1 %v25_v10  ;;  %v227_v4 = vld [vmem:[%s3132_s1 + $0x528] sm:$0xff]  ;;  %v1314_v8 = vpack.c.bf16 %v224_v0, %v222_v63  ;;  %v437_v55 = vld [vmem:[%s3132_s1 + $0xbb8] sm:$0xff]  ;;  %v1332_v58 = vpack.c.bf16 %v245_v53, %v243_v52  ;;  %v242_v59 = vld [vmem:[%s3132_s1 + $0x5a0] sm:$0xff] }
  0x90   :  { %995 = vmatprep.mubr.f32.mxu0 %v31_v12  ;;  %v1316_v10 = vpack.c.bf16 %v229_v5, %v227_v4  ;;  %v228_v12 = vld [vmem:[%s3132_s1 + $0x530] sm:$0xff]  ;;  %v247_v0 = vld [vmem:[%s3132_s1 + $0x5c8] sm:$0xff]  ;;  %v249_v1 = vld [vmem:[%s3132_s1 + $0x5d8] sm:$0xff] }
  0x91   :  { %1295 = vmatpush1.bf16.msra.mxu1 %v1294_v11  ;;  %v226_v11 = vld [vmem:[%s3132_s1 + $0x520] sm:$0xff]  ;;  %v436_v63 = vld [vmem:[%s3132_s1 + $0xbb0] sm:$0xff]  ;;  %v441_v3 = vld [vmem:[%s3132_s1 + $0xbd8] sm:$0xff] }
  0x92   :  { %1487 = vmatpush1.bf16.msra.mxu0 %v1486_v13  ;;  %1297 = vmatprep.subr.bf16.mxu1 %v1296_v14  ;;  %v418_v13 = vld [vmem:[%s3132_s1 + $0xb20] sm:$0xff]  ;;  %v1508_v14 = vpack.c.bf16 %v421_v7, %v419_v6  ;;  %v1318_v20 = vpack.c.bf16 %v228_v12, %v226_v11  ;;  %v1336_v6 = vpack.c.bf16 %v249_v1, %v247_v0  ;;  %v440_v11 = vld [vmem:[%s3132_s1 + $0xbd0] sm:$0xff]  ;;  %v251_v12 = vld [vmem:[%s3132_s1 + $0x5e8] sm:$0xff] }
  0x93   :  { %1489 = vmatprep.subr.bf16.mxu0 %v1488_v18  ;;  %v423_v18 = vld [vmem:[%s3132_s1 + $0xb48] sm:$0xff]  ;;  %v1510_v21 = vpack.c.bf16 %v420_v15, %v418_v13  ;;  %v246_v7 = vld [vmem:[%s3132_s1 + $0x5c0] sm:$0xff]  ;;  %v253_v13 = vld [vmem:[%s3132_s1 + $0x5f8] sm:$0xff] }
  0x94   :  { %v445_v15 = vld [vmem:[%s3132_s1 + $0xbf8] sm:$0xff]  ;;  %v446_v29 = vld [vmem:[%s3132_s1 + $0xc00] sm:$0xff]  ;;  %v45_v40 = vld [vmem:[%s3133_s0 + $0xc8] sm:$0xff] }
  0x95   :  { %1299 = vmatpush1.bf16.msra.mxu1 %v1298_v24  ;;  %v232_v24 = vld [vmem:[%s3132_s1 + $0x550] sm:$0xff]  ;;  %v455_v41 = vld [vmem:[%s3132_s1 + $0xc48] sm:$0xff]  ;;  %v59_v52 = vld [vmem:[%s3133_s0 + $0x138] sm:$0xff] }
  0x96   :  { %1491 = vmatpush1.bf16.msra.mxu0 %v1490_v25  ;;  %1301 = vmatprep.subr.bf16.mxu1 %v1300_v26  ;;  %v422_v25 = vld [vmem:[%s3132_s1 + $0xb40] sm:$0xff]  ;;  %v1512_v26 = vpack.c.bf16 %v425_v19, %v423_v18  ;;  %v1322_v32 = vpack.c.bf16 %v232_v24, %v230_v23  ;;  %v1340_v18 = vpack.c.bf16 %v253_v13, %v251_v12  ;;  %v444_v23 = vld [vmem:[%s3132_s1 + $0xbf0] sm:$0xff]  ;;  %v447_v24 = vld [vmem:[%s3132_s1 + $0xc08] sm:$0xff] }
  0x97   :  { %1493 = vmatprep.subr.bf16.mxu0 %v1492_v30  ;;  %v427_v30 = vld [vmem:[%s3132_s1 + $0xb68] sm:$0xff]  ;;  %v1514_v33 = vpack.c.bf16 %v424_v27, %v422_v25  ;;  %v250_v19 = vld [vmem:[%s3132_s1 + $0x5e0] sm:$0xff]  ;;  %v449_v25 = vld [vmem:[%s3132_s1 + $0xc18] sm:$0xff] }
  0x98   :  { %v1536_v28 = vpack.c.bf16 %v449_v25, %v447_v24  ;;  %v52_v53 = vld [vmem:[%s3133_s0 + $0x100] sm:$0xff] }
  0x99   :  { %1303 = vmatpush1.bf16.msra.mxu1 %v1302_v36  ;;  %v236_v36 = vld [vmem:[%s3132_s1 + $0x570] sm:$0xff]  ;;  %v462_v1 = vld [vmem:[%s3132_s1 + $0xc80] sm:$0xff] }
  0x9a   :  { %1495 = vmatpush1.bf16.msra.mxu0 %v1494_v37  ;;  %1305 = vmatprep.subr.bf16.mxu1 %v1304_v38  ;;  %v426_v37 = vld [vmem:[%s3132_s1 + $0xb60] sm:$0xff]  ;;  %v1516_v38 = vpack.c.bf16 %v429_v31, %v427_v30  ;;  %v1326_v44 = vpack.c.bf16 %v236_v36, %v234_v35  ;;  %v448_v30 = vld [vmem:[%s3132_s1 + $0xc10] sm:$0xff]  ;;  %v451_v31 = vld [vmem:[%s3132_s1 + $0xc28] sm:$0xff] }
  0x9b   :  { %1497 = vmatprep.subr.bf16.mxu0 %v1496_v42  ;;  %v431_v42 = vld [vmem:[%s3132_s1 + $0xb88] sm:$0xff]  ;;  %v1518_v45 = vpack.c.bf16 %v428_v39, %v426_v37  ;;  %v30_v35 = vld [vmem:[%s3133_s0 + $0x50] sm:$0xff]  ;;  %v450_v36 = vld [vmem:[%s3132_s1 + $0xc20] sm:$0xff] }
  0x9c   :  { %v452_v37 = vld [vmem:[%s3132_s1 + $0xc30] sm:$0xff]  ;;  %v470_v13 = vld [vmem:[%s3132_s1 + $0xcc0] sm:$0xff] }
  0x9d   :  { %1307 = vmatpush1.bf16.msra.mxu1 %v1306_v48  ;;  %v240_v48 = vld [vmem:[%s3132_s1 + $0x590] sm:$0xff]  ;;  %v478_v25 = vld [vmem:[%s3132_s1 + $0xd00] sm:$0xff] }
  0x9e   :  { %1499 = vmatpush1.bf16.msra.mxu0 %v1498_v49  ;;  %1309 = vmatprep.subr.bf16.mxu1 %v1308_v50  ;;  %v430_v49 = vld [vmem:[%s3132_s1 + $0xb80] sm:$0xff]  ;;  %v1520_v50 = vpack.c.bf16 %v433_v43, %v431_v42  ;;  %v1330_v56 = vpack.c.bf16 %v240_v48, %v238_v47  ;;  %v457_v42 = vld [vmem:[%s3132_s1 + $0xc58] sm:$0xff]  ;;  %v38_v43 = vld [vmem:[%s3133_s0 + $0x90] sm:$0xff] }
  0x9f   :  { %1501 = vmatprep.subr.bf16.mxu0 %v1500_v54  ;;  %v435_v54 = vld [vmem:[%s3132_s1 + $0xba8] sm:$0xff]  ;;  %v1522_v57 = vpack.c.bf16 %v432_v51, %v430_v49  ;;  %v456_v47 = vld [vmem:[%s3132_s1 + $0xc50] sm:$0xff]  ;;  %v1544_v49 = vpack.c.bf16 %v457_v42, %v455_v41  ;;  %v461_v51 = vld [vmem:[%s3132_s1 + $0xc78] sm:$0xff] }
  0xa0   :  { %v53_v48 = vld [vmem:[%s3133_s0 + $0x108] sm:$0xff] }
  0xa1   :  { %1311 = vmatpush1.bf16.msra.mxu1 %v1310_v60  ;;  %v244_v60 = vld [vmem:[%s3132_s1 + $0x5b0] sm:$0xff] }
  0xa2   :  { %1503 = vmatpush1.bf16.msra.mxu0 %v1502_v61  ;;  %1313 = vmatprep.subr.bf16.mxu1 %v1312_v62  ;;  %v434_v61 = vld [vmem:[%s3132_s1 + $0xba0] sm:$0xff]  ;;  %v1524_v62 = vpack.c.bf16 %v437_v55, %v435_v54  ;;  %v1334_v4 = vpack.c.bf16 %v244_v60, %v242_v59  ;;  %v58_v55 = vld [vmem:[%s3133_s0 + $0x130] sm:$0xff]  ;;  %v463_v59 = vld [vmem:[%s3132_s1 + $0xc88] sm:$0xff] }
  0xa3   :  { %1505 = vmatprep.subr.bf16.mxu0 %v1504_v2  ;;  %v439_v2 = vld [vmem:[%s3132_s1 + $0xbc8] sm:$0xff]  ;;  %v1526_v5 = vpack.c.bf16 %v436_v63, %v434_v61  ;;  %v465_v60 = vld [vmem:[%s3132_s1 + $0xc98] sm:$0xff] }
  0xa4   :  { %v33_v61 = vld [vmem:[%s3133_s0 + $0x68] sm:$0xff]  ;;  %v47_v63 = vld [vmem:[%s3133_s0 + $0xd8] sm:$0xff]  ;;  %v1552_v0 = vpack.c.bf16 %v465_v60, %v463_v59 }
  0xa5   :  { %1315 = vmatpush1.bf16.msra.mxu1 %v1314_v8  ;;  %v248_v8 = vld [vmem:[%s3132_s1 + $0x5d0] sm:$0xff] }
  0xa6   :  { %1507 = vmatpush1.bf16.msra.mxu0 %v1506_v9  ;;  %1317 = vmatprep.subr.bf16.mxu1 %v1316_v10  ;;  %v438_v9 = vld [vmem:[%s3132_s1 + $0xbc0] sm:$0xff]  ;;  %v1528_v10 = vpack.c.bf16 %v441_v3, %v439_v2  ;;  %v1338_v16 = vpack.c.bf16 %v248_v8, %v246_v7  ;;  %v464_v2 = vld [vmem:[%s3132_s1 + $0xc90] sm:$0xff]  ;;  %v467_v3 = vld [vmem:[%s3132_s1 + $0xca8] sm:$0xff] }
  0xa7   :  { %1509 = vmatprep.subr.bf16.mxu0 %v1508_v14  ;;  %v443_v14 = vld [vmem:[%s3132_s1 + $0xbe8] sm:$0xff]  ;;  %v1530_v17 = vpack.c.bf16 %v440_v11, %v438_v9  ;;  %v466_v7 = vld [vmem:[%s3132_s1 + $0xca0] sm:$0xff]  ;;  %v468_v8 = vld [vmem:[%s3132_s1 + $0xcb0] sm:$0xff] }
  0xa8   :  { %v471_v9 = vld [vmem:[%s3132_s1 + $0xcc8] sm:$0xff]  ;;  %v1558_v11 = vpack.c.bf16 %v468_v8, %v466_v7 }
  0xa9   :  { %1319 = vmatpush1.bf16.msra.mxu1 %v1318_v20  ;;  %v252_v20 = vld [vmem:[%s3132_s1 + $0x5f0] sm:$0xff] }
  0xaa   :  { %1511 = vmatpush1.bf16.msra.mxu0 %v1510_v21  ;;  %1321 = vmatprep.subr.bf16.mxu1 %v1320_v22  ;;  %v442_v21 = vld [vmem:[%s3132_s1 + $0xbe0] sm:$0xff]  ;;  %v1532_v22 = vpack.c.bf16 %v445_v15, %v443_v14  ;;  %v472_v14 = vld [vmem:[%s3132_s1 + $0xcd0] sm:$0xff]  ;;  %v475_v15 = vld [vmem:[%s3132_s1 + $0xce8] sm:$0xff] }
  0xab   :  { %1513 = vmatprep.subr.bf16.mxu0 %v1512_v26  ;;  %v1342_v26 = vpack.c.bf16 %v252_v20, %v250_v19  ;;  %v1534_v27 = vpack.c.bf16 %v444_v23, %v442_v21  ;;  %v474_v19 = vld [vmem:[%s3132_s1 + $0xce0] sm:$0xff]  ;;  %v476_v20 = vld [vmem:[%s3132_s1 + $0xcf0] sm:$0xff]  ;;  %v479_v21 = vld [vmem:[%s3132_s1 + $0xd08] sm:$0xff] }
  0xac   :  { %v1566_v23 = vpack.c.bf16 %v476_v20, %v474_v19 }
  0xad   :  { %1323 = vmatpush1.bf16.msra.mxu1 %v1322_v32  ;;  %v453_v32 = vld [vmem:[%s3132_s1 + $0xc38] sm:$0xff] }
  0xae   :  { %1515 = vmatpush1.bf16.msra.mxu0 %v1514_v33  ;;  %1325 = vmatprep.subr.bf16.mxu1 %v1324_v34  ;;  %v24_v33 = vld [vmem:[%s3133_s0 + $0x20] sm:$0xff]  ;;  %v1538_v34 = vpack.c.bf16 %v448_v30, %v446_v29  ;;  %v1540_v39 = vpack.c.bf16 %v453_v32, %v451_v31  ;;  %v484_v32 = vld [vmem:[%s3132_s1 + $0xd30] sm:$0xff] }
  0xaf   :  { %1517 = vmatprep.subr.bf16.mxu0 %v1516_v38  ;;  %v39_v38 = vld [vmem:[%s3133_s0 + $0x98] sm:$0xff]  ;;  %v482_v31 = vld [vmem:[%s3132_s1 + $0xd20] sm:$0xff] }
  0xb1   :  { %1327 = vmatpush1.bf16.msra.mxu1 %v1326_v44  ;;  %v1542_v44 = vpack.c.bf16 %v452_v37, %v450_v36  ;;  %v486_v37 = vld [vmem:[%s3132_s1 + $0xd40] sm:$0xff] }
  0xb2   :  { %1519 = vmatpush1.bf16.msra.mxu0 %v1518_v45  ;;  %1329 = vmatprep.subr.bf16.mxu1 %v1328_v46  ;;  %v44_v45 = vld [vmem:[%s3133_s0 + $0xc0] sm:$0xff] }
  0xb3   :  { %1521 = vmatprep.subr.bf16.mxu0 %v1520_v50  ;;  %v454_v46 = vld [vmem:[%s3132_s1 + $0xc40] sm:$0xff]  ;;  %v459_v50 = vld [vmem:[%s3132_s1 + $0xc68] sm:$0xff] }
  0xb4   :  { %v1546_v54 = vpack.c.bf16 %v456_v47, %v454_v46  ;;  %v46_v46 = vld [vmem:[%s3133_s0 + $0xd0] sm:$0xff]  ;;  %v32_v47 = vld [vmem:[%s3133_s0 + $0x60] sm:$0xff] }
  0xb5   :  { %1331 = vmatpush1.bf16.msra.mxu1 %v1330_v56  ;;  %v1548_v56 = vpack.c.bf16 %v461_v51, %v459_v50  ;;  %v496_v50 = vlaneseq }
  0xb6   :  { %1523 = vmatpush1.bf16.msra.mxu0 %v1522_v57  ;;  %1333 = vmatprep.subr.bf16.mxu1 %v1332_v58  ;;  %v458_v57 = vld [vmem:[%s3132_s1 + $0xc60] sm:$0xff]  ;;  %v460_v58 = vld [vmem:[%s3132_s1 + $0xc70] sm:$0xff] }
  0xb7   :  { %1525 = vmatprep.subr.bf16.mxu0 %v1524_v62  ;;  %v1550_v62 = vpack.c.bf16 %v460_v58, %v458_v57  ;;  %v497_v51 = vshrl.u32 %v496_v50, 7 }
  0xb9   :  { %1335 = vmatpush1.bf16.msra.mxu1 %v1334_v4  ;;  %v469_v4 = vld [vmem:[%s3132_s1 + $0xcb8] sm:$0xff] }
  0xba   :  { %1527 = vmatpush1.bf16.msra.mxu0 %v1526_v5  ;;  %1337 = vmatprep.subr.bf16.mxu1 %v1336_v6  ;;  %v1554_v5 = vpack.c.bf16 %v464_v2, %v462_v1  ;;  %v1556_v6 = vpack.c.bf16 %v469_v4, %v467_v3 }
  0xbb   :  { %1529 = vmatprep.subr.bf16.mxu0 %v1528_v10  ;;  %v473_v10 = vld [vmem:[%s3132_s1 + $0xcd8] sm:$0xff] }
  0xbc   :  { %v1560_v12 = vpack.c.bf16 %v473_v10, %v471_v9 }
  0xbd   :  { %1339 = vmatpush1.bf16.msra.mxu1 %v1338_v16  ;;  %v477_v16 = vld [vmem:[%s3132_s1 + $0xcf8] sm:$0xff] }
  0xbe   :  { %1531 = vmatpush1.bf16.msra.mxu0 %v1530_v17  ;;  %1341 = vmatprep.subr.bf16.mxu1 %v1340_v18  ;;  %v1562_v17 = vpack.c.bf16 %v472_v14, %v470_v13  ;;  %v1564_v18 = vpack.c.bf16 %v477_v16, %v475_v15  ;;  %v1121_v13 = vld [vmem:[%s3136_s4] sm:$0x3] }
  0xbf   :  { %1533 = vmatprep.subr.bf16.mxu0 %v1532_v22  ;;  %v481_v22 = vld [vmem:[%s3132_s1 + $0xd18] sm:$0xff] }
  0xc0   :  { %v1568_v24 = vpack.c.bf16 %v481_v22, %v479_v21 }
  0xc1   :  { %1343 = vmatpush1.bf16.msra.mxu1 %v1342_v26  ;;  %v480_v26 = vld [vmem:[%s3132_s1 + $0xd10] sm:$0xff] }
  0xc2   :  { %1535 = vmatpush1.bf16.msra.mxu0 %v1534_v27  ;;  %1584 = vmatprep.subr.bf16.mxu1 %v1536_v28  ;;  %v483_v27 = vld [vmem:[%s3132_s1 + $0xd28] sm:$0xff]  ;;  %v1570_v29 = vpack.c.bf16 %v480_v26, %v478_v25 }
  0xc3   :  { %1537 = vmatprep.subr.bf16.mxu0 %v1536_v28  ;;  %v485_v28 = vld [vmem:[%s3132_s1 + $0xd38] sm:$0xff] }
  0xc4   :  { %747 = vmatmul.mubr.f32.vlgmr.msra.gmra.mrb[0].mxu1 %v24_v33  ;;  %v1572_v30 = vpack.c.bf16 %v485_v28, %v483_v27  ;;  %v487_v33 = vld [vmem:[%s3132_s1 + $0xd48] sm:$0xff] }
  0xc5   :  { %996 = vmatmul.mubr.f32.vlgmr.msra.gmra.mrb[0].mxu0 %v30_v35  ;;  %1596 = vmatpush1.bf16.msra.mxu1 %v1538_v34  ;;  %v1574_v35 = vpack.c.bf16 %v484_v32, %v482_v31 }
  0xc6   :  { %1539 = vmatpush1.bf16.msra.mxu0 %v1538_v34  ;;  %752 = vmatprep.mubr.f32.mxu1 %v39_v38  ;;  %v489_v34 = vld [vmem:[%s3132_s1 + $0xd58] sm:$0xff]  ;;  %v488_v38 = vld [vmem:[%s3132_s1 + $0xd50] sm:$0xff] }
  0xc7   :  { %1001 = vmatprep.mubr.f32.mxu0 %v45_v40  ;;  %1541 = vmatprep.subr.bf16.mxu0 %v1540_v39  ;;  %v1576_v36 = vpack.c.bf16 %v489_v34, %v487_v33  ;;  %v493_v40 = vld [vmem:[%s3132_s1 + $0xd78] sm:$0xff]  ;;  %v1578_v41 = vpack.c.bf16 %v488_v38, %v486_v37 }
  0xc8   :  { %753 = vmatmul.mubr.f32.gmra.mrb[2].mxu1 %v38_v43  ;;  %1585 = vmatprep.subr.bf16.mxu1 %v1540_v39  ;;  %v491_v39 = vld [vmem:[%s3132_s1 + $0xd68] sm:$0xff]  ;;  %v490_v43 = vld [vmem:[%s3132_s1 + $0xd60] sm:$0xff] }
  0xc9   :  { %1002 = vmatmul.mubr.f32.gmra.mrb[2].mxu0 %v44_v45  ;;  %1597 = vmatpush1.bf16.msra.mxu1 %v1542_v44  ;;  %v1580_v42 = vpack.c.bf16 %v493_v40, %v491_v39 }
  0xca   :  { %1543 = vmatpush1.bf16.msra.mxu0 %v1542_v44  ;;  %758 = vmatprep.mubr.f32.mxu1 %v53_v48  ;;  %v492_v44 = vld [vmem:[%s3132_s1 + $0xd70] sm:$0xff]  ;;  %v61_v48 = vld [vmem:[%s3133_s0 + $0x148] sm:$0xff] }
  0xcb   :  { %1007 = vmatprep.mubr.f32.mxu0 %v59_v52  ;;  %1545 = vmatprep.subr.bf16.mxu0 %v1544_v49  ;;  %v1582_v45 = vpack.c.bf16 %v492_v44, %v490_v43  ;;  %v498_v52 = vsub.s32 0, %v497_v51 }
  0xcc   :  { %759 = vmatmul.mubr.f32.gmra.mrb[4].mxu1 %v52_v53  ;;  %1586 = vmatprep.subr.bf16.mxu1 %v1544_v49  ;;  %v60_v49 = vld [vmem:[%s3133_s0 + $0x140] sm:$0xff] }
  0xcd   :  { %1008 = vmatmul.mubr.f32.gmra.mrb[4].mxu0 %v58_v55  ;;  %1598 = vmatpush1.bf16.msra.mxu1 %v1546_v54  ;;  %v494_v53 = vld [vmem:[%s3134_s2] sm:$0x3]  ;;  %v502_v55 = vsub.s32 1, %v497_v51 }
  0xce   :  { %1547 = vmatpush1.bf16.msra.mxu0 %v1546_v54  ;;  %1587 = vmatprep.subr.bf16.mxu1 %v1548_v56  ;;  %v499_v57 = vrot.slane %v494_v53, %v498_v52 }
  0xcf   :  { %1549 = vmatprep.subr.bf16.mxu0 %v1548_v56  ;;  %1149 = vmatprep.mubr.msk.f32.mxu0 %vm506_vm0, %v33_v61  ;;  %v503_v58 = vrot.slane %v494_v53, %v502_v55  ;;  %v1130_v28 = vrot.slane %v1121_v13, %v502_v55 }
  0xd0   :  { %1150 = vmatprep.mubr.msk.f32.mxu1 %vm506_vm0, %v47_v63 }
  0xd1   :  { %1599 = vmatpush1.bf16.msra.mxu1 %v1550_v62 }
  0xd2   :  { %1551 = vmatpush1.bf16.msra.mxu0 %v1550_v62  ;;  %1588 = vmatprep.subr.bf16.mxu1 %v1552_v0 }
  0xd3   :  { %1553 = vmatprep.subr.bf16.mxu0 %v1552_v0 }
  0xd5   :  { %1600 = vmatpush1.bf16.msra.mxu1 %v1554_v5 }
  0xd6   :  { %1555 = vmatpush1.bf16.msra.mxu0 %v1554_v5  ;;  %1589 = vmatprep.subr.bf16.mxu1 %v1556_v6 }
  0xd7   :  { %1557 = vmatprep.subr.bf16.mxu0 %v1556_v6 }
  0xd9   :  { %1601 = vmatpush1.bf16.msra.mxu1 %v1558_v11 }
  0xda   :  { %1559 = vmatpush1.bf16.msra.mxu0 %v1558_v11  ;;  %1590 = vmatprep.subr.bf16.mxu1 %v1560_v12  ;;  %v1103_v11 = vld [vmem:[%s3135_s3] sm:$0x3] }
  0xdb   :  { %1561 = vmatprep.subr.bf16.mxu0 %v1560_v12  ;;  %v1112_v22 = vrot.slane %v1103_v11, %v502_v55 }
  0xdd   :  { %1602 = vmatpush1.bf16.msra.mxu1 %v1562_v17 }
  0xde   :  { %1563 = vmatpush1.bf16.msra.mxu0 %v1562_v17  ;;  %1591 = vmatprep.subr.bf16.mxu1 %v1564_v18  ;;  %v1108_v17 = vrot.slane %v1103_v11, %v498_v52 }
  0xdf   :  { %1565 = vmatprep.subr.bf16.mxu0 %v1564_v18 }
  0xe1   :  { %1603 = vmatpush1.bf16.msra.mxu1 %v1566_v23 }
  0xe2   :  { %1567 = vmatpush1.bf16.msra.mxu0 %v1566_v23  ;;  %1592 = vmatprep.subr.bf16.mxu1 %v1568_v24 }
  0xe3   :  { %1569 = vmatprep.subr.bf16.mxu0 %v1568_v24  ;;  %v1126_v24 = vrot.slane %v1121_v13, %v498_v52 }
  0xe5   :  { %1604 = vmatpush1.bf16.msra.mxu1 %v1570_v29 }
  0xe6   :  { %1571 = vmatpush1.bf16.msra.mxu0 %v1570_v29  ;;  %1593 = vmatprep.subr.bf16.mxu1 %v1572_v30 }
  0xe7   :  { %1573 = vmatprep.subr.bf16.mxu0 %v1572_v30 }
  0xe9   :  { %1605 = vmatpush1.bf16.msra.mxu1 %v1574_v35 }
  0xea   :  { %1575 = vmatpush1.bf16.msra.mxu0 %v1574_v35  ;;  %1594 = vmatprep.subr.bf16.mxu1 %v1576_v36 }
  0xeb   :  { %1577 = vmatprep.subr.bf16.mxu0 %v1576_v36 }
  0xed   :  { %1606 = vmatpush1.bf16.msra.mxu1 %v1578_v41 }
  0xee   :  { %1579 = vmatpush1.bf16.msra.mxu0 %v1578_v41  ;;  %1595 = vmatprep.subr.bf16.mxu1 %v1580_v42 }
  0xef   :  { %1581 = vmatprep.subr.bf16.mxu0 %v1580_v42 }
  0xf1   :  { %1607 = vmatpush1.bf16.msra.mxu1 %v1582_v45 }
  0xf2   :  { %1583 = vmatpush1.bf16.msra.mxu0 %v1582_v45 }
  0xf4   :  { %1085 = vmatmul.mubr.f32.vlgmr.msra.gmra.mrb[6].mxu1 %v46_v46 }
  0xf5   :  { %1079 = vmatmul.mubr.f32.vlgmr.msra.gmra.mrb[0].mxu0 %v32_v47  ;;  %1151 = vmatprep.mubr.msk.f32.mxu1 %vm506_vm0, %v61_v48 }
  0xf8   :  { %1091 = vmatmul.mubr.f32.gmra.mrb[8].mxu1 %v60_v49 }
 0x197   :  { %v748_v54 = vpop.f32.mrb[0].mxu1 }
 0x198   :  { %v750_v56 = vpop.f32.mrb[1].mxu1  ;;  %v1608_v12 = vadd.f32 %v748_v54, %v499_v57 }
 0x199   :  { %v1610_v15 = vadd.f32 %v750_v56, %v503_v58 }
 0x19b   :  { %v754_v59 = vpop.f32.mrb[2].mxu1 }
 0x19c   :  { %v1612_v60 = vadd.f32 %v754_v59, %v499_v57  ;;  %v1003_v61 = vpop.f32.mrb[2].mxu0  ;;  %v756_v62 = vpop.f32.mrb[3].mxu1 }
 0x19d   :  { %v1615_v63 = vadd.f32 %v756_v62, %v503_v58  ;;  %v1005_v0 = vpop.f32.mrb[3].mxu0 }
 0x19e   :  { %v1613_v1 = vadd.f32 %v1612_v60, %v1003_v61 }
 0x19f   :  { %v1616_v2 = vadd.f32 %v1615_v63, %v1005_v0  ;;  %v760_v3 = vpop.f32.mrb[4].mxu1 }
 0x1a0   :  { %v1618_v4 = vadd.f32 %v760_v3, %v499_v57  ;;  %v1009_v5 = vpop.f32.mrb[4].mxu0  ;;  %v762_v6 = vpop.f32.mrb[5].mxu1 }
 0x1a1   :  { %v1621_v7 = vadd.f32 %v762_v6, %v503_v58  ;;  %v1011_v8 = vpop.f32.mrb[5].mxu0 }
 0x1a2   :  { %v1619_v9 = vadd.f32 %v1618_v4, %v1009_v5 }
 0x1a3   :  { %v1622_v10 = vadd.f32 %v1621_v7, %v1011_v8 }
 0x1c7   :  { %v1086_v14 = vpop.f32.mrb[6].mxu1 }
 0x1c8   :  { %v1080_v16 = vpop.f32.mrb[0].mxu0  ;;  %v1614_v18 = vadd.f32 %v1613_v1, %v1086_v14  ;;  %v1088_v19 = vpop.f32.mrb[7].mxu1 }
 0x1c9   :  { %v1609_v20 = vadd.f32 %v1608_v12, %v1080_v16  ;;  %v1082_v21 = vpop.f32.mrb[1].mxu0  ;;  %v1617_v23 = vadd.f32 %v1616_v2, %v1088_v19 }
 0x1ca   :  { %v1099_v25 = vmax.f32 %v1614_v18, 0.0  ;;  %v1611_v26 = vadd.f32 %v1610_v15, %v1082_v21 }
 0x1cb   :  { %v1097_v27 = vmax.f32 %v1609_v20, 0.0  ;;  %v1100_v29 = vmax.f32 %v1617_v23, 0.0  ;;  %v1092_v30 = vpop.f32.mrb[8].mxu1 }
 0x1cc   :  { %v1117_v31 = vmul.f32 %v1108_v17, %v1099_v25  ;;  %v1098_v32 = vmax.f32 %v1611_v26, 0.0  ;;  %v1620_v33 = vadd.f32 %v1619_v9, %v1092_v30  ;;  %v1094_v34 = vpop.f32.mrb[9].mxu1 }
 0x1cd   :  { %v1115_v35 = vmul.f32 %v1108_v17, %v1097_v27  ;;  %v1118_v36 = vmul.f32 %v1112_v22, %v1100_v29  ;;  %v1623_v37 = vadd.f32 %v1622_v10, %v1094_v34 }
 0x1ce   :  { %v1135_v38 = vadd.f32 %v1126_v24, %v1117_v31  ;;  %v1116_v39 = vmul.f32 %v1112_v22, %v1098_v32  ;;  %v1101_v40 = vmax.f32 %v1620_v33, 0.0 }
 0x1cf   :  { %v1133_v41 = vadd.f32 %v1126_v24, %v1115_v35  ;;  %v1136_v42 = vadd.f32 %v1130_v28, %v1118_v36  ;;  %v1102_v43 = vmax.f32 %v1623_v37, 0.0 }
 0x1d0   :  { %1141 = vst [vmem:[%s3137_s5 + $0x10] sm:$0xff] %v1135_v38  ;;  %v1134_v44 = vadd.f32 %v1130_v28, %v1116_v39  ;;  %v1119_v45 = vmul.f32 %v1108_v17, %v1101_v40 }
 0x1d1   :  { %1139 = vst [vmem:[%s3137_s5] sm:$0xff] %v1133_v41  ;;  %1142 = vst [vmem:[%s3137_s5 + $0x18] sm:$0xff] %v1136_v42  ;;  %v1120_v46 = vmul.f32 %v1112_v22, %v1102_v43 }
 0x1d2   :  { %1140 = vst [vmem:[%s3137_s5 + $0x8] sm:$0xff] %v1134_v44  ;;  %v1137_v47 = vadd.f32 %v1126_v24, %v1119_v45 }
 0x1d3   :  { %v1138_v48 = vadd.f32 %v1130_v28, %v1120_v46 }
 0x1d4   :  { %1143 = vst [vmem:[%s3137_s5 + $0x20] sm:$0xff] %v1137_v47 }
 0x1d5   :  { %1144 = vst [vmem:[%s3137_s5 + $0x28] sm:$0xff] %v1138_v48 }

// kernel: ref_cnn_forward.9
= control target key start
LH: loop header
LB: loop body
LE: loop exit
PB: predicated region body
PF: predicated region fallthrough
CT: control target
= control target key end

     0   :  { %s6821_s0 = inlined_call_operand.vmem [shape: f32[2,2304], index: 0, kind: input, shape index: {}]   ;;  %s6822_s1 = inlined_call_operand.vmem [shape: f32[2304,300], index: 1, kind: input, shape index: {}]   ;;  %s6823_s2 = inlined_call_operand.vmem [shape: f32[1,300], index: 2, kind: input, shape index: {}]   ;;  %s6824_s3 = inlined_call_operand.vmem [shape: f32[1,300], index: 3, kind: input, shape index: {}]   ;;  %s6825_s4 = inlined_call_operand.vmem [shape: f32[1,300], index: 4, kind: input, shape index: {}]   ;;  %s6826_s5 = inlined_call_operand.vmem [shape: f32[300,10], index: 5, kind: input, shape index: {}]   ;;  %s6827_s6 = inlined_call_operand.vmem [shape: f32[1,10], index: 6, kind: input, shape index: {}]   ;;  %s6828_s7 = inlined_call_operand.hbm [shape: f32[2,10], index: 7, kind: output, shape index: {}]  }
   0x1   :  { %v33_v0 = vld [vmem:[%s6822_s1 + $0x8] sm:$0xff]  ;;  %v36_v1 = vld [vmem:[%s6822_s1 + $0x20] sm:$0xff]  ;;  %v35_v6 = vld [vmem:[%s6822_s1 + $0x18] sm:$0xff] }
   0x2   :  { %v225_v2 = vld [vmem:[%s6822_s1 + $0x608] sm:$0xff]  ;;  %v2921_v3 = vpack.c.bf16 %v36_v1, %v33_v0  ;;  %v228_v4 = vld [vmem:[%s6822_s1 + $0x620] sm:$0xff]  ;;  %v227_v10 = vld [vmem:[%s6822_s1 + $0x618] sm:$0xff] }
   0x3   :  { %v32_v5 = vld [vmem:[%s6822_s1] sm:$0xff]  ;;  %v3049_v7 = vpack.c.bf16 %v228_v4, %v225_v2  ;;  %v39_v11 = vld [vmem:[%s6822_s1 + $0x38] sm:$0xff]  ;;  %v42_v13 = vld [vmem:[%s6822_s1 + $0x50] sm:$0xff] }
   0x4   :  { %v2923_v8 = vpack.c.bf16 %v35_v6, %v32_v5  ;;  %v224_v9 = vld [vmem:[%s6822_s1 + $0x600] sm:$0xff]  ;;  %2922 = vmatprep.subr.bf16.mxu1 %v2921_v3  ;;  %v231_v14 = vld [vmem:[%s6822_s1 + $0x638] sm:$0xff]  ;;  %v234_v15 = vld [vmem:[%s6822_s1 + $0x650] sm:$0xff]  ;;  %v2925_v16 = vpack.c.bf16 %v42_v13, %v39_v11 }
   0x5   :  { %v3051_v12 = vpack.c.bf16 %v227_v10, %v224_v9  ;;  %3050 = vmatprep.subr.bf16.mxu0 %v3049_v7  ;;  %v3053_v17 = vpack.c.bf16 %v234_v15, %v231_v14  ;;  %v38_v18 = vld [vmem:[%s6822_s1 + $0x30] sm:$0xff]  ;;  %v41_v19 = vld [vmem:[%s6822_s1 + $0x48] sm:$0xff]  ;;  %v48_v24 = vld [vmem:[%s6822_s1 + $0x80] sm:$0xff] }
   0x6   :  { %2924 = vmatpush1.bf16.msra.mxu1 %v2923_v8  ;;  %v230_v20 = vld [vmem:[%s6822_s1 + $0x630] sm:$0xff]  ;;  %v2927_v21 = vpack.c.bf16 %v41_v19, %v38_v18  ;;  %v233_v22 = vld [vmem:[%s6822_s1 + $0x648] sm:$0xff]  ;;  %v240_v28 = vld [vmem:[%s6822_s1 + $0x680] sm:$0xff] }
   0x7   :  { %3052 = vmatpush1.bf16.msra.mxu0 %v3051_v12  ;;  %v45_v23 = vld [vmem:[%s6822_s1 + $0x68] sm:$0xff]  ;;  %2926 = vmatprep.subr.bf16.mxu1 %v2925_v16  ;;  %v3055_v25 = vpack.c.bf16 %v233_v22, %v230_v20  ;;  %v44_v29 = vld [vmem:[%s6822_s1 + $0x60] sm:$0xff]  ;;  %v47_v31 = vld [vmem:[%s6822_s1 + $0x78] sm:$0xff] }
   0x8   :  { %3054 = vmatprep.subr.bf16.mxu0 %v3053_v17  ;;  %v2929_v26 = vpack.c.bf16 %v48_v24, %v45_v23  ;;  %v237_v27 = vld [vmem:[%s6822_s1 + $0x668] sm:$0xff]  ;;  %v236_v32 = vld [vmem:[%s6822_s1 + $0x660] sm:$0xff]  ;;  %v239_v33 = vld [vmem:[%s6822_s1 + $0x678] sm:$0xff]  ;;  %v2931_v34 = vpack.c.bf16 %v47_v31, %v44_v29 }
   0x9   :  { %v3057_v30 = vpack.c.bf16 %v240_v28, %v237_v27  ;;  %v51_v35 = vld [vmem:[%s6822_s1 + $0x98] sm:$0xff]  ;;  %v54_v36 = vld [vmem:[%s6822_s1 + $0xb0] sm:$0xff]  ;;  %v3059_v38 = vpack.c.bf16 %v239_v33, %v236_v32  ;;  %v53_v42 = vld [vmem:[%s6822_s1 + $0xa8] sm:$0xff] }
   0xa   :  { %2928 = vmatpush1.bf16.msra.mxu1 %v2927_v21  ;;  %v243_v37 = vld [vmem:[%s6822_s1 + $0x698] sm:$0xff]  ;;  %v2933_v39 = vpack.c.bf16 %v54_v36, %v51_v35  ;;  %v246_v40 = vld [vmem:[%s6822_s1 + $0x6b0] sm:$0xff]  ;;  %v245_v45 = vld [vmem:[%s6822_s1 + $0x6a8] sm:$0xff] }
   0xb   :  { %3056 = vmatpush1.bf16.msra.mxu0 %v3055_v25  ;;  %2930 = vmatprep.subr.bf16.mxu1 %v2929_v26  ;;  %v50_v41 = vld [vmem:[%s6822_s1 + $0x90] sm:$0xff]  ;;  %v3061_v43 = vpack.c.bf16 %v246_v40, %v243_v37  ;;  %v57_v46 = vld [vmem:[%s6822_s1 + $0xc8] sm:$0xff]  ;;  %v60_v47 = vld [vmem:[%s6822_s1 + $0xe0] sm:$0xff] }
   0xc   :  { %3058 = vmatprep.subr.bf16.mxu0 %v3057_v30  ;;  %v242_v44 = vld [vmem:[%s6822_s1 + $0x690] sm:$0xff]  ;;  %v249_v48 = vld [vmem:[%s6822_s1 + $0x6c8] sm:$0xff]  ;;  %v252_v49 = vld [vmem:[%s6822_s1 + $0x6e0] sm:$0xff]  ;;  %v2935_v50 = vpack.c.bf16 %v53_v42, %v50_v41  ;;  %v2937_v52 = vpack.c.bf16 %v60_v47, %v57_v46  ;;  %v898_v46 = vlaneseq  ;;  %v3883_v47 = vmov 1983009808  }
   0xd   :  { %v3063_v51 = vpack.c.bf16 %v245_v45, %v242_v44  ;;  %v56_v53 = vld [vmem:[%s6822_s1 + $0xc0] sm:$0xff]  ;;  %v59_v54 = vld [vmem:[%s6822_s1 + $0xd8] sm:$0xff]  ;;  %v3065_v56 = vpack.c.bf16 %v252_v49, %v249_v48  ;;  %v66_v59 = vld [vmem:[%s6822_s1 + $0x110] sm:$0xff]  ;;  %v920_v48 = vunpack.c.l.s4 %v3883_v47 }
   0xe   :  { %2932 = vmatpush1.bf16.msra.mxu1 %v2931_v34  ;;  %v248_v55 = vld [vmem:[%s6822_s1 + $0x6c0] sm:$0xff]  ;;  %v251_v57 = vld [vmem:[%s6822_s1 + $0x6d8] sm:$0xff]  ;;  %v258_v61 = vld [vmem:[%s6822_s1 + $0x710] sm:$0xff]  ;;  %v2939_v62 = vpack.c.bf16 %v59_v54, %v56_v53 }
   0xf   :  { %3060 = vmatpush1.bf16.msra.mxu0 %v3059_v38  ;;  %2934 = vmatprep.subr.bf16.mxu1 %v2933_v39  ;;  %v63_v58 = vld [vmem:[%s6822_s1 + $0xf8] sm:$0xff]  ;;  %v3067_v63 = vpack.c.bf16 %v251_v57, %v248_v55  ;;  %v62_v1 = vld [vmem:[%s6822_s1 + $0xf0] sm:$0xff]  ;;  %v65_v2 = vld [vmem:[%s6822_s1 + $0x108] sm:$0xff] }
  0x10   :  { %3062 = vmatprep.subr.bf16.mxu0 %v3061_v43  ;;  %v255_v60 = vld [vmem:[%s6822_s1 + $0x6f8] sm:$0xff]  ;;  %v2941_v0 = vpack.c.bf16 %v66_v59, %v63_v58  ;;  %v254_v3 = vld [vmem:[%s6822_s1 + $0x6f0] sm:$0xff]  ;;  %v257_v5 = vld [vmem:[%s6822_s1 + $0x708] sm:$0xff]  ;;  %v2943_v10 = vpack.c.bf16 %v65_v2, %v62_v1 }
  0x11   :  { %v3069_v4 = vpack.c.bf16 %v258_v61, %v255_v60  ;;  %v69_v6 = vld [vmem:[%s6822_s1 + $0x128] sm:$0xff]  ;;  %v72_v7 = vld [vmem:[%s6822_s1 + $0x140] sm:$0xff]  ;;  %v3071_v11 = vpack.c.bf16 %v257_v5, %v254_v3  ;;  %v71_v14 = vld [vmem:[%s6822_s1 + $0x138] sm:$0xff]  ;;  %v4181_v61 = vshrl.u32 %v898_v46, 7 }
  0x12   :  { %2936 = vmatpush1.bf16.msra.mxu1 %v2935_v50  ;;  %v261_v8 = vld [vmem:[%s6822_s1 + $0x728] sm:$0xff]  ;;  %v264_v9 = vld [vmem:[%s6822_s1 + $0x740] sm:$0xff]  ;;  %v2945_v12 = vpack.c.bf16 %v72_v7, %v69_v6  ;;  %v263_v17 = vld [vmem:[%s6822_s1 + $0x738] sm:$0xff] }
  0x13   :  { %3064 = vmatpush1.bf16.msra.mxu0 %v3063_v51  ;;  %2938 = vmatprep.subr.bf16.mxu1 %v2937_v52  ;;  %v68_v13 = vld [vmem:[%s6822_s1 + $0x120] sm:$0xff]  ;;  %v3073_v16 = vpack.c.bf16 %v264_v9, %v261_v8  ;;  %v75_v18 = vld [vmem:[%s6822_s1 + $0x158] sm:$0xff]  ;;  %v78_v19 = vld [vmem:[%s6822_s1 + $0x170] sm:$0xff] }
  0x14   :  { %3066 = vmatprep.subr.bf16.mxu0 %v3065_v56  ;;  %v260_v15 = vld [vmem:[%s6822_s1 + $0x720] sm:$0xff]  ;;  %v267_v20 = vld [vmem:[%s6822_s1 + $0x758] sm:$0xff]  ;;  %v270_v21 = vld [vmem:[%s6822_s1 + $0x770] sm:$0xff]  ;;  %v2947_v22 = vpack.c.bf16 %v71_v14, %v68_v13  ;;  %v2949_v24 = vpack.c.bf16 %v78_v19, %v75_v18 }
  0x15   :  { %v3075_v23 = vpack.c.bf16 %v263_v17, %v260_v15  ;;  %v74_v25 = vld [vmem:[%s6822_s1 + $0x150] sm:$0xff]  ;;  %v77_v26 = vld [vmem:[%s6822_s1 + $0x168] sm:$0xff]  ;;  %v3077_v28 = vpack.c.bf16 %v270_v21, %v267_v20  ;;  %v84_v31 = vld [vmem:[%s6822_s1 + $0x1a0] sm:$0xff] }
  0x16   :  { %2940 = vmatpush1.bf16.msra.mxu1 %v2939_v62  ;;  %v266_v27 = vld [vmem:[%s6822_s1 + $0x750] sm:$0xff]  ;;  %v269_v29 = vld [vmem:[%s6822_s1 + $0x768] sm:$0xff]  ;;  %v276_v33 = vld [vmem:[%s6822_s1 + $0x7a0] sm:$0xff]  ;;  %v2951_v34 = vpack.c.bf16 %v77_v26, %v74_v25  ;;  %v921_v62 = vunpack.c.0.s8 %v920_v48 }
  0x17   :  { %3068 = vmatpush1.bf16.msra.mxu0 %v3067_v63  ;;  %2942 = vmatprep.subr.bf16.mxu1 %v2941_v0  ;;  %v81_v30 = vld [vmem:[%s6822_s1 + $0x188] sm:$0xff]  ;;  %v3079_v35 = vpack.c.bf16 %v269_v29, %v266_v27  ;;  %v80_v37 = vld [vmem:[%s6822_s1 + $0x180] sm:$0xff]  ;;  %v83_v38 = vld [vmem:[%s6822_s1 + $0x198] sm:$0xff] }
  0x18   :  { %3070 = vmatprep.subr.bf16.mxu0 %v3069_v4  ;;  %v273_v32 = vld [vmem:[%s6822_s1 + $0x788] sm:$0xff]  ;;  %v2953_v36 = vpack.c.bf16 %v84_v31, %v81_v30  ;;  %v272_v39 = vld [vmem:[%s6822_s1 + $0x780] sm:$0xff]  ;;  %v275_v41 = vld [vmem:[%s6822_s1 + $0x798] sm:$0xff]  ;;  %v2955_v49 = vpack.c.bf16 %v83_v38, %v80_v37 }
  0x19   :  { %v3081_v40 = vpack.c.bf16 %v276_v33, %v273_v32  ;;  %v87_v42 = vld [vmem:[%s6822_s1 + $0x1b8] sm:$0xff]  ;;  %v90_v43 = vld [vmem:[%s6822_s1 + $0x1d0] sm:$0xff]  ;;  %v3083_v50 = vpack.c.bf16 %v275_v41, %v272_v39  ;;  %v89_v53 = vld [vmem:[%s6822_s1 + $0x1c8] sm:$0xff] }
  0x1a   :  { %2944 = vmatpush1.bf16.msra.mxu1 %v2943_v10  ;;  %v279_v44 = vld [vmem:[%s6822_s1 + $0x7b8] sm:$0xff]  ;;  %v282_v45 = vld [vmem:[%s6822_s1 + $0x7d0] sm:$0xff]  ;;  %v2957_v51 = vpack.c.bf16 %v90_v43, %v87_v42  ;;  %v281_v56 = vld [vmem:[%s6822_s1 + $0x7c8] sm:$0xff] }
  0x1b   :  { %3072 = vmatpush1.bf16.msra.mxu0 %v3071_v11  ;;  %2946 = vmatprep.subr.bf16.mxu1 %v2945_v12  ;;  %v86_v52 = vld [vmem:[%s6822_s1 + $0x1b0] sm:$0xff]  ;;  %v3085_v55 = vpack.c.bf16 %v282_v45, %v279_v44  ;;  %v93_v57 = vld [vmem:[%s6822_s1 + $0x1e8] sm:$0xff]  ;;  %v96_v58 = vld [vmem:[%s6822_s1 + $0x200] sm:$0xff]  ;;  %v4208_v11 = vsub.s32 %v921_v62, %v4181_v61 }
  0x1c   :  { %3074 = vmatprep.subr.bf16.mxu0 %v3073_v16  ;;  %v278_v54 = vld [vmem:[%s6822_s1 + $0x7b0] sm:$0xff]  ;;  %v285_v59 = vld [vmem:[%s6822_s1 + $0x7e8] sm:$0xff]  ;;  %v288_v60 = vld [vmem:[%s6822_s1 + $0x800] sm:$0xff]  ;;  %v2959_v63 = vpack.c.bf16 %v89_v53, %v86_v52  ;;  %v2961_v1 = vpack.c.bf16 %v96_v58, %v93_v57 }
  0x1d   :  { %v3087_v0 = vpack.c.bf16 %v281_v56, %v278_v54  ;;  %v92_v2 = vld [vmem:[%s6822_s1 + $0x1e0] sm:$0xff]  ;;  %v95_v3 = vld [vmem:[%s6822_s1 + $0x1f8] sm:$0xff]  ;;  %v3089_v5 = vpack.c.bf16 %v288_v60, %v285_v59  ;;  %v102_v8 = vld [vmem:[%s6822_s1 + $0x230] sm:$0xff] }
  0x1e   :  { %2948 = vmatpush1.bf16.msra.mxu1 %v2947_v22  ;;  %v284_v4 = vld [vmem:[%s6822_s1 + $0x7e0] sm:$0xff]  ;;  %v287_v6 = vld [vmem:[%s6822_s1 + $0x7f8] sm:$0xff]  ;;  %v294_v10 = vld [vmem:[%s6822_s1 + $0x830] sm:$0xff]  ;;  %v2963_v12 = vpack.c.bf16 %v95_v3, %v92_v2 }
  0x1f   :  { %3076 = vmatpush1.bf16.msra.mxu0 %v3075_v23  ;;  %2950 = vmatprep.subr.bf16.mxu1 %v2949_v24  ;;  %v99_v7 = vld [vmem:[%s6822_s1 + $0x218] sm:$0xff]  ;;  %v98_v13 = vld [vmem:[%s6822_s1 + $0x210] sm:$0xff]  ;;  %v3091_v14 = vpack.c.bf16 %v287_v6, %v284_v4  ;;  %v101_v16 = vld [vmem:[%s6822_s1 + $0x228] sm:$0xff] }
  0x20   :  { %3078 = vmatprep.subr.bf16.mxu0 %v3077_v28  ;;  %v291_v9 = vld [vmem:[%s6822_s1 + $0x818] sm:$0xff]  ;;  %v2965_v15 = vpack.c.bf16 %v102_v8, %v99_v7  ;;  %v290_v17 = vld [vmem:[%s6822_s1 + $0x810] sm:$0xff]  ;;  %v293_v18 = vld [vmem:[%s6822_s1 + $0x828] sm:$0xff]  ;;  %v2967_v27 = vpack.c.bf16 %v101_v16, %v98_v13 }
  0x21   :  { %v3093_v19 = vpack.c.bf16 %v294_v10, %v291_v9  ;;  %v105_v20 = vld [vmem:[%s6822_s1 + $0x248] sm:$0xff]  ;;  %v108_v21 = vld [vmem:[%s6822_s1 + $0x260] sm:$0xff]  ;;  %v3095_v29 = vpack.c.bf16 %v293_v18, %v290_v17  ;;  %v107_v32 = vld [vmem:[%s6822_s1 + $0x258] sm:$0xff] }
  0x22   :  { %2952 = vmatpush1.bf16.msra.mxu1 %v2951_v34  ;;  %v4231_v22 = vld [vmem:[%s6821_s0] sm:$0xff]  ;;  %v297_v23 = vld [vmem:[%s6822_s1 + $0x848] sm:$0xff]  ;;  %v2969_v30 = vpack.c.bf16 %v108_v21, %v105_v20  ;;  %v111_v37 = vld [vmem:[%s6822_s1 + $0x278] sm:$0xff] }
  0x23   :  { %3080 = vmatpush1.bf16.msra.mxu0 %v3079_v35  ;;  %2954 = vmatprep.subr.bf16.mxu1 %v2953_v36  ;;  %v300_v24 = vld [vmem:[%s6822_s1 + $0x860] sm:$0xff]  ;;  %v4241_v25 = vrot.slane %v4231_v22, %v4208_v11  ;;  %v4246_v26 = vld [vmem:[%s6821_s0 + $0x8] sm:$0xff]  ;;  %v299_v36 = vld [vmem:[%s6822_s1 + $0x858] sm:$0xff] }
  0x24   :  { %3082 = vmatprep.subr.bf16.mxu0 %v3081_v40  ;;  %v4250_v28 = vrot.slane %v4246_v26, %v4208_v11  ;;  %v104_v31 = vld [vmem:[%s6822_s1 + $0x240] sm:$0xff]  ;;  %v3097_v35 = vpack.c.bf16 %v300_v24, %v297_v23  ;;  %v114_v38 = vld [vmem:[%s6822_s1 + $0x290] sm:$0xff]  ;;  %v303_v40 = vld [vmem:[%s6822_s1 + $0x878] sm:$0xff] }
  0x25   :  { %v296_v33 = vld [vmem:[%s6822_s1 + $0x840] sm:$0xff]  ;;  %v4263_v34 = vcombine.high %v4241_v25, %v4241_v25  ;;  %v306_v41 = vld [vmem:[%s6822_s1 + $0x890] sm:$0xff]  ;;  %v2971_v42 = vpack.c.bf16 %v107_v32, %v104_v31  ;;  %v2973_v44 = vpack.c.bf16 %v114_v38, %v111_v37  ;;  %v113_v46 = vld [vmem:[%s6822_s1 + $0x288] sm:$0xff] }
  0x26   :  { %2956 = vmatpush1.bf16.msra.mxu1 %v2955_v49  ;;  %v4276_v39 = vcombine.high %v4250_v28, %v4250_v28  ;;  %v3099_v43 = vpack.c.bf16 %v299_v36, %v296_v33  ;;  %v110_v45 = vld [vmem:[%s6822_s1 + $0x270] sm:$0xff]  ;;  %v3101_v48 = vpack.c.bf16 %v306_v41, %v303_v40  ;;  %v305_v49 = vld [vmem:[%s6822_s1 + $0x888] sm:$0xff]  ;;  %v312_v53 = vld [vmem:[%s6822_s1 + $0x8c0] sm:$0xff] }
  0x27   :  { %3084 = vmatpush1.bf16.msra.mxu0 %v3083_v50  ;;  %2958 = vmatprep.subr.bf16.mxu1 %v2957_v51  ;;  %v302_v47 = vld [vmem:[%s6822_s1 + $0x870] sm:$0xff]  ;;  %v117_v50 = vld [vmem:[%s6822_s1 + $0x2a8] sm:$0xff]  ;;  %v120_v51 = vld [vmem:[%s6822_s1 + $0x2c0] sm:$0xff]  ;;  %v2975_v54 = vpack.c.bf16 %v113_v46, %v110_v45 }
  0x28   :  { %3086 = vmatprep.subr.bf16.mxu0 %v3085_v55  ;;  %1076 = vmatprep.mubr.f32.mxu1 %v4263_v34  ;;  %v309_v52 = vld [vmem:[%s6822_s1 + $0x8a8] sm:$0xff]  ;;  %v3103_v55 = vpack.c.bf16 %v305_v49, %v302_v47  ;;  %v2977_v56 = vpack.c.bf16 %v120_v51, %v117_v50  ;;  %v116_v57 = vld [vmem:[%s6822_s1 + $0x2a0] sm:$0xff]  ;;  %v119_v58 = vld [vmem:[%s6822_s1 + $0x2b8] sm:$0xff] }
  0x29   :  { %1218 = vmatprep.mubr.f32.mxu0 %v4276_v39  ;;  %v308_v59 = vld [vmem:[%s6822_s1 + $0x8a0] sm:$0xff]  ;;  %v3105_v60 = vpack.c.bf16 %v312_v53, %v309_v52  ;;  %v311_v62 = vld [vmem:[%s6822_s1 + $0x8b8] sm:$0xff]  ;;  %v318_v2 = vld [vmem:[%s6822_s1 + $0x8f0] sm:$0xff]  ;;  %v2979_v3 = vpack.c.bf16 %v119_v58, %v116_v57 }
  0x2a   :  { %2960 = vmatpush1.bf16.msra.mxu1 %v2959_v63  ;;  %v123_v63 = vld [vmem:[%s6822_s1 + $0x2d8] sm:$0xff]  ;;  %v3107_v4 = vpack.c.bf16 %v311_v62, %v308_v59  ;;  %v122_v6 = vld [vmem:[%s6822_s1 + $0x2d0] sm:$0xff]  ;;  %v125_v7 = vld [vmem:[%s6822_s1 + $0x2e8] sm:$0xff] }
  0x2b   :  { %3088 = vmatpush1.bf16.msra.mxu0 %v3087_v0  ;;  %2962 = vmatprep.subr.bf16.mxu1 %v2961_v1  ;;  %v126_v0 = vld [vmem:[%s6822_s1 + $0x2f0] sm:$0xff]  ;;  %v315_v1 = vld [vmem:[%s6822_s1 + $0x8d8] sm:$0xff]  ;;  %v317_v10 = vld [vmem:[%s6822_s1 + $0x8e8] sm:$0xff]  ;;  %v2983_v18 = vpack.c.bf16 %v125_v7, %v122_v6 }
  0x2c   :  { %3090 = vmatprep.subr.bf16.mxu0 %v3089_v5  ;;  %v2981_v5 = vpack.c.bf16 %v126_v0, %v123_v63  ;;  %v314_v8 = vld [vmem:[%s6822_s1 + $0x8d0] sm:$0xff]  ;;  %v3109_v9 = vpack.c.bf16 %v318_v2, %v315_v1  ;;  %v129_v13 = vld [vmem:[%s6822_s1 + $0x308] sm:$0xff]  ;;  %v324_v17 = vld [vmem:[%s6822_s1 + $0x920] sm:$0xff] }
  0x2d   :  { %v321_v16 = vld [vmem:[%s6822_s1 + $0x908] sm:$0xff]  ;;  %v128_v21 = vld [vmem:[%s6822_s1 + $0x300] sm:$0xff]  ;;  %v327_v31 = vld [vmem:[%s6822_s1 + $0x938] sm:$0xff] }
  0x2e   :  { %2964 = vmatpush1.bf16.msra.mxu1 %v2963_v12  ;;  %v918_v12 = vcombine.high %v4231_v22, %v4231_v22  ;;  %v131_v22 = vld [vmem:[%s6822_s1 + $0x318] sm:$0xff]  ;;  %v320_v23 = vld [vmem:[%s6822_s1 + $0x900] sm:$0xff]  ;;  %v3113_v24 = vpack.c.bf16 %v324_v17, %v321_v16  ;;  %v330_v32 = vld [vmem:[%s6822_s1 + $0x950] sm:$0xff] }
  0x2f   :  { %3092 = vmatpush1.bf16.msra.mxu0 %v3091_v14  ;;  %2966 = vmatprep.subr.bf16.mxu1 %v2965_v15  ;;  %v132_v14 = vld [vmem:[%s6822_s1 + $0x320] sm:$0xff]  ;;  %v935_v15 = vcombine.high %v4246_v26, %v4246_v26  ;;  %v323_v26 = vld [vmem:[%s6822_s1 + $0x918] sm:$0xff]  ;;  %v134_v38 = vld [vmem:[%s6822_s1 + $0x330] sm:$0xff] }
  0x30   :  { %3094 = vmatprep.subr.bf16.mxu0 %v3093_v19  ;;  %v3111_v19 = vpack.c.bf16 %v317_v10, %v314_v8  ;;  %v2985_v20 = vpack.c.bf16 %v132_v14, %v129_v13  ;;  %v3115_v36 = vpack.c.bf16 %v323_v26, %v320_v23  ;;  %v137_v40 = vld [vmem:[%s6822_s1 + $0x348] sm:$0xff]  ;;  %v326_v41 = vld [vmem:[%s6822_s1 + $0x930] sm:$0xff]  ;;  %v144_v45 = vld [vmem:[%s6822_s1 + $0x380] sm:$0xff] }
  0x31   :  { %v4390_v33 = vrot.slane %v935_v15, %v4208_v11  ;;  %v333_v47 = vld [vmem:[%s6822_s1 + $0x968] sm:$0xff]  ;;  %v2991_v50 = vpack.c.bf16 %v137_v40, %v134_v38  ;;  %v140_v53 = vld [vmem:[%s6822_s1 + $0x360] sm:$0xff]  ;;  %v335_v57 = vld [vmem:[%s6822_s1 + $0x978] sm:$0xff] }
  0x32   :  { %2968 = vmatpush1.bf16.msra.mxu1 %v2967_v27  ;;  %v135_v27 = vld [vmem:[%s6822_s1 + $0x338] sm:$0xff]  ;;  %v150_v59 = vld [vmem:[%s6822_s1 + $0x3b0] sm:$0xff]  ;;  %v341_v6 = vld [vmem:[%s6822_s1 + $0x9a8] sm:$0xff] }
  0x33   :  { %3096 = vmatpush1.bf16.msra.mxu0 %v3095_v29  ;;  %2970 = vmatprep.subr.bf16.mxu1 %v2969_v30  ;;  %v138_v29 = vld [vmem:[%s6822_s1 + $0x350] sm:$0xff]  ;;  %v4381_v30 = vrot.slane %v918_v12, %v4208_v11  ;;  %v4423_v49 = vcombine.high %v4390_v33, %v4390_v33  ;;  %v147_v58 = vld [vmem:[%s6822_s1 + $0x398] sm:$0xff]  ;;  %v153_v7 = vld [vmem:[%s6822_s1 + $0x3c8] sm:$0xff] }
  0x34   :  { %3098 = vmatprep.subr.bf16.mxu0 %v3097_v35  ;;  %v2987_v35 = vpack.c.bf16 %v131_v22, %v128_v21  ;;  %v2989_v37 = vpack.c.bf16 %v138_v29, %v135_v27  ;;  %v342_v62 = vld [vmem:[%s6822_s1 + $0x9b0] sm:$0xff]  ;;  %v2997_v1 = vpack.c.bf16 %v150_v59, %v147_v58  ;;  %v156_v8 = vld [vmem:[%s6822_s1 + $0x3e0] sm:$0xff]  ;;  %v155_v16 = vld [vmem:[%s6822_s1 + $0x3d8] sm:$0xff] }
  0x35   :  { %v4412_v46 = vcombine.high %v4381_v30, %v4381_v30  ;;  %v146_v2 = vld [vmem:[%s6822_s1 + $0x390] sm:$0xff]  ;;  %v348_v10 = vld [vmem:[%s6822_s1 + $0x9e0] sm:$0xff]  ;;  %v3001_v14 = vpack.c.bf16 %v156_v8, %v153_v7  ;;  %v351_v22 = vld [vmem:[%s6822_s1 + $0x9f8] sm:$0xff] }
  0x36   :  { %2972 = vmatpush1.bf16.msra.mxu1 %v2971_v42  ;;  %v3117_v42 = vpack.c.bf16 %v330_v32, %v327_v31  ;;  %v152_v15 = vld [vmem:[%s6822_s1 + $0x3c0] sm:$0xff]  ;;  %v162_v21 = vld [vmem:[%s6822_s1 + $0x410] sm:$0xff]  ;;  %v161_v31 = vld [vmem:[%s6822_s1 + $0x408] sm:$0xff] }
  0x37   :  { %3100 = vmatpush1.bf16.msra.mxu0 %v3099_v43  ;;  %2974 = vmatprep.subr.bf16.mxu1 %v2973_v44  ;;  %v329_v43 = vld [vmem:[%s6822_s1 + $0x948] sm:$0xff]  ;;  %v344_v17 = vld [vmem:[%s6822_s1 + $0x9c0] sm:$0xff]  ;;  %v354_v23 = vld [vmem:[%s6822_s1 + $0xa10] sm:$0xff] }
  0x38   :  { %3102 = vmatprep.subr.bf16.mxu0 %v3101_v48  ;;  %v141_v44 = vld [vmem:[%s6822_s1 + $0x368] sm:$0xff]  ;;  %v336_v48 = vld [vmem:[%s6822_s1 + $0x980] sm:$0xff]  ;;  %v3119_v51 = vpack.c.bf16 %v329_v43, %v326_v41  ;;  %v158_v29 = vld [vmem:[%s6822_s1 + $0x3f0] sm:$0xff] }
  0x39   :  { %v2993_v52 = vpack.c.bf16 %v144_v45, %v141_v44  ;;  %v350_v32 = vld [vmem:[%s6822_s1 + $0x9f0] sm:$0xff]  ;;  %v168_v38 = vld [vmem:[%s6822_s1 + $0x440] sm:$0xff]  ;;  %v357_v40 = vld [vmem:[%s6822_s1 + $0xa28] sm:$0xff] }
  0x3a   :  { %2976 = vmatpush1.bf16.msra.mxu1 %v2975_v54  ;;  %v143_v54 = vld [vmem:[%s6822_s1 + $0x378] sm:$0xff]  ;;  %v360_v41 = vld [vmem:[%s6822_s1 + $0xa40] sm:$0xff]  ;;  %v170_v59 = vld [vmem:[%s6822_s1 + $0x450] sm:$0xff] }
  0x3b   :  { %3104 = vmatpush1.bf16.msra.mxu0 %v3103_v55  ;;  %2978 = vmatprep.subr.bf16.mxu1 %v2977_v56  ;;  %v332_v55 = vld [vmem:[%s6822_s1 + $0x960] sm:$0xff]  ;;  %v3121_v56 = vpack.c.bf16 %v336_v48, %v333_v47  ;;  %v2995_v63 = vpack.c.bf16 %v143_v54, %v140_v53  ;;  %v167_v47 = vld [vmem:[%s6822_s1 + $0x438] sm:$0xff]  ;;  %v174_v53 = vld [vmem:[%s6822_s1 + $0x470] sm:$0xff] }
  0x3c   :  { %3106 = vmatprep.subr.bf16.mxu0 %v3105_v60  ;;  %v339_v60 = vld [vmem:[%s6822_s1 + $0x998] sm:$0xff]  ;;  %v3123_v0 = vpack.c.bf16 %v335_v57, %v332_v55  ;;  %v164_v45 = vld [vmem:[%s6822_s1 + $0x420] sm:$0xff]  ;;  %v366_v55 = vld [vmem:[%s6822_s1 + $0xa70] sm:$0xff] }
  0x3d   :  { %v356_v48 = vld [vmem:[%s6822_s1 + $0xa20] sm:$0xff]  ;;  %v363_v54 = vld [vmem:[%s6822_s1 + $0xa58] sm:$0xff] }
  0x3e   :  { %2980 = vmatpush1.bf16.msra.mxu1 %v2979_v3  ;;  %v149_v3 = vld [vmem:[%s6822_s1 + $0x3a8] sm:$0xff]  ;;  %v176_v8 = vld [vmem:[%s6822_s1 + $0x480] sm:$0xff] }
  0x3f   :  { %3108 = vmatpush1.bf16.msra.mxu0 %v3107_v4  ;;  %2982 = vmatprep.subr.bf16.mxu1 %v2981_v5  ;;  %v338_v4 = vld [vmem:[%s6822_s1 + $0x990] sm:$0xff]  ;;  %v3125_v5 = vpack.c.bf16 %v342_v62, %v339_v60  ;;  %v2999_v12 = vpack.c.bf16 %v149_v3, %v146_v2  ;;  %v173_v60 = vld [vmem:[%s6822_s1 + $0x468] sm:$0xff]  ;;  %v180_v2 = vld [vmem:[%s6822_s1 + $0x4a0] sm:$0xff] }
  0x40   :  { %3110 = vmatprep.subr.bf16.mxu0 %v3109_v9  ;;  %v345_v9 = vld [vmem:[%s6822_s1 + $0x9c8] sm:$0xff]  ;;  %v3127_v13 = vpack.c.bf16 %v341_v6, %v338_v4  ;;  %v362_v62 = vld [vmem:[%s6822_s1 + $0xa50] sm:$0xff]  ;;  %v372_v4 = vld [vmem:[%s6822_s1 + $0xaa0] sm:$0xff] }
  0x41   :  { %v369_v3 = vld [vmem:[%s6822_s1 + $0xa88] sm:$0xff] }
  0x42   :  { %2984 = vmatpush1.bf16.msra.mxu1 %v2983_v18  ;;  %v3129_v18 = vpack.c.bf16 %v348_v10, %v345_v9  ;;  %v179_v9 = vld [vmem:[%s6822_s1 + $0x498] sm:$0xff]  ;;  %v368_v10 = vld [vmem:[%s6822_s1 + $0xa80] sm:$0xff] }
  0x43   :  { %3112 = vmatpush1.bf16.msra.mxu0 %v3111_v19  ;;  %2986 = vmatprep.subr.bf16.mxu1 %v2985_v20  ;;  %v347_v19 = vld [vmem:[%s6822_s1 + $0x9d8] sm:$0xff] }
  0x44   :  { %3114 = vmatprep.subr.bf16.mxu0 %v3113_v24  ;;  %v159_v20 = vld [vmem:[%s6822_s1 + $0x3f8] sm:$0xff]  ;;  %v3003_v24 = vpack.c.bf16 %v155_v16, %v152_v15  ;;  %v3131_v26 = vpack.c.bf16 %v347_v19, %v344_v17  ;;  %v186_v15 = vld [vmem:[%s6822_s1 + $0x4d0] sm:$0xff] }
  0x45   :  { %1077 = vmatmul.mubr.f32.vlgmr.msra.gmra.mrb[0].mxu1 %v4241_v25  ;;  %v3005_v27 = vpack.c.bf16 %v162_v21, %v159_v20  ;;  %v375_v16 = vld [vmem:[%s6822_s1 + $0xab8] sm:$0xff]  ;;  %v378_v17 = vld [vmem:[%s6822_s1 + $0xad0] sm:$0xff] }
  0x46   :  { %2988 = vmatpush1.bf16.msra.mxu1 %v2987_v35  ;;  %1219 = vmatmul.mubr.f32.vlgmr.msra.gmra.mrb[0].mxu0 %v4250_v28  ;;  %v3133_v35 = vpack.c.bf16 %v354_v23, %v351_v22  ;;  %v182_v21 = vld [vmem:[%s6822_s1 + $0x4b0] sm:$0xff]  ;;  %v185_v22 = vld [vmem:[%s6822_s1 + $0x4c8] sm:$0xff] }
  0x47   :  { %3116 = vmatpush1.bf16.msra.mxu0 %v3115_v36  ;;  %2990 = vmatprep.subr.bf16.mxu1 %v2989_v37  ;;  %v353_v36 = vld [vmem:[%s6822_s1 + $0xa08] sm:$0xff]  ;;  %v374_v23 = vld [vmem:[%s6822_s1 + $0xab0] sm:$0xff] }
  0x48   :  { %3118 = vmatprep.subr.bf16.mxu0 %v3117_v42  ;;  %1147 = vmatprep.mubr.f32.mxu1 %v4412_v46  ;;  %v165_v37 = vld [vmem:[%s6822_s1 + $0x428] sm:$0xff]  ;;  %v3007_v42 = vpack.c.bf16 %v161_v31, %v158_v29  ;;  %v3135_v43 = vpack.c.bf16 %v353_v36, %v350_v32  ;;  %v192_v29 = vld [vmem:[%s6822_s1 + $0x500] sm:$0xff] }
  0x49   :  { %1289 = vmatprep.mubr.f32.mxu0 %v4423_v49  ;;  %v3009_v44 = vpack.c.bf16 %v168_v38, %v165_v37  ;;  %v381_v31 = vld [vmem:[%s6822_s1 + $0xae8] sm:$0xff]  ;;  %v384_v32 = vld [vmem:[%s6822_s1 + $0xb00] sm:$0xff] }
  0x4a   :  { %2992 = vmatpush1.bf16.msra.mxu1 %v2991_v50  ;;  %v3137_v50 = vpack.c.bf16 %v360_v41, %v357_v40  ;;  %v188_v38 = vld [vmem:[%s6822_s1 + $0x4e0] sm:$0xff]  ;;  %v191_v40 = vld [vmem:[%s6822_s1 + $0x4f8] sm:$0xff] }
  0x4b   :  { %3120 = vmatpush1.bf16.msra.mxu0 %v3119_v51  ;;  %2994 = vmatprep.subr.bf16.mxu1 %v2993_v52  ;;  %v359_v51 = vld [vmem:[%s6822_s1 + $0xa38] sm:$0xff]  ;;  %v380_v41 = vld [vmem:[%s6822_s1 + $0xae0] sm:$0xff] }
  0x4c   :  { %3122 = vmatprep.subr.bf16.mxu0 %v3121_v56  ;;  %v171_v52 = vld [vmem:[%s6822_s1 + $0x458] sm:$0xff]  ;;  %v3011_v56 = vpack.c.bf16 %v167_v47, %v164_v45  ;;  %v3139_v57 = vpack.c.bf16 %v359_v51, %v356_v48  ;;  %v198_v45 = vld [vmem:[%s6822_s1 + $0x530] sm:$0xff] }
  0x4d   :  { %v3013_v58 = vpack.c.bf16 %v174_v53, %v171_v52  ;;  %v387_v47 = vld [vmem:[%s6822_s1 + $0xb18] sm:$0xff]  ;;  %v390_v48 = vld [vmem:[%s6822_s1 + $0xb30] sm:$0xff] }
  0x4e   :  { %2996 = vmatpush1.bf16.msra.mxu1 %v2995_v63  ;;  %v3141_v63 = vpack.c.bf16 %v366_v55, %v363_v54  ;;  %v194_v53 = vld [vmem:[%s6822_s1 + $0x510] sm:$0xff]  ;;  %v197_v54 = vld [vmem:[%s6822_s1 + $0x528] sm:$0xff] }
  0x4f   :  { %3124 = vmatpush1.bf16.msra.mxu0 %v3123_v0  ;;  %2998 = vmatprep.subr.bf16.mxu1 %v2997_v1  ;;  %v365_v0 = vld [vmem:[%s6822_s1 + $0xa68] sm:$0xff]  ;;  %v386_v55 = vld [vmem:[%s6822_s1 + $0xb10] sm:$0xff] }
  0x50   :  { %3126 = vmatprep.subr.bf16.mxu0 %v3125_v5  ;;  %v177_v1 = vld [vmem:[%s6822_s1 + $0x488] sm:$0xff]  ;;  %v3015_v5 = vpack.c.bf16 %v173_v60, %v170_v59  ;;  %v3143_v6 = vpack.c.bf16 %v365_v0, %v362_v62  ;;  %v204_v59 = vld [vmem:[%s6822_s1 + $0x560] sm:$0xff] }
  0x51   :  { %v3017_v7 = vpack.c.bf16 %v180_v2, %v177_v1  ;;  %v393_v60 = vld [vmem:[%s6822_s1 + $0xb48] sm:$0xff]  ;;  %v396_v62 = vld [vmem:[%s6822_s1 + $0xb60] sm:$0xff] }
  0x52   :  { %3000 = vmatpush1.bf16.msra.mxu1 %v2999_v12  ;;  %v3145_v12 = vpack.c.bf16 %v372_v4, %v369_v3  ;;  %v200_v2 = vld [vmem:[%s6822_s1 + $0x540] sm:$0xff]  ;;  %v203_v3 = vld [vmem:[%s6822_s1 + $0x558] sm:$0xff] }
  0x53   :  { %3128 = vmatpush1.bf16.msra.mxu0 %v3127_v13  ;;  %3002 = vmatprep.subr.bf16.mxu1 %v3001_v14  ;;  %v371_v13 = vld [vmem:[%s6822_s1 + $0xa98] sm:$0xff]  ;;  %v392_v4 = vld [vmem:[%s6822_s1 + $0xb40] sm:$0xff] }
  0x54   :  { %3130 = vmatprep.subr.bf16.mxu0 %v3129_v18  ;;  %v183_v14 = vld [vmem:[%s6822_s1 + $0x4b8] sm:$0xff]  ;;  %v3019_v18 = vpack.c.bf16 %v179_v9, %v176_v8  ;;  %v3147_v19 = vpack.c.bf16 %v371_v13, %v368_v10  ;;  %v210_v8 = vld [vmem:[%s6822_s1 + $0x590] sm:$0xff] }
  0x55   :  { %v3021_v20 = vpack.c.bf16 %v186_v15, %v183_v14  ;;  %v399_v9 = vld [vmem:[%s6822_s1 + $0xb78] sm:$0xff]  ;;  %v402_v10 = vld [vmem:[%s6822_s1 + $0xb90] sm:$0xff] }
  0x56   :  { %3004 = vmatpush1.bf16.msra.mxu1 %v3003_v24  ;;  %v3149_v24 = vpack.c.bf16 %v378_v17, %v375_v16  ;;  %v206_v15 = vld [vmem:[%s6822_s1 + $0x570] sm:$0xff]  ;;  %v209_v16 = vld [vmem:[%s6822_s1 + $0x588] sm:$0xff] }
  0x57   :  { %3132 = vmatpush1.bf16.msra.mxu0 %v3131_v26  ;;  %3006 = vmatprep.subr.bf16.mxu1 %v3005_v27  ;;  %v377_v26 = vld [vmem:[%s6822_s1 + $0xac8] sm:$0xff]  ;;  %v398_v17 = vld [vmem:[%s6822_s1 + $0xb70] sm:$0xff] }
  0x58   :  { %3134 = vmatprep.subr.bf16.mxu0 %v3133_v35  ;;  %v189_v27 = vld [vmem:[%s6822_s1 + $0x4e8] sm:$0xff]  ;;  %v3023_v35 = vpack.c.bf16 %v185_v22, %v182_v21  ;;  %v3151_v36 = vpack.c.bf16 %v377_v26, %v374_v23  ;;  %v216_v21 = vld [vmem:[%s6822_s1 + $0x5c0] sm:$0xff] }
  0x59   :  { %v3025_v37 = vpack.c.bf16 %v192_v29, %v189_v27  ;;  %v405_v22 = vld [vmem:[%s6822_s1 + $0xba8] sm:$0xff]  ;;  %v408_v23 = vld [vmem:[%s6822_s1 + $0xbc0] sm:$0xff] }
  0x5a   :  { %3008 = vmatpush1.bf16.msra.mxu1 %v3007_v42  ;;  %v3153_v42 = vpack.c.bf16 %v384_v32, %v381_v31  ;;  %v212_v29 = vld [vmem:[%s6822_s1 + $0x5a0] sm:$0xff]  ;;  %v215_v31 = vld [vmem:[%s6822_s1 + $0x5b8] sm:$0xff] }
  0x5b   :  { %3136 = vmatpush1.bf16.msra.mxu0 %v3135_v43  ;;  %3010 = vmatprep.subr.bf16.mxu1 %v3009_v44  ;;  %v383_v43 = vld [vmem:[%s6822_s1 + $0xaf8] sm:$0xff]  ;;  %v404_v32 = vld [vmem:[%s6822_s1 + $0xba0] sm:$0xff] }
  0x5c   :  { %3138 = vmatprep.subr.bf16.mxu0 %v3137_v50  ;;  %v195_v44 = vld [vmem:[%s6822_s1 + $0x518] sm:$0xff]  ;;  %v3027_v50 = vpack.c.bf16 %v191_v40, %v188_v38  ;;  %v3155_v51 = vpack.c.bf16 %v383_v43, %v380_v41  ;;  %v222_v38 = vld [vmem:[%s6822_s1 + $0x5f0] sm:$0xff] }
  0x5d   :  { %v3029_v52 = vpack.c.bf16 %v198_v45, %v195_v44  ;;  %v411_v40 = vld [vmem:[%s6822_s1 + $0xbd8] sm:$0xff]  ;;  %v414_v41 = vld [vmem:[%s6822_s1 + $0xbf0] sm:$0xff] }
  0x5e   :  { %3012 = vmatpush1.bf16.msra.mxu1 %v3011_v56  ;;  %v3157_v56 = vpack.c.bf16 %v390_v48, %v387_v47  ;;  %v218_v45 = vld [vmem:[%s6822_s1 + $0x5d0] sm:$0xff]  ;;  %v221_v47 = vld [vmem:[%s6822_s1 + $0x5e8] sm:$0xff] }
  0x5f   :  { %3140 = vmatpush1.bf16.msra.mxu0 %v3139_v57  ;;  %3014 = vmatprep.subr.bf16.mxu1 %v3013_v58  ;;  %v389_v57 = vld [vmem:[%s6822_s1 + $0xb28] sm:$0xff]  ;;  %v410_v48 = vld [vmem:[%s6822_s1 + $0xbd0] sm:$0xff] }
  0x60   :  { %3142 = vmatprep.subr.bf16.mxu0 %v3141_v63  ;;  %v201_v58 = vld [vmem:[%s6822_s1 + $0x548] sm:$0xff]  ;;  %v3031_v63 = vpack.c.bf16 %v197_v54, %v194_v53  ;;  %v3159_v0 = vpack.c.bf16 %v389_v57, %v386_v55  ;;  %v420_v55 = vld [vmem:[%s6822_s1 + $0xc20] sm:$0xff] }
  0x61   :  { %v3033_v1 = vpack.c.bf16 %v204_v59, %v201_v58  ;;  %v85_v53 = vld [vmem:[%s6822_s1 + $0x1a8] sm:$0xff]  ;;  %v416_v59 = vld [vmem:[%s6822_s1 + $0xc00] sm:$0xff] }
  0x62   :  { %3016 = vmatpush1.bf16.msra.mxu1 %v3015_v5  ;;  %v3161_v5 = vpack.c.bf16 %v396_v62, %v393_v60  ;;  %v417_v54 = vld [vmem:[%s6822_s1 + $0xc08] sm:$0xff]  ;;  %v34_v60 = vld [vmem:[%s6822_s1 + $0x10] sm:$0xff] }
  0x63   :  { %3144 = vmatpush1.bf16.msra.mxu0 %v3143_v6  ;;  %3018 = vmatprep.subr.bf16.mxu1 %v3017_v7  ;;  %v395_v6 = vld [vmem:[%s6822_s1 + $0xb58] sm:$0xff]  ;;  %v37_v62 = vld [vmem:[%s6822_s1 + $0x28] sm:$0xff] }
  0x64   :  { %3146 = vmatprep.subr.bf16.mxu0 %v3145_v12  ;;  %v207_v7 = vld [vmem:[%s6822_s1 + $0x578] sm:$0xff]  ;;  %v3035_v12 = vpack.c.bf16 %v203_v3, %v200_v2  ;;  %v3163_v13 = vpack.c.bf16 %v395_v6, %v392_v4  ;;  %v426_v4 = vld [vmem:[%s6822_s1 + $0xc50] sm:$0xff] }
  0x65   :  { %v3037_v14 = vpack.c.bf16 %v210_v8, %v207_v7  ;;  %v91_v2 = vld [vmem:[%s6822_s1 + $0x1d8] sm:$0xff]  ;;  %v4791_v6 = vld [vmem:[%s6821_s0 + $0x10] sm:$0xff] }
  0x66   :  { %3020 = vmatpush1.bf16.msra.mxu1 %v3019_v18  ;;  %v3165_v18 = vpack.c.bf16 %v402_v10, %v399_v9  ;;  %v423_v3 = vld [vmem:[%s6822_s1 + $0xc38] sm:$0xff]  ;;  %v422_v9 = vld [vmem:[%s6822_s1 + $0xc30] sm:$0xff]  ;;  %v40_v10 = vld [vmem:[%s6822_s1 + $0x40] sm:$0xff] }
  0x67   :  { %3148 = vmatpush1.bf16.msra.mxu0 %v3147_v19  ;;  %3022 = vmatprep.subr.bf16.mxu1 %v3021_v20  ;;  %v401_v19 = vld [vmem:[%s6822_s1 + $0xb88] sm:$0xff] }
  0x68   :  { %3150 = vmatprep.subr.bf16.mxu0 %v3149_v24  ;;  %v213_v20 = vld [vmem:[%s6822_s1 + $0x5a8] sm:$0xff]  ;;  %v3039_v24 = vpack.c.bf16 %v209_v16, %v206_v15  ;;  %v3167_v26 = vpack.c.bf16 %v401_v19, %v398_v17  ;;  %v94_v16 = vld [vmem:[%s6822_s1 + $0x1f0] sm:$0xff]  ;;  %v432_v19 = vld [vmem:[%s6822_s1 + $0xc80] sm:$0xff] }
  0x69   :  { %v3041_v27 = vpack.c.bf16 %v216_v21, %v213_v20  ;;  %v425_v15 = vld [vmem:[%s6822_s1 + $0xc48] sm:$0xff] }
  0x6a   :  { %3024 = vmatpush1.bf16.msra.mxu1 %v3023_v35  ;;  %v3169_v35 = vpack.c.bf16 %v408_v23, %v405_v22  ;;  %v97_v17 = vld [vmem:[%s6822_s1 + $0x208] sm:$0xff]  ;;  %v3183_v22 = vpack.c.bf16 %v425_v15, %v422_v9  ;;  %v456_v15 = vld [vmem:[%s6822_s1 + $0xd40] sm:$0xff] }
  0x6b   :  { %3152 = vmatpush1.bf16.msra.mxu0 %v3151_v36  ;;  %3026 = vmatprep.subr.bf16.mxu1 %v3025_v37  ;;  %v407_v36 = vld [vmem:[%s6822_s1 + $0xbb8] sm:$0xff]  ;;  %v3505_v23 = vpack.c.bf16 %v97_v17, %v94_v16  ;;  %v449_v9 = vld [vmem:[%s6822_s1 + $0xd08] sm:$0xff] }
  0x6c   :  { %3154 = vmatprep.subr.bf16.mxu0 %v3153_v42  ;;  %v219_v37 = vld [vmem:[%s6822_s1 + $0x5d8] sm:$0xff]  ;;  %v3043_v42 = vpack.c.bf16 %v215_v31, %v212_v29  ;;  %v3171_v43 = vpack.c.bf16 %v407_v36, %v404_v32  ;;  %v100_v32 = vld [vmem:[%s6822_s1 + $0x220] sm:$0xff] }
  0x6d   :  { %v3045_v44 = vpack.c.bf16 %v222_v38, %v219_v37  ;;  %v431_v31 = vld [vmem:[%s6822_s1 + $0xc78] sm:$0xff]  ;;  %v438_v37 = vld [vmem:[%s6822_s1 + $0xcb0] sm:$0xff] }
  0x6e   :  { %3028 = vmatpush1.bf16.msra.mxu1 %v3027_v50  ;;  %v3173_v50 = vpack.c.bf16 %v414_v41, %v411_v40  ;;  %v435_v36 = vld [vmem:[%s6822_s1 + $0xc98] sm:$0xff] }
  0x6f   :  { %3156 = vmatpush1.bf16.msra.mxu0 %v3155_v51  ;;  %3030 = vmatprep.subr.bf16.mxu1 %v3029_v52  ;;  %v413_v51 = vld [vmem:[%s6822_s1 + $0xbe8] sm:$0xff]  ;;  %v82_v52 = vld [vmem:[%s6822_s1 + $0x190] sm:$0xff] }
  0x70   :  { %3158 = vmatprep.subr.bf16.mxu0 %v3157_v56  ;;  %v3047_v56 = vpack.c.bf16 %v221_v47, %v218_v45  ;;  %v3175_v57 = vpack.c.bf16 %v413_v51, %v410_v48  ;;  %v3497_v58 = vpack.c.bf16 %v85_v53, %v82_v52  ;;  %v437_v45 = vld [vmem:[%s6822_s1 + $0xca8] sm:$0xff]  ;;  %v106_v47 = vld [vmem:[%s6822_s1 + $0x250] sm:$0xff]  ;;  %v444_v51 = vld [vmem:[%s6822_s1 + $0xce0] sm:$0xff] }
  0x71   :  { %v109_v48 = vld [vmem:[%s6822_s1 + $0x268] sm:$0xff] }
  0x72   :  { %3032 = vmatpush1.bf16.msra.mxu1 %v3031_v63  ;;  %v3177_v63 = vpack.c.bf16 %v420_v55, %v417_v54  ;;  %v3513_v54 = vpack.c.bf16 %v109_v48, %v106_v47  ;;  %v440_v55 = vld [vmem:[%s6822_s1 + $0xcc0] sm:$0xff] }
  0x73   :  { %3160 = vmatpush1.bf16.msra.mxu0 %v3159_v0  ;;  %3034 = vmatprep.subr.bf16.mxu1 %v3033_v1  ;;  %v419_v0 = vld [vmem:[%s6822_s1 + $0xc18] sm:$0xff]  ;;  %v88_v1 = vld [vmem:[%s6822_s1 + $0x1c0] sm:$0xff] }
  0x74   :  { %3162 = vmatprep.subr.bf16.mxu0 %v3161_v5  ;;  %v3499_v5 = vpack.c.bf16 %v37_v62, %v34_v60  ;;  %v3179_v7 = vpack.c.bf16 %v419_v0, %v416_v59  ;;  %v3501_v8 = vpack.c.bf16 %v91_v2, %v88_v1  ;;  %v443_v59 = vld [vmem:[%s6822_s1 + $0xcd8] sm:$0xff]  ;;  %v112_v60 = vld [vmem:[%s6822_s1 + $0x280] sm:$0xff]  ;;  %v450_v0 = vld [vmem:[%s6822_s1 + $0xd10] sm:$0xff] }
  0x75   :  { %v115_v62 = vld [vmem:[%s6822_s1 + $0x298] sm:$0xff]  ;;  %v3195_v2 = vpack.c.bf16 %v443_v59, %v440_v55  ;;  %v474_v59 = vld [vmem:[%s6822_s1 + $0xdd0] sm:$0xff] }
  0x76   :  { %3036 = vmatpush1.bf16.msra.mxu1 %v3035_v12  ;;  %v43_v12 = vld [vmem:[%s6822_s1 + $0x58] sm:$0xff] }
  0x77   :  { %3164 = vmatpush1.bf16.msra.mxu0 %v3163_v13  ;;  %3038 = vmatprep.subr.bf16.mxu1 %v3037_v14  ;;  %v4804_v13 = vrot.slane %v4791_v6, %v4208_v11  ;;  %v3181_v14 = vpack.c.bf16 %v426_v4, %v423_v3  ;;  %v3503_v21 = vpack.c.bf16 %v43_v12, %v40_v10  ;;  %v446_v4 = vld [vmem:[%s6822_s1 + $0xcf0] sm:$0xff]  ;;  %v121_v12 = vld [vmem:[%s6822_s1 + $0x2c8] sm:$0xff]  ;;  %v467_v55 = vld [vmem:[%s6822_s1 + $0xd98] sm:$0xff] }
  0x78   :  { %3166 = vmatprep.subr.bf16.mxu0 %v3165_v18  ;;  %v429_v18 = vld [vmem:[%s6822_s1 + $0xc68] sm:$0xff]  ;;  %v3517_v3 = vpack.c.bf16 %v115_v62, %v112_v60  ;;  %v118_v10 = vld [vmem:[%s6822_s1 + $0x2b0] sm:$0xff]  ;;  %v3199_v17 = vpack.c.bf16 %v449_v9, %v446_v4  ;;  %v480_v9 = vld [vmem:[%s6822_s1 + $0xe00] sm:$0xff] }
  0x79   :  { %v4824_v20 = vcombine.high %v4804_v13, %v4804_v13  ;;  %v3185_v29 = vpack.c.bf16 %v432_v19, %v429_v18  ;;  %v3521_v18 = vpack.c.bf16 %v121_v12, %v118_v10  ;;  %v452_v19 = vld [vmem:[%s6822_s1 + $0xd20] sm:$0xff]  ;;  %v473_v4 = vld [vmem:[%s6822_s1 + $0xdc8] sm:$0xff] }
  0x7a   :  { %3040 = vmatpush1.bf16.msra.mxu1 %v3039_v24  ;;  %v428_v24 = vld [vmem:[%s6822_s1 + $0xc60] sm:$0xff] }
  0x7b   :  { %3168 = vmatpush1.bf16.msra.mxu0 %v3167_v26  ;;  %3042 = vmatprep.subr.bf16.mxu1 %v3041_v27  ;;  %v46_v26 = vld [vmem:[%s6822_s1 + $0x70] sm:$0xff]  ;;  %v49_v27 = vld [vmem:[%s6822_s1 + $0x88] sm:$0xff]  ;;  %v3187_v40 = vpack.c.bf16 %v431_v31, %v428_v24  ;;  %v455_v24 = vld [vmem:[%s6822_s1 + $0xd38] sm:$0xff] }
  0x7c   :  { %3170 = vmatprep.subr.bf16.mxu0 %v3169_v35  ;;  %v103_v35 = vld [vmem:[%s6822_s1 + $0x238] sm:$0xff]  ;;  %v3507_v38 = vpack.c.bf16 %v49_v27, %v46_v26  ;;  %v124_v26 = vld [vmem:[%s6822_s1 + $0x2e0] sm:$0xff]  ;;  %v462_v31 = vld [vmem:[%s6822_s1 + $0xd70] sm:$0xff] }
  0x7d   :  { %v3509_v41 = vpack.c.bf16 %v103_v35, %v100_v32  ;;  %v127_v27 = vld [vmem:[%s6822_s1 + $0x2f8] sm:$0xff]  ;;  %v3203_v35 = vpack.c.bf16 %v455_v24, %v452_v19 }
  0x7e   :  { %3044 = vmatpush1.bf16.msra.mxu1 %v3043_v42  ;;  %v52_v42 = vld [vmem:[%s6822_s1 + $0xa0] sm:$0xff]  ;;  %v199_v19 = vld [vmem:[%s6822_s1 + $0x538] sm:$0xff] }
  0x7f   :  { %3172 = vmatpush1.bf16.msra.mxu0 %v3171_v43  ;;  %3046 = vmatprep.subr.bf16.mxu1 %v3045_v44  ;;  %v55_v43 = vld [vmem:[%s6822_s1 + $0xb8] sm:$0xff]  ;;  %v3189_v44 = vpack.c.bf16 %v438_v37, %v435_v36  ;;  %v3525_v36 = vpack.c.bf16 %v127_v27, %v124_v26  ;;  %v458_v37 = vld [vmem:[%s6822_s1 + $0xd50] sm:$0xff] }
  0x80   :  { %3174 = vmatprep.subr.bf16.mxu0 %v3173_v50  ;;  %v441_v50 = vld [vmem:[%s6822_s1 + $0xcc8] sm:$0xff]  ;;  %v3511_v52 = vpack.c.bf16 %v55_v43, %v52_v42  ;;  %v178_v42 = vld [vmem:[%s6822_s1 + $0x490] sm:$0xff] }
  0x81   :  { %v181_v43 = vld [vmem:[%s6822_s1 + $0x4a8] sm:$0xff]  ;;  %v482_v27 = vld [vmem:[%s6822_s1 + $0xe10] sm:$0xff] }
  0x82   :  { %3048 = vmatpush1.bf16.msra.mxu1 %v3047_v56  ;;  %v58_v56 = vld [vmem:[%s6822_s1 + $0xd0] sm:$0xff] }
  0x83   :  { %3176 = vmatpush1.bf16.msra.mxu0 %v3175_v57  ;;  %3498 = vmatprep.subr.bf16.mxu1 %v3497_v58  ;;  %v61_v57 = vld [vmem:[%s6822_s1 + $0xe8] sm:$0xff]  ;;  %v3193_v58 = vpack.c.bf16 %v444_v51, %v441_v50  ;;  %v3529_v50 = vpack.c.bf16 %v181_v43, %v178_v42  ;;  %v464_v51 = vld [vmem:[%s6822_s1 + $0xd80] sm:$0xff] }
  0x84   :  { %3178 = vmatprep.subr.bf16.mxu0 %v3177_v63  ;;  %v447_v63 = vld [vmem:[%s6822_s1 + $0xcf8] sm:$0xff]  ;;  %v3515_v1 = vpack.c.bf16 %v61_v57, %v58_v56  ;;  %v184_v56 = vld [vmem:[%s6822_s1 + $0x4c0] sm:$0xff]  ;;  %v3211_v62 = vpack.c.bf16 %v467_v55, %v464_v51 }
  0x85   :  { %1148 = vmatmul.mubr.f32.vlgmr.msra.gmra.mrb[0].mxu1 %v4381_v30  ;;  %v187_v57 = vld [vmem:[%s6822_s1 + $0x4d8] sm:$0xff]  ;;  %v488_v43 = vld [vmem:[%s6822_s1 + $0xe40] sm:$0xff] }
  0x86   :  { %1290 = vmatmul.mubr.f32.vlgmr.msra.gmra.mrb[0].mxu0 %v4390_v33  ;;  %3500 = vmatpush3.bf16.msra.mxu1 %v3499_v5  ;;  %v64_v5 = vld [vmem:[%s6822_s1 + $0x100] sm:$0xff]  ;;  %v211_v51 = vld [vmem:[%s6822_s1 + $0x598] sm:$0xff] }
  0x87   :  { %3180 = vmatpush1.bf16.msra.mxu0 %v3179_v7  ;;  %3502 = vmatprep.subr.bf16.mxu1 %v3501_v8  ;;  %v67_v7 = vld [vmem:[%s6822_s1 + $0x118] sm:$0xff]  ;;  %v3197_v8 = vpack.c.bf16 %v450_v0, %v447_v63  ;;  %v3533_v63 = vpack.c.bf16 %v187_v57, %v184_v56  ;;  %v470_v0 = vld [vmem:[%s6822_s1 + $0xdb0] sm:$0xff] }
  0x88   :  { %3182 = vmatprep.subr.bf16.mxu0 %v3181_v14  ;;  %1715 = vmatprep.mubr.f32.mxu1 %v4263_v34  ;;  %v434_v34 = vld [vmem:[%s6822_s1 + $0xc90] sm:$0xff]  ;;  %v453_v14 = vld [vmem:[%s6822_s1 + $0xd28] sm:$0xff]  ;;  %v3519_v16 = vpack.c.bf16 %v67_v7, %v64_v5  ;;  %v3215_v12 = vpack.c.bf16 %v473_v4, %v470_v0 }
  0x89   :  { %1360 = vmatprep.mubr.f32.mxu0 %v4824_v20  ;;  %v3191_v53 = vpack.c.bf16 %v437_v45, %v434_v34  ;;  %v461_v34 = vld [vmem:[%s6822_s1 + $0xd68] sm:$0xff]  ;;  %v468_v45 = vld [vmem:[%s6822_s1 + $0xda0] sm:$0xff]  ;;  %v190_v5 = vld [vmem:[%s6822_s1 + $0x4f0] sm:$0xff] }
  0x8a   :  { %3504 = vmatpush3.bf16.msra.mxu1 %v3503_v21  ;;  %v70_v21 = vld [vmem:[%s6822_s1 + $0x130] sm:$0xff]  ;;  %v3207_v48 = vpack.c.bf16 %v461_v34, %v458_v37  ;;  %v193_v7 = vld [vmem:[%s6822_s1 + $0x508] sm:$0xff] }
  0x8b   :  { %3184 = vmatpush1.bf16.msra.mxu0 %v3183_v22  ;;  %3506 = vmatprep.subr.bf16.mxu1 %v3505_v23  ;;  %v73_v22 = vld [vmem:[%s6822_s1 + $0x148] sm:$0xff]  ;;  %v3201_v23 = vpack.c.bf16 %v456_v15, %v453_v14  ;;  %v3537_v14 = vpack.c.bf16 %v193_v7, %v190_v5  ;;  %v142_v15 = vld [vmem:[%s6822_s1 + $0x370] sm:$0xff]  ;;  %v500_v7 = vld [vmem:[%s6822_s1 + $0xea0] sm:$0xff] }
  0x8c   :  { %3186 = vmatprep.subr.bf16.mxu0 %v3185_v29  ;;  %v459_v29 = vld [vmem:[%s6822_s1 + $0xd58] sm:$0xff]  ;;  %v3523_v32 = vpack.c.bf16 %v73_v22, %v70_v21  ;;  %v486_v22 = vld [vmem:[%s6822_s1 + $0xe30] sm:$0xff]  ;;  %v205_v37 = vld [vmem:[%s6822_s1 + $0x568] sm:$0xff] }
  0x8d   :  { %v483_v21 = vld [vmem:[%s6822_s1 + $0xe18] sm:$0xff]  ;;  %v494_v57 = vld [vmem:[%s6822_s1 + $0xe70] sm:$0xff]  ;;  %v217_v0 = vld [vmem:[%s6822_s1 + $0x5c8] sm:$0xff] }
  0x8e   :  { %3508 = vmatpush3.bf16.msra.mxu1 %v3507_v38  ;;  %v76_v38 = vld [vmem:[%s6822_s1 + $0x160] sm:$0xff] }
  0x8f   :  { %3188 = vmatpush1.bf16.msra.mxu0 %v3187_v40  ;;  %3510 = vmatprep.subr.bf16.mxu1 %v3509_v41  ;;  %v79_v40 = vld [vmem:[%s6822_s1 + $0x178] sm:$0xff]  ;;  %v3205_v41 = vpack.c.bf16 %v462_v31, %v459_v29  ;;  %v148_v29 = vld [vmem:[%s6822_s1 + $0x3a0] sm:$0xff] }
  0x90   :  { %3190 = vmatprep.subr.bf16.mxu0 %v3189_v44  ;;  %v465_v44 = vld [vmem:[%s6822_s1 + $0xd88] sm:$0xff]  ;;  %v3527_v47 = vpack.c.bf16 %v79_v40, %v76_v38  ;;  %v151_v31 = vld [vmem:[%s6822_s1 + $0x3b8] sm:$0xff]  ;;  %v492_v40 = vld [vmem:[%s6822_s1 + $0xe60] sm:$0xff] }
  0x91   :  { %v489_v38 = vld [vmem:[%s6822_s1 + $0xe48] sm:$0xff] }
  0x92   :  { %3512 = vmatpush3.bf16.msra.mxu1 %v3511_v52  ;;  %v130_v52 = vld [vmem:[%s6822_s1 + $0x310] sm:$0xff] }
  0x93   :  { %3192 = vmatpush1.bf16.msra.mxu0 %v3191_v53  ;;  %3514 = vmatprep.subr.bf16.mxu1 %v3513_v54  ;;  %v133_v53 = vld [vmem:[%s6822_s1 + $0x328] sm:$0xff]  ;;  %v3209_v54 = vpack.c.bf16 %v468_v45, %v465_v44  ;;  %v154_v44 = vld [vmem:[%s6822_s1 + $0x3d0] sm:$0xff] }
  0x94   :  { %3194 = vmatprep.subr.bf16.mxu0 %v3193_v58  ;;  %v471_v58 = vld [vmem:[%s6822_s1 + $0xdb8] sm:$0xff]  ;;  %v3531_v60 = vpack.c.bf16 %v133_v53, %v130_v52  ;;  %v157_v45 = vld [vmem:[%s6822_s1 + $0x3e8] sm:$0xff]  ;;  %v498_v53 = vld [vmem:[%s6822_s1 + $0xe90] sm:$0xff] }
  0x95   :  { %v495_v52 = vld [vmem:[%s6822_s1 + $0xe78] sm:$0xff] }
  0x96   :  { %3516 = vmatpush3.bf16.msra.mxu1 %v3515_v1  ;;  %v136_v1 = vld [vmem:[%s6822_s1 + $0x340] sm:$0xff] }
  0x97   :  { %3196 = vmatpush1.bf16.msra.mxu0 %v3195_v2  ;;  %3518 = vmatprep.subr.bf16.mxu1 %v3517_v3  ;;  %v139_v2 = vld [vmem:[%s6822_s1 + $0x358] sm:$0xff]  ;;  %v3213_v3 = vpack.c.bf16 %v474_v59, %v471_v58  ;;  %v160_v58 = vld [vmem:[%s6822_s1 + $0x400] sm:$0xff] }
  0x98   :  { %3198 = vmatprep.subr.bf16.mxu0 %v3197_v8  ;;  %v477_v8 = vld [vmem:[%s6822_s1 + $0xde8] sm:$0xff]  ;;  %v3535_v10 = vpack.c.bf16 %v139_v2, %v136_v1  ;;  %v163_v59 = vld [vmem:[%s6822_s1 + $0x418] sm:$0xff]  ;;  %v504_v2 = vld [vmem:[%s6822_s1 + $0xec0] sm:$0xff] }
  0x99   :  { %v501_v1 = vld [vmem:[%s6822_s1 + $0xea8] sm:$0xff] }
  0x9a   :  { %3520 = vmatpush3.bf16.msra.mxu1 %v3519_v16  ;;  %v145_v16 = vld [vmem:[%s6822_s1 + $0x388] sm:$0xff] }
  0x9b   :  { %3200 = vmatpush1.bf16.msra.mxu0 %v3199_v17  ;;  %3522 = vmatprep.subr.bf16.mxu1 %v3521_v18  ;;  %v3217_v17 = vpack.c.bf16 %v480_v9, %v477_v8  ;;  %v196_v18 = vld [vmem:[%s6822_s1 + $0x520] sm:$0xff]  ;;  %v166_v8 = vld [vmem:[%s6822_s1 + $0x430] sm:$0xff]  ;;  %v169_v9 = vld [vmem:[%s6822_s1 + $0x448] sm:$0xff] }
  0x9c   :  { %3202 = vmatprep.subr.bf16.mxu0 %v3201_v23  ;;  %v3539_v23 = vpack.c.bf16 %v145_v16, %v142_v15  ;;  %v3541_v26 = vpack.c.bf16 %v199_v19, %v196_v18  ;;  %v507_v15 = vld [vmem:[%s6822_s1 + $0xed8] sm:$0xff]  ;;  %v510_v16 = vld [vmem:[%s6822_s1 + $0xef0] sm:$0xff] }
  0x9d   :  { %v506_v19 = vld [vmem:[%s6822_s1 + $0xed0] sm:$0xff] }
  0x9e   :  { %3524 = vmatpush3.bf16.msra.mxu1 %v3523_v32  ;;  %v3221_v32 = vpack.c.bf16 %v486_v22, %v483_v21  ;;  %v172_v21 = vld [vmem:[%s6822_s1 + $0x460] sm:$0xff]  ;;  %v175_v22 = vld [vmem:[%s6822_s1 + $0x478] sm:$0xff] }
  0x9f   :  { %3204 = vmatpush1.bf16.msra.mxu0 %v3203_v35  ;;  %3526 = vmatprep.subr.bf16.mxu1 %v3525_v36  ;;  %v485_v35 = vld [vmem:[%s6822_s1 + $0xe28] sm:$0xff]  ;;  %v202_v36 = vld [vmem:[%s6822_s1 + $0x550] sm:$0xff] }
  0xa0   :  { %3206 = vmatprep.subr.bf16.mxu0 %v3205_v41  ;;  %v3543_v41 = vpack.c.bf16 %v151_v31, %v148_v29  ;;  %v3223_v34 = vpack.c.bf16 %v485_v35, %v482_v27  ;;  %v3545_v42 = vpack.c.bf16 %v205_v37, %v202_v36  ;;  %v277_v27 = vld [vmem:[%s6822_s1 + $0x7a8] sm:$0xff]  ;;  %v516_v31 = vld [vmem:[%s6822_s1 + $0xf20] sm:$0xff]  ;;  %v3559_v35 = vpack.c.bf16 %v175_v22, %v172_v21 }
  0xa1   :  { %v513_v29 = vld [vmem:[%s6822_s1 + $0xf08] sm:$0xff]  ;;  %v540_v22 = vld [vmem:[%s6822_s1 + $0xfe0] sm:$0xff] }
  0xa2   :  { %3528 = vmatpush3.bf16.msra.mxu1 %v3527_v47  ;;  %v3225_v47 = vpack.c.bf16 %v492_v40, %v489_v38  ;;  %v512_v38 = vld [vmem:[%s6822_s1 + $0xf00] sm:$0xff]  ;;  %v226_v40 = vld [vmem:[%s6822_s1 + $0x610] sm:$0xff]  ;;  %v537_v21 = vld [vmem:[%s6822_s1 + $0xfc8] sm:$0xff] }
  0xa3   :  { %3208 = vmatpush1.bf16.msra.mxu0 %v3207_v48  ;;  %3530 = vmatprep.subr.bf16.mxu1 %v3529_v50  ;;  %v491_v48 = vld [vmem:[%s6822_s1 + $0xe58] sm:$0xff]  ;;  %v208_v50 = vld [vmem:[%s6822_s1 + $0x580] sm:$0xff] }
  0xa4   :  { %3210 = vmatprep.subr.bf16.mxu0 %v3209_v54  ;;  %v3547_v54 = vpack.c.bf16 %v157_v45, %v154_v44  ;;  %v3227_v55 = vpack.c.bf16 %v491_v48, %v488_v43  ;;  %v3549_v56 = vpack.c.bf16 %v211_v51, %v208_v50  ;;  %v283_v43 = vld [vmem:[%s6822_s1 + $0x7d8] sm:$0xff]  ;;  %v522_v45 = vld [vmem:[%s6822_s1 + $0xf50] sm:$0xff] }
  0xa5   :  { %1716 = vmatmul.mubr.f32.vlgmr.msra.gmra.mrb[2].mxu1 %v4241_v25  ;;  %v476_v25 = vld [vmem:[%s6822_s1 + $0xde0] sm:$0xff]  ;;  %v519_v44 = vld [vmem:[%s6822_s1 + $0xf38] sm:$0xff] }
  0xa6   :  { %3532 = vmatpush3.bf16.msra.mxu1 %v3531_v60  ;;  %1785 = vmatprep.mubr.f32.mxu1 %v4412_v46  ;;  %v479_v46 = vld [vmem:[%s6822_s1 + $0xdf8] sm:$0xff]  ;;  %v3229_v60 = vpack.c.bf16 %v498_v53, %v495_v52  ;;  %v518_v52 = vld [vmem:[%s6822_s1 + $0xf30] sm:$0xff]  ;;  %v232_v53 = vld [vmem:[%s6822_s1 + $0x640] sm:$0xff] }
  0xa7   :  { %3212 = vmatpush1.bf16.msra.mxu0 %v3211_v62  ;;  %3534 = vmatprep.subr.bf16.mxu1 %v3533_v63  ;;  %v3219_v24 = vpack.c.bf16 %v479_v46, %v476_v25  ;;  %v497_v62 = vld [vmem:[%s6822_s1 + $0xe88] sm:$0xff]  ;;  %v214_v63 = vld [vmem:[%s6822_s1 + $0x5b0] sm:$0xff]  ;;  %v223_v25 = vld [vmem:[%s6822_s1 + $0x5f8] sm:$0xff] }
  0xa8   :  { %3214 = vmatprep.subr.bf16.mxu0 %v3213_v3  ;;  %v3551_v3 = vpack.c.bf16 %v163_v59, %v160_v58  ;;  %v3231_v4 = vpack.c.bf16 %v497_v62, %v494_v57  ;;  %v3553_v5 = vpack.c.bf16 %v217_v0, %v214_v63  ;;  %v286_v57 = vld [vmem:[%s6822_s1 + $0x7f0] sm:$0xff]  ;;  %v289_v58 = vld [vmem:[%s6822_s1 + $0x808] sm:$0xff] }
  0xa9   :  { %v525_v59 = vld [vmem:[%s6822_s1 + $0xf68] sm:$0xff] }
  0xaa   :  { %3536 = vmatpush3.bf16.msra.mxu1 %v3535_v10  ;;  %v3233_v10 = vpack.c.bf16 %v504_v2, %v501_v1  ;;  %v524_v1 = vld [vmem:[%s6822_s1 + $0xf60] sm:$0xff]  ;;  %v238_v2 = vld [vmem:[%s6822_s1 + $0x670] sm:$0xff] }
  0xab   :  { %3216 = vmatpush1.bf16.msra.mxu0 %v3215_v12  ;;  %3538 = vmatprep.subr.bf16.mxu1 %v3537_v14  ;;  %v503_v12 = vld [vmem:[%s6822_s1 + $0xeb8] sm:$0xff]  ;;  %v220_v14 = vld [vmem:[%s6822_s1 + $0x5e0] sm:$0xff] }
  0xac   :  { %3218 = vmatprep.subr.bf16.mxu0 %v3217_v17  ;;  %v3555_v17 = vpack.c.bf16 %v169_v9, %v166_v8  ;;  %v3235_v46 = vpack.c.bf16 %v503_v12, %v500_v7  ;;  %v3557_v18 = vpack.c.bf16 %v223_v25, %v220_v14  ;;  %v292_v7 = vld [vmem:[%s6822_s1 + $0x820] sm:$0xff]  ;;  %v295_v8 = vld [vmem:[%s6822_s1 + $0x838] sm:$0xff] }
  0xad   :  { %v531_v9 = vld [vmem:[%s6822_s1 + $0xf98] sm:$0xff]  ;;  %v3573_v25 = vpack.c.bf16 %v295_v8, %v292_v7  ;;  %v554_v7 = vld [vmem:[%s6822_s1 + $0x1050] sm:$0xff]  ;;  %v268_v8 = vld [vmem:[%s6822_s1 + $0x760] sm:$0xff] }
  0xae   :  { %3540 = vmatpush3.bf16.msra.mxu1 %v3539_v23  ;;  %v3237_v23 = vpack.c.bf16 %v510_v16, %v507_v15  ;;  %v244_v15 = vld [vmem:[%s6822_s1 + $0x6a0] sm:$0xff]  ;;  %v247_v16 = vld [vmem:[%s6822_s1 + $0x6b8] sm:$0xff] }
  0xaf   :  { %3220 = vmatpush1.bf16.msra.mxu0 %v3219_v24  ;;  %3542 = vmatprep.subr.bf16.mxu1 %v3541_v26  ;;  %v509_v24 = vld [vmem:[%s6822_s1 + $0xee8] sm:$0xff]  ;;  %v274_v26 = vld [vmem:[%s6822_s1 + $0x790] sm:$0xff] }
  0xb0   :  { %3222 = vmatprep.subr.bf16.mxu0 %v3221_v32  ;;  %v952_v32 = vcombine.high %v4791_v6, %v4791_v6  ;;  %v3239_v36 = vpack.c.bf16 %v509_v24, %v506_v19  ;;  %v3561_v37 = vpack.c.bf16 %v277_v27, %v274_v26  ;;  %v3241_v6 = vpack.c.bf16 %v516_v31, %v513_v29  ;;  %v301_v19 = vld [vmem:[%s6822_s1 + $0x868] sm:$0xff]  ;;  %v536_v27 = vld [vmem:[%s6822_s1 + $0xfc0] sm:$0xff]  ;;  %v250_v29 = vld [vmem:[%s6822_s1 + $0x6d0] sm:$0xff] }
  0xb1   :  { %v253_v31 = vld [vmem:[%s6822_s1 + $0x6e8] sm:$0xff] }
  0xb2   :  { %3544 = vmatpush3.bf16.msra.mxu1 %v3543_v41  ;;  %v229_v41 = vld [vmem:[%s6822_s1 + $0x628] sm:$0xff] }
  0xb3   :  { %3224 = vmatpush1.bf16.msra.mxu0 %v3223_v34  ;;  %3546 = vmatprep.subr.bf16.mxu1 %v3545_v42  ;;  %v515_v34 = vld [vmem:[%s6822_s1 + $0xf18] sm:$0xff]  ;;  %v280_v42 = vld [vmem:[%s6822_s1 + $0x7c0] sm:$0xff]  ;;  %v3563_v48 = vpack.c.bf16 %v229_v41, %v226_v40  ;;  %v546_v40 = vld [vmem:[%s6822_s1 + $0x1010] sm:$0xff]  ;;  %v3579_v41 = vpack.c.bf16 %v253_v31, %v250_v29 }
  0xb4   :  { %3226 = vmatprep.subr.bf16.mxu0 %v3225_v47  ;;  %v5194_v47 = vrot.slane %v952_v32, %v4208_v11  ;;  %v3243_v50 = vpack.c.bf16 %v515_v34, %v512_v38  ;;  %v3565_v51 = vpack.c.bf16 %v283_v43, %v280_v42  ;;  %v3257_v32 = vpack.c.bf16 %v540_v22, %v537_v21  ;;  %v543_v38 = vld [vmem:[%s6822_s1 + $0xff8] sm:$0xff]  ;;  %v542_v42 = vld [vmem:[%s6822_s1 + $0xff0] sm:$0xff]  ;;  %v256_v43 = vld [vmem:[%s6822_s1 + $0x700] sm:$0xff] }
  0xb5   :  { %v325_v21 = vld [vmem:[%s6822_s1 + $0x928] sm:$0xff]  ;;  %v570_v29 = vld [vmem:[%s6822_s1 + $0x10d0] sm:$0xff] }
  0xb6   :  { %3548 = vmatpush3.bf16.msra.mxu1 %v3547_v54  ;;  %v235_v54 = vld [vmem:[%s6822_s1 + $0x658] sm:$0xff]  ;;  %v5223_v62 = vcombine.high %v5194_v47, %v5194_v47 }
  0xb7   :  { %3228 = vmatpush1.bf16.msra.mxu0 %v3227_v55  ;;  %3550 = vmatprep.subr.bf16.mxu1 %v3549_v56  ;;  %v3245_v55 = vpack.c.bf16 %v522_v45, %v519_v44  ;;  %v521_v56 = vld [vmem:[%s6822_s1 + $0xf48] sm:$0xff]  ;;  %v3567_v63 = vpack.c.bf16 %v235_v54, %v232_v53  ;;  %v259_v44 = vld [vmem:[%s6822_s1 + $0x718] sm:$0xff]  ;;  %v3261_v45 = vpack.c.bf16 %v546_v40, %v543_v38  ;;  %v552_v53 = vld [vmem:[%s6822_s1 + $0x1040] sm:$0xff] }
  0xb8   :  { %3230 = vmatprep.subr.bf16.mxu0 %v3229_v60  ;;  %v528_v60 = vld [vmem:[%s6822_s1 + $0xf80] sm:$0xff]  ;;  %v3247_v0 = vpack.c.bf16 %v521_v56, %v518_v52  ;;  %v549_v52 = vld [vmem:[%s6822_s1 + $0x1028] sm:$0xff]  ;;  %v3583_v54 = vpack.c.bf16 %v259_v44, %v256_v43  ;;  %v331_v38 = vld [vmem:[%s6822_s1 + $0x958] sm:$0xff] }
  0xb9   :  { %v576_v43 = vld [vmem:[%s6822_s1 + $0x1100] sm:$0xff] }
  0xba   :  { %3552 = vmatpush3.bf16.msra.mxu1 %v3551_v3  ;;  %v241_v3 = vld [vmem:[%s6822_s1 + $0x688] sm:$0xff] }
  0xbb   :  { %3232 = vmatpush1.bf16.msra.mxu0 %v3231_v4  ;;  %3554 = vmatprep.subr.bf16.mxu1 %v3553_v5  ;;  %v3249_v4 = vpack.c.bf16 %v528_v60, %v525_v59  ;;  %v527_v5 = vld [vmem:[%s6822_s1 + $0xf78] sm:$0xff]  ;;  %v3571_v12 = vpack.c.bf16 %v241_v3, %v238_v2  ;;  %v265_v59 = vld [vmem:[%s6822_s1 + $0x748] sm:$0xff]  ;;  %v3265_v60 = vpack.c.bf16 %v552_v53, %v549_v52  ;;  %v558_v2 = vld [vmem:[%s6822_s1 + $0x1070] sm:$0xff] }
  0xbc   :  { %3234 = vmatprep.subr.bf16.mxu0 %v3233_v10  ;;  %v534_v10 = vld [vmem:[%s6822_s1 + $0xfb0] sm:$0xff]  ;;  %v3251_v14 = vpack.c.bf16 %v527_v5, %v524_v1  ;;  %v555_v1 = vld [vmem:[%s6822_s1 + $0x1058] sm:$0xff]  ;;  %v388_v53 = vld [vmem:[%s6822_s1 + $0xb20] sm:$0xff] }
  0xbe   :  { %3556 = vmatpush3.bf16.msra.mxu1 %v3555_v17  ;;  %v3253_v17 = vpack.c.bf16 %v534_v10, %v531_v9  ;;  %v271_v9 = vld [vmem:[%s6822_s1 + $0x778] sm:$0xff]  ;;  %v3269_v10 = vpack.c.bf16 %v558_v2, %v555_v1  ;;  %v581_v1 = vld [vmem:[%s6822_s1 + $0x1128] sm:$0xff]  ;;  %v394_v2 = vld [vmem:[%s6822_s1 + $0xb50] sm:$0xff] }
  0xbf   :  { %3236 = vmatpush1.bf16.msra.mxu0 %v3235_v46  ;;  %3558 = vmatprep.subr.bf16.mxu1 %v3557_v18  ;;  %v533_v46 = vld [vmem:[%s6822_s1 + $0xfa8] sm:$0xff]  ;;  %v298_v18 = vld [vmem:[%s6822_s1 + $0x850] sm:$0xff] }
  0xc0   :  { %3238 = vmatprep.subr.bf16.mxu0 %v3237_v23  ;;  %v3575_v23 = vpack.c.bf16 %v247_v16, %v244_v15  ;;  %v3577_v26 = vpack.c.bf16 %v301_v19, %v298_v18  ;;  %v564_v15 = vld [vmem:[%s6822_s1 + $0x10a0] sm:$0xff]  ;;  %v3591_v16 = vpack.c.bf16 %v271_v9, %v268_v8  ;;  %v322_v19 = vld [vmem:[%s6822_s1 + $0x910] sm:$0xff] }
  0xc1   :  { %v560_v18 = vld [vmem:[%s6822_s1 + $0x1080] sm:$0xff]  ;;  %v3595_v31 = vpack.c.bf16 %v325_v21, %v322_v19 }
  0xc2   :  { %3560 = vmatpush3.bf16.msra.mxu1 %v3559_v35  ;;  %v539_v35 = vld [vmem:[%s6822_s1 + $0xfd8] sm:$0xff] }
  0xc3   :  { %3240 = vmatpush1.bf16.msra.mxu0 %v3239_v36  ;;  %3562 = vmatprep.subr.bf16.mxu1 %v3561_v37  ;;  %v304_v36 = vld [vmem:[%s6822_s1 + $0x880] sm:$0xff]  ;;  %v307_v37 = vld [vmem:[%s6822_s1 + $0x898] sm:$0xff] }
  0xc4   :  { %3242 = vmatprep.subr.bf16.mxu0 %v3241_v6  ;;  %v3259_v6 = vpack.c.bf16 %v539_v35, %v536_v27  ;;  %v3581_v34 = vpack.c.bf16 %v307_v37, %v304_v36  ;;  %v567_v27 = vld [vmem:[%s6822_s1 + $0x10b8] sm:$0xff]  ;;  %v566_v36 = vld [vmem:[%s6822_s1 + $0x10b0] sm:$0xff]  ;;  %v328_v37 = vld [vmem:[%s6822_s1 + $0x940] sm:$0xff] }
  0xc5   :  { %1786 = vmatmul.mubr.f32.vlgmr.msra.gmra.mrb[4].mxu1 %v4381_v30  ;;  %v3569_v30 = vpack.c.bf16 %v289_v58, %v286_v57  ;;  %v548_v57 = vld [vmem:[%s6822_s1 + $0x1020] sm:$0xff]  ;;  %v262_v58 = vld [vmem:[%s6822_s1 + $0x730] sm:$0xff]  ;;  %v3277_v40 = vpack.c.bf16 %v570_v29, %v567_v27  ;;  %v3599_v44 = vpack.c.bf16 %v331_v38, %v328_v37  ;;  %v593_v27 = vld [vmem:[%s6822_s1 + $0x1188] sm:$0xff] }
  0xc6   :  { %1361 = vmatmul.mubr.f32.vlgmr.msra.gmra.mrb[0].mxu0 %v4804_v13  ;;  %3564 = vmatpush3.bf16.msra.mxu1 %v3563_v48  ;;  %v545_v48 = vld [vmem:[%s6822_s1 + $0x1008] sm:$0xff]  ;;  %v3587_v3 = vpack.c.bf16 %v265_v59, %v262_v58  ;;  %v406_v29 = vld [vmem:[%s6822_s1 + $0xbb0] sm:$0xff] }
  0xc7   :  { %3244 = vmatpush1.bf16.msra.mxu0 %v3243_v50  ;;  %3566 = vmatprep.subr.bf16.mxu1 %v3565_v51  ;;  %v310_v50 = vld [vmem:[%s6822_s1 + $0x8b0] sm:$0xff]  ;;  %v313_v51 = vld [vmem:[%s6822_s1 + $0x8c8] sm:$0xff] }
  0xc8   :  { %3246 = vmatprep.subr.bf16.mxu0 %v3245_v55  ;;  %1855 = vmatprep.mubr.f32.mxu1 %v4276_v39  ;;  %v530_v39 = vld [vmem:[%s6822_s1 + $0xf90] sm:$0xff]  ;;  %v3263_v55 = vpack.c.bf16 %v545_v48, %v542_v42  ;;  %v3585_v56 = vpack.c.bf16 %v313_v51, %v310_v50  ;;  %v573_v42 = vld [vmem:[%s6822_s1 + $0x10e8] sm:$0xff] }
  0xc9   :  { %1431 = vmatprep.mubr.f32.mxu0 %v5223_v62  ;;  %v3255_v24 = vpack.c.bf16 %v533_v46, %v530_v39  ;;  %v561_v39 = vld [vmem:[%s6822_s1 + $0x1088] sm:$0xff]  ;;  %v334_v50 = vld [vmem:[%s6822_s1 + $0x970] sm:$0xff]  ;;  %v3281_v52 = vpack.c.bf16 %v576_v43, %v573_v42  ;;  %v599_v42 = vld [vmem:[%s6822_s1 + $0x11b8] sm:$0xff] }
  0xca   :  { %3568 = vmatpush3.bf16.msra.mxu1 %v3567_v63  ;;  %v551_v63 = vld [vmem:[%s6822_s1 + $0x1038] sm:$0xff]  ;;  %v3273_v22 = vpack.c.bf16 %v564_v15, %v561_v39  ;;  %v337_v51 = vld [vmem:[%s6822_s1 + $0x988] sm:$0xff]  ;;  %v400_v15 = vld [vmem:[%s6822_s1 + $0xb80] sm:$0xff] }
  0xcb   :  { %3248 = vmatpush1.bf16.msra.mxu0 %v3247_v0  ;;  %3570 = vmatprep.subr.bf16.mxu1 %v3569_v30  ;;  %v316_v0 = vld [vmem:[%s6822_s1 + $0x8e0] sm:$0xff]  ;;  %v319_v30 = vld [vmem:[%s6822_s1 + $0x8f8] sm:$0xff] }
  0xcc   :  { %3250 = vmatprep.subr.bf16.mxu0 %v3249_v4  ;;  %v3267_v4 = vpack.c.bf16 %v551_v63, %v548_v57  ;;  %v3589_v5 = vpack.c.bf16 %v319_v30, %v316_v0  ;;  %v3603_v57 = vpack.c.bf16 %v337_v51, %v334_v50  ;;  %v340_v63 = vld [vmem:[%s6822_s1 + $0x9a0] sm:$0xff]  ;;  %v343_v0 = vld [vmem:[%s6822_s1 + $0x9b8] sm:$0xff] }
  0xcd   :  { %v587_v39 = vld [vmem:[%s6822_s1 + $0x1158] sm:$0xff]  ;;  %v412_v43 = vld [vmem:[%s6822_s1 + $0xbe0] sm:$0xff] }
  0xce   :  { %3572 = vmatpush3.bf16.msra.mxu1 %v3571_v12  ;;  %v557_v12 = vld [vmem:[%s6822_s1 + $0x1068] sm:$0xff] }
  0xcf   :  { %3252 = vmatpush1.bf16.msra.mxu0 %v3251_v14  ;;  %3574 = vmatprep.subr.bf16.mxu1 %v3573_v25  ;;  %v370_v14 = vld [vmem:[%s6822_s1 + $0xa90] sm:$0xff]  ;;  %v373_v25 = vld [vmem:[%s6822_s1 + $0xaa8] sm:$0xff] }
  0xd0   :  { %3254 = vmatprep.subr.bf16.mxu0 %v3253_v17  ;;  %v3271_v17 = vpack.c.bf16 %v557_v12, %v554_v7  ;;  %v3593_v46 = vpack.c.bf16 %v373_v25, %v370_v14  ;;  %v3607_v7 = vpack.c.bf16 %v343_v0, %v340_v63  ;;  %v346_v12 = vld [vmem:[%s6822_s1 + $0x9d0] sm:$0xff]  ;;  %v349_v14 = vld [vmem:[%s6822_s1 + $0x9e8] sm:$0xff]  ;;  %v5569_v63 = vld [vmem:[%s6821_s0 + $0x18] sm:$0xff] }
  0xd2   :  { %3576 = vmatpush3.bf16.msra.mxu1 %v3575_v23  ;;  %v563_v23 = vld [vmem:[%s6822_s1 + $0x1098] sm:$0xff] }
  0xd3   :  { %3256 = vmatpush1.bf16.msra.mxu0 %v3255_v24  ;;  %3578 = vmatprep.subr.bf16.mxu1 %v3577_v26  ;;  %v376_v24 = vld [vmem:[%s6822_s1 + $0xac0] sm:$0xff]  ;;  %v379_v26 = vld [vmem:[%s6822_s1 + $0xad8] sm:$0xff] }
  0xd4   :  { %3258 = vmatprep.subr.bf16.mxu0 %v3257_v32  ;;  %v3275_v32 = vpack.c.bf16 %v563_v23, %v560_v18  ;;  %v3597_v35 = vpack.c.bf16 %v379_v26, %v376_v24  ;;  %v3611_v18 = vpack.c.bf16 %v349_v14, %v346_v12  ;;  %v352_v23 = vld [vmem:[%s6822_s1 + $0xa00] sm:$0xff]  ;;  %v355_v24 = vld [vmem:[%s6822_s1 + $0xa18] sm:$0xff]  ;;  %v5597_v12 = vrot.slane %v5569_v63, %v4208_v11 }
  0xd6   :  { %3580 = vmatpush3.bf16.msra.mxu1 %v3579_v41  ;;  %v569_v41 = vld [vmem:[%s6822_s1 + $0x10c8] sm:$0xff] }
  0xd7   :  { %3260 = vmatpush1.bf16.msra.mxu0 %v3259_v6  ;;  %3582 = vmatprep.subr.bf16.mxu1 %v3581_v34  ;;  %v382_v6 = vld [vmem:[%s6822_s1 + $0xaf0] sm:$0xff]  ;;  %v385_v34 = vld [vmem:[%s6822_s1 + $0xb08] sm:$0xff] }
  0xd8   :  { %3262 = vmatprep.subr.bf16.mxu0 %v3261_v45  ;;  %v3279_v45 = vpack.c.bf16 %v569_v41, %v566_v36  ;;  %v3601_v48 = vpack.c.bf16 %v385_v34, %v382_v6  ;;  %v3615_v36 = vpack.c.bf16 %v355_v24, %v352_v23  ;;  %v358_v41 = vld [vmem:[%s6822_s1 + $0xa30] sm:$0xff]  ;;  %v361_v6 = vld [vmem:[%s6822_s1 + $0xa48] sm:$0xff]  ;;  %v624_v23 = vld [vmem:[%s6822_s1 + $0x1280] sm:$0xff]  ;;  %v5626_v24 = vcombine.high %v5597_v12, %v5597_v12 }
  0xda   :  { %3584 = vmatpush3.bf16.msra.mxu1 %v3583_v54  ;;  %v391_v54 = vld [vmem:[%s6822_s1 + $0xb38] sm:$0xff] }
  0xdb   :  { %3264 = vmatpush1.bf16.msra.mxu0 %v3263_v55  ;;  %3586 = vmatprep.subr.bf16.mxu1 %v3585_v56  ;;  %v579_v55 = vld [vmem:[%s6822_s1 + $0x1118] sm:$0xff]  ;;  %v582_v56 = vld [vmem:[%s6822_s1 + $0x1130] sm:$0xff]  ;;  %v3605_v59 = vpack.c.bf16 %v391_v54, %v388_v53 }
  0xdc   :  { %3266 = vmatprep.subr.bf16.mxu0 %v3265_v60  ;;  %v578_v60 = vld [vmem:[%s6822_s1 + $0x1110] sm:$0xff]  ;;  %v3285_v30 = vpack.c.bf16 %v582_v56, %v579_v55  ;;  %v367_v53 = vld [vmem:[%s6822_s1 + $0xa78] sm:$0xff]  ;;  %v605_v55 = vld [vmem:[%s6822_s1 + $0x11e8] sm:$0xff] }
  0xdd   :  { %v3287_v8 = vpack.c.bf16 %v581_v1, %v578_v60  ;;  %v466_v56 = vld [vmem:[%s6822_s1 + $0xd90] sm:$0xff]  ;;  %v608_v1 = vld [vmem:[%s6822_s1 + $0x1200] sm:$0xff] }
  0xde   :  { %3588 = vmatpush3.bf16.msra.mxu1 %v3587_v3  ;;  %v397_v3 = vld [vmem:[%s6822_s1 + $0xb68] sm:$0xff] }
  0xdf   :  { %3268 = vmatpush1.bf16.msra.mxu0 %v3267_v4  ;;  %3590 = vmatprep.subr.bf16.mxu1 %v3589_v5  ;;  %v585_v4 = vld [vmem:[%s6822_s1 + $0x1148] sm:$0xff]  ;;  %v588_v5 = vld [vmem:[%s6822_s1 + $0x1160] sm:$0xff]  ;;  %v3609_v9 = vpack.c.bf16 %v397_v3, %v394_v2  ;;  %v418_v2 = vld [vmem:[%s6822_s1 + $0xc10] sm:$0xff] }
  0xe0   :  { %3270 = vmatprep.subr.bf16.mxu0 %v3269_v10  ;;  %v584_v10 = vld [vmem:[%s6822_s1 + $0x1140] sm:$0xff]  ;;  %v3289_v25 = vpack.c.bf16 %v588_v5, %v585_v4  ;;  %v421_v3 = vld [vmem:[%s6822_s1 + $0xc28] sm:$0xff]  ;;  %v611_v5 = vld [vmem:[%s6822_s1 + $0x1218] sm:$0xff] }
  0xe1   :  { %v3291_v19 = vpack.c.bf16 %v587_v39, %v584_v10  ;;  %v618_v10 = vld [vmem:[%s6822_s1 + $0x1250] sm:$0xff]  ;;  %v3627_v14 = vpack.c.bf16 %v421_v3, %v418_v2 }
  0xe2   :  { %3592 = vmatpush3.bf16.msra.mxu1 %v3591_v16  ;;  %v403_v16 = vld [vmem:[%s6822_s1 + $0xb98] sm:$0xff] }
  0xe3   :  { %3272 = vmatpush1.bf16.msra.mxu0 %v3271_v17  ;;  %3594 = vmatprep.subr.bf16.mxu1 %v3593_v46  ;;  %v591_v17 = vld [vmem:[%s6822_s1 + $0x1178] sm:$0xff]  ;;  %v594_v46 = vld [vmem:[%s6822_s1 + $0x1190] sm:$0xff]  ;;  %v3613_v21 = vpack.c.bf16 %v403_v16, %v400_v15  ;;  %v424_v16 = vld [vmem:[%s6822_s1 + $0xc40] sm:$0xff] }
  0xe4   :  { %3274 = vmatprep.subr.bf16.mxu0 %v3273_v22  ;;  %v590_v22 = vld [vmem:[%s6822_s1 + $0x1170] sm:$0xff]  ;;  %v3293_v26 = vpack.c.bf16 %v594_v46, %v591_v17  ;;  %v427_v17 = vld [vmem:[%s6822_s1 + $0xc58] sm:$0xff] }
  0xe5   :  { %1856 = vmatmul.mubr.f32.vlgmr.msra.gmra.mrb[6].mxu1 %v4250_v28  ;;  %v572_v28 = vld [vmem:[%s6822_s1 + $0x10e0] sm:$0xff]  ;;  %v3295_v37 = vpack.c.bf16 %v593_v27, %v590_v22  ;;  %v614_v15 = vld [vmem:[%s6822_s1 + $0x1230] sm:$0xff]  ;;  %v621_v22 = vld [vmem:[%s6822_s1 + $0x1268] sm:$0xff] }
  0xe6   :  { %3596 = vmatpush3.bf16.msra.mxu1 %v3595_v31  ;;  %1925 = vmatprep.mubr.f32.mxu1 %v4423_v49  ;;  %v575_v49 = vld [vmem:[%s6822_s1 + $0x10f8] sm:$0xff]  ;;  %v409_v31 = vld [vmem:[%s6822_s1 + $0xbc8] sm:$0xff] }
  0xe7   :  { %3276 = vmatpush1.bf16.msra.mxu0 %v3275_v32  ;;  %3598 = vmatprep.subr.bf16.mxu1 %v3597_v35  ;;  %v3283_v58 = vpack.c.bf16 %v575_v49, %v572_v28  ;;  %v597_v32 = vld [vmem:[%s6822_s1 + $0x11a8] sm:$0xff]  ;;  %v600_v35 = vld [vmem:[%s6822_s1 + $0x11c0] sm:$0xff]  ;;  %v3617_v38 = vpack.c.bf16 %v409_v31, %v406_v29  ;;  %v3619_v28 = vpack.c.bf16 %v361_v6, %v358_v41 }
  0xe8   :  { %3278 = vmatprep.subr.bf16.mxu0 %v3277_v40  ;;  %v596_v40 = vld [vmem:[%s6822_s1 + $0x11a0] sm:$0xff]  ;;  %v3297_v34 = vpack.c.bf16 %v600_v35, %v597_v32 }
  0xe9   :  { %v3299_v50 = vpack.c.bf16 %v599_v42, %v596_v40  ;;  %v364_v49 = vld [vmem:[%s6822_s1 + $0xa60] sm:$0xff] }
  0xea   :  { %3600 = vmatpush3.bf16.msra.mxu1 %v3599_v44  ;;  %v415_v44 = vld [vmem:[%s6822_s1 + $0xbf8] sm:$0xff]  ;;  %v3623_v60 = vpack.c.bf16 %v367_v53, %v364_v49 }
  0xeb   :  { %3280 = vmatpush1.bf16.msra.mxu0 %v3279_v45  ;;  %3602 = vmatprep.subr.bf16.mxu1 %v3601_v48  ;;  %v603_v45 = vld [vmem:[%s6822_s1 + $0x11d8] sm:$0xff]  ;;  %v606_v48 = vld [vmem:[%s6822_s1 + $0x11f0] sm:$0xff]  ;;  %v3621_v51 = vpack.c.bf16 %v415_v44, %v412_v43 }
  0xec   :  { %3282 = vmatprep.subr.bf16.mxu0 %v3281_v52  ;;  %v602_v52 = vld [vmem:[%s6822_s1 + $0x11d0] sm:$0xff]  ;;  %v3301_v54 = vpack.c.bf16 %v606_v48, %v603_v45 }
  0xed   :  { %v3303_v0 = vpack.c.bf16 %v605_v55, %v602_v52 }
  0xee   :  { %3604 = vmatpush3.bf16.msra.mxu1 %v3603_v57  ;;  %v469_v57 = vld [vmem:[%s6822_s1 + $0xda8] sm:$0xff] }
  0xef   :  { %3284 = vmatpush1.bf16.msra.mxu0 %v3283_v58  ;;  %3606 = vmatprep.subr.bf16.mxu1 %v3605_v59  ;;  %v609_v58 = vld [vmem:[%s6822_s1 + $0x1208] sm:$0xff]  ;;  %v612_v59 = vld [vmem:[%s6822_s1 + $0x1220] sm:$0xff] }
  0xf0   :  { %3286 = vmatprep.subr.bf16.mxu0 %v3285_v30  ;;  %v3625_v30 = vpack.c.bf16 %v469_v57, %v466_v56  ;;  %v3305_v4 = vpack.c.bf16 %v612_v59, %v609_v58 }
  0xf2   :  { %3608 = vmatpush3.bf16.msra.mxu1 %v3607_v7  ;;  %v472_v7 = vld [vmem:[%s6822_s1 + $0xdc0] sm:$0xff] }
  0xf3   :  { %3288 = vmatpush1.bf16.msra.mxu0 %v3287_v8  ;;  %3610 = vmatprep.subr.bf16.mxu1 %v3609_v9  ;;  %v475_v8 = vld [vmem:[%s6822_s1 + $0xdd8] sm:$0xff] }
  0xf4   :  { %3290 = vmatprep.subr.bf16.mxu0 %v3289_v25  ;;  %v615_v9 = vld [vmem:[%s6822_s1 + $0x1238] sm:$0xff]  ;;  %v3307_v25 = vpack.c.bf16 %v611_v5, %v608_v1  ;;  %v3629_v39 = vpack.c.bf16 %v475_v8, %v472_v7 }
  0xf5   :  { %v3309_v46 = vpack.c.bf16 %v618_v10, %v615_v9 }
  0xf6   :  { %3612 = vmatpush3.bf16.msra.mxu1 %v3611_v18  ;;  %v617_v18 = vld [vmem:[%s6822_s1 + $0x1248] sm:$0xff] }
  0xf7   :  { %3292 = vmatpush1.bf16.msra.mxu0 %v3291_v19  ;;  %3614 = vmatprep.subr.bf16.mxu1 %v3613_v21  ;;  %v478_v19 = vld [vmem:[%s6822_s1 + $0xdf0] sm:$0xff]  ;;  %v481_v21 = vld [vmem:[%s6822_s1 + $0xe08] sm:$0xff] }
  0xf8   :  { %3294 = vmatprep.subr.bf16.mxu0 %v3293_v26  ;;  %v3631_v26 = vpack.c.bf16 %v427_v17, %v424_v16 }
  0xfa   :  { %3616 = vmatpush3.bf16.msra.mxu1 %v3615_v36 }
  0xfb   :  { %3296 = vmatpush1.bf16.msra.mxu0 %v3295_v37  ;;  %3618 = vmatprep.subr.bf16.mxu1 %v3617_v38 }
  0xfc   :  { %3298 = vmatprep.subr.bf16.mxu0 %v3297_v34 }
  0xfe   :  { %3620 = vmatpush3.bf16.msra.mxu1 %v3619_v28 }
  0xff   :  { %3300 = vmatpush1.bf16.msra.mxu0 %v3299_v50  ;;  %3622 = vmatprep.subr.bf16.mxu1 %v3621_v51 }
 0x100   :  { %3302 = vmatprep.subr.bf16.mxu0 %v3301_v54 }
 0x102   :  { %3624 = vmatpush3.bf16.msra.mxu1 %v3623_v60 }
 0x103   :  { %3304 = vmatpush1.bf16.msra.mxu0 %v3303_v0  ;;  %3626 = vmatprep.subr.bf16.mxu1 %v3625_v30 }
 0x104   :  { %3306 = vmatprep.subr.bf16.mxu0 %v3305_v4 }
 0x105   :  { %1926 = vmatmul.mubr.f32.vlgmr.msra.gmra.mrb[8].mxu1 %v4390_v33 }
 0x106   :  { %1432 = vmatmul.mubr.f32.vlgmr.msra.gmra.mrb[0].mxu0 %v5194_v47  ;;  %3628 = vmatpush3.bf16.msra.mxu1 %v3627_v14 }
 0x107   :  { %12 = vsyncpa [#allocation3], 0  ;;  %3308 = vmatpush1.bf16.msra.mxu0 %v3307_v25  ;;  %3630 = vmatprep.subr.bf16.mxu1 %v3629_v39  ;;  %v3311_v33 = vpack.c.bf16 %v617_v18, %v614_v15  ;;  %v3633_v27 = vpack.c.bf16 %v481_v21, %v478_v19  ;;  %v620_v29 = vld [vmem:[%s6822_s1 + $0x1260] sm:$0xff]  ;;  %v430_v31 = vld [vmem:[%s6822_s1 + $0xc70] sm:$0xff]  ;;  %v3313_v35 = vpack.c.bf16 %v624_v23, %v621_v22  ;;  %vm3885_vm0 = vmmov 0  }
 0x108   :  { %v433_v32 = vld [vmem:[%s6822_s1 + $0xc88] sm:$0xff]  ;;  %3310 = vmatprep.subr.bf16.mxu0 %v3309_v46  ;;  %v623_v36 = vld [vmem:[%s6822_s1 + $0x1278] sm:$0xff]  ;;  %v484_v37 = vld [vmem:[%s6822_s1 + $0xe20] sm:$0xff]  ;;  %1995 = vmatprep.mubr.f32.mxu1 %v4824_v20  ;;  %vm2373_vm1 = vcmask 1043456   ;;  %vm3887_vm2 = vmmov 1   ;;  %vm2369_vm4 = vcmask 359424  }
 0x109   :  { %v487_v38 = vld [vmem:[%s6822_s1 + $0xe38] sm:$0xff]  ;;  %v630_v41 = vld [vmem:[%s6822_s1 + $0x12b0] sm:$0xff]  ;;  %1502 = vmatprep.mubr.f32.mxu0 %v5626_v24  ;;  %v3635_v6 = vpack.c.bf16 %v433_v32, %v430_v31  ;;  %v3315_v34 = vpack.c.bf16 %v623_v36, %v620_v29  ;;  %v436_v43 = vld [vmem:[%s6822_s1 + $0xca0] sm:$0xff]  ;;  %vm2517_vm5 = vcmask 74752  }
 0x10a   :  { %v627_v40 = vld [vmem:[%s6822_s1 + $0x1298] sm:$0xff]  ;;  %3632 = vmatpush3.bf16.msra.mxu1 %v3631_v26  ;;  %v3637_v42 = vpack.c.bf16 %v487_v38, %v484_v37  ;;  %v626_v20 = vld [vmem:[%s6822_s1 + $0x1290] sm:$0xff]  ;;  %v629_v48 = vld [vmem:[%s6822_s1 + $0x12a8] sm:$0xff] }
 0x10b   :  { %3312 = vmatpush1.bf16.msra.mxu0 %v3311_v33  ;;  %3634 = vmatprep.subr.bf16.mxu1 %v3633_v27  ;;  %v439_v44 = vld [vmem:[%s6822_s1 + $0xcb8] sm:$0xff]  ;;  %v3317_v45 = vpack.c.bf16 %v630_v41, %v627_v40  ;;  %v490_v28 = vld [vmem:[%s6822_s1 + $0xe50] sm:$0xff]  ;;  %v493_v50 = vld [vmem:[%s6822_s1 + $0xe68] sm:$0xff]  ;;  %v3319_v53 = vpack.c.bf16 %v629_v48, %v626_v20 }
 0x10c   :  { %3314 = vmatprep.subr.bf16.mxu0 %v3313_v35  ;;  %v633_v51 = vld [vmem:[%s6822_s1 + $0x12c8] sm:$0xff]  ;;  %v636_v52 = vld [vmem:[%s6822_s1 + $0x12e0] sm:$0xff]  ;;  %v3639_v49 = vpack.c.bf16 %v439_v44, %v436_v43  ;;  %v3641_v54 = vpack.c.bf16 %v493_v50, %v490_v28  ;;  %v442_v56 = vld [vmem:[%s6822_s1 + $0xcd0] sm:$0xff] }
 0x10d   :  { %v632_v55 = vld [vmem:[%s6822_s1 + $0x12c0] sm:$0xff]  ;;  %v445_v57 = vld [vmem:[%s6822_s1 + $0xce8] sm:$0xff]  ;;  %v3321_v58 = vpack.c.bf16 %v636_v52, %v633_v51  ;;  %v635_v59 = vld [vmem:[%s6822_s1 + $0x12d8] sm:$0xff] }
 0x10e   :  { %3636 = vmatpush3.bf16.msra.mxu1 %v3635_v6  ;;  %v496_v60 = vld [vmem:[%s6822_s1 + $0xe80] sm:$0xff]  ;;  %v499_v0 = vld [vmem:[%s6822_s1 + $0xe98] sm:$0xff]  ;;  %v642_v1 = vld [vmem:[%s6822_s1 + $0x1310] sm:$0xff]  ;;  %v3643_v2 = vpack.c.bf16 %v445_v57, %v442_v56  ;;  %v3323_v3 = vpack.c.bf16 %v635_v59, %v632_v55 }
 0x10f   :  { %3316 = vmatpush1.bf16.msra.mxu0 %v3315_v34  ;;  %3638 = vmatprep.subr.bf16.mxu1 %v3637_v42  ;;  %v639_v30 = vld [vmem:[%s6822_s1 + $0x12f8] sm:$0xff]  ;;  %v3645_v4 = vpack.c.bf16 %v499_v0, %v496_v60  ;;  %v638_v5 = vld [vmem:[%s6822_s1 + $0x12f0] sm:$0xff]  ;;  %v448_v7 = vld [vmem:[%s6822_s1 + $0xd00] sm:$0xff] }
 0x110   :  { %3318 = vmatprep.subr.bf16.mxu0 %v3317_v45  ;;  %v451_v8 = vld [vmem:[%s6822_s1 + $0xd18] sm:$0xff]  ;;  %v3325_v9 = vpack.c.bf16 %v642_v1, %v639_v30  ;;  %v641_v10 = vld [vmem:[%s6822_s1 + $0x1308] sm:$0xff]  ;;  %v502_v14 = vld [vmem:[%s6822_s1 + $0xeb0] sm:$0xff] }
 0x111   :  { %v505_v25 = vld [vmem:[%s6822_s1 + $0xec8] sm:$0xff]  ;;  %v648_v15 = vld [vmem:[%s6822_s1 + $0x1340] sm:$0xff]  ;;  %v3647_v16 = vpack.c.bf16 %v451_v8, %v448_v7  ;;  %v3327_v17 = vpack.c.bf16 %v641_v10, %v638_v5  ;;  %v454_v19 = vld [vmem:[%s6822_s1 + $0xd30] sm:$0xff] }
 0x112   :  { %3640 = vmatpush3.bf16.msra.mxu1 %v3639_v49  ;;  %v645_v39 = vld [vmem:[%s6822_s1 + $0x1328] sm:$0xff]  ;;  %v3649_v46 = vpack.c.bf16 %v505_v25, %v502_v14  ;;  %v644_v18 = vld [vmem:[%s6822_s1 + $0x1320] sm:$0xff]  ;;  %v647_v23 = vld [vmem:[%s6822_s1 + $0x1338] sm:$0xff] }
 0x113   :  { %3320 = vmatpush1.bf16.msra.mxu0 %v3319_v53  ;;  %3642 = vmatprep.subr.bf16.mxu1 %v3641_v54  ;;  %v457_v21 = vld [vmem:[%s6822_s1 + $0xd48] sm:$0xff]  ;;  %v3329_v22 = vpack.c.bf16 %v648_v15, %v645_v39  ;;  %v508_v26 = vld [vmem:[%s6822_s1 + $0xee0] sm:$0xff]  ;;  %v511_v33 = vld [vmem:[%s6822_s1 + $0xef8] sm:$0xff]  ;;  %v3331_v32 = vpack.c.bf16 %v647_v23, %v644_v18 }
 0x114   :  { %3322 = vmatprep.subr.bf16.mxu0 %v3321_v58  ;;  %v651_v27 = vld [vmem:[%s6822_s1 + $0x1358] sm:$0xff]  ;;  %v654_v29 = vld [vmem:[%s6822_s1 + $0x1370] sm:$0xff]  ;;  %v3651_v31 = vpack.c.bf16 %v457_v21, %v454_v19  ;;  %v3653_v35 = vpack.c.bf16 %v511_v33, %v508_v26  ;;  %v460_v37 = vld [vmem:[%s6822_s1 + $0xd60] sm:$0xff] }
 0x115   :  { %v650_v36 = vld [vmem:[%s6822_s1 + $0x1350] sm:$0xff]  ;;  %v463_v38 = vld [vmem:[%s6822_s1 + $0xd78] sm:$0xff]  ;;  %v3333_v40 = vpack.c.bf16 %v654_v29, %v651_v27  ;;  %v653_v41 = vld [vmem:[%s6822_s1 + $0x1368] sm:$0xff] }
 0x116   :  { %3644 = vmatpush3.bf16.msra.mxu1 %v3643_v2  ;;  %v562_v6 = vld [vmem:[%s6822_s1 + $0x1090] sm:$0xff]  ;;  %v565_v34 = vld [vmem:[%s6822_s1 + $0x10a8] sm:$0xff]  ;;  %v660_v20 = vld [vmem:[%s6822_s1 + $0x13a0] sm:$0xff]  ;;  %v3655_v43 = vpack.c.bf16 %v463_v38, %v460_v37  ;;  %v3335_v44 = vpack.c.bf16 %v653_v41, %v650_v36 }
 0x117   :  { %3324 = vmatpush1.bf16.msra.mxu0 %v3323_v3  ;;  %3646 = vmatprep.subr.bf16.mxu1 %v3645_v4  ;;  %v657_v42 = vld [vmem:[%s6822_s1 + $0x1388] sm:$0xff]  ;;  %v3657_v45 = vpack.c.bf16 %v565_v34, %v562_v6  ;;  %v656_v48 = vld [vmem:[%s6822_s1 + $0x1380] sm:$0xff]  ;;  %v514_v28 = vld [vmem:[%s6822_s1 + $0xf10] sm:$0xff] }
 0x118   :  { %3326 = vmatprep.subr.bf16.mxu0 %v3325_v9  ;;  %v517_v50 = vld [vmem:[%s6822_s1 + $0xf28] sm:$0xff]  ;;  %v3337_v51 = vpack.c.bf16 %v660_v20, %v657_v42  ;;  %v659_v52 = vld [vmem:[%s6822_s1 + $0x1398] sm:$0xff]  ;;  %v568_v49 = vld [vmem:[%s6822_s1 + $0x10c0] sm:$0xff] }
 0x119   :  { %v571_v53 = vld [vmem:[%s6822_s1 + $0x10d8] sm:$0xff]  ;;  %v666_v55 = vld [vmem:[%s6822_s1 + $0x13d0] sm:$0xff]  ;;  %v3659_v56 = vpack.c.bf16 %v517_v50, %v514_v28  ;;  %v3339_v57 = vpack.c.bf16 %v659_v52, %v656_v48  ;;  %v520_v60 = vld [vmem:[%s6822_s1 + $0xf40] sm:$0xff] }
 0x11a   :  { %3648 = vmatpush3.bf16.msra.mxu1 %v3647_v16  ;;  %v663_v54 = vld [vmem:[%s6822_s1 + $0x13b8] sm:$0xff]  ;;  %v3661_v58 = vpack.c.bf16 %v571_v53, %v568_v49  ;;  %v662_v59 = vld [vmem:[%s6822_s1 + $0x13b0] sm:$0xff]  ;;  %v665_v1 = vld [vmem:[%s6822_s1 + $0x13c8] sm:$0xff] }
 0x11b   :  { %3328 = vmatpush1.bf16.msra.mxu0 %v3327_v17  ;;  %3650 = vmatprep.subr.bf16.mxu1 %v3649_v46  ;;  %v523_v0 = vld [vmem:[%s6822_s1 + $0xf58] sm:$0xff]  ;;  %v3341_v30 = vpack.c.bf16 %v666_v55, %v663_v54  ;;  %v574_v2 = vld [vmem:[%s6822_s1 + $0x10f0] sm:$0xff]  ;;  %v577_v3 = vld [vmem:[%s6822_s1 + $0x1108] sm:$0xff]  ;;  %v3343_v8 = vpack.c.bf16 %v665_v1, %v662_v59 }
 0x11c   :  { %3330 = vmatprep.subr.bf16.mxu0 %v3329_v22  ;;  %v669_v4 = vld [vmem:[%s6822_s1 + $0x13e8] sm:$0xff]  ;;  %v672_v5 = vld [vmem:[%s6822_s1 + $0x1400] sm:$0xff]  ;;  %v3663_v7 = vpack.c.bf16 %v523_v0, %v520_v60  ;;  %v3665_v9 = vpack.c.bf16 %v577_v3, %v574_v2  ;;  %v526_v10 = vld [vmem:[%s6822_s1 + $0xf70] sm:$0xff] }
 0x11d   :  { %v529_v14 = vld [vmem:[%s6822_s1 + $0xf88] sm:$0xff]  ;;  %v3345_v25 = vpack.c.bf16 %v672_v5, %v669_v4  ;;  %v580_v39 = vld [vmem:[%s6822_s1 + $0x1120] sm:$0xff]  ;;  %v583_v15 = vld [vmem:[%s6822_s1 + $0x1138] sm:$0xff] }
 0x11e   :  { %3652 = vmatpush3.bf16.msra.mxu1 %v3651_v31  ;;  %v675_v16 = vld [vmem:[%s6822_s1 + $0x1418] sm:$0xff]  ;;  %v678_v17 = vld [vmem:[%s6822_s1 + $0x1430] sm:$0xff]  ;;  %v3667_v46 = vpack.c.bf16 %v529_v14, %v526_v10  ;;  %v3669_v19 = vpack.c.bf16 %v583_v15, %v580_v39  ;;  %v532_v22 = vld [vmem:[%s6822_s1 + $0xfa0] sm:$0xff] }
 0x11f   :  { %3332 = vmatpush1.bf16.msra.mxu0 %v3331_v32  ;;  %3654 = vmatprep.subr.bf16.mxu1 %v3653_v35  ;;  %v674_v21 = vld [vmem:[%s6822_s1 + $0x1410] sm:$0xff]  ;;  %v535_v23 = vld [vmem:[%s6822_s1 + $0xfb8] sm:$0xff]  ;;  %v3349_v26 = vpack.c.bf16 %v678_v17, %v675_v16  ;;  %v677_v33 = vld [vmem:[%s6822_s1 + $0x1428] sm:$0xff] }
 0x120   :  { %3334 = vmatprep.subr.bf16.mxu0 %v3333_v40  ;;  %v586_v27 = vld [vmem:[%s6822_s1 + $0x1150] sm:$0xff]  ;;  %v589_v29 = vld [vmem:[%s6822_s1 + $0x1168] sm:$0xff]  ;;  %v684_v32 = vld [vmem:[%s6822_s1 + $0x1460] sm:$0xff]  ;;  %v3671_v35 = vpack.c.bf16 %v535_v23, %v532_v22  ;;  %v3351_v36 = vpack.c.bf16 %v677_v33, %v674_v21 }
 0x121   :  { %v681_v31 = vld [vmem:[%s6822_s1 + $0x1448] sm:$0xff]  ;;  %v3673_v37 = vpack.c.bf16 %v589_v29, %v586_v27  ;;  %v680_v38 = vld [vmem:[%s6822_s1 + $0x1440] sm:$0xff]  ;;  %v538_v40 = vld [vmem:[%s6822_s1 + $0xfd0] sm:$0xff] }
 0x122   :  { %3656 = vmatpush3.bf16.msra.mxu1 %v3655_v43  ;;  %v541_v41 = vld [vmem:[%s6822_s1 + $0xfe8] sm:$0xff]  ;;  %v3353_v6 = vpack.c.bf16 %v684_v32, %v681_v31  ;;  %v683_v34 = vld [vmem:[%s6822_s1 + $0x1458] sm:$0xff]  ;;  %v592_v42 = vld [vmem:[%s6822_s1 + $0x1180] sm:$0xff] }
 0x123   :  { %3336 = vmatpush1.bf16.msra.mxu0 %v3335_v44  ;;  %3658 = vmatprep.subr.bf16.mxu1 %v3657_v45  ;;  %v595_v20 = vld [vmem:[%s6822_s1 + $0x1198] sm:$0xff]  ;;  %v690_v44 = vld [vmem:[%s6822_s1 + $0x1490] sm:$0xff]  ;;  %v3675_v45 = vpack.c.bf16 %v541_v41, %v538_v40  ;;  %v3355_v48 = vpack.c.bf16 %v683_v34, %v680_v38  ;;  %v689_v53 = vld [vmem:[%s6822_s1 + $0x1488] sm:$0xff] }
 0x124   :  { %3338 = vmatprep.subr.bf16.mxu0 %v3337_v51  ;;  %v687_v43 = vld [vmem:[%s6822_s1 + $0x1478] sm:$0xff]  ;;  %v3677_v28 = vpack.c.bf16 %v595_v20, %v592_v42  ;;  %v686_v50 = vld [vmem:[%s6822_s1 + $0x1470] sm:$0xff]  ;;  %v544_v51 = vld [vmem:[%s6822_s1 + $0x1000] sm:$0xff] }
 0x125   :  { %1996 = vmatmul.mubr.f32.vlgmr.msra.gmra.mrb[10].mxu1 %v4804_v13  ;;  %v668_v13 = vld [vmem:[%s6822_s1 + $0x13e0] sm:$0xff]  ;;  %v547_v52 = vld [vmem:[%s6822_s1 + $0x1018] sm:$0xff]  ;;  %v3357_v49 = vpack.c.bf16 %v690_v44, %v687_v43  ;;  %v598_v54 = vld [vmem:[%s6822_s1 + $0x11b0] sm:$0xff]  ;;  %v3359_v59 = vpack.c.bf16 %v689_v53, %v686_v50 }
 0x126   :  { %3660 = vmatpush3.bf16.msra.mxu1 %v3659_v56  ;;  %2065 = vmatprep.mubr.f32.mxu1 %v5223_v62  ;;  %v671_v62 = vld [vmem:[%s6822_s1 + $0x13f8] sm:$0xff]  ;;  %v601_v55 = vld [vmem:[%s6822_s1 + $0x11c8] sm:$0xff]  ;;  %v692_v0 = vld [vmem:[%s6822_s1 + $0x14a0] sm:$0xff] }
 0x127   :  { %3340 = vmatpush1.bf16.msra.mxu0 %v3339_v57  ;;  %3662 = vmatprep.subr.bf16.mxu1 %v3661_v58  ;;  %v3347_v18 = vpack.c.bf16 %v671_v62, %v668_v13  ;;  %v693_v56 = vld [vmem:[%s6822_s1 + $0x14a8] sm:$0xff]  ;;  %v696_v57 = vld [vmem:[%s6822_s1 + $0x14c0] sm:$0xff]  ;;  %v3679_v58 = vpack.c.bf16 %v547_v52, %v544_v51  ;;  %v3681_v60 = vpack.c.bf16 %v601_v55, %v598_v54  ;;  %v695_v3 = vld [vmem:[%s6822_s1 + $0x14b8] sm:$0xff] }
 0x128   :  { %3342 = vmatprep.subr.bf16.mxu0 %v3341_v30  ;;  %v550_v30 = vld [vmem:[%s6822_s1 + $0x1030] sm:$0xff]  ;;  %v553_v1 = vld [vmem:[%s6822_s1 + $0x1048] sm:$0xff]  ;;  %v3361_v2 = vpack.c.bf16 %v696_v57, %v693_v56  ;;  %v604_v4 = vld [vmem:[%s6822_s1 + $0x11e0] sm:$0xff]  ;;  %v3363_v13 = vpack.c.bf16 %v695_v3, %v692_v0 }
 0x129   :  { %v607_v5 = vld [vmem:[%s6822_s1 + $0x11f8] sm:$0xff]  ;;  %v698_v14 = vld [vmem:[%s6822_s1 + $0x14d0] sm:$0xff]  ;;  %v701_v15 = vld [vmem:[%s6822_s1 + $0x14e8] sm:$0xff] }
 0x12a   :  { %3664 = vmatpush3.bf16.msra.mxu1 %v3663_v7  ;;  %v699_v7 = vld [vmem:[%s6822_s1 + $0x14d8] sm:$0xff]  ;;  %v3685_v10 = vpack.c.bf16 %v607_v5, %v604_v4  ;;  %v658_v16 = vld [vmem:[%s6822_s1 + $0x1390] sm:$0xff]  ;;  %v661_v17 = vld [vmem:[%s6822_s1 + $0x13a8] sm:$0xff]  ;;  %v3367_v22 = vpack.c.bf16 %v701_v15, %v698_v14 }
 0x12b   :  { %3344 = vmatpush1.bf16.msra.mxu0 %v3343_v8  ;;  %3666 = vmatprep.subr.bf16.mxu1 %v3665_v9  ;;  %v702_v8 = vld [vmem:[%s6822_s1 + $0x14f0] sm:$0xff]  ;;  %v3683_v9 = vpack.c.bf16 %v553_v1, %v550_v30  ;;  %v559_v62 = vld [vmem:[%s6822_s1 + $0x1078] sm:$0xff]  ;;  %v3689_v23 = vpack.c.bf16 %v661_v17, %v658_v16  ;;  %v613_v27 = vld [vmem:[%s6822_s1 + $0x1228] sm:$0xff] }
 0x12c   :  { %3346 = vmatprep.subr.bf16.mxu0 %v3345_v25  ;;  %v556_v25 = vld [vmem:[%s6822_s1 + $0x1060] sm:$0xff]  ;;  %v3365_v39 = vpack.c.bf16 %v702_v8, %v699_v7  ;;  %v610_v33 = vld [vmem:[%s6822_s1 + $0x1210] sm:$0xff]  ;;  %v707_v29 = vld [vmem:[%s6822_s1 + $0x1518] sm:$0xff] }
 0x12d   :  { %v3687_v21 = vpack.c.bf16 %v559_v62, %v556_v25  ;;  %v664_v31 = vld [vmem:[%s6822_s1 + $0x13c0] sm:$0xff]  ;;  %v667_v32 = vld [vmem:[%s6822_s1 + $0x13d8] sm:$0xff]  ;;  %v3691_v38 = vpack.c.bf16 %v613_v27, %v610_v33  ;;  %v713_v20 = vld [vmem:[%s6822_s1 + $0x1548] sm:$0xff] }
 0x12e   :  { %3668 = vmatpush3.bf16.msra.mxu1 %v3667_v46  ;;  %v705_v46 = vld [vmem:[%s6822_s1 + $0x1508] sm:$0xff]  ;;  %v3693_v41 = vpack.c.bf16 %v667_v32, %v664_v31  ;;  %v616_v34 = vld [vmem:[%s6822_s1 + $0x1240] sm:$0xff]  ;;  %v619_v42 = vld [vmem:[%s6822_s1 + $0x1258] sm:$0xff] }
 0x12f   :  { %3348 = vmatpush1.bf16.msra.mxu0 %v3347_v18  ;;  %3670 = vmatprep.subr.bf16.mxu1 %v3669_v19  ;;  %v708_v18 = vld [vmem:[%s6822_s1 + $0x1520] sm:$0xff]  ;;  %v969_v19 = vcombine.high %v5569_v63, %v5569_v63  ;;  %v670_v43 = vld [vmem:[%s6822_s1 + $0x13f0] sm:$0xff]  ;;  %v673_v44 = vld [vmem:[%s6822_s1 + $0x1408] sm:$0xff]  ;;  %v3695_v50 = vpack.c.bf16 %v619_v42, %v616_v34 }
 0x130   :  { %3350 = vmatprep.subr.bf16.mxu0 %v3349_v26  ;;  %v704_v26 = vld [vmem:[%s6822_s1 + $0x1500] sm:$0xff]  ;;  %v3369_v63 = vpack.c.bf16 %v708_v18, %v705_v46  ;;  %v625_v53 = vld [vmem:[%s6822_s1 + $0x1288] sm:$0xff]  ;;  %v719_v55 = vld [vmem:[%s6822_s1 + $0x1578] sm:$0xff] }
 0x131   :  { %v3371_v40 = vpack.c.bf16 %v707_v29, %v704_v26  ;;  %v716_v52 = vld [vmem:[%s6822_s1 + $0x1560] sm:$0xff]  ;;  %v679_v57 = vld [vmem:[%s6822_s1 + $0x1438] sm:$0xff]  ;;  %v725_v4 = vld [vmem:[%s6822_s1 + $0x15a8] sm:$0xff] }
 0x132   :  { %3672 = vmatpush3.bf16.msra.mxu1 %v3671_v35  ;;  %v711_v35 = vld [vmem:[%s6822_s1 + $0x1538] sm:$0xff]  ;;  %v676_v56 = vld [vmem:[%s6822_s1 + $0x1420] sm:$0xff]  ;;  %v3379_v0 = vpack.c.bf16 %v719_v55, %v716_v52  ;;  %v682_v5 = vld [vmem:[%s6822_s1 + $0x1450] sm:$0xff] }
 0x133   :  { %3352 = vmatpush1.bf16.msra.mxu0 %v3351_v36  ;;  %3674 = vmatprep.subr.bf16.mxu1 %v3673_v37  ;;  %v714_v36 = vld [vmem:[%s6822_s1 + $0x1550] sm:$0xff]  ;;  %v5996_v37 = vrot.slane %v969_v19, %v4208_v11  ;;  %v3701_v30 = vpack.c.bf16 %v679_v57, %v676_v56  ;;  %v628_v1 = vld [vmem:[%s6822_s1 + $0x12a0] sm:$0xff]  ;;  %v685_v7 = vld [vmem:[%s6822_s1 + $0x1468] sm:$0xff] }
 0x134   :  { %3354 = vmatprep.subr.bf16.mxu0 %v3353_v6  ;;  %v710_v6 = vld [vmem:[%s6822_s1 + $0x1530] sm:$0xff]  ;;  %v3373_v11 = vpack.c.bf16 %v714_v36, %v711_v35  ;;  %v729_v8 = vld [vmem:[%s6822_s1 + $0x15c8] sm:$0xff]  ;;  %v3705_v14 = vpack.c.bf16 %v685_v7, %v682_v5  ;;  %v728_v25 = vld [vmem:[%s6822_s1 + $0x15c0] sm:$0xff] }
 0x135   :  { %v3375_v51 = vpack.c.bf16 %v713_v20, %v710_v6  ;;  %v634_v62 = vld [vmem:[%s6822_s1 + $0x12d0] sm:$0xff]  ;;  %v731_v16 = vld [vmem:[%s6822_s1 + $0x15d8] sm:$0xff]  ;;  %v688_v17 = vld [vmem:[%s6822_s1 + $0x1480] sm:$0xff] }
 0x136   :  { %3676 = vmatpush3.bf16.msra.mxu1 %v3675_v45  ;;  %v717_v45 = vld [vmem:[%s6822_s1 + $0x1568] sm:$0xff]  ;;  %v691_v46 = vld [vmem:[%s6822_s1 + $0x1498] sm:$0xff]  ;;  %v738_v19 = vld [vmem:[%s6822_s1 + $0x1610] sm:$0xff] }
 0x137   :  { %3356 = vmatpush1.bf16.msra.mxu0 %v3355_v48  ;;  %3678 = vmatprep.subr.bf16.mxu1 %v3677_v28  ;;  %v720_v48 = vld [vmem:[%s6822_s1 + $0x1580] sm:$0xff]  ;;  %v6025_v28 = vcombine.high %v5996_v37, %v5996_v37  ;;  %v735_v18 = vld [vmem:[%s6822_s1 + $0x15f8] sm:$0xff]  ;;  %v734_v26 = vld [vmem:[%s6822_s1 + $0x15f0] sm:$0xff] }
 0x138   :  { %3358 = vmatprep.subr.bf16.mxu0 %v3357_v49  ;;  %v622_v49 = vld [vmem:[%s6822_s1 + $0x1270] sm:$0xff]  ;;  %v3377_v54 = vpack.c.bf16 %v720_v48, %v717_v45  ;;  %v640_v33 = vld [vmem:[%s6822_s1 + $0x1300] sm:$0xff]  ;;  %v643_v27 = vld [vmem:[%s6822_s1 + $0x1318] sm:$0xff] }
 0x139   :  { %v737_v29 = vld [vmem:[%s6822_s1 + $0x1608] sm:$0xff]  ;;  %v694_v31 = vld [vmem:[%s6822_s1 + $0x14b0] sm:$0xff]  ;;  %v744_v36 = vld [vmem:[%s6822_s1 + $0x1640] sm:$0xff] }
 0x13a   :  { %3680 = vmatpush3.bf16.msra.mxu1 %v3679_v58  ;;  %v723_v58 = vld [vmem:[%s6822_s1 + $0x1598] sm:$0xff]  ;;  %v697_v32 = vld [vmem:[%s6822_s1 + $0x14c8] sm:$0xff]  ;;  %v740_v6 = vld [vmem:[%s6822_s1 + $0x1620] sm:$0xff] }
 0x13b   :  { %3360 = vmatpush1.bf16.msra.mxu0 %v3359_v59  ;;  %3682 = vmatprep.subr.bf16.mxu1 %v3681_v60  ;;  %v726_v59 = vld [vmem:[%s6822_s1 + $0x15b0] sm:$0xff]  ;;  %v3699_v60 = vpack.c.bf16 %v625_v53, %v622_v49  ;;  %v741_v35 = vld [vmem:[%s6822_s1 + $0x1628] sm:$0xff]  ;;  %v703_v45 = vld [vmem:[%s6822_s1 + $0x14f8] sm:$0xff] }
 0x13c   :  { %3362 = vmatprep.subr.bf16.mxu0 %v3361_v2  ;;  %v631_v2 = vld [vmem:[%s6822_s1 + $0x12b8] sm:$0xff]  ;;  %v3381_v3 = vpack.c.bf16 %v726_v59, %v723_v58  ;;  %v646_v34 = vld [vmem:[%s6822_s1 + $0x1330] sm:$0xff]  ;;  %v649_v42 = vld [vmem:[%s6822_s1 + $0x1348] sm:$0xff]  ;;  %v3393_v20 = vpack.c.bf16 %v744_v36, %v741_v35 }
 0x13d   :  { %v746_v53 = vld [vmem:[%s6822_s1 + $0x1650] sm:$0xff]  ;;  %v655_v55 = vld [vmem:[%s6822_s1 + $0x1378] sm:$0xff]  ;;  %v749_v57 = vld [vmem:[%s6822_s1 + $0x1668] sm:$0xff] }
 0x13e   :  { %3684 = vmatpush3.bf16.msra.mxu1 %v3683_v9  ;;  %v732_v9 = vld [vmem:[%s6822_s1 + $0x15e0] sm:$0xff]  ;;  %v754_v58 = vld [vmem:[%s6822_s1 + $0x1690] sm:$0xff]  ;;  %v757_v59 = vld [vmem:[%s6822_s1 + $0x16a8] sm:$0xff] }
 0x13f   :  { %3364 = vmatpush1.bf16.msra.mxu0 %v3363_v13  ;;  %3686 = vmatprep.subr.bf16.mxu1 %v3685_v10  ;;  %v3703_v13 = vpack.c.bf16 %v631_v2, %v628_v1  ;;  %v3385_v15 = vpack.c.bf16 %v732_v9, %v729_v8  ;;  %v3721_v1 = vpack.c.bf16 %v757_v59, %v754_v58  ;;  %v752_v2 = vld [vmem:[%s6822_s1 + $0x1680] sm:$0xff]  ;;  %v755_v7 = vld [vmem:[%s6822_s1 + $0x1698] sm:$0xff]  ;;  %v774_v36 = vld [vmem:[%s6822_s1 + $0x1730] sm:$0xff] }
 0x140   :  { %3366 = vmatprep.subr.bf16.mxu0 %v3365_v39  ;;  %v637_v39 = vld [vmem:[%s6822_s1 + $0x12e8] sm:$0xff]  ;;  %v760_v8 = vld [vmem:[%s6822_s1 + $0x16c0] sm:$0xff]  ;;  %v763_v9 = vld [vmem:[%s6822_s1 + $0x16d8] sm:$0xff] }
 0x141   :  { %v771_v35 = vld [vmem:[%s6822_s1 + $0x1718] sm:$0xff]  ;;  %v784_v58 = vld [vmem:[%s6822_s1 + $0x1780] sm:$0xff]  ;;  %vm3825_vm3 = vmpackc.low %vm2373_vm1, %vm3887_vm2 }
 0x142   :  { %3688 = vmatpush3.bf16.msra.mxu1 %v3687_v21  ;;  %v3707_v21 = vpack.c.bf16 %v637_v39, %v634_v62  ;;  %v3725_v62 = vpack.c.bf16 %v763_v9, %v760_v8  ;;  %v758_v39 = vld [vmem:[%s6822_s1 + $0x16b0] sm:$0xff]  ;;  %v787_v59 = vld [vmem:[%s6822_s1 + $0x1798] sm:$0xff]  ;;  %v793_v9 = vld [vmem:[%s6822_s1 + $0x17c8] sm:$0xff] }
 0x143   :  { %3368 = vmatpush1.bf16.msra.mxu0 %v3367_v22  ;;  %3690 = vmatprep.subr.bf16.mxu1 %v3689_v23  ;;  %v3387_v22 = vpack.c.bf16 %v731_v16, %v728_v25  ;;  %v3709_v23 = vpack.c.bf16 %v691_v46, %v688_v17  ;;  %v3403_v25 = vpack.c.bf16 %v755_v7, %v752_v2  ;;  %v715_v16 = vld [vmem:[%s6822_s1 + $0x1558] sm:$0xff]  ;;  %v761_v46 = vld [vmem:[%s6822_s1 + $0x16c8] sm:$0xff]  ;;  %v782_v2 = vld [vmem:[%s6822_s1 + $0x1770] sm:$0xff] }
 0x144   :  { %3370 = vmatprep.subr.bf16.mxu0 %v3369_v63  ;;  %v3389_v63 = vpack.c.bf16 %v738_v19, %v735_v18  ;;  %v766_v18 = vld [vmem:[%s6822_s1 + $0x16f0] sm:$0xff]  ;;  %v769_v19 = vld [vmem:[%s6822_s1 + $0x1708] sm:$0xff] }
 0x145   :  { %2066 = vmatmul.mubr.f32.vlgmr.msra.gmra.mrb[12].mxu1 %v5194_v47  ;;  %v3697_v47 = vpack.c.bf16 %v673_v44, %v670_v43  ;;  %v743_v43 = vld [vmem:[%s6822_s1 + $0x1638] sm:$0xff]  ;;  %v700_v44 = vld [vmem:[%s6822_s1 + $0x14e0] sm:$0xff]  ;;  %v785_v7 = vld [vmem:[%s6822_s1 + $0x1788] sm:$0xff] }
 0x146   :  { %1503 = vmatmul.mubr.f32.vlgmr.msra.gmra.mrb[0].mxu0 %v5597_v12  ;;  %3692 = vmatpush3.bf16.msra.mxu1 %v3691_v38  ;;  %v3711_v38 = vpack.c.bf16 %v643_v27, %v640_v33  ;;  %v3395_v52 = vpack.c.bf16 %v743_v43, %v740_v6  ;;  %v3717_v49 = vpack.c.bf16 %v703_v45, %v700_v44  ;;  %v718_v27 = vld [vmem:[%s6822_s1 + $0x1570] sm:$0xff]  ;;  %v773_v43 = vld [vmem:[%s6822_s1 + $0x1728] sm:$0xff] }
 0x147   :  { %3372 = vmatpush1.bf16.msra.mxu0 %v3371_v40  ;;  %3694 = vmatprep.subr.bf16.mxu1 %v3693_v41  ;;  %v3391_v40 = vpack.c.bf16 %v737_v29, %v734_v26  ;;  %v3713_v41 = vpack.c.bf16 %v697_v32, %v694_v31  ;;  %v3407_v26 = vpack.c.bf16 %v761_v46, %v758_v39  ;;  %v772_v31 = vld [vmem:[%s6822_s1 + $0x1720] sm:$0xff]  ;;  %v775_v32 = vld [vmem:[%s6822_s1 + $0x1738] sm:$0xff]  ;;  %v770_v6 = vld [vmem:[%s6822_s1 + $0x1710] sm:$0xff] }
 0x148   :  { %3374 = vmatprep.subr.bf16.mxu0 %v3373_v11  ;;  %2135 = vmatprep.mubr.f32.mxu1 %v5626_v24  ;;  %v722_v24 = vld [vmem:[%s6822_s1 + $0x1590] sm:$0xff]  ;;  %v3729_v33 = vpack.c.bf16 %v769_v19, %v766_v18  ;;  %v781_v45 = vld [vmem:[%s6822_s1 + $0x1768] sm:$0xff]  ;;  %v788_v39 = vld [vmem:[%s6822_s1 + $0x17a0] sm:$0xff] }
 0x149   :  { %1573 = vmatprep.mubr.f32.mxu0 %v6025_v28  ;;  %v3383_v10 = vpack.c.bf16 %v725_v4, %v722_v24  ;;  %v3399_v24 = vpack.c.bf16 %v749_v57, %v746_v53  ;;  %v709_v4 = vld [vmem:[%s6822_s1 + $0x1528] sm:$0xff]  ;;  %v778_v44 = vld [vmem:[%s6822_s1 + $0x1750] sm:$0xff]  ;;  %v776_v53 = vld [vmem:[%s6822_s1 + $0x1740] sm:$0xff] }
 0x14a   :  { %3696 = vmatpush3.bf16.msra.mxu1 %v3695_v50  ;;  %v747_v50 = vld [vmem:[%s6822_s1 + $0x1658] sm:$0xff]  ;;  %v790_v8 = vld [vmem:[%s6822_s1 + $0x17b0] sm:$0xff]  ;;  %v796_v18 = vld [vmem:[%s6822_s1 + $0x17e0] sm:$0xff] }
 0x14b   :  { %3376 = vmatpush1.bf16.msra.mxu0 %v3375_v51  ;;  %3698 = vmatprep.subr.bf16.mxu1 %v3697_v47  ;;  %v750_v51 = vld [vmem:[%s6822_s1 + $0x1670] sm:$0xff]  ;;  %v3715_v47 = vpack.c.bf16 %v649_v42, %v646_v34  ;;  %v724_v34 = vld [vmem:[%s6822_s1 + $0x15a0] sm:$0xff]  ;;  %v727_v42 = vld [vmem:[%s6822_s1 + $0x15b8] sm:$0xff] }
 0x14c   :  { %3378 = vmatprep.subr.bf16.mxu0 %v3377_v54  ;;  %v652_v54 = vld [vmem:[%s6822_s1 + $0x1360] sm:$0xff]  ;;  %v3397_v56 = vpack.c.bf16 %v750_v51, %v747_v50  ;;  %v777_v50 = vld [vmem:[%s6822_s1 + $0x1748] sm:$0xff]  ;;  %v779_v57 = vld [vmem:[%s6822_s1 + $0x1758] sm:$0xff] }
 0x14d   :  { %v780_v51 = vld [vmem:[%s6822_s1 + $0x1760] sm:$0xff]  ;;  %v791_v46 = vld [vmem:[%s6822_s1 + $0x17b8] sm:$0xff] }
 0x14e   :  { %3700 = vmatpush3.bf16.msra.mxu1 %v3699_v60  ;;  %v753_v60 = vld [vmem:[%s6822_s1 + $0x1688] sm:$0xff]  ;;  %v799_v19 = vld [vmem:[%s6822_s1 + $0x17f8] sm:$0xff] }
 0x14f   :  { %3380 = vmatpush1.bf16.msra.mxu0 %v3379_v0  ;;  %3702 = vmatprep.subr.bf16.mxu1 %v3701_v30  ;;  %v756_v0 = vld [vmem:[%s6822_s1 + $0x16a0] sm:$0xff]  ;;  %v3719_v30 = vpack.c.bf16 %v655_v55, %v652_v54  ;;  %v730_v54 = vld [vmem:[%s6822_s1 + $0x15d0] sm:$0xff]  ;;  %v733_v55 = vld [vmem:[%s6822_s1 + $0x15e8] sm:$0xff] }
 0x150   :  { %3382 = vmatprep.subr.bf16.mxu0 %v3381_v3  ;;  %v706_v3 = vld [vmem:[%s6822_s1 + $0x1510] sm:$0xff]  ;;  %v3401_v5 = vpack.c.bf16 %v756_v0, %v753_v60  ;;  %v783_v60 = vld [vmem:[%s6822_s1 + $0x1778] sm:$0xff] }
 0x151   :  { %v786_v0 = vld [vmem:[%s6822_s1 + $0x1790] sm:$0xff] }
 0x152   :  { %3704 = vmatpush3.bf16.msra.mxu1 %v3703_v13  ;;  %v759_v13 = vld [vmem:[%s6822_s1 + $0x16b8] sm:$0xff] }
 0x153   :  { %3384 = vmatpush1.bf16.msra.mxu0 %v3383_v10  ;;  %3706 = vmatprep.subr.bf16.mxu1 %v3705_v14  ;;  %v762_v10 = vld [vmem:[%s6822_s1 + $0x16d0] sm:$0xff]  ;;  %v3723_v14 = vpack.c.bf16 %v709_v4, %v706_v3  ;;  %v736_v3 = vld [vmem:[%s6822_s1 + $0x1600] sm:$0xff]  ;;  %v739_v4 = vld [vmem:[%s6822_s1 + $0x1618] sm:$0xff] }
 0x154   :  { %3386 = vmatprep.subr.bf16.mxu0 %v3385_v15  ;;  %v712_v15 = vld [vmem:[%s6822_s1 + $0x1540] sm:$0xff]  ;;  %v3405_v17 = vpack.c.bf16 %v762_v10, %v759_v13  ;;  %v789_v13 = vld [vmem:[%s6822_s1 + $0x17a8] sm:$0xff] }
 0x155   :  { %v792_v10 = vld [vmem:[%s6822_s1 + $0x17c0] sm:$0xff] }
 0x156   :  { %3708 = vmatpush3.bf16.msra.mxu1 %v3707_v21  ;;  %v765_v21 = vld [vmem:[%s6822_s1 + $0x16e8] sm:$0xff] }
 0x157   :  { %3388 = vmatpush1.bf16.msra.mxu0 %v3387_v22  ;;  %3710 = vmatprep.subr.bf16.mxu1 %v3709_v23  ;;  %v768_v22 = vld [vmem:[%s6822_s1 + $0x1700] sm:$0xff]  ;;  %v3727_v23 = vpack.c.bf16 %v715_v16, %v712_v15  ;;  %v742_v15 = vld [vmem:[%s6822_s1 + $0x1630] sm:$0xff]  ;;  %v745_v16 = vld [vmem:[%s6822_s1 + $0x1648] sm:$0xff] }
 0x158   :  { %v6135_v11 = vpop.f32.mrb[0].mxu1  ;;  %3390 = vmatprep.subr.bf16.mxu0 %v3389_v63  ;;  %v721_v63 = vld [vmem:[%s6822_s1 + $0x1588] sm:$0xff]  ;;  %v3409_v29 = vpack.c.bf16 %v768_v22, %v765_v21  ;;  %v795_v22 = vld [vmem:[%s6822_s1 + $0x17d8] sm:$0xff] }
 0x159   :  { %v6146_v48 = vpop.f32.mrb[1].mxu1 }
 0x15a   :  { %3712 = vmatpush3.bf16.msra.mxu1 %v3711_v38  ;;  %v3731_v38 = vpack.c.bf16 %v721_v63, %v718_v27  ;;  %v3427_v27 = vpack.c.bf16 %v791_v46, %v788_v39  ;;  %v3749_v63 = vpack.c.bf16 %v799_v19, %v796_v18  ;;  %v822_v39 = vld [vmem:[%s6822_s1 + $0x18b0] sm:$0xff]  ;;  %v820_v18 = vld [vmem:[%s6822_s1 + $0x18a0] sm:$0xff]  ;;  %v823_v19 = vld [vmem:[%s6822_s1 + $0x18b8] sm:$0xff] }
 0x15b   :  { %3392 = vmatpush1.bf16.msra.mxu0 %v3391_v40  ;;  %3714 = vmatprep.subr.bf16.mxu1 %v3713_v41  ;;  %v3733_v41 = vpack.c.bf16 %v775_v32, %v772_v31  ;;  %v751_v31 = vld [vmem:[%s6822_s1 + $0x1678] sm:$0xff]  ;;  %v818_v46 = vld [vmem:[%s6822_s1 + $0x1890] sm:$0xff] }
 0x15c   :  { %3394 = vmatprep.subr.bf16.mxu0 %v3393_v20  ;;  %v3413_v20 = vpack.c.bf16 %v774_v36, %v771_v35  ;;  %v797_v35 = vld [vmem:[%s6822_s1 + $0x17e8] sm:$0xff]  ;;  %v850_v36 = vld [vmem:[%s6822_s1 + $0x1990] sm:$0xff] }
 0x15e   :  { %3716 = vmatpush3.bf16.msra.mxu1 %v3715_v47  ;;  %v3735_v47 = vpack.c.bf16 %v727_v42, %v724_v34 }
 0x15f   :  { %3396 = vmatpush1.bf16.msra.mxu0 %v3395_v52  ;;  %3718 = vmatprep.subr.bf16.mxu1 %v3717_v49  ;;  %v3415_v52 = vpack.c.bf16 %v773_v43, %v770_v6  ;;  %v3737_v49 = vpack.c.bf16 %v781_v45, %v778_v44  ;;  %v802_v43 = vld [vmem:[%s6822_s1 + $0x1810] sm:$0xff]  ;;  %v805_v44 = vld [vmem:[%s6822_s1 + $0x1828] sm:$0xff] }
 0x160   :  { %3398 = vmatprep.subr.bf16.mxu0 %v3397_v56  ;;  %v3417_v56 = vpack.c.bf16 %v780_v51, %v777_v50  ;;  %v803_v50 = vld [vmem:[%s6822_s1 + $0x1818] sm:$0xff]  ;;  %v856_v51 = vld [vmem:[%s6822_s1 + $0x19c0] sm:$0xff] }
 0x162   :  { %3720 = vmatpush3.bf16.msra.mxu1 %v3719_v30  ;;  %v3739_v30 = vpack.c.bf16 %v733_v55, %v730_v54  ;;  %v3755_v54 = vpack.c.bf16 %v805_v44, %v802_v43 }
 0x163   :  { %3400 = vmatpush1.bf16.msra.mxu0 %v3399_v24  ;;  %3722 = vmatprep.subr.bf16.mxu1 %v3721_v1  ;;  %v3419_v24 = vpack.c.bf16 %v779_v57, %v776_v53  ;;  %v3741_v1 = vpack.c.bf16 %v787_v59, %v784_v58  ;;  %v6401_v53 = vld.sshfl [vmem:[%s6821_s0 + $0x20] sm:$0x33 pattern:$0x76325410]  ;;  %v806_v57 = vld [vmem:[%s6822_s1 + $0x1830] sm:$0xff]  ;;  %v811_v59 = vld [vmem:[%s6822_s1 + $0x1858] sm:$0xff] }
 0x164   :  { %3402 = vmatprep.subr.bf16.mxu0 %v3401_v5  ;;  %v3421_v5 = vpack.c.bf16 %v786_v0, %v783_v60  ;;  %v808_v58 = vld [vmem:[%s6822_s1 + $0x1840] sm:$0xff]  ;;  %v809_v0 = vld [vmem:[%s6822_s1 + $0x1848] sm:$0xff] }
 0x165   :  { %2136 = vmatmul.mubr.f32.vlgmr.msra.gmra.mrb[14].mxu1 %v5597_v12  ;;  %v764_v12 = vld [vmem:[%s6822_s1 + $0x16e0] sm:$0xff] }
 0x166   :  { %3724 = vmatpush3.bf16.msra.mxu1 %v3723_v14  ;;  %2205 = vmatprep.mubr.f32.mxu1 %v6025_v28  ;;  %v767_v28 = vld [vmem:[%s6822_s1 + $0x16f8] sm:$0xff]  ;;  %v3743_v14 = vpack.c.bf16 %v739_v4, %v736_v3  ;;  %v816_v3 = vld [vmem:[%s6822_s1 + $0x1880] sm:$0xff]  ;;  %v3759_v4 = vpack.c.bf16 %v811_v59, %v808_v58 }
 0x167   :  { %3404 = vmatpush1.bf16.msra.mxu0 %v3403_v25  ;;  %3726 = vmatprep.subr.bf16.mxu1 %v3725_v62  ;;  %v3411_v40 = vpack.c.bf16 %v767_v28, %v764_v12  ;;  %v3423_v25 = vpack.c.bf16 %v785_v7, %v782_v2  ;;  %v3745_v62 = vpack.c.bf16 %v793_v9, %v790_v8  ;;  %v748_v28 = vld [vmem:[%s6822_s1 + $0x1660] sm:$0xff]  ;;  %v813_v2 = vld [vmem:[%s6822_s1 + $0x1868] sm:$0xff]  ;;  %v814_v9 = vld [vmem:[%s6822_s1 + $0x1870] sm:$0xff] }
 0x168   :  { %3406 = vmatprep.subr.bf16.mxu0 %v3405_v17  ;;  %v3425_v17 = vpack.c.bf16 %v792_v10, %v789_v13  ;;  %v3751_v6 = vpack.c.bf16 %v751_v31, %v748_v28  ;;  %v812_v8 = vld [vmem:[%s6822_s1 + $0x1860] sm:$0xff]  ;;  %v817_v13 = vld [vmem:[%s6822_s1 + $0x1888] sm:$0xff]  ;;  %v815_v10 = vld [vmem:[%s6822_s1 + $0x1878] sm:$0xff] }
 0x169   :  { %v824_v31 = vld [vmem:[%s6822_s1 + $0x18c0] sm:$0xff] }
 0x16a   :  { %3728 = vmatpush3.bf16.msra.mxu1 %v3727_v23  ;;  %v798_v23 = vld [vmem:[%s6822_s1 + $0x17f0] sm:$0xff]  ;;  %v840_v58 = vld [vmem:[%s6822_s1 + $0x1940] sm:$0xff] }
 0x16b   :  { %3408 = vmatpush1.bf16.msra.mxu0 %v3407_v26  ;;  %3730 = vmatprep.subr.bf16.mxu1 %v3729_v33  ;;  %v3747_v33 = vpack.c.bf16 %v745_v16, %v742_v15  ;;  %v3429_v32 = vpack.c.bf16 %v798_v23, %v795_v22  ;;  %v3763_v15 = vpack.c.bf16 %v817_v13, %v814_v9  ;;  %v821_v22 = vld [vmem:[%s6822_s1 + $0x18a8] sm:$0xff]  ;;  %v874_v23 = vld [vmem:[%s6822_s1 + $0x1a50] sm:$0xff]  ;;  %v843_v9 = vld [vmem:[%s6822_s1 + $0x1958] sm:$0xff] }
 0x16c   :  { %3410 = vmatprep.subr.bf16.mxu0 %v3409_v29  ;;  %v794_v29 = vld [vmem:[%s6822_s1 + $0x17d0] sm:$0xff]  ;;  %v3443_v16 = vpack.c.bf16 %v815_v10, %v812_v8 }
 0x16d   :  { %v3431_v34 = vpack.c.bf16 %v797_v35, %v794_v29  ;;  %v3447_v29 = vpack.c.bf16 %v821_v22, %v818_v46  ;;  %v829_v35 = vld [vmem:[%s6822_s1 + $0x18e8] sm:$0xff]  ;;  %v846_v13 = vld [vmem:[%s6822_s1 + $0x1970] sm:$0xff] }
 0x16e   :  { %3732 = vmatpush3.bf16.msra.mxu1 %v3731_v38  ;;  %v853_v38 = vld [vmem:[%s6822_s1 + $0x19a8] sm:$0xff] }
 0x16f   :  { %3412 = vmatpush1.bf16.msra.mxu0 %v3411_v40  ;;  %3734 = vmatprep.subr.bf16.mxu1 %v3733_v41  ;;  %v801_v40 = vld [vmem:[%s6822_s1 + $0x1808] sm:$0xff]  ;;  %v804_v41 = vld [vmem:[%s6822_s1 + $0x1820] sm:$0xff]  ;;  %v3753_v42 = vpack.c.bf16 %v853_v38, %v850_v36  ;;  %v827_v38 = vld [vmem:[%s6822_s1 + $0x18d8] sm:$0xff] }
 0x170   :  { %3414 = vmatprep.subr.bf16.mxu0 %v3413_v20  ;;  %v800_v20 = vld [vmem:[%s6822_s1 + $0x1800] sm:$0xff]  ;;  %v3433_v45 = vpack.c.bf16 %v804_v41, %v801_v40  ;;  %v883_v41 = vld [vmem:[%s6822_s1 + $0x1a98] sm:$0xff]  ;;  %v3451_v44 = vpack.c.bf16 %v827_v38, %v824_v31  ;;  %v854_v31 = vld [vmem:[%s6822_s1 + $0x19b0] sm:$0xff] }
 0x171   :  { %v3435_v55 = vpack.c.bf16 %v803_v50, %v800_v20  ;;  %v880_v40 = vld [vmem:[%s6822_s1 + $0x1a80] sm:$0xff]  ;;  %v830_v50 = vld [vmem:[%s6822_s1 + $0x18f0] sm:$0xff] }
 0x172   :  { %3736 = vmatpush3.bf16.msra.mxu1 %v3735_v47  ;;  %v859_v47 = vld [vmem:[%s6822_s1 + $0x19d8] sm:$0xff]  ;;  %v6509_v20 = vld [vmem:[%s6823_s2] sm:$0x7] }
 0x173   :  { %3416 = vmatpush1.bf16.msra.mxu0 %v3415_v52  ;;  %3738 = vmatprep.subr.bf16.mxu1 %v3737_v49  ;;  %v807_v52 = vld [vmem:[%s6822_s1 + $0x1838] sm:$0xff]  ;;  %v810_v49 = vld [vmem:[%s6822_s1 + $0x1850] sm:$0xff] }
 0x174   :  { %3418 = vmatprep.subr.bf16.mxu0 %v3417_v56  ;;  %v3757_v56 = vpack.c.bf16 %v859_v47, %v856_v51  ;;  %v3437_v60 = vpack.c.bf16 %v810_v49, %v807_v52  ;;  %v832_v51 = vld [vmem:[%s6822_s1 + $0x1900] sm:$0xff]  ;;  %v835_v47 = vld [vmem:[%s6822_s1 + $0x1918] sm:$0xff]  ;;  %v833_v49 = vld [vmem:[%s6822_s1 + $0x1908] sm:$0xff] }
 0x175   :  { %v3775_v59 = vpack.c.bf16 %v835_v47, %v832_v51  ;;  %v869_v51 = vld [vmem:[%s6822_s1 + $0x1a28] sm:$0xff] }
 0x176   :  { %3740 = vmatpush3.bf16.msra.mxu1 %v3739_v30  ;;  %v862_v30 = vld [vmem:[%s6822_s1 + $0x19f0] sm:$0xff]  ;;  %v873_v47 = vld [vmem:[%s6822_s1 + $0x1a48] sm:$0xff] }
 0x177   :  { %3420 = vmatpush1.bf16.msra.mxu0 %v3419_v24  ;;  %3742 = vmatprep.subr.bf16.mxu1 %v3741_v1  ;;  %v865_v24 = vld [vmem:[%s6822_s1 + $0x1a08] sm:$0xff]  ;;  %v993_v1 = vcombine.high %v6401_v53, %v6401_v53 }
 0x178   :  { %3422 = vmatprep.subr.bf16.mxu0 %v3421_v5  ;;  %v2581_v21 = vpop.f32.mrb[2].mxu1  ;;  %v3439_v5 = vpack.c.bf16 %v809_v0, %v806_v57  ;;  %v3761_v7 = vpack.c.bf16 %v865_v24, %v862_v30  ;;  %v837_v57 = vld [vmem:[%s6822_s1 + $0x1928] sm:$0xff]  ;;  %v836_v30 = vld [vmem:[%s6822_s1 + $0x1920] sm:$0xff]  ;;  %v838_v24 = vld [vmem:[%s6822_s1 + $0x1930] sm:$0xff] }
 0x179   :  { %v2582_v26 = vpop.f32.mrb[3].mxu1 }
 0x17a   :  { %3744 = vmatpush3.bf16.msra.mxu1 %v3743_v14  ;;  %v6348_v12 = vadd.f32 %v2582_v26, %v2581_v21  ;;  %v868_v14 = vld [vmem:[%s6822_s1 + $0x1a20] sm:$0xff]  ;;  %v877_v26 = vld [vmem:[%s6822_s1 + $0x1a68] sm:$0xff] }
 0x17b   :  { %3424 = vmatpush1.bf16.msra.mxu0 %v3423_v25  ;;  %3746 = vmatprep.subr.bf16.mxu1 %v3745_v62  ;;  %v871_v25 = vld [vmem:[%s6822_s1 + $0x1a38] sm:$0xff]  ;;  %v3769_v28 = vpack.c.bf16 %v877_v26, %v874_v23  ;;  %v848_v26 = vld [vmem:[%s6822_s1 + $0x1980] sm:$0xff] }
 0x17c   :  { %3426 = vmatprep.subr.bf16.mxu0 %v3425_v17  ;;  %v819_v62 = vld [vmem:[%s6822_s1 + $0x1898] sm:$0xff]  ;;  %v3765_v17 = vpack.c.bf16 %v871_v25, %v868_v14 }
 0x17d   :  { %v3445_v21 = vpack.c.bf16 %v822_v39, %v819_v62  ;;  %v847_v39 = vld [vmem:[%s6822_s1 + $0x1978] sm:$0xff] }
 0x17e   :  { %3748 = vmatpush3.bf16.msra.mxu1 %v3747_v33  ;;  %v825_v33 = vld [vmem:[%s6822_s1 + $0x18c8] sm:$0xff] }
 0x17f   :  { %3428 = vmatpush1.bf16.msra.mxu0 %v3427_v27  ;;  %3750 = vmatprep.subr.bf16.mxu1 %v3749_v63  ;;  %v828_v27 = vld [vmem:[%s6822_s1 + $0x18e0] sm:$0xff]  ;;  %v3767_v63 = vpack.c.bf16 %v823_v19, %v820_v18  ;;  %v849_v18 = vld [vmem:[%s6822_s1 + $0x1988] sm:$0xff] }
 0x180   :  { %3430 = vmatprep.subr.bf16.mxu0 %v3429_v32  ;;  %v826_v32 = vld [vmem:[%s6822_s1 + $0x18d0] sm:$0xff]  ;;  %v3449_v36 = vpack.c.bf16 %v828_v27, %v825_v33  ;;  %v852_v19 = vld [vmem:[%s6822_s1 + $0x19a0] sm:$0xff]  ;;  %v851_v33 = vld [vmem:[%s6822_s1 + $0x1998] sm:$0xff] }
 0x181   :  { %v3771_v43 = vpack.c.bf16 %v829_v35, %v826_v32  ;;  %v3465_v23 = vpack.c.bf16 %v852_v19, %v849_v18  ;;  %v855_v27 = vld [vmem:[%s6822_s1 + $0x19b8] sm:$0xff]  ;;  %v857_v32 = vld [vmem:[%s6822_s1 + $0x19c8] sm:$0xff] }
 0x182   :  { %3752 = vmatpush3.bf16.msra.mxu1 %v3751_v6  ;;  %v6498_v6 = vsub.s32 2, %v4181_v61  ;;  %v861_v35 = vld [vmem:[%s6822_s1 + $0x19e8] sm:$0xff]  ;;  %v3471_v38 = vpack.c.bf16 %v857_v32, %v854_v31  ;;  %v2326_v31 = vld [vmem:[%s6826_s5 + $0x10] sm:$0xff] }
 0x183   :  { %3432 = vmatpush1.bf16.msra.mxu0 %v3431_v34  ;;  %3754 = vmatprep.subr.bf16.mxu1 %v3753_v42  ;;  %v831_v34 = vld [vmem:[%s6822_s1 + $0x18f8] sm:$0xff]  ;;  %v834_v42 = vld [vmem:[%s6822_s1 + $0x1910] sm:$0xff] }
 0x184   :  { %3434 = vmatprep.subr.bf16.mxu0 %v3433_v45  ;;  %v3773_v45 = vpack.c.bf16 %v883_v41, %v880_v40  ;;  %v3453_v52 = vpack.c.bf16 %v834_v42, %v831_v34  ;;  %v860_v41 = vld [vmem:[%s6822_s1 + $0x19e0] sm:$0xff]  ;;  %v863_v34 = vld [vmem:[%s6822_s1 + $0x19f8] sm:$0xff] }
 0x185   :  { %2206 = vmatmul.mubr.f32.vlgmr.msra.gmra.mrb[16].mxu1 %v5996_v37  ;;  %v867_v42 = vld [vmem:[%s6822_s1 + $0x1a18] sm:$0xff] }
 0x186   :  { %1574 = vmatmul.mubr.f32.vlgmr.msra.gmra.mrb[0].mxu0 %v5996_v37  ;;  %3756 = vmatpush3.bf16.msra.mxu1 %v3755_v54  ;;  %v3441_v37 = vpack.c.bf16 %v816_v3, %v813_v2  ;;  %v886_v54 = vld [vmem:[%s6822_s1 + $0x1ab0] sm:$0xff]  ;;  %v3457_v2 = vpack.c.bf16 %v840_v58, %v837_v57  ;;  %v839_v3 = vld [vmem:[%s6822_s1 + $0x1938] sm:$0xff] }
 0x187   :  { %3436 = vmatpush1.bf16.msra.mxu0 %v3435_v55  ;;  %3758 = vmatprep.subr.bf16.mxu1 %v3757_v56  ;;  %v889_v55 = vld [vmem:[%s6822_s1 + $0x1ac8] sm:$0xff]  ;;  %v909_v56 = vrot.slane %v6509_v20, %v6498_v6  ;;  %v3459_v25 = vpack.c.bf16 %v839_v3, %v836_v30  ;;  %v879_v57 = vld [vmem:[%s6822_s1 + $0x1a78] sm:$0xff]  ;;  %v882_v58 = vld [vmem:[%s6822_s1 + $0x1a90] sm:$0xff] }
 0x188   :  { %3438 = vmatprep.subr.bf16.mxu0 %v3437_v60  ;;  %2275 = vmatprep.mubr.f32.mxu1 %v993_v1  ;;  %v3455_v60 = vpack.c.bf16 %v833_v49, %v830_v50  ;;  %v3777_v0 = vpack.c.bf16 %v889_v55, %v886_v54  ;;  %v866_v50 = vld [vmem:[%s6822_s1 + $0x1a10] sm:$0xff]  ;;  %v872_v55 = vld [vmem:[%s6822_s1 + $0x1a40] sm:$0xff]  ;;  %v881_v30 = vld [vmem:[%s6822_s1 + $0x1a88] sm:$0xff] }
 0x189   :  { %1644 = vmatprep.mubr.f32.mxu0 %v993_v1  ;;  %v841_v1 = vld [vmem:[%s6822_s1 + $0x1948] sm:$0xff]  ;;  %v3479_v49 = vpack.c.bf16 %v869_v51, %v866_v50  ;;  %v2330_v51 = vld [vmem:[%s6826_s5 + $0x30] sm:$0xff] }
 0x18a   :  { %3760 = vmatpush3.bf16.msra.mxu1 %v3759_v4  ;;  %v892_v4 = vld [vmem:[%s6822_s1 + $0x1ae0] sm:$0xff]  ;;  %v3779_v10 = vpack.c.bf16 %v841_v1, %v838_v24  ;;  %v885_v24 = vld [vmem:[%s6822_s1 + $0x1aa8] sm:$0xff] }
 0x18b   :  { %3440 = vmatpush1.bf16.msra.mxu0 %v3439_v5  ;;  %3762 = vmatprep.subr.bf16.mxu1 %v3761_v7  ;;  %v895_v5 = vld [vmem:[%s6822_s1 + $0x1af8] sm:$0xff]  ;;  %v1718_v7 = vadd.f32 %v6348_v12, %v909_v56  ;;  %v844_v12 = vld [vmem:[%s6822_s1 + $0x1960] sm:$0xff] }
 0x18c   :  { %3442 = vmatprep.subr.bf16.mxu0 %v3441_v37  ;;  %v3781_v62 = vpack.c.bf16 %v895_v5, %v892_v4  ;;  %v875_v56 = vld [vmem:[%s6822_s1 + $0x1a58] sm:$0xff]  ;;  %v888_v1 = vld [vmem:[%s6822_s1 + $0x1ac0] sm:$0xff] }
 0x18d   :  { %v3489_v4 = vpack.c.bf16 %v888_v1, %v885_v24  ;;  %v884_v5 = vld [vmem:[%s6822_s1 + $0x1aa0] sm:$0xff]  ;;  %v2335_v24 = vld [vmem:[%s6826_s5 + $0x58] sm:$0xff] }
 0x18e   :  { %3764 = vmatpush3.bf16.msra.mxu1 %v3763_v15  ;;  %v3461_v15 = vpack.c.bf16 %v846_v13, %v843_v9  ;;  %v891_v9 = vld [vmem:[%s6822_s1 + $0x1ad8] sm:$0xff]  ;;  %v894_v13 = vld [vmem:[%s6822_s1 + $0x1af0] sm:$0xff] }
 0x18f   :  { %3444 = vmatpush1.bf16.msra.mxu0 %v3443_v16  ;;  %3766 = vmatprep.subr.bf16.mxu1 %v3765_v17  ;;  %v842_v16 = vld [vmem:[%s6822_s1 + $0x1950] sm:$0xff]  ;;  %v845_v17 = vld [vmem:[%s6822_s1 + $0x1968] sm:$0xff] }
 0x190   :  { %3446 = vmatprep.subr.bf16.mxu0 %v3445_v21  ;;  %v3783_v21 = vpack.c.bf16 %v847_v39, %v844_v12  ;;  %v3463_v22 = vpack.c.bf16 %v845_v17, %v842_v16  ;;  %v893_v12 = vld [vmem:[%s6822_s1 + $0x1ae8] sm:$0xff] }
 0x192   :  { %3768 = vmatpush3.bf16.msra.mxu1 %v3767_v63  ;;  %v858_v63 = vld [vmem:[%s6822_s1 + $0x19d0] sm:$0xff] }
 0x193   :  { %3448 = vmatpush1.bf16.msra.mxu0 %v3447_v29  ;;  %3770 = vmatprep.subr.bf16.mxu1 %v3769_v28  ;;  %v3467_v29 = vpack.c.bf16 %v851_v33, %v848_v26  ;;  %v3469_v28 = vpack.c.bf16 %v858_v63, %v855_v27  ;;  %v2341_v26 = vld [vmem:[%s6826_s5 + $0x88] sm:$0xff] }
 0x194   :  { %3450 = vmatprep.subr.bf16.mxu0 %v3449_v36  ;;  %v864_v36 = vld [vmem:[%s6822_s1 + $0x1a00] sm:$0xff]  ;;  %v2325_v27 = vld [vmem:[%s6826_s5 + $0x8] sm:$0xff] }
 0x195   :  { %v3473_v40 = vpack.c.bf16 %v864_v36, %v861_v35  ;;  %v2327_v35 = vld [vmem:[%s6826_s5 + $0x18] sm:$0xff]  ;;  %v2344_v36 = vld [vmem:[%s6826_s5 + $0xa0] sm:$0xff] }
 0x196   :  { %3772 = vmatpush3.bf16.msra.mxu1 %v3771_v43  ;;  %v870_v43 = vld [vmem:[%s6822_s1 + $0x1a30] sm:$0xff] }
 0x197   :  { %3452 = vmatpush1.bf16.msra.mxu0 %v3451_v44  ;;  %3774 = vmatprep.subr.bf16.mxu1 %v3773_v45  ;;  %v3475_v44 = vpack.c.bf16 %v863_v34, %v860_v41  ;;  %v3477_v45 = vpack.c.bf16 %v870_v43, %v867_v42  ;;  %v2328_v34 = vld [vmem:[%s6826_s5 + $0x20] sm:$0xff]  ;;  %v2329_v42 = vld [vmem:[%s6826_s5 + $0x28] sm:$0xff]  ;;  %v2346_v43 = vld [vmem:[%s6826_s5 + $0xb0] sm:$0xff] }
 0x198   :  { %3454 = vmatprep.subr.bf16.mxu0 %v3453_v52  ;;  %v2616_v8 = vpop.f32.mrb[4].mxu1  ;;  %v876_v52 = vld [vmem:[%s6822_s1 + $0x1a60] sm:$0xff] }
 0x199   :  { %v2617_v37 = vpop.f32.mrb[5].mxu1  ;;  %v3481_v54 = vpack.c.bf16 %v876_v52, %v873_v47  ;;  %v2331_v47 = vld [vmem:[%s6826_s5 + $0x38] sm:$0xff]  ;;  %v2348_v52 = vld [vmem:[%s6826_s5 + $0xc0] sm:$0xff] }
 0x19a   :  { %3776 = vmatpush3.bf16.msra.mxu1 %v3775_v59  ;;  %v2618_v14 = vadd.f32 %v2617_v37, %v2616_v8  ;;  %v3483_v59 = vpack.c.bf16 %v875_v56, %v872_v55  ;;  %v2332_v56 = vld [vmem:[%s6826_s5 + $0x40] sm:$0xff] }
 0x19b   :  { %3456 = vmatpush1.bf16.msra.mxu0 %v3455_v60  ;;  %3778 = vmatprep.subr.bf16.mxu1 %v3777_v0  ;;  %v3485_v60 = vpack.c.bf16 %v882_v58, %v879_v57  ;;  %v878_v0 = vld [vmem:[%s6822_s1 + $0x1a70] sm:$0xff]  ;;  %v2333_v57 = vld [vmem:[%s6826_s5 + $0x48] sm:$0xff] }
 0x19c   :  { %3458 = vmatprep.subr.bf16.mxu0 %v3457_v2  ;;  %v6574_v46 = vadd.f32 %v2618_v14, %v1718_v7  ;;  %v3487_v2 = vpack.c.bf16 %v881_v30, %v878_v0  ;;  %v887_v7 = vld [vmem:[%s6822_s1 + $0x1ab8] sm:$0xff]  ;;  %v2350_v58 = vld [vmem:[%s6826_s5 + $0xd0] sm:$0xff] }
 0x19d   :  { %v2334_v30 = vld [vmem:[%s6826_s5 + $0x50] sm:$0xff] }
 0x19e   :  { %3780 = vmatpush3.bf16.msra.mxu1 %v3779_v10  ;;  %v3491_v10 = vpack.c.bf16 %v887_v7, %v884_v5  ;;  %v3807_v1 = vpack.c.bf16 %v2335_v24, %v2334_v30  ;;  %v2360_v30 = vld [vmem:[%s6826_s5 + $0x120] sm:$0xff]  ;;  %v2361_v24 = vld [vmem:[%s6826_s5 + $0x128] sm:$0xf] }
 0x19f   :  { %3460 = vmatpush1.bf16.msra.mxu0 %v3459_v25  ;;  %3782 = vmatprep.subr.bf16.mxu1 %v3781_v62  ;;  %v3493_v25 = vpack.c.bf16 %v894_v13, %v891_v9  ;;  %v890_v62 = vld [vmem:[%s6822_s1 + $0x1ad0] sm:$0xff]  ;;  %v2337_v9 = vld [vmem:[%s6826_s5 + $0x68] sm:$0xff] }
 0x1a0   :  { %3462 = vmatprep.subr.bf16.mxu0 %v3461_v15  ;;  %v3495_v39 = vpack.c.bf16 %v893_v12, %v890_v62  ;;  %v2338_v12 = vld [vmem:[%s6826_s5 + $0x70] sm:$0xff] }
 0x1a2   :  { %3784 = vmatpush3.bf16.msra.mxu1 %v3783_v21 }
 0x1a3   :  { %3464 = vmatpush1.bf16.msra.mxu0 %v3463_v22 }
 0x1a4   :  { %3466 = vmatprep.subr.bf16.mxu0 %v3465_v23  ;;  %v2340_v23 = vld [vmem:[%s6826_s5 + $0x80] sm:$0xff] }
 0x1a5   :  { %2276 = vmatmul.mubr.f32.vlgmr.msra.gmra.mrb[18].mxu1 %v6401_v53  ;;  %v3785_v33 = vpack.c.bf16 %v2341_v26, %v2340_v23 }
 0x1a7   :  { %3468 = vmatpush1.bf16.msra.mxu0 %v3467_v29  ;;  %v2342_v29 = vld [vmem:[%s6826_s5 + $0x90] sm:$0xff]  ;;  %3786 = vmatprep.subr.bf16.mxu1 %v3785_v33 }
 0x1a8   :  { %3470 = vmatprep.subr.bf16.mxu0 %v3469_v28  ;;  %v2343_v28 = vld [vmem:[%s6826_s5 + $0x98] sm:$0xff] }
 0x1a9   :  { %v3789_v32 = vpack.c.bf16 %v2343_v28, %v2342_v29  ;;  %v900_v29 = vsub.s32 0, %v4181_v61  ;;  %v904_v28 = vsub.s32 1, %v4181_v61  ;;  %v2304_v61 = vld [vmem:[%s6825_s4] sm:$0x7] }
 0x1ab   :  { %3472 = vmatpush1.bf16.msra.mxu0 %v3471_v38  ;;  %v2345_v38 = vld [vmem:[%s6826_s5 + $0xa8] sm:$0xff] }
 0x1ac   :  { %3474 = vmatprep.subr.bf16.mxu0 %v3473_v40  ;;  %v3791_v40 = vpack.c.bf16 %v2327_v35, %v2326_v31  ;;  %v3793_v41 = vpack.c.bf16 %v2345_v38, %v2344_v36  ;;  %v901_v31 = vrot.slane %v6509_v20, %v900_v29  ;;  %v2284_v38 = vld [vmem:[%s6824_s3] sm:$0x7] }
 0x1ae   :  { %v3827_v35 = vadd.f32 %v6135_v11, %v901_v31 }
 0x1af   :  { %3476 = vmatpush1.bf16.msra.mxu0 %v3475_v44  ;;  %v2347_v44 = vld [vmem:[%s6826_s5 + $0xb8] sm:$0xff] }
 0x1b0   :  { %3478 = vmatprep.subr.bf16.mxu0 %v3477_v45  ;;  %v3795_v45 = vpack.c.bf16 %v2329_v42, %v2328_v34  ;;  %v3797_v50 = vpack.c.bf16 %v2347_v44, %v2346_v43  ;;  %v2289_v34 = vrot.slane %v2284_v38, %v900_v29  ;;  %v2293_v44 = vrot.slane %v2284_v38, %v904_v28 }
 0x1b3   :  { %3480 = vmatpush1.bf16.msra.mxu0 %v3479_v49  ;;  %v2349_v49 = vld [vmem:[%s6826_s5 + $0xc8] sm:$0xff] }
 0x1b4   :  { %3482 = vmatprep.subr.bf16.mxu0 %v3481_v54  ;;  %v3799_v54 = vpack.c.bf16 %v2331_v47, %v2330_v51  ;;  %v3801_v55 = vpack.c.bf16 %v2349_v49, %v2348_v52  ;;  %v2309_v51 = vrot.slane %v2304_v61, %v900_v29  ;;  %v2357_v47 = vld [vmem:[%s6826_s5 + $0x108] sm:$0xff] }
 0x1b7   :  { %3484 = vmatpush1.bf16.msra.mxu0 %v3483_v59  ;;  %v2351_v59 = vld [vmem:[%s6826_s5 + $0xd8] sm:$0xff] }
 0x1b8   :  { %v2651_v3 = vpop.f32.mrb[6].mxu1  ;;  %3486 = vmatprep.subr.bf16.mxu0 %v3485_v60  ;;  %v3803_v60 = vpack.c.bf16 %v2333_v57, %v2332_v56  ;;  %v3805_v0 = vpack.c.bf16 %v2351_v59, %v2350_v58  ;;  %v2358_v56 = vld [vmem:[%s6826_s5 + $0x110] sm:$0xff]  ;;  %v2359_v57 = vld [vmem:[%s6826_s5 + $0x118] sm:$0xff]  ;;  %v3886_v59 = vmov 0.0  }
 0x1b9   :  { %v2652_v8 = vpop.f32.mrb[7].mxu1  ;;  %v3821_v58 = vpack.c.bf16 %v2359_v57, %v2358_v56 }
 0x1ba   :  { %v2653_v37 = vadd.f32 %v2652_v8, %v2651_v3  ;;  %v2352_v3 = vld [vmem:[%s6826_s5 + $0xe0] sm:$0xff] }
 0x1bb   :  { %3488 = vmatpush1.bf16.msra.mxu0 %v3487_v2  ;;  %v2336_v8 = vld [vmem:[%s6826_s5 + $0x60] sm:$0xff] }
 0x1bc   :  { %v1858_v14 = vadd.f32 %v2653_v37, %v6574_v46  ;;  %3490 = vmatprep.subr.bf16.mxu0 %v3489_v4  ;;  %v2353_v4 = vld [vmem:[%s6826_s5 + $0xe8] sm:$0xff]  ;;  %v3811_v37 = vpack.c.bf16 %v2337_v9, %v2336_v8  ;;  %v2546_v9 = vld [vmem:[%s6827_s6] ss:$0 sm:$0xff] }
 0x1bd   :  { %v3809_v7 = vpack.c.bf16 %v2353_v4, %v2352_v3  ;;  %v2317_v3 = vrot.slane %v2304_v61, %v6498_v6 }
 0x1bf   :  { %3492 = vmatpush1.bf16.msra.mxu0 %v3491_v10 }
 0x1c0   :  { %3494 = vmatprep.subr.bf16.mxu0 %v3493_v25  ;;  %v2355_v25 = vld [vmem:[%s6826_s5 + $0xf8] sm:$0xff] }
 0x1c3   :  { %3496 = vmatpush1.bf16.msra.mxu0 %v3495_v39  ;;  %v2339_v39 = vld [vmem:[%s6826_s5 + $0x78] sm:$0xff] }
 0x1c6   :  { %1645 = vmatmul.mubr.f32.vlgmr.msra.gmra.mrb[0].mxu0 %v6401_v53  ;;  %v2324_v53 = vld [vmem:[%s6826_s5] sm:$0xff] }
 0x1c7   :  { %v3787_v63 = vpack.c.bf16 %v2325_v27, %v2324_v53 }
 0x1c9   :  { %3788 = vmatpush3.bf16.msra.mxu1 %v3787_v63 }
 0x1ca   :  { %3790 = vmatprep.subr.bf16.mxu1 %v3789_v32  ;;  %v905_v32 = vrot.slane %v6509_v20, %v904_v28 }
 0x1cc   :  { %v3829_v36 = vadd.f32 %v6146_v48, %v905_v32  ;;  %v2356_v48 = vld [vmem:[%s6826_s5 + $0x100] sm:$0xff] }
 0x1cd   :  { %3792 = vmatpush3.bf16.msra.mxu1 %v3791_v40 }
 0x1ce   :  { %3794 = vmatprep.subr.bf16.mxu1 %v3793_v41 }
 0x1d1   :  { %3796 = vmatpush3.bf16.msra.mxu1 %v3795_v45 }
 0x1d2   :  { %3798 = vmatprep.subr.bf16.mxu1 %v3797_v50  ;;  %v2313_v50 = vrot.slane %v2304_v61, %v904_v28 }
 0x1d5   :  { %3800 = vmatpush3.bf16.msra.mxu1 %v3799_v54  ;;  %v3818_v54 = vpack.c.bf16 %v2357_v47, %v2356_v48 }
 0x1d6   :  { %3802 = vmatprep.subr.bf16.mxu1 %v3801_v55 }
 0x1d8   :  { %v2686_v15 = vpop.f32.mrb[8].mxu1 }
 0x1d9   :  { %v2687_v16 = vpop.f32.mrb[9].mxu1  ;;  %3804 = vmatpush3.bf16.msra.mxu1 %v3803_v60 }
 0x1da   :  { %v2688_v17 = vadd.f32 %v2687_v16, %v2686_v15  ;;  %3806 = vmatprep.subr.bf16.mxu1 %v3805_v0  ;;  %v3815_v15 = vpack.c.bf16 %v2339_v39, %v2338_v12  ;;  %v3884_v16 = vmov 0.0|0.0   ;;  %v2297_v0 = vrot.slane %v2284_v38, %v6498_v6 }
 0x1dc   :  { %v1928_v46 = vadd.f32 %v2688_v17, %v1858_v14  ;;  %v2354_v14 = vld [vmem:[%s6826_s5 + $0xf0] sm:$0xff]  ;;  %s3888_s5 = smov [#allocation2]  }
 0x1dd   :  { %3808 = vmatpush3.bf16.msra.mxu1 %v3807_v1  ;;  %v3813_v62 = vpack.c.bf16 %v2355_v25, %v2354_v14  ;;  %v3824_v1 = vpack.c.bf16 %v2361_v24, %v2360_v30  ;;  %s2537_s6 = sshll.u32 %s3888_s5, 4  ;;  %s2538_s6 = int_to_ptr.vmem [resolvable:$true] %s2537_s6 }
 0x1de   :  { %3810 = vmatprep.subr.bf16.mxu1 %v3809_v7  ;;  %s3859_s2 = scalar_lea.vmem %s2538_s6, 32  ;;  %p3864_p1 = scmp.lt.s32.totalorder %s2538_s6, %s2538_s6 }
 0x1df   :  { %p3860_p0 = scmp.ne.s32.totalorder %s2538_s6, %s3859_s2  ;;  %p3865_p2 = scmp.lt.s32.totalorder %s3859_s2, %s3859_s2 }
 0x1e1   :  { %3812 = vmatpush3.bf16.msra.mxu1 %v3811_v37  ;;  %p3866_p3 = por %p3865_p2, %p3864_p1 }
 0x1e2   :  { %3814 = vmatprep.subr.bf16.mxu1 %v3813_v62 }
 0x1e3   :  { %p3867_p4 = pnand %p3866_p3, %p3860_p0 }
 0x1e5   :  { %3816 = vmatpush3.bf16.msra.mxu1 %v3815_v15 }
 0x1e6   :  { %3817 = vmatprep.subr.bf16.mxu1 %v3884_v16 }
 0x1f8   :  { %v2721_v18 = vpop.f32.mrb[10].mxu1 }
 0x1f9   :  { %v2722_v19 = vpop.f32.mrb[11].mxu1 }
 0x1fa   :  { %v2723_v21 = vadd.f32 %v2722_v19, %v2721_v18 }
 0x1fc   :  { %v1998_v22 = vadd.f32 %v2723_v21, %v1928_v46 }
 0x218   :  { %v2756_v2 = vpop.f32.mrb[12].mxu1 }
 0x219   :  { %v2757_v5 = vpop.f32.mrb[13].mxu1 }
 0x21a   :  { %v2758_v13 = vadd.f32 %v2757_v5, %v2756_v2 }
 0x21c   :  { %v2068_v10 = vadd.f32 %v2758_v13, %v1998_v22 }
 0x238   :  { %v2791_v17 = vpop.f32.mrb[14].mxu1 }
 0x239   :  { %v2792_v46 = vpop.f32.mrb[15].mxu1 }
 0x23a   :  { %v2793_v18 = vadd.f32 %v2792_v46, %v2791_v17 }
 0x23c   :  { %v2138_v19 = vadd.f32 %v2793_v18, %v2068_v10 }
 0x258   :  { %v2826_v21 = vpop.f32.mrb[16].mxu1 }
 0x259   :  { %v2827_v22 = vpop.f32.mrb[17].mxu1 }
 0x25a   :  { %v2828_v23 = vadd.f32 %v2827_v22, %v2826_v21 }
 0x25c   :  { %v2208_v26 = vadd.f32 %v2828_v23, %v2138_v19 }
 0x278   :  { %v2861_v33 = vpop.f32.mrb[18].mxu1 }
 0x279   :  { %v2862_v53 = vpop.f32.mrb[19].mxu1 }
 0x27a   :  { %v2863_v27 = vadd.f32 %v2862_v53, %v2861_v33 }
 0x27c   :  { %v2278_v63 = vadd.f32 %v2863_v27, %v2208_v26 }
 0x27e   :  { %v2283_v60 = vmax.f32 %v2278_v63, 0.0 }
 0x280   :  { %v2303_v2 = vmul.f32 %v2297_v0, %v2283_v60 }
 0x282   :  { %v2323_v4 = vadd.f32 %v2317_v3, %v2303_v2 }
 0x299   :  { %v1646_v40 = vpop.f32.mrb[0].mxu0 }
 0x29a   :  { %v3828_v41 = vadd.f32 %v3827_v35, %v1646_v40  ;;  %v1648_v42 = vpop.f32.mrb[1].mxu0 }
 0x29b   :  { %v3830_v43 = vadd.f32 %v3829_v36, %v1648_v42 }
 0x29c   :  { %v2281_v45 = vmax.f32 %v3828_v41, 0.0 }
 0x29d   :  { %v2282_v20 = vmax.f32 %v3830_v43, 0.0 }
 0x29e   :  { %v2301_v11 = vmul.f32 %v2289_v34, %v2281_v45 }
 0x29f   :  { %v2302_v52 = vmul.f32 %v2293_v44, %v2282_v20 }
 0x2a0   :  { %v2321_v55 = vadd.f32 %v2309_v51, %v2301_v11 }
 0x2a1   :  { %v2322_v49 = vadd.f32 %v2313_v50, %v2302_v52 }
 0x2a3   :  { %2441 = vmatprep.mubr.f32.mxu1 %v2322_v49 }
 0x2a4   :  { %2442 = vmatmul.mubr.f32.vlgmr.msra.gmra.mrb[20].mxu1 %v2321_v55 }
 0x2a5   :  { %3819 = vmatpush3.bf16.msra.mxu1 %v3818_v54  ;;  %2918 = vmatprep.mubr.msk.f32.mxu1 %vm3885_vm0, %v3886_v59 }
 0x2a6   :  { %3820 = vmatprep.subr.bf16.mxu1 %v3884_v16 }
 0x2a9   :  { %3822 = vmatpush3.bf16.msra.mxu1 %v3821_v58 }
 0x2aa   :  { %3823 = vmatprep.subr.bf16.mxu1 %v3884_v16 }
 0x2ad   :  { %3826 = vmatpush3.bf16.msk.msra.mxu1 %vm3825_vm3, %v3824_v1 }
 0x2b0   :  { %2919 = vmatmul.mubr.msk.f32.vlgmr.msra.gmra.mrb[22].mxu1 %vm2369_vm4, %v2323_v4 }
 0x377   :  { %v2896_v5 = vpop.f32.mrb[20].mxu1 }
 0x378   :  { %v2897_v7 = vpop.f32.mrb[21].mxu1 }
 0x379   :  { %v2898_v8 = vadd.f32 %v2897_v7, %v2896_v5 }
 0x37b   :  { %v2444_v13 = vadd.f32 %v2898_v8, %v2546_v9 }
 0x383   :  { %v2513_v37 = vpop.f32.mrb[22].mxu1 }
 0x384   :  { %v2514_v10 = vadd.f32 %v2513_v37, %v2444_v13  ;;  %v2920_v14 = vpop.f32.mrb[23].mxu1 }
 0x386   :  { %v2518_v6 = vsel %vm2517_vm5, %v2514_v10, -inf }
 0x387   :  { %2519 = vmax.xlane.f32.xlu0 %v2518_v6 }
 0x414   :  { %v2520_v25 = vpop.xlane.xlu0 %2519 }
 0x415   :  { %v2521_v62 = vsub.f32 %v2514_v10, %v2520_v25 }
 0x417   :  { %v2522_v12 = vmul.f32 1.442695, %v2521_v62 }
 0x419   :  { %3855 = vpow2.f32 %v2522_v12 }
 0x423   :  { %v3856_v39 = vpop.eup %3855 }
 0x424   :  { %v2524_v15 = vsel %vm2517_vm5, %v3856_v39, 0.0 }
 0x425   :  { %2525 = vadd.xlane.f32.xlu0 %v2524_v15 }
 0x4b2   :  { %v2526_v16 = vpop.xlane.xlu0 %2525 }
 0x4b3   :  { %3857 = vlog2.f32 %v2526_v16 }
 0x4bd   :  { %v3858_v17 = vpop.eup %3857 }
 0x4be   :  { %v2528_v46 = vmul.f32 0.6931472, %v3858_v17 }
 0x4c0   :  { %v2529_v18 = vsub.f32 %v2521_v62, %v2528_v46 }
 0x4c2   :  { %2530 = vst.msk [vmem:[#allocation2] sm:$0x3] %vm2517_vm5, %v2529_v18 }
 0x4c3   :  { %3870 = shalt.err (!%p3867_p4)
}
 0x4c4   :  { %s3871_s8 = scalar_lea.hbm %s6828_s7, 32 }
 0x4c5   :  { %p3872_p5 = scmp.ne.s32.totalorder %s6828_s7, %s3871_s8  ;;  %p3875_p6 = scmp.lt.u32.totalorder %s3871_s8, %s6828_s7 }
 0x4c7   :  { %p3877_p7 = pnand %p3875_p6, %p3872_p5 }
 0x4c9   :  { %3880 = shalt.err (!%p3877_p7)
}
 0x4ca   :  { %2540 = dma.vmem_to_hbm [thread:$0]  %s2538_s6, 32, %s6828_s7, [#allocation3]  }
 0x4cb   :  { %3881 = dma.done.wait [#allocation3], 32  }
 0x4cc   :  { %3882 = vsyncadd [#allocation3], 4294967264 }
 0x4cd   :  { %2544 = vsyncpa [#allocation3], 1 }

</bundles_post_ra>
